<compile_context>
chip_gen: v6e
topology: v6e:2x2x1
jax: 0.10.0
libtpu: 0.0.40
codegen_flags: <defaults>
</compile_context>

<pallas_src>
import jax
import jax.numpy as jnp
import numpy as np
from jax import lax
from jax.experimental import pallas as pl
from jax.experimental.pallas import tpu as pltpu

# MXU operand dtype (accumulation is always f32). bf16 is the native high-rate
# MXU path on v6e/v7x; set to jnp.float32 for bit-exact full-precision math.
MATMUL_DTYPE = jnp.bfloat16

_VMEM_LIMIT = 48 * 1024 * 1024  # < v7x 64 MiB physical, > default scoped limit


def _round_up(n, m):
    return (n + m - 1) // m * m


# ----------------------------- kernel helpers --------------------------------

def _fill_padded(xp_ref, interior, H, W):
    """Write `interior` (H, W, C) into the centre of the padded VMEM scratch
    and zero only the 1-wide border actually read by the 3x3 taps.

    Zeroing the border every step (instead of the whole buffer once) costs
    O(H+W) stores and is correct regardless of how a parallel grid axis is
    split across TensorCores. Columns beyond W+1 (sublane-alignment padding)
    are never read, so they are left untouched.
    """
    Wp = xp_ref.shape[1]
    C = xp_ref.shape[2]
    dt = xp_ref.dtype
    xp_ref[0:1, :, :] = jnp.zeros((1, Wp, C), dt)              # top row
    xp_ref[H + 1:H + 2, :, :] = jnp.zeros((1, Wp, C), dt)      # bottom row
    xp_ref[:, 0:1, :] = jnp.zeros((H + 2, 1, C), dt)           # left col
    xp_ref[:, W + 1:W + 2, :] = jnp.zeros((H + 2, 1, C), dt)   # right col
    xp_ref[1:H + 1, 1:W + 1, :] = interior.astype(dt)


def _im2col_conv(xp_ref, w_ref, H, W, Cin, Cout):
    """3x3 'SAME' conv from a zero-padded scratch as ONE im2col MXU matmul.

    xp_ref: (H+2, >=W+2, Cin) padded input (1-wide zero border), MATMUL_DTYPE.
    w_ref : (9*Cin, Cout) weights, (kh, kw, cin) major->minor along axis 0.
    Returns (H, W, Cout) float32 (pre-bias / pre-activation).

    All 9 taps are stacked on the contraction axis, so the matmul result is
    lane-dense and no output slicing / accumulation passes are needed.
    """
    cols = []
    for kh in range(3):          # static taps; kh slices hit the untiled axis
        for kw in range(3):
            cols.append(xp_ref[kh:kh + H, kw:kw + W, :])
    patches = jnp.concatenate(cols, axis=-1).reshape(H * W, 9 * Cin)
    y = jnp.dot(patches, w_ref[...], preferred_element_type=jnp.float32)
    return y.reshape(H, W, Cout)


def _maxpool2x2(y, H, W, C):
    """2x2 max-pool of a (H, W, C) f32 value.

    H pairs first via a layout-free major-axis split, then the W-pair reduce
    runs on the already height-halved tensor (half the relayout volume of a
    single 5D reshape)."""
    Hh, Wh = H // 2, W // 2
    hmax = jnp.max(y.reshape(Hh, 2, W, C), axis=1)        # free split of major axis
    return jnp.max(hmax.reshape(Hh, Wh, 2, C), axis=2)    # (Hh, Wh, C)


# ------------------------------ Pallas kernels --------------------------------

def _conv1_kernel(x_ref, w_ref, b_ref, scale_ref, shift_ref, o_ref, xp_ref):
    """MeanShift (per-channel affine) + zero-pad + 3x3 conv (3->64) + bias + ReLU."""
    H, W, Cin = x_ref.shape[1], x_ref.shape[2], x_ref.shape[3]
    Cout = b_ref.shape[1]

    shifted = x_ref[0] * scale_ref[0][None, None, :] + shift_ref[0][None, None, :]
    _fill_padded(xp_ref, shifted, H, W)

    y = _im2col_conv(xp_ref, w_ref, H, W, Cin, Cout)
    y = jnp.maximum(y + b_ref[0][None, None, :], 0.0)
    o_ref[0] = y.astype(o_ref.dtype)


def _fused_pool_kernel(x_ref, wa_ref, ba_ref, wb_ref, bb_ref, o_ref,
                       xpa_ref, xpb_ref):
    """conv3x3(Cin->Cmid)+ReLU -> 2x2 maxpool -> conv3x3(Cmid->Cout)+ReLU,
    all in VMEM: the full-resolution conv output and the pooled activation
    never round-trip through HBM."""
    H, W, Cin = x_ref.shape[1], x_ref.shape[2], x_ref.shape[3]
    Cmid = ba_ref.shape[1]
    Cout = bb_ref.shape[1]
    Hh, Wh = H // 2, W // 2

    # stage A: conv + bias + ReLU
    _fill_padded(xpa_ref, x_ref[0], H, W)
    ya = _im2col_conv(xpa_ref, wa_ref, H, W, Cin, Cmid)
    ya = jnp.maximum(ya + ba_ref[0][None, None, :], 0.0)

    # 2x2 maxpool, result written straight into stage-B's padded scratch
    pooled = _maxpool2x2(ya, H, W, Cmid)

    # stage B: conv + bias + ReLU
    _fill_padded(xpb_ref, pooled, Hh, Wh)
    yb = _im2col_conv(xpb_ref, wb_ref, Hh, Wh, Cmid, Cout)
    yb = jnp.maximum(yb + bb_ref[0][None, None, :], 0.0)
    o_ref[0] = yb.astype(o_ref.dtype)


# ------------------------------- wrappers -------------------------------------

def conv1_block(x, w, b, scale, shift):
    """x: (B,H,W,3) f32, w: (27,64) MATMUL_DTYPE, b/scale/shift: per-channel f32."""
    B, H, W, Cin = x.shape
    Cout = b.shape[0]
    Wp = _round_up(W + 2, 8)
    return pl.pallas_call(
        _conv1_kernel,
        out_shape=jax.ShapeDtypeStruct((B, H, W, Cout), x.dtype),
        grid=(B,),
        in_specs=[
            pl.BlockSpec((1, H, W, Cin), lambda bi: (bi, 0, 0, 0)),
            pl.BlockSpec((9 * Cin, Cout), lambda bi: (0, 0)),
            pl.BlockSpec((1, Cout), lambda bi: (0, 0)),
            pl.BlockSpec((1, Cin), lambda bi: (0, 0)),
            pl.BlockSpec((1, Cin), lambda bi: (0, 0)),
        ],
        out_specs=pl.BlockSpec((1, H, W, Cout), lambda bi: (bi, 0, 0, 0)),
        scratch_shapes=[pltpu.VMEM((H + 2, Wp, Cin), MATMUL_DTYPE)],
        compiler_params=pltpu.CompilerParams(
            dimension_semantics=("parallel",),
            vmem_limit_bytes=_VMEM_LIMIT,
        ),
    )(x, w, b.reshape(1, Cout), scale.reshape(1, Cin), shift.reshape(1, Cin))


def fused_conv_pool_conv(x, wa, ba, wb, bb):
    """x: (B,H,W,Cin), wa: (9*Cin,Cmid), wb: (9*Cmid,Cout) (MATMUL_DTYPE),
    ba/bb f32. Returns (B, H//2, W//2, Cout)."""
    B, H, W, Cin = x.shape
    Cmid = ba.shape[0]
    Cout = bb.shape[0]
    assert H % 2 == 0 and W % 2 == 0, "2x2 maxpool requires even H and W"
    Hh, Wh = H // 2, W // 2
    Wpa = _round_up(W + 2, 8)
    Wpb = _round_up(Wh + 2, 8)
    return pl.pallas_call(
        _fused_pool_kernel,
        out_shape=jax.ShapeDtypeStruct((B, Hh, Wh, Cout), x.dtype),
        grid=(B,),
        in_specs=[
            pl.BlockSpec((1, H, W, Cin), lambda bi: (bi, 0, 0, 0)),
            pl.BlockSpec((9 * Cin, Cmid), lambda bi: (0, 0)),
            pl.BlockSpec((1, Cmid), lambda bi: (0, 0)),
            pl.BlockSpec((9 * Cmid, Cout), lambda bi: (0, 0)),
            pl.BlockSpec((1, Cout), lambda bi: (0, 0)),
        ],
        out_specs=pl.BlockSpec((1, Hh, Wh, Cout), lambda bi: (bi, 0, 0, 0)),
        scratch_shapes=[
            pltpu.VMEM((H + 2, Wpa, Cin), MATMUL_DTYPE),   # padded stage-A input
            pltpu.VMEM((Hh + 2, Wpb, Cmid), MATMUL_DTYPE), # padded pooled activation
        ],
        compiler_params=pltpu.CompilerParams(
            dimension_semantics=("parallel",),
            vmem_limit_bytes=_VMEM_LIMIT,
        ),
    )(x, wa, ba.reshape(1, Cmid), wb, bb.reshape(1, Cout))


# --------------------------- parameter setup ----------------------------------

def init_raw_params(key, rgb_range=1.0):
    """Raw (unfused) parameters, mirroring the PyTorch module's structure."""
    mean = jnp.array([0.485, 0.456, 0.406], jnp.float32)
    std = jnp.array([0.229, 0.224, 0.225], jnp.float32)

    def conv_w(k, cin, cout):
        return jax.random.normal(k, (3, 3, cin, cout), jnp.float32) / jnp.sqrt(9.0 * cin)

    ks = jax.random.split(key, 10)
    return {
        "mean": mean, "std": std, "rgb_range": float(rgb_range),
        "w1_1": conv_w(ks[0], 3, 64),    "b1_1": 0.01 * jax.random.normal(ks[1], (64,), jnp.float32),
        "w1_2": conv_w(ks[2], 64, 64),   "b1_2": 0.01 * jax.random.normal(ks[3], (64,), jnp.float32),
        "w2_1": conv_w(ks[4], 64, 128),  "b2_1": 0.01 * jax.random.normal(ks[5], (128,), jnp.float32),
        "w2_2": conv_w(ks[6], 128, 128), "b2_2": 0.01 * jax.random.normal(ks[7], (128,), jnp.float32),
        "w3_1": conv_w(ks[8], 128, 256), "b3_1": 0.01 * jax.random.normal(ks[9], (256,), jnp.float32),
    }


def meanshift_affine(raw):
    """MeanShift as an exact per-channel affine: y = x*scale + shift."""
    rr = raw["rgb_range"]
    std_eff = raw["std"] * rr
    return 1.0 / std_eff, -rr * raw["mean"] / std_eff


def prepare_kernel_params(raw, matmul_dtype=MATMUL_DTYPE):
    """Flatten HWIO weights to (9*Cin, Cout) im2col layout and cast for the MXU."""
    def flatten(w):  # (3,3,cin,cout) -> (9*cin, cout), (kh,kw,cin) major->minor
        kh, kw, cin, cout = w.shape
        return w.reshape(kh * kw * cin, cout).astype(matmul_dtype)

    scale1, shift1 = meanshift_affine(raw)
    return {
        "scale1": scale1, "shift1": shift1,
        "w1_1": flatten(raw["w1_1"]), "b1_1": raw["b1_1"],
        "w1_2": flatten(raw["w1_2"]), "b1_2": raw["b1_2"],
        "w2_1": flatten(raw["w2_1"]), "b2_1": raw["b2_1"],
        "w2_2": flatten(raw["w2_2"]), "b2_2": raw["b2_2"],
        "w3_1": flatten(raw["w3_1"]), "b3_1": raw["b3_1"],
    }


# ------------------------------ LTE forward ------------------------------------

def lte_forward(x_nchw, kp):
    x = jnp.transpose(x_nchw, (0, 2, 3, 1))                                   # NCHW -> NHWC
    # slice1: MeanShift + conv 3->64 + ReLU
    x_lv1 = conv1_block(x, kp["w1_1"], kp["b1_1"], kp["scale1"], kp["shift1"])
    # slice2: conv 64->64 + ReLU + pool + conv 64->128 + ReLU   (one kernel)
    x_lv2 = fused_conv_pool_conv(x_lv1, kp["w1_2"], kp["b1_2"], kp["w2_1"], kp["b2_1"])
    # slice3: conv 128->128 + ReLU + pool + conv 128->256 + ReLU (one kernel)
    x_lv3 = fused_conv_pool_conv(x_lv2, kp["w2_2"], kp["b2_2"], kp["w3_1"], kp["b3_1"])
    to_nchw = lambda t: jnp.transpose(t, (0, 3, 1, 2))                        # back to NCHW
    return to_nchw(x_lv1), to_nchw(x_lv2), to_nchw(x_lv3)


# --------------------------- pure-JAX reference --------------------------------

def _ref_conv_relu(x, w, b):
    # Same precision recipe as the kernel: MATMUL_DTYPE operands, f32 accumulation.
    y = lax.conv_general_dilated(
        x.astype(MATMUL_DTYPE), w.astype(MATMUL_DTYPE), (1, 1), "SAME",
        dimension_numbers=("NHWC", "HWIO", "NHWC"),
        preferred_element_type=jnp.float32)
    return jnp.maximum(y + b[None, None, None, :], 0.0)


def _ref_pool(x):
    return lax.reduce_window(x, -jnp.inf, lax.max,
                             (1, 2, 2, 1), (1, 2, 2, 1), "VALID")


def lte_reference(x_nchw, raw):
    scale, shift = meanshift_affine(raw)
    x = jnp.transpose(x_nchw, (0, 2, 3, 1))
    x = x * scale[None, None, None, :] + shift[None, None, None, :]
    x_lv1 = _ref_conv_relu(x, raw["w1_1"], raw["b1_1"])
    h = _ref_pool(_ref_conv_relu(x_lv1, raw["w1_2"], raw["b1_2"]))
    x_lv2 = _ref_conv_relu(h, raw["w2_1"], raw["b2_1"])
    h = _ref_pool(_ref_conv_relu(x_lv2, raw["w2_2"], raw["b2_2"]))
    x_lv3 = _ref_conv_relu(h, raw["w3_1"], raw["b3_1"])
    to_nchw = lambda t: jnp.transpose(t, (0, 3, 1, 2))
    return to_nchw(x_lv1), to_nchw(x_lv2), to_nchw(x_lv3)


# --------------------------------- main -----------------------------------------

if __name__ == "__main__":
    key = jax.random.PRNGKey(0)
    kx, kparam = jax.random.split(key)
    x = jax.random.normal(kx, (2, 3, 16, 16), jnp.float32)   # NCHW, like the PyTorch module

    raw = init_raw_params(kparam)
    kparams = prepare_kernel_params(raw)

    outs = jax.jit(lte_forward)(x, kparams)
    outs = jax.block_until_ready(outs)

    refs = lte_reference(x, raw)
    expected_shapes = [(2, 64, 16, 16), (2, 128, 8, 8), (2, 256, 4, 4)]
    for o, r, s in zip(outs, refs, expected_shapes):
        assert o.shape == s, (o.shape, s)
        np.testing.assert_allclose(np.asarray(o), np.asarray(r), atol=5e-3, rtol=5e-3)

    print("KERNEL_OK")
</pallas_src>

<mosaic_0001>
module attributes {stable_mosaic.version = 11 : i64} {
  func.func @_conv1_kernel(%arg0: i32, %arg1: memref<1x16x16x3xf32, #tpu.memory_space<vmem>>, %arg2: memref<27x64xbf16, #tpu.memory_space<vmem>>, %arg3: memref<1x64xf32, #tpu.memory_space<vmem>>, %arg4: memref<1x3xf32, #tpu.memory_space<vmem>>, %arg5: memref<1x3xf32, #tpu.memory_space<vmem>>, %arg6: memref<1x16x16x64xf32, #tpu.memory_space<vmem>>, %arg7: memref<18x24x3xbf16, #tpu.memory_space<vmem>>) attributes {dimension_semantics = [#tpu.dimension_semantics<parallel>], iteration_bounds = array<i64: 2>, scalar_prefetch = 0 : i64, scratch_operands = 1 : i64, tpu.core_type = #tpu.core_type<tc>, window_params = [{transform_indices = @transform_0, window_bounds = array<i64: 1, 16, 16, 3>}, {pipeline_mode = #tpu.pipeline_mode<synchronous>, transform_indices = @transform_1, window_bounds = array<i64: 27, 64>}, {pipeline_mode = #tpu.pipeline_mode<synchronous>, transform_indices = @transform_2, window_bounds = array<i64: 1, 64>}, {pipeline_mode = #tpu.pipeline_mode<synchronous>, transform_indices = @transform_3, window_bounds = array<i64: 1, 3>}, {pipeline_mode = #tpu.pipeline_mode<synchronous>, transform_indices = @transform_4, window_bounds = array<i64: 1, 3>}, {transform_indices = @transform_5, window_bounds = array<i64: 1, 16, 16, 64>}]} {
    %c0 = arith.constant 0 : index
    %c0_0 = arith.constant 0 : index
    %c0_1 = arith.constant 0 : index
    %c0_2 = arith.constant 0 : index
    %0 = vector.load %arg1[%c0, %c0_0, %c0_1, %c0_2] : memref<1x16x16x3xf32, #tpu.memory_space<vmem>>, vector<1x16x16x3xf32>
    %1 = vector.shape_cast %0 : vector<1x16x16x3xf32> to vector<16x16x3xf32>
    %c0_3 = arith.constant 0 : index
    %c0_4 = arith.constant 0 : index
    %2 = vector.load %arg4[%c0_3, %c0_4] : memref<1x3xf32, #tpu.memory_space<vmem>>, vector<1x3xf32>
    %3 = vector.shape_cast %2 : vector<1x3xf32> to vector<3xf32>
    %4 = vector.shape_cast %3 : vector<3xf32> to vector<1x1x3xf32>
    %5 = vector.broadcast %4 : vector<1x1x3xf32> to vector<16x16x3xf32>
    %6 = arith.mulf %1, %5 : vector<16x16x3xf32>
    %c0_5 = arith.constant 0 : index
    %c0_6 = arith.constant 0 : index
    %7 = vector.load %arg5[%c0_5, %c0_6] : memref<1x3xf32, #tpu.memory_space<vmem>>, vector<1x3xf32>
    %8 = vector.shape_cast %7 : vector<1x3xf32> to vector<3xf32>
    %9 = vector.shape_cast %8 : vector<3xf32> to vector<1x1x3xf32>
    %10 = vector.broadcast %9 : vector<1x1x3xf32> to vector<16x16x3xf32>
    %11 = arith.addf %6, %10 : vector<16x16x3xf32>
    %cst = arith.constant 0.000000e+00 : bf16
    %12 = vector.broadcast %cst : bf16 to vector<1x24x3xbf16>
    %c0_7 = arith.constant 0 : index
    %c0_8 = arith.constant 0 : index
    %c0_9 = arith.constant 0 : index
    %13 = vector.load %arg7[%c0_7, %c0_8, %c0_9] : memref<18x24x3xbf16, #tpu.memory_space<vmem>>, vector<1x24x3xbf16>
    tpu.vector_store %arg7[%c0_7, %c0_8, %c0_9], %12 {strides = array<i32>} : memref<18x24x3xbf16, #tpu.memory_space<vmem>>, vector<1x24x3xbf16>,
    %cst_10 = arith.constant 0.000000e+00 : bf16
    %14 = vector.broadcast %cst_10 : bf16 to vector<1x24x3xbf16>
    %c17 = arith.constant 17 : index
    %c0_11 = arith.constant 0 : index
    %c0_12 = arith.constant 0 : index
    %15 = vector.load %arg7[%c17, %c0_11, %c0_12] : memref<18x24x3xbf16, #tpu.memory_space<vmem>>, vector<1x24x3xbf16>
    tpu.vector_store %arg7[%c17, %c0_11, %c0_12], %14 {strides = array<i32>} : memref<18x24x3xbf16, #tpu.memory_space<vmem>>, vector<1x24x3xbf16>,
    %cst_13 = arith.constant 0.000000e+00 : bf16
    %16 = vector.broadcast %cst_13 : bf16 to vector<18x1x3xbf16>
    %c0_14 = arith.constant 0 : index
    %c0_15 = arith.constant 0 : index
    %c0_16 = arith.constant 0 : index
    %17 = vector.load %arg7[%c0_14, %c0_15, %c0_16] : memref<18x24x3xbf16, #tpu.memory_space<vmem>>, vector<18x1x3xbf16>
    tpu.vector_store %arg7[%c0_14, %c0_15, %c0_16], %16 {strides = array<i32>} : memref<18x24x3xbf16, #tpu.memory_space<vmem>>, vector<18x1x3xbf16>,
    %cst_17 = arith.constant 0.000000e+00 : bf16
    %18 = vector.broadcast %cst_17 : bf16 to vector<18x1x3xbf16>
    %c0_18 = arith.constant 0 : index
    %c17_19 = arith.constant 17 : index
    %c0_20 = arith.constant 0 : index
    %19 = vector.load %arg7[%c0_18, %c17_19, %c0_20] : memref<18x24x3xbf16, #tpu.memory_space<vmem>>, vector<18x1x3xbf16>
    tpu.vector_store %arg7[%c0_18, %c17_19, %c0_20], %18 {strides = array<i32>} : memref<18x24x3xbf16, #tpu.memory_space<vmem>>, vector<18x1x3xbf16>,
    %20 = arith.truncf %11 : vector<16x16x3xf32> to vector<16x16x3xbf16>
    %c1 = arith.constant 1 : index
    %c1_21 = arith.constant 1 : index
    %c0_22 = arith.constant 0 : index
    %21 = vector.load %arg7[%c1, %c1_21, %c0_22] : memref<18x24x3xbf16, #tpu.memory_space<vmem>>, vector<16x16x3xbf16>
    tpu.vector_store %arg7[%c1, %c1_21, %c0_22], %20 {strides = array<i32>} : memref<18x24x3xbf16, #tpu.memory_space<vmem>>, vector<16x16x3xbf16>,
    %c0_23 = arith.constant 0 : index
    %c0_24 = arith.constant 0 : index
    %c0_25 = arith.constant 0 : index
    %22 = vector.load %arg7[%c0_23, %c0_24, %c0_25] : memref<18x24x3xbf16, #tpu.memory_space<vmem>>, vector<16x16x3xbf16>
    %c0_26 = arith.constant 0 : index
    %c1_27 = arith.constant 1 : index
    %c0_28 = arith.constant 0 : index
    %23 = vector.load %arg7[%c0_26, %c1_27, %c0_28] : memref<18x24x3xbf16, #tpu.memory_space<vmem>>, vector<16x16x3xbf16>
    %c0_29 = arith.constant 0 : index
    %c2 = arith.constant 2 : index
    %c0_30 = arith.constant 0 : index
    %24 = vector.load %arg7[%c0_29, %c2, %c0_30] : memref<18x24x3xbf16, #tpu.memory_space<vmem>>, vector<16x16x3xbf16>
    %c1_31 = arith.constant 1 : index
    %c0_32 = arith.constant 0 : index
    %c0_33 = arith.constant 0 : index
    %25 = vector.load %arg7[%c1_31, %c0_32, %c0_33] : memref<18x24x3xbf16, #tpu.memory_space<vmem>>, vector<16x16x3xbf16>
    %c1_34 = arith.constant 1 : index
    %c1_35 = arith.constant 1 : index
    %c0_36 = arith.constant 0 : index
    %26 = vector.load %arg7[%c1_34, %c1_35, %c0_36] : memref<18x24x3xbf16, #tpu.memory_space<vmem>>, vector<16x16x3xbf16>
    %c1_37 = arith.constant 1 : index
    %c2_38 = arith.constant 2 : index
    %c0_39 = arith.constant 0 : index
    %27 = vector.load %arg7[%c1_37, %c2_38, %c0_39] : memref<18x24x3xbf16, #tpu.memory_space<vmem>>, vector<16x16x3xbf16>
    %c2_40 = arith.constant 2 : index
    %c0_41 = arith.constant 0 : index
    %c0_42 = arith.constant 0 : index
    %28 = vector.load %arg7[%c2_40, %c0_41, %c0_42] : memref<18x24x3xbf16, #tpu.memory_space<vmem>>, vector<16x16x3xbf16>
    %c2_43 = arith.constant 2 : index
    %c1_44 = arith.constant 1 : index
    %c0_45 = arith.constant 0 : index
    %29 = vector.load %arg7[%c2_43, %c1_44, %c0_45] : memref<18x24x3xbf16, #tpu.memory_space<vmem>>, vector<16x16x3xbf16>
    %c2_46 = arith.constant 2 : index
    %c2_47 = arith.constant 2 : index
    %c0_48 = arith.constant 0 : index
    %30 = vector.load %arg7[%c2_46, %c2_47, %c0_48] : memref<18x24x3xbf16, #tpu.memory_space<vmem>>, vector<16x16x3xbf16>
    %31 = tpu.concatenate %22, %23, %24, %25, %26, %27, %28, %29, %30 in 2 : vector<16x16x3xbf16>, vector<16x16x3xbf16>, vector<16x16x3xbf16>, vector<16x16x3xbf16>, vector<16x16x3xbf16>, vector<16x16x3xbf16>, vector<16x16x3xbf16>, vector<16x16x3xbf16>, vector<16x16x3xbf16> -> vector<16x16x27xbf16>
    %32 = vector.shape_cast %31 : vector<16x16x27xbf16> to vector<256x27xbf16>
    %c0_49 = arith.constant 0 : index
    %c0_50 = arith.constant 0 : index
    %33 = vector.load %arg2[%c0_49, %c0_50] : memref<27x64xbf16, #tpu.memory_space<vmem>>, vector<27x64xbf16>
    %cst_51 = arith.constant dense<0.000000e+00> : vector<256x64xf32>
    %34 = tpu.matmul %32, %33, %cst_51 {dimension_numbers = #tpu.dot_dimension_numbers<[1], [0], [0], [1], [0, 0, 1, 1], [], []>} : vector<256x27xbf16>, vector<27x64xbf16>, vector<256x64xf32> -> vector<256x64xf32>
    %35 = vector.shape_cast %34 : vector<256x64xf32> to vector<16x16x64xf32>
    %c0_52 = arith.constant 0 : index
    %c0_53 = arith.constant 0 : index
    %36 = vector.load %arg3[%c0_52, %c0_53] : memref<1x64xf32, #tpu.memory_space<vmem>>, vector<1x64xf32>
    %37 = vector.shape_cast %36 : vector<1x64xf32> to vector<64xf32>
    %38 = vector.shape_cast %37 : vector<64xf32> to vector<1x1x64xf32>
    %39 = vector.broadcast %38 : vector<1x1x64xf32> to vector<16x16x64xf32>
    %40 = arith.addf %35, %39 : vector<16x16x64xf32>
    %cst_54 = arith.constant 0.000000e+00 : f32
    %41 = vector.broadcast %cst_54 : f32 to vector<16x16x64xf32>
    %42 = arith.maximumf %40, %41 : vector<16x16x64xf32>
    %c0_55 = arith.constant 0 : index
    %c0_56 = arith.constant 0 : index
    %c0_57 = arith.constant 0 : index
    %c0_58 = arith.constant 0 : index
    %43 = vector.load %arg6[%c0_55, %c0_56, %c0_57, %c0_58] : memref<1x16x16x64xf32, #tpu.memory_space<vmem>>, vector<1x16x16x64xf32>
    %44 = vector.shape_cast %43 : vector<1x16x16x64xf32> to vector<16x16x64xf32>
    %45 = vector.shape_cast %42 : vector<16x16x64xf32> to vector<1x16x16x64xf32>
    tpu.vector_store %arg6[%c0_55, %c0_56, %c0_57, %c0_58], %45 {strides = array<i32>} : memref<1x16x16x64xf32, #tpu.memory_space<vmem>>, vector<1x16x16x64xf32>,
    return
  }
  func.func @transform_0(%arg0: i32) -> (i32, i32, i32, i32) {
    %c0_i32 = arith.constant 0 : i32
    %c0_i32_0 = arith.constant 0 : i32
    %c0_i32_1 = arith.constant 0 : i32
    %c0_i32_2 = arith.constant 0 : i32
    return %arg0, %c0_i32, %c0_i32_0, %c0_i32_1 : i32, i32, i32, i32
  }
  func.func @transform_1(%arg0: i32) -> (i32, i32) {
    %c0_i32 = arith.constant 0 : i32
    %c0_i32_0 = arith.constant 0 : i32
    %c0_i32_1 = arith.constant 0 : i32
    return %c0_i32, %c0_i32_0 : i32, i32
  }
  func.func @transform_2(%arg0: i32) -> (i32, i32) {
    %c0_i32 = arith.constant 0 : i32
    %c0_i32_0 = arith.constant 0 : i32
    %c0_i32_1 = arith.constant 0 : i32
    return %c0_i32, %c0_i32_0 : i32, i32
  }
  func.func @transform_3(%arg0: i32) -> (i32, i32) {
    %c0_i32 = arith.constant 0 : i32
    %c0_i32_0 = arith.constant 0 : i32
    %c0_i32_1 = arith.constant 0 : i32
    return %c0_i32, %c0_i32_0 : i32, i32
  }
  func.func @transform_4(%arg0: i32) -> (i32, i32) {
    %c0_i32 = arith.constant 0 : i32
    %c0_i32_0 = arith.constant 0 : i32
    %c0_i32_1 = arith.constant 0 : i32
    return %c0_i32, %c0_i32_0 : i32, i32
  }
  func.func @transform_5(%arg0: i32) -> (i32, i32, i32, i32) {
    %c0_i32 = arith.constant 0 : i32
    %c0_i32_0 = arith.constant 0 : i32
    %c0_i32_1 = arith.constant 0 : i32
    %c0_i32_2 = arith.constant 0 : i32
    return %arg0, %c0_i32, %c0_i32_0, %c0_i32_1 : i32, i32, i32, i32
  }
}

module attributes {stable_mosaic.version = 11 : i64} {
  func.func @_fused_pool_kernel(%arg0: i32, %arg1: memref<1x16x16x64xf32, #tpu.memory_space<vmem>>, %arg2: memref<576x64xbf16, #tpu.memory_space<vmem>>, %arg3: memref<1x64xf32, #tpu.memory_space<vmem>>, %arg4: memref<576x128xbf16, #tpu.memory_space<vmem>>, %arg5: memref<1x128xf32, #tpu.memory_space<vmem>>, %arg6: memref<1x8x8x128xf32, #tpu.memory_space<vmem>>, %arg7: memref<18x24x64xbf16, #tpu.memory_space<vmem>>, %arg8: memref<10x16x64xbf16, #tpu.memory_space<vmem>>) attributes {dimension_semantics = [#tpu.dimension_semantics<parallel>], iteration_bounds = array<i64: 2>, scalar_prefetch = 0 : i64, scratch_operands = 2 : i64, tpu.core_type = #tpu.core_type<tc>, window_params = [{transform_indices = @transform_0, window_bounds = array<i64: 1, 16, 16, 64>}, {pipeline_mode = #tpu.pipeline_mode<synchronous>, transform_indices = @transform_1, window_bounds = array<i64: 576, 64>}, {pipeline_mode = #tpu.pipeline_mode<synchronous>, transform_indices = @transform_2, window_bounds = array<i64: 1, 64>}, {pipeline_mode = #tpu.pipeline_mode<synchronous>, transform_indices = @transform_3, window_bounds = array<i64: 576, 128>}, {pipeline_mode = #tpu.pipeline_mode<synchronous>, transform_indices = @transform_4, window_bounds = array<i64: 1, 128>}, {transform_indices = @transform_5, window_bounds = array<i64: 1, 8, 8, 128>}]} {
    %c0 = arith.constant 0 : index
    %c0_0 = arith.constant 0 : index
    %c0_1 = arith.constant 0 : index
    %c0_2 = arith.constant 0 : index
    %0 = vector.load %arg1[%c0, %c0_0, %c0_1, %c0_2] : memref<1x16x16x64xf32, #tpu.memory_space<vmem>>, vector<1x16x16x64xf32>
    %1 = vector.shape_cast %0 : vector<1x16x16x64xf32> to vector<16x16x64xf32>
    %cst = arith.constant 0.000000e+00 : bf16
    %2 = vector.broadcast %cst : bf16 to vector<1x24x64xbf16>
    %c0_3 = arith.constant 0 : index
    %c0_4 = arith.constant 0 : index
    %c0_5 = arith.constant 0 : index
    %3 = vector.load %arg7[%c0_3, %c0_4, %c0_5] : memref<18x24x64xbf16, #tpu.memory_space<vmem>>, vector<1x24x64xbf16>
    tpu.vector_store %arg7[%c0_3, %c0_4, %c0_5], %2 {strides = array<i32>} : memref<18x24x64xbf16, #tpu.memory_space<vmem>>, vector<1x24x64xbf16>,
    %cst_6 = arith.constant 0.000000e+00 : bf16
    %4 = vector.broadcast %cst_6 : bf16 to vector<1x24x64xbf16>
    %c17 = arith.constant 17 : index
    %c0_7 = arith.constant 0 : index
    %c0_8 = arith.constant 0 : index
    %5 = vector.load %arg7[%c17, %c0_7, %c0_8] : memref<18x24x64xbf16, #tpu.memory_space<vmem>>, vector<1x24x64xbf16>
    tpu.vector_store %arg7[%c17, %c0_7, %c0_8], %4 {strides = array<i32>} : memref<18x24x64xbf16, #tpu.memory_space<vmem>>, vector<1x24x64xbf16>,
    %cst_9 = arith.constant 0.000000e+00 : bf16
    %6 = vector.broadcast %cst_9 : bf16 to vector<18x1x64xbf16>
    %c0_10 = arith.constant 0 : index
    %c0_11 = arith.constant 0 : index
    %c0_12 = arith.constant 0 : index
    %7 = vector.load %arg7[%c0_10, %c0_11, %c0_12] : memref<18x24x64xbf16, #tpu.memory_space<vmem>>, vector<18x1x64xbf16>
    tpu.vector_store %arg7[%c0_10, %c0_11, %c0_12], %6 {strides = array<i32>} : memref<18x24x64xbf16, #tpu.memory_space<vmem>>, vector<18x1x64xbf16>,
    %cst_13 = arith.constant 0.000000e+00 : bf16
    %8 = vector.broadcast %cst_13 : bf16 to vector<18x1x64xbf16>
    %c0_14 = arith.constant 0 : index
    %c17_15 = arith.constant 17 : index
    %c0_16 = arith.constant 0 : index
    %9 = vector.load %arg7[%c0_14, %c17_15, %c0_16] : memref<18x24x64xbf16, #tpu.memory_space<vmem>>, vector<18x1x64xbf16>
    tpu.vector_store %arg7[%c0_14, %c17_15, %c0_16], %8 {strides = array<i32>} : memref<18x24x64xbf16, #tpu.memory_space<vmem>>, vector<18x1x64xbf16>,
    %10 = arith.truncf %1 : vector<16x16x64xf32> to vector<16x16x64xbf16>
    %c1 = arith.constant 1 : index
    %c1_17 = arith.constant 1 : index
    %c0_18 = arith.constant 0 : index
    %11 = vector.load %arg7[%c1, %c1_17, %c0_18] : memref<18x24x64xbf16, #tpu.memory_space<vmem>>, vector<16x16x64xbf16>
    tpu.vector_store %arg7[%c1, %c1_17, %c0_18], %10 {strides = array<i32>} : memref<18x24x64xbf16, #tpu.memory_space<vmem>>, vector<16x16x64xbf16>,
    %c0_19 = arith.constant 0 : index
    %c0_20 = arith.constant 0 : index
    %c0_21 = arith.constant 0 : index
    %12 = vector.load %arg7[%c0_19, %c0_20, %c0_21] : memref<18x24x64xbf16, #tpu.memory_space<vmem>>, vector<16x16x64xbf16>
    %c0_22 = arith.constant 0 : index
    %c1_23 = arith.constant 1 : index
    %c0_24 = arith.constant 0 : index
    %13 = vector.load %arg7[%c0_22, %c1_23, %c0_24] : memref<18x24x64xbf16, #tpu.memory_space<vmem>>, vector<16x16x64xbf16>
    %c0_25 = arith.constant 0 : index
    %c2 = arith.constant 2 : index
    %c0_26 = arith.constant 0 : index
    %14 = vector.load %arg7[%c0_25, %c2, %c0_26] : memref<18x24x64xbf16, #tpu.memory_space<vmem>>, vector<16x16x64xbf16>
    %c1_27 = arith.constant 1 : index
    %c0_28 = arith.constant 0 : index
    %c0_29 = arith.constant 0 : index
    %15 = vector.load %arg7[%c1_27, %c0_28, %c0_29] : memref<18x24x64xbf16, #tpu.memory_space<vmem>>, vector<16x16x64xbf16>
    %c1_30 = arith.constant 1 : index
    %c1_31 = arith.constant 1 : index
    %c0_32 = arith.constant 0 : index
    %16 = vector.load %arg7[%c1_30, %c1_31, %c0_32] : memref<18x24x64xbf16, #tpu.memory_space<vmem>>, vector<16x16x64xbf16>
    %c1_33 = arith.constant 1 : index
    %c2_34 = arith.constant 2 : index
    %c0_35 = arith.constant 0 : index
    %17 = vector.load %arg7[%c1_33, %c2_34, %c0_35] : memref<18x24x64xbf16, #tpu.memory_space<vmem>>, vector<16x16x64xbf16>
    %c2_36 = arith.constant 2 : index
    %c0_37 = arith.constant 0 : index
    %c0_38 = arith.constant 0 : index
    %18 = vector.load %arg7[%c2_36, %c0_37, %c0_38] : memref<18x24x64xbf16, #tpu.memory_space<vmem>>, vector<16x16x64xbf16>
    %c2_39 = arith.constant 2 : index
    %c1_40 = arith.constant 1 : index
    %c0_41 = arith.constant 0 : index
    %19 = vector.load %arg7[%c2_39, %c1_40, %c0_41] : memref<18x24x64xbf16, #tpu.memory_space<vmem>>, vector<16x16x64xbf16>
    %c2_42 = arith.constant 2 : index
    %c2_43 = arith.constant 2 : index
    %c0_44 = arith.constant 0 : index
    %20 = vector.load %arg7[%c2_42, %c2_43, %c0_44] : memref<18x24x64xbf16, #tpu.memory_space<vmem>>, vector<16x16x64xbf16>
    %21 = tpu.concatenate %12, %13, %14, %15, %16, %17, %18, %19, %20 in 2 : vector<16x16x64xbf16>, vector<16x16x64xbf16>, vector<16x16x64xbf16>, vector<16x16x64xbf16>, vector<16x16x64xbf16>, vector<16x16x64xbf16>, vector<16x16x64xbf16>, vector<16x16x64xbf16>, vector<16x16x64xbf16> -> vector<16x16x576xbf16>
    %22 = vector.shape_cast %21 : vector<16x16x576xbf16> to vector<256x576xbf16>
    %c0_45 = arith.constant 0 : index
    %c0_46 = arith.constant 0 : index
    %23 = vector.load %arg2[%c0_45, %c0_46] : memref<576x64xbf16, #tpu.memory_space<vmem>>, vector<576x64xbf16>
    %cst_47 = arith.constant dense<0.000000e+00> : vector<256x64xf32>
    %24 = tpu.matmul %22, %23, %cst_47 {dimension_numbers = #tpu.dot_dimension_numbers<[1], [0], [0], [1], [0, 0, 1, 1], [], []>} : vector<256x576xbf16>, vector<576x64xbf16>, vector<256x64xf32> -> vector<256x64xf32>
    %25 = vector.shape_cast %24 : vector<256x64xf32> to vector<16x16x64xf32>
    %c0_48 = arith.constant 0 : index
    %c0_49 = arith.constant 0 : index
    %26 = vector.load %arg3[%c0_48, %c0_49] : memref<1x64xf32, #tpu.memory_space<vmem>>, vector<1x64xf32>
    %27 = vector.shape_cast %26 : vector<1x64xf32> to vector<64xf32>
    %28 = vector.shape_cast %27 : vector<64xf32> to vector<1x1x64xf32>
    %29 = vector.broadcast %28 : vector<1x1x64xf32> to vector<16x16x64xf32>
    %30 = arith.addf %25, %29 : vector<16x16x64xf32>
    %cst_50 = arith.constant 0.000000e+00 : f32
    %31 = vector.broadcast %cst_50 : f32 to vector<16x16x64xf32>
    %32 = arith.maximumf %30, %31 : vector<16x16x64xf32>
    %33 = vector.shape_cast %32 : vector<16x16x64xf32> to vector<8x2x16x64xf32>
    %cst_51 = arith.constant dense<0xFF800000> : vector<8x16x64xf32>
    %34 = vector.multi_reduction <maximumf>, %33, %cst_51 [1] : vector<8x2x16x64xf32> to vector<8x16x64xf32>
    %35 = vector.shape_cast %34 : vector<8x16x64xf32> to vector<8x8x2x64xf32>
    %cst_52 = arith.constant dense<0xFF800000> : vector<8x8x64xf32>
    %36 = vector.multi_reduction <maximumf>, %35, %cst_52 [2] : vector<8x8x2x64xf32> to vector<8x8x64xf32>
    %cst_53 = arith.constant 0.000000e+00 : bf16
    %37 = vector.broadcast %cst_53 : bf16 to vector<1x16x64xbf16>
    %c0_54 = arith.constant 0 : index
    %c0_55 = arith.constant 0 : index
    %c0_56 = arith.constant 0 : index
    %38 = vector.load %arg8[%c0_54, %c0_55, %c0_56] : memref<10x16x64xbf16, #tpu.memory_space<vmem>>, vector<1x16x64xbf16>
    tpu.vector_store %arg8[%c0_54, %c0_55, %c0_56], %37 {strides = array<i32>} : memref<10x16x64xbf16, #tpu.memory_space<vmem>>, vector<1x16x64xbf16>,
    %cst_57 = arith.constant 0.000000e+00 : bf16
    %39 = vector.broadcast %cst_57 : bf16 to vector<1x16x64xbf16>
    %c9 = arith.constant 9 : index
    %c0_58 = arith.constant 0 : index
    %c0_59 = arith.constant 0 : index
    %40 = vector.load %arg8[%c9, %c0_58, %c0_59] : memref<10x16x64xbf16, #tpu.memory_space<vmem>>, vector<1x16x64xbf16>
    tpu.vector_store %arg8[%c9, %c0_58, %c0_59], %39 {strides = array<i32>} : memref<10x16x64xbf16, #tpu.memory_space<vmem>>, vector<1x16x64xbf16>,
    %cst_60 = arith.constant 0.000000e+00 : bf16
    %41 = vector.broadcast %cst_60 : bf16 to vector<10x1x64xbf16>
    %c0_61 = arith.constant 0 : index
    %c0_62 = arith.constant 0 : index
    %c0_63 = arith.constant 0 : index
    %42 = vector.load %arg8[%c0_61, %c0_62, %c0_63] : memref<10x16x64xbf16, #tpu.memory_space<vmem>>, vector<10x1x64xbf16>
    tpu.vector_store %arg8[%c0_61, %c0_62, %c0_63], %41 {strides = array<i32>} : memref<10x16x64xbf16, #tpu.memory_space<vmem>>, vector<10x1x64xbf16>,
    %cst_64 = arith.constant 0.000000e+00 : bf16
    %43 = vector.broadcast %cst_64 : bf16 to vector<10x1x64xbf16>
    %c0_65 = arith.constant 0 : index
    %c9_66 = arith.constant 9 : index
    %c0_67 = arith.constant 0 : index
    %44 = vector.load %arg8[%c0_65, %c9_66, %c0_67] : memref<10x16x64xbf16, #tpu.memory_space<vmem>>, vector<10x1x64xbf16>
    tpu.vector_store %arg8[%c0_65, %c9_66, %c0_67], %43 {strides = array<i32>} : memref<10x16x64xbf16, #tpu.memory_space<vmem>>, vector<10x1x64xbf16>,
    %45 = arith.truncf %36 : vector<8x8x64xf32> to vector<8x8x64xbf16>
    %c1_68 = arith.constant 1 : index
    %c1_69 = arith.constant 1 : index
    %c0_70 = arith.constant 0 : index
    %46 = vector.load %arg8[%c1_68, %c1_69, %c0_70] : memref<10x16x64xbf16, #tpu.memory_space<vmem>>, vector<8x8x64xbf16>
    tpu.vector_store %arg8[%c1_68, %c1_69, %c0_70], %45 {strides = array<i32>} : memref<10x16x64xbf16, #tpu.memory_space<vmem>>, vector<8x8x64xbf16>,
    %c0_71 = arith.constant 0 : index
    %c0_72 = arith.constant 0 : index
    %c0_73 = arith.constant 0 : index
    %47 = vector.load %arg8[%c0_71, %c0_72, %c0_73] : memref<10x16x64xbf16, #tpu.memory_space<vmem>>, vector<8x8x64xbf16>
    %c0_74 = arith.constant 0 : index
    %c1_75 = arith.constant 1 : index
    %c0_76 = arith.constant 0 : index
    %48 = vector.load %arg8[%c0_74, %c1_75, %c0_76] : memref<10x16x64xbf16, #tpu.memory_space<vmem>>, vector<8x8x64xbf16>
    %c0_77 = arith.constant 0 : index
    %c2_78 = arith.constant 2 : index
    %c0_79 = arith.constant 0 : index
    %49 = vector.load %arg8[%c0_77, %c2_78, %c0_79] : memref<10x16x64xbf16, #tpu.memory_space<vmem>>, vector<8x8x64xbf16>
    %c1_80 = arith.constant 1 : index
    %c0_81 = arith.constant 0 : index
    %c0_82 = arith.constant 0 : index
    %50 = vector.load %arg8[%c1_80, %c0_81, %c0_82] : memref<10x16x64xbf16, #tpu.memory_space<vmem>>, vector<8x8x64xbf16>
    %c1_83 = arith.constant 1 : index
    %c1_84 = arith.constant 1 : index
    %c0_85 = arith.constant 0 : index
    %51 = vector.load %arg8[%c1_83, %c1_84, %c0_85] : memref<10x16x64xbf16, #tpu.memory_space<vmem>>, vector<8x8x64xbf16>
    %c1_86 = arith.constant 1 : index
    %c2_87 = arith.constant 2 : index
    %c0_88 = arith.constant 0 : index
    %52 = vector.load %arg8[%c1_86, %c2_87, %c0_88] : memref<10x16x64xbf16, #tpu.memory_space<vmem>>, vector<8x8x64xbf16>
    %c2_89 = arith.constant 2 : index
    %c0_90 = arith.constant 0 : index
    %c0_91 = arith.constant 0 : index
    %53 = vector.load %arg8[%c2_89, %c0_90, %c0_91] : memref<10x16x64xbf16, #tpu.memory_space<vmem>>, vector<8x8x64xbf16>
    %c2_92 = arith.constant 2 : index
    %c1_93 = arith.constant 1 : index
    %c0_94 = arith.constant 0 : index
    %54 = vector.load %arg8[%c2_92, %c1_93, %c0_94] : memref<10x16x64xbf16, #tpu.memory_space<vmem>>, vector<8x8x64xbf16>
    %c2_95 = arith.constant 2 : index
    %c2_96 = arith.constant 2 : index
    %c0_97 = arith.constant 0 : index
    %55 = vector.load %arg8[%c2_95, %c2_96, %c0_97] : memref<10x16x64xbf16, #tpu.memory_space<vmem>>, vector<8x8x64xbf16>
    %56 = tpu.concatenate %47, %48, %49, %50, %51, %52, %53, %54, %55 in 2 : vector<8x8x64xbf16>, vector<8x8x64xbf16>, vector<8x8x64xbf16>, vector<8x8x64xbf16>, vector<8x8x64xbf16>, vector<8x8x64xbf16>, vector<8x8x64xbf16>, vector<8x8x64xbf16>, vector<8x8x64xbf16> -> vector<8x8x576xbf16>
    %57 = vector.shape_cast %56 : vector<8x8x576xbf16> to vector<64x576xbf16>
    %c0_98 = arith.constant 0 : index
    %c0_99 = arith.constant 0 : index
    %58 = vector.load %arg4[%c0_98, %c0_99] : memref<576x128xbf16, #tpu.memory_space<vmem>>, vector<576x128xbf16>
    %cst_100 = arith.constant dense<0.000000e+00> : vector<64x128xf32>
    %59 = tpu.matmul %57, %58, %cst_100 {dimension_numbers = #tpu.dot_dimension_numbers<[1], [0], [0], [1], [0, 0, 1, 1], [], []>} : vector<64x576xbf16>, vector<576x128xbf16>, vector<64x128xf32> -> vector<64x128xf32>
    %60 = vector.shape_cast %59 : vector<64x128xf32> to vector<8x8x128xf32>
    %c0_101 = arith.constant 0 : index
    %c0_102 = arith.constant 0 : index
    %61 = vector.load %arg5[%c0_101, %c0_102] : memref<1x128xf32, #tpu.memory_space<vmem>>, vector<1x128xf32>
    %62 = vector.shape_cast %61 : vector<1x128xf32> to vector<128xf32>
    %63 = vector.shape_cast %62 : vector<128xf32> to vector<1x1x128xf32>
    %64 = vector.broadcast %63 : vector<1x1x128xf32> to vector<8x8x128xf32>
    %65 = arith.addf %60, %64 : vector<8x8x128xf32>
    %cst_103 = arith.constant 0.000000e+00 : f32
    %66 = vector.broadcast %cst_103 : f32 to vector<8x8x128xf32>
    %67 = arith.maximumf %65, %66 : vector<8x8x128xf32>
    %c0_104 = arith.constant 0 : index
    %c0_105 = arith.constant 0 : index
    %c0_106 = arith.constant 0 : index
    %c0_107 = arith.constant 0 : index
    %68 = vector.load %arg6[%c0_104, %c0_105, %c0_106, %c0_107] : memref<1x8x8x128xf32, #tpu.memory_space<vmem>>, vector<1x8x8x128xf32>
    %69 = vector.shape_cast %68 : vector<1x8x8x128xf32> to vector<8x8x128xf32>
    %70 = vector.shape_cast %67 : vector<8x8x128xf32> to vector<1x8x8x128xf32>
    tpu.vector_store %arg6[%c0_104, %c0_105, %c0_106, %c0_107], %70 {strides = array<i32>} : memref<1x8x8x128xf32, #tpu.memory_space<vmem>>, vector<1x8x8x128xf32>,
    return
  }
  func.func @transform_0(%arg0: i32) -> (i32, i32, i32, i32) {
    %c0_i32 = arith.constant 0 : i32
    %c0_i32_0 = arith.constant 0 : i32
    %c0_i32_1 = arith.constant 0 : i32
    %c0_i32_2 = arith.constant 0 : i32
    return %arg0, %c0_i32, %c0_i32_0, %c0_i32_1 : i32, i32, i32, i32
  }
  func.func @transform_1(%arg0: i32) -> (i32, i32) {
    %c0_i32 = arith.constant 0 : i32
    %c0_i32_0 = arith.constant 0 : i32
    %c0_i32_1 = arith.constant 0 : i32
    return %c0_i32, %c0_i32_0 : i32, i32
  }
  func.func @transform_2(%arg0: i32) -> (i32, i32) {
    %c0_i32 = arith.constant 0 : i32
    %c0_i32_0 = arith.constant 0 : i32
    %c0_i32_1 = arith.constant 0 : i32
    return %c0_i32, %c0_i32_0 : i32, i32
  }
  func.func @transform_3(%arg0: i32) -> (i32, i32) {
    %c0_i32 = arith.constant 0 : i32
    %c0_i32_0 = arith.constant 0 : i32
    %c0_i32_1 = arith.constant 0 : i32
    return %c0_i32, %c0_i32_0 : i32, i32
  }
  func.func @transform_4(%arg0: i32) -> (i32, i32) {
    %c0_i32 = arith.constant 0 : i32
    %c0_i32_0 = arith.constant 0 : i32
    %c0_i32_1 = arith.constant 0 : i32
    return %c0_i32, %c0_i32_0 : i32, i32
  }
  func.func @transform_5(%arg0: i32) -> (i32, i32, i32, i32) {
    %c0_i32 = arith.constant 0 : i32
    %c0_i32_0 = arith.constant 0 : i32
    %c0_i32_1 = arith.constant 0 : i32
    %c0_i32_2 = arith.constant 0 : i32
    return %arg0, %c0_i32, %c0_i32_0, %c0_i32_1 : i32, i32, i32, i32
  }
}

module attributes {stable_mosaic.version = 11 : i64} {
  func.func @_fused_pool_kernel(%arg0: i32, %arg1: memref<1x8x8x128xf32, #tpu.memory_space<vmem>>, %arg2: memref<1152x128xbf16, #tpu.memory_space<vmem>>, %arg3: memref<1x128xf32, #tpu.memory_space<vmem>>, %arg4: memref<1152x256xbf16, #tpu.memory_space<vmem>>, %arg5: memref<1x256xf32, #tpu.memory_space<vmem>>, %arg6: memref<1x4x4x256xf32, #tpu.memory_space<vmem>>, %arg7: memref<10x16x128xbf16, #tpu.memory_space<vmem>>, %arg8: memref<6x8x128xbf16, #tpu.memory_space<vmem>>) attributes {dimension_semantics = [#tpu.dimension_semantics<parallel>], iteration_bounds = array<i64: 2>, scalar_prefetch = 0 : i64, scratch_operands = 2 : i64, tpu.core_type = #tpu.core_type<tc>, window_params = [{transform_indices = @transform_0, window_bounds = array<i64: 1, 8, 8, 128>}, {pipeline_mode = #tpu.pipeline_mode<synchronous>, transform_indices = @transform_1, window_bounds = array<i64: 1152, 128>}, {pipeline_mode = #tpu.pipeline_mode<synchronous>, transform_indices = @transform_2, window_bounds = array<i64: 1, 128>}, {pipeline_mode = #tpu.pipeline_mode<synchronous>, transform_indices = @transform_3, window_bounds = array<i64: 1152, 256>}, {pipeline_mode = #tpu.pipeline_mode<synchronous>, transform_indices = @transform_4, window_bounds = array<i64: 1, 256>}, {transform_indices = @transform_5, window_bounds = array<i64: 1, 4, 4, 256>}]} {
    %c0 = arith.constant 0 : index
    %c0_0 = arith.constant 0 : index
    %c0_1 = arith.constant 0 : index
    %c0_2 = arith.constant 0 : index
    %0 = vector.load %arg1[%c0, %c0_0, %c0_1, %c0_2] : memref<1x8x8x128xf32, #tpu.memory_space<vmem>>, vector<1x8x8x128xf32>
    %1 = vector.shape_cast %0 : vector<1x8x8x128xf32> to vector<8x8x128xf32>
    %cst = arith.constant 0.000000e+00 : bf16
    %2 = vector.broadcast %cst : bf16 to vector<1x16x128xbf16>
    %c0_3 = arith.constant 0 : index
    %c0_4 = arith.constant 0 : index
    %c0_5 = arith.constant 0 : index
    %3 = vector.load %arg7[%c0_3, %c0_4, %c0_5] : memref<10x16x128xbf16, #tpu.memory_space<vmem>>, vector<1x16x128xbf16>
    tpu.vector_store %arg7[%c0_3, %c0_4, %c0_5], %2 {strides = array<i32>} : memref<10x16x128xbf16, #tpu.memory_space<vmem>>, vector<1x16x128xbf16>,
    %cst_6 = arith.constant 0.000000e+00 : bf16
    %4 = vector.broadcast %cst_6 : bf16 to vector<1x16x128xbf16>
    %c9 = arith.constant 9 : index
    %c0_7 = arith.constant 0 : index
    %c0_8 = arith.constant 0 : index
    %5 = vector.load %arg7[%c9, %c0_7, %c0_8] : memref<10x16x128xbf16, #tpu.memory_space<vmem>>, vector<1x16x128xbf16>
    tpu.vector_store %arg7[%c9, %c0_7, %c0_8], %4 {strides = array<i32>} : memref<10x16x128xbf16, #tpu.memory_space<vmem>>, vector<1x16x128xbf16>,
    %cst_9 = arith.constant 0.000000e+00 : bf16
    %6 = vector.broadcast %cst_9 : bf16 to vector<10x1x128xbf16>
    %c0_10 = arith.constant 0 : index
    %c0_11 = arith.constant 0 : index
    %c0_12 = arith.constant 0 : index
    %7 = vector.load %arg7[%c0_10, %c0_11, %c0_12] : memref<10x16x128xbf16, #tpu.memory_space<vmem>>, vector<10x1x128xbf16>
    tpu.vector_store %arg7[%c0_10, %c0_11, %c0_12], %6 {strides = array<i32>} : memref<10x16x128xbf16, #tpu.memory_space<vmem>>, vector<10x1x128xbf16>,
    %cst_13 = arith.constant 0.000000e+00 : bf16
    %8 = vector.broadcast %cst_13 : bf16 to vector<10x1x128xbf16>
    %c0_14 = arith.constant 0 : index
    %c9_15 = arith.constant 9 : index
    %c0_16 = arith.constant 0 : index
    %9 = vector.load %arg7[%c0_14, %c9_15, %c0_16] : memref<10x16x128xbf16, #tpu.memory_space<vmem>>, vector<10x1x128xbf16>
    tpu.vector_store %arg7[%c0_14, %c9_15, %c0_16], %8 {strides = array<i32>} : memref<10x16x128xbf16, #tpu.memory_space<vmem>>, vector<10x1x128xbf16>,
    %10 = arith.truncf %1 : vector<8x8x128xf32> to vector<8x8x128xbf16>
    %c1 = arith.constant 1 : index
    %c1_17 = arith.constant 1 : index
    %c0_18 = arith.constant 0 : index
    %11 = vector.load %arg7[%c1, %c1_17, %c0_18] : memref<10x16x128xbf16, #tpu.memory_space<vmem>>, vector<8x8x128xbf16>
    tpu.vector_store %arg7[%c1, %c1_17, %c0_18], %10 {strides = array<i32>} : memref<10x16x128xbf16, #tpu.memory_space<vmem>>, vector<8x8x128xbf16>,
    %c0_19 = arith.constant 0 : index
    %c0_20 = arith.constant 0 : index
    %c0_21 = arith.constant 0 : index
    %12 = vector.load %arg7[%c0_19, %c0_20, %c0_21] : memref<10x16x128xbf16, #tpu.memory_space<vmem>>, vector<8x8x128xbf16>
    %c0_22 = arith.constant 0 : index
    %c1_23 = arith.constant 1 : index
    %c0_24 = arith.constant 0 : index
    %13 = vector.load %arg7[%c0_22, %c1_23, %c0_24] : memref<10x16x128xbf16, #tpu.memory_space<vmem>>, vector<8x8x128xbf16>
    %c0_25 = arith.constant 0 : index
    %c2 = arith.constant 2 : index
    %c0_26 = arith.constant 0 : index
    %14 = vector.load %arg7[%c0_25, %c2, %c0_26] : memref<10x16x128xbf16, #tpu.memory_space<vmem>>, vector<8x8x128xbf16>
    %c1_27 = arith.constant 1 : index
    %c0_28 = arith.constant 0 : index
    %c0_29 = arith.constant 0 : index
    %15 = vector.load %arg7[%c1_27, %c0_28, %c0_29] : memref<10x16x128xbf16, #tpu.memory_space<vmem>>, vector<8x8x128xbf16>
    %c1_30 = arith.constant 1 : index
    %c1_31 = arith.constant 1 : index
    %c0_32 = arith.constant 0 : index
    %16 = vector.load %arg7[%c1_30, %c1_31, %c0_32] : memref<10x16x128xbf16, #tpu.memory_space<vmem>>, vector<8x8x128xbf16>
    %c1_33 = arith.constant 1 : index
    %c2_34 = arith.constant 2 : index
    %c0_35 = arith.constant 0 : index
    %17 = vector.load %arg7[%c1_33, %c2_34, %c0_35] : memref<10x16x128xbf16, #tpu.memory_space<vmem>>, vector<8x8x128xbf16>
    %c2_36 = arith.constant 2 : index
    %c0_37 = arith.constant 0 : index
    %c0_38 = arith.constant 0 : index
    %18 = vector.load %arg7[%c2_36, %c0_37, %c0_38] : memref<10x16x128xbf16, #tpu.memory_space<vmem>>, vector<8x8x128xbf16>
    %c2_39 = arith.constant 2 : index
    %c1_40 = arith.constant 1 : index
    %c0_41 = arith.constant 0 : index
    %19 = vector.load %arg7[%c2_39, %c1_40, %c0_41] : memref<10x16x128xbf16, #tpu.memory_space<vmem>>, vector<8x8x128xbf16>
    %c2_42 = arith.constant 2 : index
    %c2_43 = arith.constant 2 : index
    %c0_44 = arith.constant 0 : index
    %20 = vector.load %arg7[%c2_42, %c2_43, %c0_44] : memref<10x16x128xbf16, #tpu.memory_space<vmem>>, vector<8x8x128xbf16>
    %21 = tpu.concatenate %12, %13, %14, %15, %16, %17, %18, %19, %20 in 2 : vector<8x8x128xbf16>, vector<8x8x128xbf16>, vector<8x8x128xbf16>, vector<8x8x128xbf16>, vector<8x8x128xbf16>, vector<8x8x128xbf16>, vector<8x8x128xbf16>, vector<8x8x128xbf16>, vector<8x8x128xbf16> -> vector<8x8x1152xbf16>
    %22 = vector.shape_cast %21 : vector<8x8x1152xbf16> to vector<64x1152xbf16>
    %c0_45 = arith.constant 0 : index
    %c0_46 = arith.constant 0 : index
    %23 = vector.load %arg2[%c0_45, %c0_46] : memref<1152x128xbf16, #tpu.memory_space<vmem>>, vector<1152x128xbf16>
    %cst_47 = arith.constant dense<0.000000e+00> : vector<64x128xf32>
    %24 = tpu.matmul %22, %23, %cst_47 {dimension_numbers = #tpu.dot_dimension_numbers<[1], [0], [0], [1], [0, 0, 1, 1], [], []>} : vector<64x1152xbf16>, vector<1152x128xbf16>, vector<64x128xf32> -> vector<64x128xf32>
    %25 = vector.shape_cast %24 : vector<64x128xf32> to vector<8x8x128xf32>
    %c0_48 = arith.constant 0 : index
    %c0_49 = arith.constant 0 : index
    %26 = vector.load %arg3[%c0_48, %c0_49] : memref<1x128xf32, #tpu.memory_space<vmem>>, vector<1x128xf32>
    %27 = vector.shape_cast %26 : vector<1x128xf32> to vector<128xf32>
    %28 = vector.shape_cast %27 : vector<128xf32> to vector<1x1x128xf32>
    %29 = vector.broadcast %28 : vector<1x1x128xf32> to vector<8x8x128xf32>
    %30 = arith.addf %25, %29 : vector<8x8x128xf32>
    %cst_50 = arith.constant 0.000000e+00 : f32
    %31 = vector.broadcast %cst_50 : f32 to vector<8x8x128xf32>
    %32 = arith.maximumf %30, %31 : vector<8x8x128xf32>
    %33 = vector.shape_cast %32 : vector<8x8x128xf32> to vector<4x2x8x128xf32>
    %cst_51 = arith.constant dense<0xFF800000> : vector<4x8x128xf32>
    %34 = vector.multi_reduction <maximumf>, %33, %cst_51 [1] : vector<4x2x8x128xf32> to vector<4x8x128xf32>
    %35 = vector.shape_cast %34 : vector<4x8x128xf32> to vector<4x4x2x128xf32>
    %cst_52 = arith.constant dense<0xFF800000> : vector<4x4x128xf32>
    %36 = vector.multi_reduction <maximumf>, %35, %cst_52 [2] : vector<4x4x2x128xf32> to vector<4x4x128xf32>
    %cst_53 = arith.constant 0.000000e+00 : bf16
    %37 = vector.broadcast %cst_53 : bf16 to vector<1x8x128xbf16>
    %c0_54 = arith.constant 0 : index
    %c0_55 = arith.constant 0 : index
    %c0_56 = arith.constant 0 : index
    %38 = vector.load %arg8[%c0_54, %c0_55, %c0_56] : memref<6x8x128xbf16, #tpu.memory_space<vmem>>, vector<1x8x128xbf16>
    tpu.vector_store %arg8[%c0_54, %c0_55, %c0_56], %37 {strides = array<i32>} : memref<6x8x128xbf16, #tpu.memory_space<vmem>>, vector<1x8x128xbf16>,
    %cst_57 = arith.constant 0.000000e+00 : bf16
    %39 = vector.broadcast %cst_57 : bf16 to vector<1x8x128xbf16>
    %c5 = arith.constant 5 : index
    %c0_58 = arith.constant 0 : index
    %c0_59 = arith.constant 0 : index
    %40 = vector.load %arg8[%c5, %c0_58, %c0_59] : memref<6x8x128xbf16, #tpu.memory_space<vmem>>, vector<1x8x128xbf16>
    tpu.vector_store %arg8[%c5, %c0_58, %c0_59], %39 {strides = array<i32>} : memref<6x8x128xbf16, #tpu.memory_space<vmem>>, vector<1x8x128xbf16>,
    %cst_60 = arith.constant 0.000000e+00 : bf16
    %41 = vector.broadcast %cst_60 : bf16 to vector<6x1x128xbf16>
    %c0_61 = arith.constant 0 : index
    %c0_62 = arith.constant 0 : index
    %c0_63 = arith.constant 0 : index
    %42 = vector.load %arg8[%c0_61, %c0_62, %c0_63] : memref<6x8x128xbf16, #tpu.memory_space<vmem>>, vector<6x1x128xbf16>
    tpu.vector_store %arg8[%c0_61, %c0_62, %c0_63], %41 {strides = array<i32>} : memref<6x8x128xbf16, #tpu.memory_space<vmem>>, vector<6x1x128xbf16>,
    %cst_64 = arith.constant 0.000000e+00 : bf16
    %43 = vector.broadcast %cst_64 : bf16 to vector<6x1x128xbf16>
    %c0_65 = arith.constant 0 : index
    %c5_66 = arith.constant 5 : index
    %c0_67 = arith.constant 0 : index
    %44 = vector.load %arg8[%c0_65, %c5_66, %c0_67] : memref<6x8x128xbf16, #tpu.memory_space<vmem>>, vector<6x1x128xbf16>
    tpu.vector_store %arg8[%c0_65, %c5_66, %c0_67], %43 {strides = array<i32>} : memref<6x8x128xbf16, #tpu.memory_space<vmem>>, vector<6x1x128xbf16>,
    %45 = arith.truncf %36 : vector<4x4x128xf32> to vector<4x4x128xbf16>
    %c1_68 = arith.constant 1 : index
    %c1_69 = arith.constant 1 : index
    %c0_70 = arith.constant 0 : index
    %46 = vector.load %arg8[%c1_68, %c1_69, %c0_70] : memref<6x8x128xbf16, #tpu.memory_space<vmem>>, vector<4x4x128xbf16>
    tpu.vector_store %arg8[%c1_68, %c1_69, %c0_70], %45 {strides = array<i32>} : memref<6x8x128xbf16, #tpu.memory_space<vmem>>, vector<4x4x128xbf16>,
    %c0_71 = arith.constant 0 : index
    %c0_72 = arith.constant 0 : index
    %c0_73 = arith.constant 0 : index
    %47 = vector.load %arg8[%c0_71, %c0_72, %c0_73] : memref<6x8x128xbf16, #tpu.memory_space<vmem>>, vector<4x4x128xbf16>
    %c0_74 = arith.constant 0 : index
    %c1_75 = arith.constant 1 : index
    %c0_76 = arith.constant 0 : index
    %48 = vector.load %arg8[%c0_74, %c1_75, %c0_76] : memref<6x8x128xbf16, #tpu.memory_space<vmem>>, vector<4x4x128xbf16>
    %c0_77 = arith.constant 0 : index
    %c2_78 = arith.constant 2 : index
    %c0_79 = arith.constant 0 : index
    %49 = vector.load %arg8[%c0_77, %c2_78, %c0_79] : memref<6x8x128xbf16, #tpu.memory_space<vmem>>, vector<4x4x128xbf16>
    %c1_80 = arith.constant 1 : index
    %c0_81 = arith.constant 0 : index
    %c0_82 = arith.constant 0 : index
    %50 = vector.load %arg8[%c1_80, %c0_81, %c0_82] : memref<6x8x128xbf16, #tpu.memory_space<vmem>>, vector<4x4x128xbf16>
    %c1_83 = arith.constant 1 : index
    %c1_84 = arith.constant 1 : index
    %c0_85 = arith.constant 0 : index
    %51 = vector.load %arg8[%c1_83, %c1_84, %c0_85] : memref<6x8x128xbf16, #tpu.memory_space<vmem>>, vector<4x4x128xbf16>
    %c1_86 = arith.constant 1 : index
    %c2_87 = arith.constant 2 : index
    %c0_88 = arith.constant 0 : index
    %52 = vector.load %arg8[%c1_86, %c2_87, %c0_88] : memref<6x8x128xbf16, #tpu.memory_space<vmem>>, vector<4x4x128xbf16>
    %c2_89 = arith.constant 2 : index
    %c0_90 = arith.constant 0 : index
    %c0_91 = arith.constant 0 : index
    %53 = vector.load %arg8[%c2_89, %c0_90, %c0_91] : memref<6x8x128xbf16, #tpu.memory_space<vmem>>, vector<4x4x128xbf16>
    %c2_92 = arith.constant 2 : index
    %c1_93 = arith.constant 1 : index
    %c0_94 = arith.constant 0 : index
    %54 = vector.load %arg8[%c2_92, %c1_93, %c0_94] : memref<6x8x128xbf16, #tpu.memory_space<vmem>>, vector<4x4x128xbf16>
    %c2_95 = arith.constant 2 : index
    %c2_96 = arith.constant 2 : index
    %c0_97 = arith.constant 0 : index
    %55 = vector.load %arg8[%c2_95, %c2_96, %c0_97] : memref<6x8x128xbf16, #tpu.memory_space<vmem>>, vector<4x4x128xbf16>
    %56 = tpu.concatenate %47, %48, %49, %50, %51, %52, %53, %54, %55 in 2 : vector<4x4x128xbf16>, vector<4x4x128xbf16>, vector<4x4x128xbf16>, vector<4x4x128xbf16>, vector<4x4x128xbf16>, vector<4x4x128xbf16>, vector<4x4x128xbf16>, vector<4x4x128xbf16>, vector<4x4x128xbf16> -> vector<4x4x1152xbf16>
    %57 = vector.shape_cast %56 : vector<4x4x1152xbf16> to vector<16x1152xbf16>
    %c0_98 = arith.constant 0 : index
    %c0_99 = arith.constant 0 : index
    %58 = vector.load %arg4[%c0_98, %c0_99] : memref<1152x256xbf16, #tpu.memory_space<vmem>>, vector<1152x256xbf16>
    %cst_100 = arith.constant dense<0.000000e+00> : vector<16x256xf32>
    %59 = tpu.matmul %57, %58, %cst_100 {dimension_numbers = #tpu.dot_dimension_numbers<[1], [0], [0], [1], [0, 0, 1, 1], [], []>} : vector<16x1152xbf16>, vector<1152x256xbf16>, vector<16x256xf32> -> vector<16x256xf32>
    %60 = vector.shape_cast %59 : vector<16x256xf32> to vector<4x4x256xf32>
    %c0_101 = arith.constant 0 : index
    %c0_102 = arith.constant 0 : index
    %61 = vector.load %arg5[%c0_101, %c0_102] : memref<1x256xf32, #tpu.memory_space<vmem>>, vector<1x256xf32>
    %62 = vector.shape_cast %61 : vector<1x256xf32> to vector<256xf32>
    %63 = vector.shape_cast %62 : vector<256xf32> to vector<1x1x256xf32>
    %64 = vector.broadcast %63 : vector<1x1x256xf32> to vector<4x4x256xf32>
    %65 = arith.addf %60, %64 : vector<4x4x256xf32>
    %cst_103 = arith.constant 0.000000e+00 : f32
    %66 = vector.broadcast %cst_103 : f32 to vector<4x4x256xf32>
    %67 = arith.maximumf %65, %66 : vector<4x4x256xf32>
    %c0_104 = arith.constant 0 : index
    %c0_105 = arith.constant 0 : index
    %c0_106 = arith.constant 0 : index
    %c0_107 = arith.constant 0 : index
    %68 = vector.load %arg6[%c0_104, %c0_105, %c0_106, %c0_107] : memref<1x4x4x256xf32, #tpu.memory_space<vmem>>, vector<1x4x4x256xf32>
    %69 = vector.shape_cast %68 : vector<1x4x4x256xf32> to vector<4x4x256xf32>
    %70 = vector.shape_cast %67 : vector<4x4x256xf32> to vector<1x4x4x256xf32>
    tpu.vector_store %arg6[%c0_104, %c0_105, %c0_106, %c0_107], %70 {strides = array<i32>} : memref<1x4x4x256xf32, #tpu.memory_space<vmem>>, vector<1x4x4x256xf32>,
    return
  }
  func.func @transform_0(%arg0: i32) -> (i32, i32, i32, i32) {
    %c0_i32 = arith.constant 0 : i32
    %c0_i32_0 = arith.constant 0 : i32
    %c0_i32_1 = arith.constant 0 : i32
    %c0_i32_2 = arith.constant 0 : i32
    return %arg0, %c0_i32, %c0_i32_0, %c0_i32_1 : i32, i32, i32, i32
  }
  func.func @transform_1(%arg0: i32) -> (i32, i32) {
    %c0_i32 = arith.constant 0 : i32
    %c0_i32_0 = arith.constant 0 : i32
    %c0_i32_1 = arith.constant 0 : i32
    return %c0_i32, %c0_i32_0 : i32, i32
  }
  func.func @transform_2(%arg0: i32) -> (i32, i32) {
    %c0_i32 = arith.constant 0 : i32
    %c0_i32_0 = arith.constant 0 : i32
    %c0_i32_1 = arith.constant 0 : i32
    return %c0_i32, %c0_i32_0 : i32, i32
  }
  func.func @transform_3(%arg0: i32) -> (i32, i32) {
    %c0_i32 = arith.constant 0 : i32
    %c0_i32_0 = arith.constant 0 : i32
    %c0_i32_1 = arith.constant 0 : i32
    return %c0_i32, %c0_i32_0 : i32, i32
  }
  func.func @transform_4(%arg0: i32) -> (i32, i32) {
    %c0_i32 = arith.constant 0 : i32
    %c0_i32_0 = arith.constant 0 : i32
    %c0_i32_1 = arith.constant 0 : i32
    return %c0_i32, %c0_i32_0 : i32, i32
  }
  func.func @transform_5(%arg0: i32) -> (i32, i32, i32, i32) {
    %c0_i32 = arith.constant 0 : i32
    %c0_i32_0 = arith.constant 0 : i32
    %c0_i32_1 = arith.constant 0 : i32
    %c0_i32_2 = arith.constant 0 : i32
    return %arg0, %c0_i32, %c0_i32_0, %c0_i32_1 : i32, i32, i32, i32
  }
}

</mosaic_0001>

<bundles_post_ra>
// kernel: lte_forward.3
= control target key start
LH: loop header
LB: loop body
LE: loop exit
PB: predicated region body
PF: predicated region fallthrough
CT: control target
= control target key end

     0   :  { %s3839_s18 = smov 0   ;;  %s5512_s0 = inlined_call_operand.vmem [shape: f32[2,16,16,3], index: 0, kind: input, shape index: {}]   ;;  %s5513_s1 = inlined_call_operand.vmem [shape: bf16[27,64], index: 1, kind: input, shape index: {}]   ;;  %s5514_s2 = inlined_call_operand.vmem [shape: f32[1,64], index: 2, kind: input, shape index: {}]   ;;  %s5515_s3 = inlined_call_operand.vmem [shape: f32[1,3], index: 3, kind: input, shape index: {}]   ;;  %s5516_s4 = inlined_call_operand.vmem [shape: f32[1,3], index: 4, kind: input, shape index: {}]   ;;  %s5517_s5 = inlined_call_operand.vmem [shape: f32[2,16,16,64], index: 5, kind: output, shape index: {}]  }
   0x1 LB: > { %s3328_s19 = sadd.s32 4294967295, %s3797_s18   ;;  %p3332_p0 = scmp.ge.s32.totalorder %s3797_s18, 1  ;;  %s3797_s18 = sphi %s3839_s18, %s15_s18  }
   0x2   : > { %p187_p1 = scmp.lt.s32.totalorder %s3797_s18, 3 }
   0x4   : > { %p188_p2 = pnand %p3332_p0, %p187_p1 }
   0x6   : > { %191 = sbr.rel (%p188_p2) target bundleno = 634 (0x27a), region = 40 }
   0xb   : > { %vm336_vm0 = vcmask 19456   ;;  %vm344_vm1 = vcmask 16384   ;;  %vm345_vm2 = vsmask.f32 256  ;;  %v3799_v0 = vmov 0   ;;  %p215_p3 = scmp.lt.s32.totalorder %s3328_s19, 1 }
   0xc   : > { %337 = vst.msk [vmem:[#allocation2] sm:$0xf] %vm336_vm0, %v3799_v0  ;;  %338 = vst.msk [vmem:[#allocation2 + $0x4] sm:$0xf] %vm336_vm0, %v3799_v0  ;;  %vm401_vm4 = vsmask.f32 7938 }
   0xd   : > { %339 = vst.msk [vmem:[#allocation2 + $0x8] sm:$0xf] %vm336_vm0, %v3799_v0  ;;  %vm3852_vm3 = vmand %vm344_vm1, %vm345_vm2  ;;  %v374_v2 = vld [vmem:[#allocation2 + $0x6c] sm:$0x1]  ;;  %s5549_s19 = smov (!%p215_p3, %s3328_s19), 1  ;;  %vm1584_vm7 = vcmask 1046528  }
   0xe   : > { %341 = vst.msk [vmem:[#allocation2 + $0xcc] sm:$0xf] %vm336_vm0, %v3799_v0  ;;  %342 = vst.msk [vmem:[#allocation2 + $0xd0] sm:$0xf] %vm336_vm0, %v3799_v0  ;;  %v350_v3 = vld [vmem:[#allocation2 + $0xc] sm:$0x1] }
   0xf   : > { %343 = vst.msk [vmem:[#allocation2 + $0xd4] sm:$0xf] %vm336_vm0, %v3799_v0  ;;  %v375_v4 = vsel %vm3852_vm3, 0, %v374_v2  ;;  %v351_v5 = vsel %vm3852_vm3, 0, %v350_v3  ;;  %v377_v6 = vld [vmem:[#allocation2 + $0x78] sm:$0x1]  ;;  %vm3874_vm5 = vmand %vm344_vm1, %vm401_vm4 }
  0x10   : > { %v3868_v7 = vld [vmem:[%s5515_s3] ss:$0 sm:$0xff]  ;;  %376 = vst [vmem:[#allocation2 + $0x6c] sm:$0x1] %v375_v4  ;;  %352 = vst [vmem:[#allocation2 + $0xc] sm:$0x1] %v351_v5 }
  0x11   : > { %v378_v8 = vsel %vm3852_vm3, 0, %v377_v6  ;;  %v353_v9 = vld [vmem:[#allocation2 + $0x18] sm:$0x1]  ;;  %v371_v10 = vld [vmem:[#allocation2 + $0x60] sm:$0x1]  ;;  %s3536_s22 = sshll.u32 %s5549_s19, 8  ;;  %vm3939_vm9 = vmand %vm336_vm0, %vm401_vm4 }
  0x12   : > { %379 = vst [vmem:[#allocation2 + $0x78] sm:$0x1] %v378_v8  ;;  %v354_v12 = vsel %vm3852_vm3, 0, %v353_v9  ;;  %v372_v13 = vsel %vm3852_vm3, 0, %v371_v10  ;;  %v427_v14 = vld [vmem:[#allocation2 + $0x68] sm:$0x1]  ;;  %s3888_s25 = scalar_lea.vmem %s5512_s0, %s3536_s22 }
  0x13   : > { %v3893_v15 = vld [vmem:[%s5516_s4] ss:$0 sm:$0xff]  ;;  %355 = vst [vmem:[#allocation2 + $0x18] sm:$0x1] %v354_v12  ;;  %373 = vst [vmem:[#allocation2 + $0x60] sm:$0x1] %v372_v13 }
  0x14   : > { %v428_v16 = vsel %vm3874_vm5, 0, %v427_v14  ;;  %v406_v17 = vld [vmem:[#allocation2 + $0x14] sm:$0x1]  ;;  %v403_v19 = vld [vmem:[#allocation2 + $0x8] sm:$0x1]  ;;  %v242_v25 = vld [vmem:[%s3888_s25 + $0x80] sm:$0xff] }
  0x15   : > { %v430_v18 = vld [vmem:[#allocation2 + $0x74] sm:$0x1]  ;;  %v991_v20 = vld [vmem:[#allocation2 + $0x4] sm:$0xf]  ;;  %v1038_v21 = vld [vmem:[#allocation2] sm:$0xe]  ;;  %v281_v29 = vmul.f32 %v3868_v7, %v242_v25 }
  0x16   : > { %vm553_vm6 = vsmask.f32 4368  ;;  %429 = vst [vmem:[#allocation2 + $0x68] sm:$0x1] %v428_v16  ;;  %v404_v22 = vsel %vm3874_vm5, 0, %v403_v19  ;;  %v3403_v23 = vcombine.low %v1038_v21, %v991_v20  ;;  %v243_v26 = vld [vmem:[%s3888_s25 + $0x88] sm:$0xff] }
  0x17   : > { %v347_v24 = vld [vmem:[#allocation2] sm:$0x1]  ;;  %v407_v27 = vsel %vm3874_vm5, 0, %v406_v17  ;;  %405 = vst [vmem:[#allocation2 + $0x8] sm:$0x1] %v404_v22  ;;  %v282_v30 = vmul.f32 %v3868_v7, %v243_v26  ;;  %v227_v32 = vld [vmem:[%s3888_s25 + $0x8] sm:$0xff]  ;;  %v320_v42 = vadd.f32 %v3893_v15, %v281_v29  ;;  %vm3947_vm10 = vmor %vm345_vm2, %vm553_vm6 }
  0x18   : > { %v348_v28 = vsel %vm3852_vm3, 0, %v347_v24  ;;  %v226_v31 = vld [vmem:[%s3888_s25] sm:$0xff]  ;;  %v244_v33 = vld [vmem:[%s3888_s25 + $0x90] sm:$0xff]  ;;  %408 = vst [vmem:[#allocation2 + $0x14] sm:$0x1] %v407_v27  ;;  %v431_v34 = vsel %vm3874_vm5, 0, %v430_v18  ;;  %v266_v37 = vmul.f32 %v3868_v7, %v227_v32 }
  0x19   : > { %v1585_v35 = vrot.slane %v3403_v23, 1  ;;  %349 = vst [vmem:[#allocation2] sm:$0x1] %v348_v28  ;;  %v265_v36 = vmul.f32 %v3868_v7, %v226_v31  ;;  %v245_v38 = vld [vmem:[%s3888_s25 + $0x98] sm:$0xff]  ;;  %v283_v39 = vmul.f32 %v3868_v7, %v244_v33  ;;  %v228_v40 = vld [vmem:[%s3888_s25 + $0x10] sm:$0xff]  ;;  %v321_v43 = vadd.f32 %v3893_v15, %v282_v30  ;;  %s3800_s28 = smov 6  }
  0x1a   : > { %v229_v41 = vld [vmem:[%s3888_s25 + $0x18] sm:$0xff]  ;;  %432 = vst [vmem:[#allocation2 + $0x74] sm:$0x1] %v431_v34  ;;  %v284_v44 = vmul.f32 %v3868_v7, %v245_v38  ;;  %v267_v45 = vmul.f32 %v3868_v7, %v228_v40  ;;  %v305_v47 = vadd.f32 %v3893_v15, %v266_v37  ;;  %v3554_v50 = vpack.c.bf16 %v320_v42, %v320_v42  ;;  %v934_v17 = vld [vmem:[#allocation2 + $0x6c] sm:$0xf]  ;;  %s3801_s29 = smov 3  }
  0x1b   : > { %v304_v46 = vadd.f32 %v3893_v15, %v265_v36  ;;  %v322_v48 = vadd.f32 %v3893_v15, %v283_v39  ;;  %v268_v49 = vmul.f32 %v3868_v7, %v229_v41  ;;  %v3555_v51 = vpack.c.bf16 %v321_v43, %v321_v43  ;;  %v878_v27 = vld [vmem:[#allocation2 + $0xc] sm:$0xf]  ;;  %s3802_s30 = smov 9   ;;  %s3803_s6 = smov 15  }
  0x1c   : > { %v323_v52 = vadd.f32 %v3893_v15, %v284_v44  ;;  %v306_v53 = vadd.f32 %v3893_v15, %v267_v45  ;;  %v3539_v55 = vpack.c.bf16 %v305_v47, %v305_v47  ;;  %vm1311_vm8 = vsmask.f32 7424  ;;  %v941_v44 = vld [vmem:[#allocation2 + $0x78] sm:$0xf]  ;;  %s3804_s7 = smov 12   ;;  %s3805_s8 = smov 18  }
  0x1d   : > { %v3538_v54 = vpack.c.bf16 %v304_v46, %v304_v46  ;;  %v3928_v56 = vpack.c.bf16 %v322_v48, %v322_v48  ;;  %v307_v57 = vadd.f32 %v3893_v15, %v268_v49  ;;  %v692_v58 = vshrl.u32 %v3554_v50, 16  ;;  %v240_v49 = vld [vmem:[%s3888_s25 + $0x70] sm:$0xff]  ;;  %s3806_s9 = smov 21   ;;  %s3807_s10 = smov 24  }
  0x1e   : > { %v695_v59 = vshll.u32 %v3554_v50, 16  ;;  %v700_v60 = vshrl.u32 %v3555_v51, 16  ;;  %v703_v61 = vshll.u32 %v3555_v51, 16  ;;  %v3646_v62 = vld [vmem:[#allocation2 + $0x8] ss:$0 sps:$4 sm:$0x11]   ;;  %v3557_v0 = vpack.c.bf16 %v323_v52, %v323_v52 }
  0x1f   : > { %v556_v63 = vshrl.u32 %v3538_v54, 16  ;;  %v3931_v2 = vpack.c.bf16 %v306_v53, %v306_v53  ;;  %v3933_v3 = vpack.c.bf16 %v307_v57, %v307_v57  ;;  %v694_v5 = vrot.slane %v692_v58, 7  ;;  %v241_v50 = vld [vmem:[%s3888_s25 + $0x78] sm:$0xff] }
  0x20   : > { %v990_v4 = vld [vmem:[#allocation2] sm:$0xf]  ;;  %v3935_v6 = vrot.slane %v700_v60, 7  ;;  %v559_v9 = vshll.u32 %v3538_v54, 16  ;;  %v564_v10 = vshrl.u32 %v3539_v55, 16  ;;  %v1586_v12 = vrot.slane %v3646_v62, 1 }
  0x21   : > { %v3943_v13 = vcombine.low %v990_v4, %v991_v20  ;;  %v1320_v14 = vshll.u32 %v3646_v62, 16  ;;  %v558_v18 = vrot.slane %v556_v63, 7  ;;  %v697_v19 = vor.u32 %v695_v59, %v694_v5  ;;  %v885_v62 = vld [vmem:[#allocation2 + $0x18] sm:$0xf] }
  0x22   : > { %v698_v21 = vrot.slane %v694_v5, 4  ;;  %v705_v22 = vor.u32 %v703_v61, %v3935_v6  ;;  %v707_v23 = vrot.slane %v3935_v6, 4  ;;  %v1587_v24 = vsel %vm1584_vm7, %v1585_v35, %v1586_v12 }
  0x23   : > { %v1313_v20 = vshrl.u32 %v3943_v13, 16  ;;  %v1315_v25 = vshll.u32 %v3943_v13, 16  ;;  %v1322_v26 = vrot.slane %v1320_v14, 1  ;;  %1633 = vrot.lane.b32.xlu0 %v1587_v24, %s3800_s28  ;;  %v935_v29 = vsel %vm3939_vm9, %v697_v19, %v934_v17  ;;  %v409_v17 = vld [vmem:[#allocation2 + $0x20] sm:$0x1] }
  0x24   : > { %v706_v28 = vsel %vm3947_vm10, %v698_v21, %v705_v22  ;;  %v561_v30 = vor.u32 %v559_v9, %v558_v18  ;;  %v562_v31 = vrot.slane %v558_v18, 4  ;;  %936 = vst [vmem:[#allocation2 + $0x6c] sm:$0xf] %v935_v29  ;;  %v566_v33 = vrot.slane %v564_v10, 7  ;;  %v433_v18 = vld [vmem:[#allocation2 + $0x80] sm:$0x1] }
  0x25   : > { %v1317_v32 = vrot.slane %v1315_v25, 1  ;;  %937 = vst.msk [vmem:[#allocation2 + $0x70] sm:$0xf] %vm336_vm0, %v706_v28  ;;  %v567_v34 = vshll.u32 %v3539_v55, 16  ;;  %v709_v35 = vshrl.u32 %v3928_v56, 16  ;;  %v712_v37 = vshll.u32 %v3928_v56, 16 }
  0x26   : > { %v879_v36 = vsel %vm3939_vm9, %v561_v30, %v878_v27  ;;  %v717_v38 = vshrl.u32 %v3557_v0, 16  ;;  %v720_v39 = vshll.u32 %v3557_v0, 16  ;;  %v571_v42 = vrot.slane %v566_v33, 4  ;;  %v882_v55 = vld [vmem:[#allocation2 + $0x14] sm:$0x1] }
  0x27   : > { %v1318_v40 = vor.u32 %v1317_v32, %v1313_v20  ;;  %v569_v41 = vor.u32 %v567_v34, %v566_v33  ;;  %880 = vst [vmem:[#allocation2 + $0xc] sm:$0xf] %v879_v36  ;;  %v711_v43 = vrot.slane %v709_v35, 7  ;;  %v573_v46 = vshrl.u32 %v3931_v2, 16  ;;  %v938_v56 = vld [vmem:[#allocation2 + $0x74] sm:$0x1] }
  0x28   : > { %v3966_v45 = vrot.slane %v717_v38, 7  ;;  %v576_v47 = vshll.u32 %v3931_v2, 16  ;;  %v581_v48 = vshrl.u32 %v3933_v3, 16  ;;  %v584_v61 = vshll.u32 %v3933_v3, 16 }
  0x29   : > { %v1323_v51 = vsel %vm1311_vm8, %v1318_v40, %v1322_v26  ;;  %v570_v52 = vsel %vm3947_vm10, %v562_v31, %v569_v41  ;;  %v714_v53 = vor.u32 %v712_v37, %v711_v43  ;;  %v715_v54 = vrot.slane %v711_v43, 4  ;;  %v927_v40 = vld [vmem:[#allocation2 + $0x60] sm:$0xf] }
  0x2a   : > { %1504 = vrot.lane.b32.xlu0 %v1323_v51, %s3801_s29  ;;  %881 = vst.msk [vmem:[#allocation2 + $0x10] sm:$0xf] %vm336_vm0, %v570_v52  ;;  %v722_v57 = vor.u32 %v720_v39, %v3966_v45  ;;  %v575_v58 = vrot.slane %v573_v46, 7  ;;  %v3979_v59 = vrot.slane %v581_v48, 7  ;;  %v279_v63 = vmul.f32 %v3868_v7, %v240_v49  ;;  %v230_v49 = vld [vmem:[%s3888_s25 + $0x20] sm:$0xff] }
  0x2b   : > { %v942_v60 = vsel %vm3939_vm9, %v714_v53, %v941_v44  ;;  %v280_v0 = vmul.f32 %v3868_v7, %v241_v50  ;;  %v1070_v2 = vld [vmem:[#allocation2 + $0x6c] sm:$0xf]  ;;  %v883_v9 = vsel %vm3852_vm3, %v571_v42, %v882_v55  ;;  %v939_v10 = vsel %vm3852_vm3, %v707_v23, %v938_v56 }
  0x2c   : > { %v3986_v4 = vld [vmem:[#allocation2 + $0x70] sm:$0xf]  ;;  %v723_v5 = vsel %vm3947_vm10, %v715_v54, %v722_v57  ;;  %943 = vst [vmem:[#allocation2 + $0x78] sm:$0xf] %v942_v60  ;;  %v578_v6 = vor.u32 %v576_v47, %v575_v58  ;;  %v579_v12 = vrot.slane %v575_v58, 4  ;;  %v586_v14 = vor.u32 %v584_v61, %v3979_v59  ;;  %v231_v55 = vld [vmem:[%s3888_s25 + $0x28] sm:$0xff] }
  0x2d   : > { %v3995_v3 = vcombine.low %v1070_v2, %v3986_v4  ;;  %944 = vst.msk [vmem:[#allocation2 + $0x7c] sm:$0xf] %vm336_vm0, %v723_v5  ;;  %884 = vst [vmem:[#allocation2 + $0x14] sm:$0x1] %v883_v9  ;;  %v318_v21 = vadd.f32 %v3893_v15, %v279_v63  ;;  %v319_v22 = vadd.f32 %v3893_v15, %v280_v0  ;;  %v410_v27 = vsel %vm3874_vm5, 0, %v409_v17 }
  0x2e   : > { %940 = vst [vmem:[#allocation2 + $0x74] sm:$0x1] %v939_v10  ;;  %v886_v19 = vsel %vm3939_vm9, %v578_v6, %v885_v62  ;;  %v1054_v23 = vld [vmem:[#allocation2 + $0xc] sm:$0xf]  ;;  %v587_v24 = vsel %vm3947_vm10, %v579_v12, %v586_v14  ;;  %v434_v28 = vsel %vm3874_vm5, 0, %v433_v18  ;;  %v724_v30 = vrot.slane %v3966_v45, 4 }
  0x2f   : > { %1761 = vrot.lane.b32.xlu1 %v3995_v3, %s3802_s30  ;;  %887 = vst [vmem:[#allocation2 + $0x18] sm:$0xf] %v886_v19  ;;  %888 = vst.msk [vmem:[#allocation2 + $0x1c] sm:$0xf] %vm336_vm0, %v587_v24  ;;  %v3552_v20 = vpack.c.bf16 %v318_v21, %v318_v21  ;;  %v3553_v25 = vpack.c.bf16 %v319_v22, %v319_v22  ;;  %v1039_v26 = vld [vmem:[#allocation2 + $0xc] sm:$0xe]  ;;  %v269_v21 = vmul.f32 %v3868_v7, %v230_v49 }
  0x30   : > { %411 = vst [vmem:[#allocation2 + $0x20] sm:$0x1] %v410_v27  ;;  %435 = vst [vmem:[#allocation2 + $0x80] sm:$0x1] %v434_v28  ;;  %v1110_v35 = vld [vmem:[#allocation2 + $0x6c] sm:$0xe] }
  0x31   : > { %v1055_v29 = vld [vmem:[#allocation2 + $0x10] sm:$0xf]  ;;  %v675_v33 = vshrl.u32 %v3552_v20, 16  ;;  %v678_v34 = vshll.u32 %v3552_v20, 16  ;;  %v1102_v36 = vld [vmem:[#allocation2 + $0xc] sm:$0xe]  ;;  %v3459_v6 = vcombine.low %v1110_v35, %v3986_v4  ;;  %v270_v20 = vmul.f32 %v3868_v7, %v231_v55 }
  0x32   : > { %v993_v31 = vld [vmem:[#allocation2 + $0x10] sm:$0xf]  ;;  %v4013_v32 = vcombine.low %v1054_v23, %v1055_v29  ;;  %v683_v38 = vshrl.u32 %v3553_v25, 16  ;;  %v686_v39 = vshll.u32 %v3553_v25, 16  ;;  %v1008_v42 = vld [vmem:[#allocation2 + $0x6c] sm:$0xf]  ;;  %v3451_v62 = vcombine.low %v1102_v36, %v1055_v29 }
  0x33   : > { %v1072_v37 = vld [vmem:[#allocation2 + $0x78] sm:$0xf]  ;;  %v3404_v41 = vcombine.low %v1039_v26, %v993_v31  ;;  %v588_v44 = vrot.slane %v3979_v59, 4  ;;  %v677_v46 = vrot.slane %v675_v33, 7  ;;  %v931_v47 = vld [vmem:[#allocation2 + $0x68] sm:$0x1] }
  0x34   : > { %1745 = vrot.lane.b32.xlu0 %v4013_v32, %s3802_s30  ;;  %v1073_v43 = vld [vmem:[#allocation2 + $0x7c] sm:$0xf]  ;;  %v1009_v48 = vld [vmem:[#allocation2 + $0x70] sm:$0xf]  ;;  %v685_v51 = vrot.slane %v683_v38, 7  ;;  %v2097_v27 = vrot.slane %v3451_v62, 1 }
  0x35   : > { %v4019_v50 = vcombine.low %v1072_v37, %v1073_v43  ;;  %v4021_v52 = vld [vmem:[#allocation2 + $0x14] ss:$0 sps:$4 sm:$0x11]   ;;  %v992_v53 = vld [vmem:[#allocation2 + $0xc] sm:$0xf]  ;;  %v680_v58 = vor.u32 %v678_v34, %v677_v46  ;;  %v681_v60 = vrot.slane %v677_v46, 4  ;;  %v4032_v12 = vcombine.low %v1008_v42, %v1009_v48 }
  0x36   : > { %v1047_v54 = vld [vmem:[#allocation2 + $0x6c] sm:$0xe]  ;;  %v1111_v56 = vld [vmem:[#allocation2 + $0x78] sm:$0xe]  ;;  %v1588_v61 = vrot.slane %v3404_v41, 1  ;;  %v688_v0 = vor.u32 %v686_v39, %v685_v51  ;;  %v690_v2 = vrot.slane %v685_v51, 4  ;;  %v4044_v23 = vcombine.low %v992_v53, %v993_v31 }
  0x37   : > { %v1056_v57 = vld [vmem:[#allocation2 + $0x18] sm:$0xf]  ;;  %1763 = vrot.lane.b32.xlu1 %v4019_v50, %s3802_s30  ;;  %v1057_v59 = vld [vmem:[#allocation2 + $0x1c] sm:$0xf]  ;;  %v1589_v5 = vrot.slane %v4021_v52, 1  ;;  %v928_v10 = vsel %vm3939_vm9, %v680_v58, %v927_v40  ;;  %v3412_v18 = vcombine.low %v1047_v54, %v1009_v48  ;;  %v3460_v4 = vcombine.low %v1111_v56, %v1073_v43 }
  0x38   : > { %v1103_v63 = vld [vmem:[#allocation2 + $0x18] sm:$0xe]  ;;  %v4028_v9 = vcombine.low %v1056_v57, %v1057_v59  ;;  %v689_v14 = vsel %vm3947_vm10, %v681_v60, %v688_v0  ;;  %929 = vst [vmem:[#allocation2 + $0x60] sm:$0xf] %v928_v10  ;;  %v932_v17 = vsel %vm3852_vm3, %v690_v2, %v931_v47  ;;  %v889_v24 = vld [vmem:[#allocation2 + $0x20] sm:$0x1]  ;;  %v308_v41 = vadd.f32 %v3893_v15, %v269_v21 }
  0x39   : > { %v4038_v19 = vld [vmem:[#allocation2 + $0x14] ss:$0 sps:$4 sm:$0x11]   ;;  %v3452_v22 = vcombine.low %v1103_v63, %v1057_v59  ;;  %930 = vst.msk [vmem:[#allocation2 + $0x64] sm:$0xf] %vm336_vm0, %v689_v14  ;;  %v1590_v25 = vsel %vm1584_vm7, %v1588_v61, %v1589_v5  ;;  %v890_v29 = vsel %vm3852_vm3, %v588_v44, %v889_v24  ;;  %v1924_v33 = vshll.u32 %v3995_v3, 16 }
  0x3a   : > { %1747 = vrot.lane.b32.xlu0 %v4028_v9, %s3802_s30  ;;  %933 = vst [vmem:[#allocation2 + $0x68] sm:$0x1] %v932_v17  ;;  %v4048_v26 = vld [vmem:[#allocation2 + $0x74] ss:$0 sps:$4 sm:$0x11]   ;;  %v2098_v28 = vrot.slane %v4038_v19, 1  ;;  %v309_v46 = vadd.f32 %v3893_v15, %v270_v20  ;;  %v4081_v2 = vpack.c.bf16 %v308_v41, %v308_v41 }
  0x3b   : > { %v2121_v34 = vrot.slane %v3459_v6, 1  ;;  %891 = vst [vmem:[#allocation2 + $0x20] sm:$0x1] %v890_v29  ;;  %v945_v35 = vld [vmem:[#allocation2 + $0x80] sm:$0x1]  ;;  %v1421_v31 = vshrl.u32 %v4032_v12, 16 }
  0x3c   : > { %v1423_v36 = vshll.u32 %v4032_v12, 16  ;;  %v1828_v37 = vshll.u32 %v4013_v32, 16  ;;  %v1612_v38 = vrot.slane %v3412_v18, 1  ;;  %v4057_v39 = vld [vmem:[#allocation2 + $0x74] ss:$0 sps:$4 sm:$0x11]   ;;  %v946_v40 = vsel %vm3852_vm3, %v724_v30, %v945_v35 }
  0x3d   : > { %v1936_v42 = vshll.u32 %v4019_v50, 16  ;;  %947 = vst [vmem:[#allocation2 + $0x80] sm:$0x1] %v946_v40  ;;  %v4066_v43 = vrot.slane %v3460_v4, 1  ;;  %v1327_v44 = vshll.u32 %v4044_v23, 16  ;;  %v1840_v47 = vshll.u32 %v4028_v9, 16 }
  0x3e   : > { %1635 = vrot.lane.b32.xlu0 %v1590_v25, %s3800_s28  ;;  %v1613_v45 = vrot.slane %v4048_v26, 1  ;;  %v2099_v48 = vsel %vm1584_vm7, %v2097_v27, %v2098_v28  ;;  %v2100_v30 = vrot.slane %v3452_v22, 1  ;;  %v1325_v53 = vshrl.u32 %v4044_v23, 16  ;;  %v356_v20 = vld [vmem:[#allocation2 + $0x24] sm:$0x1] }
  0x3f   : > { %v1046_v49 = vld [vmem:[#allocation2 + $0x60] sm:$0xe]  ;;  %v1332_v54 = vshll.u32 %v4021_v52, 16  ;;  %v2122_v56 = vrot.slane %v4057_v39, 1  ;;  %v1826_v57 = vshrl.u32 %v4013_v32, 16  ;;  %v1329_v62 = vrot.slane %v1327_v44, 1 }
  0x40   : > { %v1006_v51 = vld [vmem:[#allocation2 + $0x60] sm:$0xf]  ;;  %v1007_v55 = vld [vmem:[#allocation2 + $0x64] sm:$0xf]  ;;  %v1830_v59 = vrot.slane %v1828_v37, 1  ;;  %v1833_v0 = vshll.u32 %v4038_v19, 16  ;;  %v4083_v52 = vpack.c.bf16 %v309_v46, %v309_v46  ;;  %v1614_v14 = vsel %vm1584_vm7, %v1612_v38, %v1613_v45 }
  0x41   : > { %v3656_v58 = vld [vmem:[#allocation2 + $0x68] ss:$0 sps:$4 sm:$0x11]   ;;  %v3411_v60 = vcombine.low %v1046_v49, %v1007_v55  ;;  %v4077_v61 = vcombine.low %v1006_v51, %v1007_v55  ;;  %v1425_v18 = vrot.slane %v1423_v36, 1  ;;  %v1428_v21 = vshll.u32 %v4048_v26, 16  ;;  %v246_v25 = vld [vmem:[%s3888_s25 + $0xa0] sm:$0xff] }
  0x42   : > { %2145 = vrot.lane.b32.xlu0 %v2099_v48, %s3803_s6  ;;  %v3667_v63 = vld [vmem:[#allocation2 + $0x20] ss:$0 sps:$4 sm:$0x11]   ;;  %v1610_v6 = vrot.slane %v3656_v58, 1  ;;  %v1416_v22 = vshll.u32 %v3656_v58, 16  ;;  %v1334_v24 = vrot.slane %v1332_v54, 1  ;;  %v2123_v27 = vsel %vm1584_vm7, %v2121_v34, %v2122_v56 }
  0x43   : > { %v1609_v5 = vrot.slane %v3411_v60, 1  ;;  %v1409_v32 = vshrl.u32 %v4077_v61, 16  ;;  %v1411_v10 = vshll.u32 %v4077_v61, 16  ;;  %v2101_v17 = vrot.slane %v3667_v63, 1  ;;  %v1119_v37 = vld [vmem:[#allocation2 + $0x18] sm:$0xf] }
  0x44   : > { %v1330_v29 = vor.u32 %v1329_v62, %v1325_v53  ;;  %v1831_v35 = vor.u32 %v1830_v59, %v1826_v57  ;;  %v4094_v38 = vld [vmem:[#allocation2 + $0x1c] sm:$0xf]  ;;  %v4097_v26 = vld [vmem:[#allocation2 + $0x80] ss:$0 sps:$4 sm:$0x11]   ;;  %v1418_v40 = vrot.slane %v1416_v22, 1  ;;  %v4100_v46 = vor.u32 %v1425_v18, %v1421_v31 }
  0x45   : > { %v1611_v4 = vsel %vm1584_vm7, %v1609_v5, %v1610_v6  ;;  %v1413_v19 = vrot.slane %v1411_v10, 1  ;;  %v2102_v28 = vsel %vm1584_vm7, %v2100_v30, %v2101_v17  ;;  %v1835_v41 = vrot.slane %v1833_v0, 1  ;;  %v380_v56 = vld [vmem:[#allocation2 + $0x84] sm:$0x1]  ;;  %v412_v59 = vld [vmem:[#allocation2 + $0x2c] sm:$0x1] }
  0x46   : > { %1649 = vrot.lane.b32.xlu1 %v1611_v4, %s3800_s28  ;;  %2147 = vrot.lane.b32.xlu0 %v2102_v28, %s3803_s6  ;;  %v1838_v44 = vshrl.u32 %v4028_v9, 16  ;;  %v4102_v34 = vrot.slane %v1428_v21, 1  ;;  %v1842_v45 = vrot.slane %v1840_v47, 1  ;;  %v1845_v48 = vshll.u32 %v3667_v63, 16  ;;  %v247_v47 = vld [vmem:[%s3888_s25 + $0xa8] sm:$0xff] }
  0x47   : > { %v1414_v36 = vor.u32 %v1413_v19, %v1409_v32  ;;  %v1922_v49 = vshrl.u32 %v3995_v3, 16  ;;  %v357_v51 = vsel %vm3852_vm3, 0, %v356_v20  ;;  %v590_v53 = vshrl.u32 %v4081_v2, 16  ;;  %v1135_v6 = vld [vmem:[#allocation2 + $0x78] sm:$0xf] }
  0x48   : > { %v4111_v54 = vsel %vm1311_vm8, %v1330_v29, %v1334_v24  ;;  %v4114_v9 = vcombine.low %v1119_v37, %v4094_v38  ;;  %358 = vst [vmem:[#allocation2 + $0x24] sm:$0x1] %v357_v51  ;;  %v593_v31 = vshll.u32 %v4081_v2, 16  ;;  %v285_v55 = vmul.f32 %v3868_v7, %v246_v25  ;;  %v4128_v32 = vld [vmem:[#allocation2 + $0x7c] sm:$0xf] }
  0x49   : > { %v1419_v30 = vsel %vm1311_vm8, %v1414_v36, %v1418_v40  ;;  %v2125_v57 = vrot.slane %v4097_v26, 1  ;;  %v592_v58 = vrot.slane %v590_v53, 7  ;;  %v598_v60 = vshrl.u32 %v4083_v52, 16  ;;  %v4151_v28 = vld [vmem:[#allocation2 + $0x20] ss:$0 sps:$4 sm:$0x11]  }
  0x4a   : > { %1651 = vrot.lane.b32.xlu1 %v1614_v14, %s3800_s28  ;;  %1520 = vrot.lane.b32.xlu0 %v1419_v30, %s3801_s29  ;;  %v601_v62 = vshll.u32 %v4083_v52, 16  ;;  %v1836_v63 = vsel %vm1311_vm8, %v1831_v35, %v1835_v41  ;;  %v1843_v0 = vor.u32 %v1842_v45, %v1838_v44  ;;  %v1847_v5 = vrot.slane %v1845_v48, 1  ;;  %v436_v41 = vld [vmem:[#allocation2 + $0x8c] sm:$0x1] }
  0x4b   : > { %v4126_v2 = vrot.slane %v1924_v33, 1  ;;  %v1929_v10 = vshll.u32 %v4057_v39, 16  ;;  %v596_v14 = vrot.slane %v592_v58, 4  ;;  %v4131_v17 = vrot.slane %v598_v60, 7  ;;  %v4170_v60 = vld [vmem:[#allocation2 + $0x1c] sm:$0xf] }
  0x4c   : > { %v286_v18 = vmul.f32 %v3868_v7, %v247_v47  ;;  %v2340_v52 = vshll.u32 %v4114_v9, 16  ;;  %v595_v21 = vor.u32 %v593_v31, %v592_v58  ;;  %v324_v4 = vadd.f32 %v3893_v15, %v285_v55  ;;  %v1167_v31 = vld [vmem:[#allocation2 + $0x18] sm:$0xe] }
  0x4d   : > { %v381_v33 = vsel %vm3852_vm3, 0, %v380_v56  ;;  %v2126_v19 = vsel %vm1584_vm7, %v4066_v43, %v2125_v57  ;;  %v603_v39 = vor.u32 %v601_v62, %v4131_v17  ;;  %v413_v24 = vsel %vm3874_vm5, 0, %v412_v59  ;;  %v4166_v56 = vld [vmem:[#allocation2 + $0x80] ss:$0 sps:$4 sm:$0x11]  }
  0x4e   : > { %2161 = vrot.lane.b32.xlu1 %v2123_v27, %s3803_s6  ;;  %2017 = vrot.lane.b32.xlu0 %v1836_v63, %s3804_s7  ;;  %v325_v22 = vadd.f32 %v3893_v15, %v286_v18  ;;  %382 = vst [vmem:[#allocation2 + $0x84] sm:$0x1] %v381_v33  ;;  %v1848_v20 = vsel %vm1311_vm8, %v1843_v0, %v1847_v5  ;;  %v1934_v25 = vshrl.u32 %v4019_v50, 16  ;;  %414 = vst [vmem:[#allocation2 + $0x2c] sm:$0x1] %v413_v24  ;;  %vm3001_vm11 = vcmask 1044480  }
  0x4f   : > { %v4149_v27 = vcombine.low %v1135_v6, %v4128_v32  ;;  %v3558_v43 = vpack.c.bf16 %v324_v4, %v324_v4  ;;  %v1931_v29 = vrot.slane %v1929_v10, 1  ;;  %v1938_v35 = vrot.slane %v1936_v42, 1  ;;  %v892_v36 = vld [vmem:[#allocation2 + $0x24] sm:$0xf]  ;;  %v994_v58 = vld [vmem:[#allocation2 + $0x18] sm:$0xf] }
  0x50   : > { %v604_v37 = vsel %vm3947_vm10, %v596_v14, %v603_v39  ;;  %v3559_v40 = vpack.c.bf16 %v325_v22, %v325_v22  ;;  %v1941_v44 = vshll.u32 %v4097_v26, 16  ;;  %v893_v45 = vsel %vm3939_vm9, %v595_v21, %v892_v36  ;;  %v1175_v62 = vld [vmem:[#allocation2 + $0x78] sm:$0xe]  ;;  %v4172_v63 = vld [vmem:[#allocation2 + $0x20] ss:$0 sps:$4 sm:$0x11]  }
  0x51   : > { %895 = vst.msk [vmem:[#allocation2 + $0x28] sm:$0xf] %vm336_vm0, %v604_v37  ;;  %v726_v48 = vshrl.u32 %v3558_v43, 16  ;;  %v729_v30 = vshll.u32 %v3558_v43, 16  ;;  %894 = vst [vmem:[#allocation2 + $0x24] sm:$0xf] %v893_v45  ;;  %v1927_v18 = vor.u32 %v4126_v2, %v1922_v49  ;;  %v4197_v2 = vcombine.low %v994_v58, %v4170_v60 }
  0x52   : > { %2163 = vrot.lane.b32.xlu1 %v2126_v19, %s3803_s6  ;;  %2019 = vrot.lane.b32.xlu0 %v1848_v20, %s3804_s7  ;;  %v2338_v50 = vshrl.u32 %v4114_v9, 16  ;;  %v2342_v42 = vrot.slane %v2340_v52, 1  ;;  %v734_v51 = vshrl.u32 %v3559_v40, 16  ;;  %v737_v53 = vshll.u32 %v3559_v40, 16  ;;  %v1010_v4 = vld [vmem:[#allocation2 + $0x78] sm:$0xf] }
  0x53   : > { %v605_v47 = vrot.slane %v4131_v17, 4  ;;  %v2345_v26 = vshll.u32 %v4151_v28, 16  ;;  %v728_v55 = vrot.slane %v726_v48, 7  ;;  %v437_v57 = vsel %vm3874_vm5, 0, %v436_v41  ;;  %v4185_v33 = vld [vmem:[#allocation2 + $0x7c] sm:$0xf] }
  0x54   : > { %v736_v59 = vrot.slane %v734_v51, 7  ;;  %438 = vst [vmem:[#allocation2 + $0x8c] sm:$0x1] %v437_v57  ;;  %v1943_v0 = vrot.slane %v1941_v44, 1  ;;  %v2436_v5 = vshll.u32 %v4149_v27, 16  ;;  %v1431_v17 = vsel %vm1311_vm8, %v4100_v46, %v4102_v34  ;;  %v233_v51 = vld [vmem:[%s3888_s25 + $0x38] sm:$0xff] }
  0x55   : > { %v731_v6 = vor.u32 %v729_v30, %v728_v55  ;;  %v732_v10 = vrot.slane %v728_v55, 4  ;;  %v948_v14 = vld [vmem:[#allocation2 + $0x84] sm:$0xf]  ;;  %v1939_v52 = vor.u32 %v1938_v35, %v1934_v25  ;;  %v896_v21 = vld [vmem:[#allocation2 + $0x2c] sm:$0x1]  ;;  %v2343_v19 = vor.u32 %v2342_v42, %v2338_v50  ;;  %v232_v42 = vld [vmem:[%s3888_s25 + $0x30] sm:$0xff] }
  0x56   : > { %1506 = vrot.lane.b32.xlu1 %v4111_v54, %s3801_s29  ;;  %2257 = vrot.lane.b32.xlu0 %v4114_v9, %s3805_s8  ;;  %v739_v54 = vor.u32 %v737_v53, %v736_v59  ;;  %v2347_v39 = vrot.slane %v2345_v26, 1  ;;  %v897_v3 = vsel %vm3852_vm3, %v605_v47, %v896_v21  ;;  %v3499_v46 = vcombine.low %v1167_v31, %v4094_v38  ;;  %v4216_v50 = vld [vmem:[#allocation2 + $0x80] ss:$0 sps:$4 sm:$0x11]   ;;  %v1040_v55 = vld [vmem:[#allocation2 + $0x18] sm:$0xe] }
  0x57   : > { %v949_v22 = vsel %vm3939_vm9, %v731_v6, %v948_v14  ;;  %v741_v9 = vrot.slane %v736_v59, 4  ;;  %898 = vst [vmem:[#allocation2 + $0x2c] sm:$0x1] %v897_v3  ;;  %v3507_v20 = vcombine.low %v1175_v62, %v4128_v32  ;;  %v2441_v38 = vshll.u32 %v4166_v56, 16 }
  0x58   : > { %v4192_v34 = vld [vmem:[#allocation2 + $0x28] sm:$0xf]  ;;  %v740_v49 = vsel %vm3947_vm10, %v732_v10, %v739_v54  ;;  %950 = vst [vmem:[#allocation2 + $0x84] sm:$0xf] %v949_v22  ;;  %v1121_v24 = vld [vmem:[#allocation2 + $0x24] sm:$0xf]  ;;  %v1932_v25 = vsel %vm1311_vm8, %v1927_v18, %v1931_v29  ;;  %v4207_v37 = vcombine.low %v1010_v4, %v4185_v33  ;;  %v1944_v36 = vsel %vm1311_vm8, %v1939_v52, %v1943_v0 }
  0x59   : > { %951 = vst.msk [vmem:[#allocation2 + $0x88] sm:$0xf] %vm336_vm0, %v740_v49  ;;  %v3468_v43 = vcombine.low %v1121_v24, %v4192_v34  ;;  %v1344_v35 = vshll.u32 %v4172_v63, 16  ;;  %v2348_v40 = vsel %vm1311_vm8, %v2343_v19, %v2347_v39  ;;  %v2434_v32 = vshrl.u32 %v4149_v27, 16  ;;  %v4224_v0 = vld [vmem:[#allocation2 + $0x28] sm:$0xf] }
  0x5a   : > { %1522 = vrot.lane.b32.xlu1 %v1431_v17, %s3801_s29  ;;  %5533 = vst [vmem:[#allocation3_spill] sm:$0xff] %v4207_v37  ;;  %v2438_v41 = vrot.slane %v2436_v5, 1  ;;  %v2609_v29 = vrot.slane %v3499_v46, 1  ;;  %v1339_v30 = vshll.u32 %v4197_v2, 16  ;;  %v2443_v53 = vrot.slane %v2441_v38, 1 }
  0x5b   : > { %v952_v44 = vld [vmem:[#allocation2 + $0x8c] sm:$0x1]  ;;  %v2352_v45 = vshll.u32 %v3468_v43, 16  ;;  %2259 = vrot.lane.b32.xlu0 %v3468_v43, %s3805_s8  ;;  %v2610_v31 = vrot.slane %v4151_v28, 1  ;;  %v1337_v47 = vshrl.u32 %v4197_v2, 16  ;;  %v2633_v26 = vrot.slane %v3507_v20, 1 }
  0x5c   : > { %v953_v48 = vsel %vm3852_vm3, %v741_v9, %v952_v44  ;;  %v2350_v57 = vshrl.u32 %v3468_v43, 16  ;;  %v1346_v62 = vrot.slane %v1344_v35, 1  ;;  %v1435_v59 = vshll.u32 %v4207_v37, 16  ;;  %v996_v6 = vld [vmem:[#allocation2 + $0x24] sm:$0xf] }
  0x5d   : > { %954 = vst [vmem:[#allocation2 + $0x8c] sm:$0x1] %v953_v48  ;;  %v2354_v58 = vrot.slane %v2352_v45, 1  ;;  %v2439_v14 = vor.u32 %v2438_v41, %v2434_v32  ;;  %v1341_v17 = vrot.slane %v1339_v30, 1  ;;  %v1168_v18 = vld [vmem:[#allocation2 + $0x24] sm:$0xe]  ;;  %v3405_v54 = vcombine.low %v1040_v55, %v4170_v60 }
  0x5e   : > { %2033 = vrot.lane.b32.xlu1 %v1932_v25, %s3804_s7  ;;  %v4229_v28 = vld [vmem:[#allocation2 + $0x2c] ss:$0 sps:$4 sm:$0x11]   ;;  %v271_v21 = vmul.f32 %v3868_v7, %v232_v42  ;;  %v272_v4 = vmul.f32 %v3868_v7, %v233_v51  ;;  %v2634_v22 = vrot.slane %v4166_v56, 1  ;;  %v1440_v3 = vshll.u32 %v4216_v50, 16 }
  0x5f   : > { %v1137_v5 = vld [vmem:[#allocation2 + $0x84] sm:$0xf]  ;;  %2529 = vrot.lane.b32.xlu0 %v2348_v40, %s3806_s9  ;;  %v2355_v19 = vor.u32 %v2354_v58, %v2350_v57  ;;  %v2357_v39 = vshll.u32 %v4229_v28, 16  ;;  %v1433_v49 = vshrl.u32 %v4207_v37, 16  ;;  %v1437_v9 = vrot.slane %v1435_v59, 1 }
  0x60   : > { %v4227_v10 = vld [vmem:[#allocation2 + $0x88] sm:$0xf]  ;;  %v4241_v24 = vcombine.low %v996_v6, %v4224_v0  ;;  %v1048_v20 = vld [vmem:[#allocation2 + $0x78] sm:$0xe]  ;;  %v3500_v60 = vcombine.low %v1168_v18, %v4192_v34  ;;  %v2444_v7 = vsel %vm1311_vm8, %v2439_v14, %v2443_v53  ;;  %v1342_v43 = vor.u32 %v1341_v17, %v1337_v47  ;;  %v359_v45 = vld [vmem:[#allocation2 + $0x30] sm:$0x1] }
  0x61   : > { %v3476_v52 = vcombine.low %v1137_v5, %v4227_v10  ;;  %v2359_v38 = vrot.slane %v2357_v39, 1  ;;  %v1591_v56 = vrot.slane %v3405_v54, 1  ;;  %v1592_v35 = vrot.slane %v4172_v63, 1  ;;  %v4257_v42 = vld [vmem:[#allocation2 + $0x24] sm:$0xe] }
  0x62   : > { %2035 = vrot.lane.b32.xlu1 %v1944_v36, %s3804_s7  ;;  %5534 = vst [vmem:[#allocation4_spill] sm:$0xff] %v4241_v24  ;;  %v310_v36 = vadd.f32 %v3893_v15, %v271_v21  ;;  %v311_v40 = vadd.f32 %v3893_v15, %v272_v4  ;;  %v2611_v48 = vsel %vm1584_vm7, %v2609_v29, %v2610_v31  ;;  %v1442_v30 = vrot.slane %v1440_v3, 1  ;;  %v4260_v51 = vld [vmem:[#allocation2 + $0x84] sm:$0xe]  ;;  %v4275_v5 = vld [vmem:[#allocation2 + $0x88] sm:$0xf] }
  0x63   : > { %v2448_v46 = vshll.u32 %v3476_v52, 16  ;;  %v2360_v32 = vsel %vm1311_vm8, %v2355_v19, %v2359_v38  ;;  %v2446_v41 = vshrl.u32 %v3476_v52, 16  ;;  %v3413_v63 = vcombine.low %v1048_v20, %v4185_v33  ;;  %v4266_v57 = vld [vmem:[#allocation2 + $0x2c] ss:$0 sps:$4 sm:$0x11]   ;;  %v248_v21 = vld [vmem:[%s3888_s25 + $0xb0] sm:$0xff] }
  0x64   : > { %v4245_v25 = vld [vmem:[#allocation2 + $0x8c] ss:$0 sps:$4 sm:$0x11]   ;;  %2531 = vrot.lane.b32.xlu0 %v2360_v32, %s3806_s9  ;;  %v1347_v15 = vsel %vm1311_vm8, %v1342_v43, %v1346_v62  ;;  %v4264_v53 = vsel %vm1584_vm7, %v2633_v26, %v2634_v22  ;;  %v2612_v47 = vrot.slane %v3500_v60, 1  ;;  %v1438_v55 = vor.u32 %v1437_v9, %v1433_v49  ;;  %v1012_v33 = vld [vmem:[#allocation2 + $0x84] sm:$0xf] }
  0x65   : > { %v2450_v34 = vrot.slane %v2448_v46, 1  ;;  %v2453_v44 = vshll.u32 %v4245_v25, 16  ;;  %v1349_v29 = vshrl.u32 %v4241_v24, 16  ;;  %v4271_v31 = vsel %vm1584_vm7, %v1591_v56, %v1592_v35  ;;  %v249_v4 = vld [vmem:[%s3888_s25 + $0xb8] sm:$0xff]  ;;  %v383_v46 = vld [vmem:[#allocation2 + $0x90] sm:$0x1] }
  0x66   : > { %2273 = vrot.lane.b32.xlu1 %v4149_v27, %s3805_s8  ;;  %v1351_v27 = vshll.u32 %v4241_v24, 16  ;;  %v360_v58 = vsel %vm3852_vm3, 0, %v359_v45  ;;  %v3544_v62 = vpack.c.bf16 %v310_v36, %v310_v36  ;;  %v3406_v6 = vcombine.low %v4257_v42, %v4224_v0  ;;  %v415_v60 = vld [vmem:[#allocation2 + $0x38] sm:$0x1]  ;;  %v4294_v43 = vld [vmem:[#allocation2 + $0x28] sm:$0xf] }
  0x67   : > { %v2451_v26 = vor.u32 %v2450_v34, %v2446_v41  ;;  %v2455_v59 = vrot.slane %v2453_v44, 1  ;;  %361 = vst [vmem:[#allocation2 + $0x30] sm:$0x1] %v360_v58  ;;  %v3545_v14 = vpack.c.bf16 %v311_v40, %v311_v40  ;;  %v4280_v18 = vrot.slane %v3413_v63, 1  ;;  %v439_v42 = vld [vmem:[#allocation2 + $0x98] sm:$0x1] }
  0x68   : > { %2657 = vrot.lane.b32.xlu0 %v2611_v48, %s3807_s10  ;;  %v1353_v17 = vrot.slane %v1351_v27, 1  ;;  %v610_v54 = vshll.u32 %v3544_v62, 16  ;;  %v2613_v19 = vrot.slane %v4229_v28, 1  ;;  %v1356_v39 = vshll.u32 %v4266_v57, 16  ;;  %v1058_v28 = vld [vmem:[#allocation2 + $0x24] sm:$0xf] }
  0x69   : > { %v615_v22 = vshrl.u32 %v3545_v14, 16  ;;  %v618_v3 = vshll.u32 %v3545_v14, 16  ;;  %v3508_v0 = vcombine.low %v4260_v51, %v4227_v10  ;;  %v4290_v49 = vcombine.low %v1012_v33, %v4275_v5  ;;  %v4301_v10 = vld [vmem:[%s5515_s3] ss:$0 sm:$0xff] }
  0x6a   : > { %2275 = vrot.lane.b32.xlu1 %v3476_v52, %s3805_s8  ;;  %v607_v52 = vshrl.u32 %v3544_v62, 16  ;;  %v1616_v9 = vrot.slane %v4216_v50, 1  ;;  %v2456_v38 = vsel %vm1311_vm8, %v2451_v26, %v2455_v59  ;;  %v288_v35 = vmul.f32 %v4301_v10, %v249_v4  ;;  %v4313_v48 = vld [vmem:[%s5516_s4] ss:$0 sm:$0xff] }
  0x6b   : > { %5535 = vst [vmem:[#allocation5_spill] sm:$0xff] %v4290_v49  ;;  %v4296_v56 = vrot.slane %v615_v22, 7  ;;  %v1354_v36 = vor.u32 %v1353_v17, %v1349_v29  ;;  %v384_v41 = vsel %vm3852_vm3, 0, %v383_v46  ;;  %v2614_v34 = vsel %vm1584_vm7, %v2612_v47, %v2613_v19  ;;  %v4318_v51 = vld [vmem:[#allocation2 + $0x8c] ss:$0 sps:$4 sm:$0x11]  }
  0x6c   : > { %v609_v20 = vrot.slane %v607_v52, 7  ;;  %1508 = vrot.lane.b32.xlu0 %v1347_v15, %s3801_s29  ;;  %v1358_v44 = vrot.slane %v1356_v39, 1  ;;  %385 = vst [vmem:[#allocation2 + $0x90] sm:$0x1] %v384_v41  ;;  %v1443_v63 = vsel %vm1311_vm8, %v1438_v55, %v1442_v30  ;;  %v4321_v15 = vcombine.low %v1058_v28, %v4294_v43  ;;  %v234_v52 = vld [vmem:[%s3888_s25 + $0x40] sm:$0xff]  ;;  %v235_v39 = vld [vmem:[%s3888_s25 + $0x48] sm:$0xff] }
  0x6d   : > { %v620_v45 = vor.u32 %v618_v3, %v4296_v56  ;;  %v327_v29 = vadd.f32 %v4313_v48, %v288_v35  ;;  %v416_v33 = vsel %vm3874_vm5, 0, %v415_v60  ;;  %v1447_v58 = vshll.u32 %v4290_v49, 16  ;;  %v362_v22 = vld [vmem:[#allocation2 + $0x3c] sm:$0x1] }
  0x6e   : > { %2545 = vrot.lane.b32.xlu1 %v2444_v7, %s3806_s9  ;;  %v287_v7 = vmul.f32 %v4301_v10, %v248_v21  ;;  %v612_v40 = vor.u32 %v610_v54, %v609_v20  ;;  %v613_v32 = vrot.slane %v609_v20, 4  ;;  %v899_v47 = vld [vmem:[#allocation2 + $0x30] sm:$0xf]  ;;  %417 = vst [vmem:[#allocation2 + $0x38] sm:$0x1] %v416_v33  ;;  %v2636_v26 = vrot.slane %v3508_v0, 1 }
  0x6f   : > { %v2637_v59 = vrot.slane %v4245_v25, 1  ;;  %v1594_v14 = vrot.slane %v3406_v6, 1  ;;  %v3561_v17 = vpack.c.bf16 %v327_v29, %v327_v29  ;;  %v1359_v54 = vsel %vm1311_vm8, %v1354_v36, %v1358_v44  ;;  %v250_v44 = vld [vmem:[%s3888_s25 + $0xc0] sm:$0xff] }
  0x70   : > { %v326_v27 = vadd.f32 %v4313_v48, %v287_v7  ;;  %v621_v62 = vsel %vm3947_vm10, %v613_v32, %v620_v45  ;;  %v900_v30 = vsel %vm3939_vm9, %v612_v40, %v899_v47  ;;  %2659 = vrot.lane.b32.xlu0 %v2614_v34, %s3807_s10  ;;  %v440_v19 = vsel %vm3874_vm5, 0, %v439_v42  ;;  %v1049_v32 = vld [vmem:[#allocation2 + $0x84] sm:$0xe]  ;;  %v251_v45 = vld [vmem:[%s3888_s25 + $0xc8] sm:$0xff] }
  0x71   : > { %901 = vst [vmem:[#allocation2 + $0x30] sm:$0xf] %v900_v30  ;;  %902 = vst.msk [vmem:[#allocation2 + $0x34] sm:$0xf] %vm336_vm0, %v621_v62  ;;  %v1445_v25 = vshrl.u32 %v4290_v49, 16  ;;  %v1452_v6 = vshll.u32 %v4318_v51, 16  ;;  %v274_v35 = vmul.f32 %v4301_v10, %v235_v39  ;;  %v2638_v40 = vsel %vm1584_vm7, %v2636_v26, %v2637_v59 }
  0x72   : > { %2547 = vrot.lane.b32.xlu1 %v2456_v38, %s3806_s9  ;;  %v3560_v55 = vpack.c.bf16 %v326_v27, %v326_v27  ;;  %v751_v3 = vshrl.u32 %v3561_v17, 16  ;;  %v754_v46 = vshll.u32 %v3561_v17, 16  ;;  %441 = vst [vmem:[#allocation2 + $0x98] sm:$0x1] %v440_v19  ;;  %v1449_v0 = vrot.slane %v1447_v58, 1 }
  0x73   : > { %v622_v20 = vrot.slane %v4296_v56, 4  ;;  %v273_v38 = vmul.f32 %v4301_v10, %v234_v52  ;;  %v1595_v28 = vrot.slane %v4266_v57, 1  ;;  %v955_v7 = vld [vmem:[#allocation2 + $0x90] sm:$0xf]  ;;  %v363_v36 = vsel %vm3852_vm3, 0, %v362_v22 }
  0x74   : > { %v743_v21 = vshrl.u32 %v3560_v55, 16  ;;  %v746_v4 = vshll.u32 %v3560_v55, 16  ;;  %1510 = vrot.lane.b32.xlu0 %v1359_v54, %s3801_s29  ;;  %364 = vst [vmem:[#allocation2 + $0x3c] sm:$0x1] %v363_v36  ;;  %v1454_v57 = vrot.slane %v1452_v6, 1  ;;  %v313_v33 = vadd.f32 %v4313_v48, %v274_v35 }
  0x75   : > { %v312_v34 = vadd.f32 %v4313_v48, %v273_v38  ;;  %v1074_v27 = vld [vmem:[#allocation2 + $0x84] sm:$0xf]  ;;  %v903_v29 = vld [vmem:[#allocation2 + $0x38] sm:$0x1]  ;;  %v1450_v58 = vor.u32 %v1449_v0, %v1445_v25  ;;  %v4358_v55 = vld [vmem:[#allocation2 + $0x88] sm:$0xf]  ;;  %v1596_v19 = vsel %vm1584_vm7, %v1594_v14, %v1595_v28  ;;  %v289_v25 = vmul.f32 %v4301_v10, %v250_v44 }
  0x76   : > { %2673 = vrot.lane.b32.xlu1 %v4264_v53, %s3807_s10  ;;  %v745_v60 = vrot.slane %v743_v21, 7  ;;  %v753_v53 = vrot.slane %v751_v3, 7  ;;  %v904_v59 = vsel %vm3852_vm3, %v622_v20, %v903_v29  ;;  %v1852_v17 = vshll.u32 %v4321_v15, 16  ;;  %v4370_v54 = vld [vmem:[#allocation2 + $0x2c] ss:$0 sps:$4 sm:$0x11]  }
  0x77   : > { %905 = vst [vmem:[#allocation2 + $0x38] sm:$0x1] %v904_v59  ;;  %v3414_v6 = vcombine.low %v1049_v32, %v4275_v5  ;;  %v4380_v3 = vcombine.low %v1074_v27, %v4358_v55  ;;  %v290_v0 = vmul.f32 %v4301_v10, %v251_v45  ;;  %v1455_v14 = vsel %vm1311_vm8, %v1450_v58, %v1454_v57  ;;  %v386_v28 = vld [vmem:[#allocation2 + $0x9c] sm:$0x1]  ;;  %v1104_v44 = vld [vmem:[#allocation2 + $0x24] sm:$0xe] }
  0x78   : > { %v748_v41 = vor.u32 %v746_v4, %v745_v60  ;;  %v749_v56 = vrot.slane %v745_v60, 4  ;;  %v756_v42 = vor.u32 %v754_v46, %v753_v53  ;;  %v758_v47 = vrot.slane %v753_v53, 4  ;;  %v1060_v62 = vld [vmem:[#allocation2 + $0x30] sm:$0xf]  ;;  %v4356_v30 = vld [vmem:[#allocation2 + $0x34] sm:$0xf]  ;;  %1637 = vrot.lane.b32.xlu0 %v4271_v31, %s3800_s28 }
  0x79   : > { %v4368_v52 = vcombine.low %v1060_v62, %v4356_v30  ;;  %v3547_v4 = vpack.c.bf16 %v313_v33, %v313_v33  ;;  %v959_v39 = vld [vmem:[#allocation2 + $0x98] sm:$0x1]  ;;  %v1850_v5 = vshrl.u32 %v4321_v15, 16  ;;  %v1857_v35 = vshll.u32 %v4370_v54, 16 }
  0x7a   : > { %1524 = vrot.lane.b32.xlu1 %v1443_v63, %s3801_s29  ;;  %v956_v26 = vsel %vm3939_vm9, %v748_v41, %v955_v7  ;;  %v3546_v63 = vpack.c.bf16 %v312_v34, %v312_v34  ;;  %v757_v21 = vsel %vm3947_vm10, %v749_v56, %v756_v42  ;;  %v960_v46 = vsel %vm3852_vm3, %v758_v47, %v959_v39  ;;  %v1112_v39 = vld [vmem:[#allocation2 + $0x84] sm:$0xe] }
  0x7b   : > { %957 = vst [vmem:[#allocation2 + $0x90] sm:$0xf] %v956_v26  ;;  %958 = vst.msk [vmem:[#allocation2 + $0x94] sm:$0xf] %vm336_vm0, %v757_v21  ;;  %v632_v60 = vshrl.u32 %v3547_v4, 16  ;;  %v635_v38 = vshll.u32 %v3547_v4, 16  ;;  %v328_v56 = vadd.f32 %v4313_v48, %v289_v25  ;;  %v1617_v34 = vsel %vm1584_vm7, %v4280_v18, %v1616_v9 }
  0x7c   : > { %v624_v22 = vshrl.u32 %v3546_v63, 16  ;;  %v627_v31 = vshll.u32 %v3546_v63, 16  ;;  %961 = vst [vmem:[#allocation2 + $0x98] sm:$0x1] %v960_v46  ;;  %1639 = vrot.lane.b32.xlu0 %v1596_v19, %s3800_s28  ;;  %v1864_v53 = vshll.u32 %v4368_v52, 16  ;;  %v1854_v7 = vrot.slane %v1852_v17, 1 }
  0x7d   : > { %v906_v36 = vld [vmem:[#allocation2 + $0x3c] sm:$0xf]  ;;  %v4390_v41 = vrot.slane %v632_v60, 7  ;;  %v1618_v45 = vrot.slane %v3414_v6, 1  ;;  %v329_v57 = vadd.f32 %v4313_v48, %v290_v0  ;;  %v387_v27 = vsel %vm3852_vm3, 0, %v386_v28 }
  0x7e   : > { %2675 = vrot.lane.b32.xlu1 %v2638_v40, %s3807_s10  ;;  %v626_v20 = vrot.slane %v624_v22, 7  ;;  %v1619_v42 = vrot.slane %v4318_v51, 1  ;;  %v1948_v47 = vshll.u32 %v4380_v3, 16  ;;  %388 = vst [vmem:[#allocation2 + $0x9c] sm:$0x1] %v387_v27  ;;  %v1855_v18 = vor.u32 %v1854_v7, %v1850_v5 }
  0x7f   : > { %v637_v33 = vor.u32 %v635_v38, %v4390_v41  ;;  %v1859_v9 = vrot.slane %v1857_v35, 1  ;;  %v4410_v62 = vld [vmem:[#allocation2 + $0x38] ss:$0 sps:$4 sm:$0x11]   ;;  %v1862_v51 = vshrl.u32 %v4368_v52, 16  ;;  %v1866_v26 = vrot.slane %v1864_v53, 1 }
  0x80   : > { %v629_v40 = vor.u32 %v627_v31, %v626_v20  ;;  %v630_v32 = vrot.slane %v626_v20, 4  ;;  %1749 = vrot.lane.b32.xlu0 %v4321_v15, %s3802_s30  ;;  %v3562_v63 = vpack.c.bf16 %v328_v56, %v328_v56  ;;  %v1869_v17 = vshll.u32 %v4410_v62, 16  ;;  %v4417_v21 = vld [vmem:[#allocation2 + $0x8c] ss:$0 sps:$4 sm:$0x11]  }
  0x81   : > { %v3563_v15 = vpack.c.bf16 %v329_v57, %v329_v57  ;;  %v3453_v4 = vcombine.low %v1104_v44, %v4294_v43  ;;  %v1620_v19 = vsel %vm1584_vm7, %v1618_v45, %v1619_v42  ;;  %v418_v31 = vld [vmem:[#allocation2 + $0x44] sm:$0x1]  ;;  %v1105_v25 = vld [vmem:[#allocation2 + $0x30] sm:$0xe]  ;;  %v1860_v6 = vsel %vm1311_vm8, %v1855_v18, %v1859_v9  ;;  %v4429_v53 = vld [vmem:[#allocation2 + $0x34] sm:$0xf] }
  0x82   : > { %1526 = vrot.lane.b32.xlu1 %v1455_v14, %s3801_s29  ;;  %v1076_v29 = vld [vmem:[#allocation2 + $0x90] sm:$0xf]  ;;  %v907_v50 = vsel %vm3939_vm9, %v629_v40, %v906_v36  ;;  %v4408_v58 = vld [vmem:[#allocation2 + $0x94] sm:$0xf]  ;;  %v638_v59 = vsel %vm3947_vm10, %v630_v32, %v637_v33  ;;  %v1946_v46 = vshrl.u32 %v4380_v3, 16  ;;  %v1950_v0 = vrot.slane %v1948_v47, 1 }
  0x83   : > { %908 = vst [vmem:[#allocation2 + $0x3c] sm:$0xf] %v907_v50  ;;  %909 = vst.msk [vmem:[#allocation2 + $0x40] sm:$0xf] %vm336_vm0, %v638_v59  ;;  %v3430_v22 = vcombine.low %v1076_v29, %v4408_v58  ;;  %v1867_v14 = vor.u32 %v1866_v26, %v1862_v51  ;;  %v1871_v20 = vrot.slane %v1869_v17, 1  ;;  %v760_v38 = vshrl.u32 %v3562_v63, 16 }
  0x84   : > { %1751 = vrot.lane.b32.xlu0 %v4368_v52, %s3802_s30  ;;  %v1123_v60 = vld [vmem:[#allocation2 + $0x30] sm:$0xf]  ;;  %v763_v43 = vshll.u32 %v3562_v63, 16  ;;  %v1953_v28 = vshll.u32 %v4417_v21, 16  ;;  %v768_v5 = vshrl.u32 %v3563_v15, 16  ;;  %v3461_v7 = vcombine.low %v1112_v39, %v4358_v55 }
  0x85   : > { %v1960_v52 = vshll.u32 %v3430_v22, 16  ;;  %v2103_v35 = vrot.slane %v3453_v4, 1  ;;  %v4432_v36 = vld [vmem:[#allocation2 + $0x98] ss:$0 sps:$4 sm:$0x11]   ;;  %v762_v40 = vrot.slane %v760_v38, 7  ;;  %v3454_v32 = vcombine.low %v1105_v25, %v4356_v30 }
  0x86   : > { %1653 = vrot.lane.b32.xlu1 %v1617_v34, %s3800_s28  ;;  %v4436_v56 = vrot.slane %v768_v5, 7  ;;  %v771_v34 = vshll.u32 %v3563_v15, 16  ;;  %v962_v44 = vld [vmem:[#allocation2 + $0x9c] sm:$0xf]  ;;  %v419_v45 = vsel %vm3874_vm5, 0, %v418_v31  ;;  %v1872_v57 = vsel %vm1311_vm8, %v1867_v14, %v1871_v20 }
  0x87   : > { %v2104_v55 = vrot.slane %v4370_v54, 1  ;;  %v765_v27 = vor.u32 %v763_v43, %v762_v40  ;;  %v766_v42 = vrot.slane %v762_v40, 4  ;;  %420 = vst [vmem:[#allocation2 + $0x44] sm:$0x1] %v419_v45  ;;  %v1951_v30 = vor.u32 %v1950_v0, %v1946_v46  ;;  %v442_v51 = vld [vmem:[#allocation2 + $0xa4] sm:$0x1] }
  0x88   : > { %2021 = vrot.lane.b32.xlu0 %v1860_v6, %s3804_s7  ;;  %v1955_v47 = vrot.slane %v1953_v28, 1  ;;  %v4445_v29 = vcombine.low %v1123_v60, %v4429_v53  ;;  %v773_v33 = vor.u32 %v771_v34, %v4436_v56  ;;  %v1958_v50 = vshrl.u32 %v3430_v22, 16  ;;  %v1139_v59 = vld [vmem:[#allocation2 + $0x90] sm:$0xf] }
  0x89   : > { %v1962_v18 = vrot.slane %v1960_v52, 1  ;;  %v1965_v9 = vshll.u32 %v4432_v36, 16  ;;  %v963_v54 = vsel %vm3939_vm9, %v765_v27, %v962_v44  ;;  %v2106_v26 = vrot.slane %v3454_v32, 1  ;;  %v1113_v31 = vld [vmem:[#allocation2 + $0x90] sm:$0xe] }
  0x8a   : > { %1655 = vrot.lane.b32.xlu1 %v1620_v19, %s3800_s28  ;;  %v774_v63 = vsel %vm3947_vm10, %v766_v42, %v773_v33  ;;  %964 = vst [vmem:[#allocation2 + $0x9c] sm:$0xf] %v963_v54  ;;  %v2105_v17 = vsel %vm1584_vm7, %v2103_v35, %v2104_v55  ;;  %v2107_v15 = vrot.slane %v4410_v62, 1  ;;  %v639_v4 = vrot.slane %v4390_v41, 4  ;;  %v1125_v19 = vld [vmem:[#allocation2 + $0x3c] sm:$0xf] }
  0x8b   : > { %v4459_v39 = vld [vmem:[#allocation2 + $0x40] sm:$0xf]  ;;  %965 = vst.msk [vmem:[#allocation2 + $0xa0] sm:$0xf] %vm336_vm0, %v774_v63  ;;  %v2127_v25 = vrot.slane %v3461_v7, 1  ;;  %v2364_v6 = vshll.u32 %v4445_v29, 16  ;;  %v1956_v0 = vsel %vm1311_vm8, %v1951_v30, %v1955_v47  ;;  %v1963_v62 = vor.u32 %v1962_v18, %v1958_v50 }
  0x8c   : > { %2023 = vrot.lane.b32.xlu0 %v1872_v57, %s3804_s7  ;;  %v443_v46 = vsel %vm3874_vm5, 0, %v442_v51  ;;  %v1967_v14 = vrot.slane %v1965_v9, 1  ;;  %v2128_v20 = vrot.slane %v4417_v21, 1  ;;  %v4475_v60 = vld [vmem:[#allocation2 + $0x38] ss:$0 sps:$4 sm:$0x11]   ;;  %v3462_v43 = vcombine.low %v1113_v31, %v4408_v58 }
  0x8d   : > { %444 = vst [vmem:[#allocation2 + $0xa4] sm:$0x1] %v443_v46  ;;  %v2108_v28 = vsel %vm1584_vm7, %v2106_v26, %v2107_v15  ;;  %v1169_v5 = vld [vmem:[#allocation2 + $0x30] sm:$0xe]  ;;  %v2362_v21 = vshrl.u32 %v4445_v29, 16  ;;  %v2366_v40 = vrot.slane %v2364_v6, 1 }
  0x8e   : > { %1765 = vrot.lane.b32.xlu1 %v4380_v3, %s3802_s30  ;;  %v4452_v3 = vld [vmem:[#allocation2 + $0x94] sm:$0xf]  ;;  %v910_v38 = vld [vmem:[#allocation2 + $0x44] sm:$0x1]  ;;  %v998_v52 = vld [vmem:[#allocation2 + $0x30] sm:$0xf]  ;;  %v1968_v58 = vsel %vm1311_vm8, %v1963_v62, %v1967_v14  ;;  %v2129_v27 = vsel %vm1584_vm7, %v2127_v25, %v2128_v20  ;;  %v3501_v42 = vcombine.low %v1169_v5, %v4429_v53 }
  0x8f   : > { %v4468_v41 = vcombine.low %v1139_v59, %v4452_v3  ;;  %v911_v7 = vsel %vm3852_vm3, %v639_v4, %v910_v38  ;;  %v236_v35 = vld [vmem:[%s3888_s25 + $0x50] sm:$0xff]  ;;  %v775_v45 = vrot.slane %v4436_v56, 4  ;;  %v4491_v57 = vld [vmem:[#allocation2 + $0x98] ss:$0 sps:$4 sm:$0x11]   ;;  %v2369_v47 = vshll.u32 %v4475_v60, 16 }
  0x90   : > { %2149 = vrot.lane.b32.xlu0 %v2105_v17, %s3803_s6  ;;  %912 = vst [vmem:[#allocation2 + $0x44] sm:$0x1] %v911_v7  ;;  %v4484_v32 = vld [vmem:[#allocation2 + $0x34] sm:$0xf]  ;;  %v4486_v34 = vld [vmem:[#allocation2 + $0x30] sm:$0xe]  ;;  %v275_v26 = vmul.f32 %v4301_v10, %v236_v35  ;;  %v2367_v53 = vor.u32 %v2366_v40, %v2362_v21 }
  0x91   : > { %v2460_v44 = vshll.u32 %v4468_v41, 16  ;;  %v237_v55 = vld [vmem:[%s3888_s25 + $0x58] sm:$0xff]  ;;  %v252_v33 = vld [vmem:[%s3888_s25 + $0xd0] sm:$0xff]  ;;  %v2130_v50 = vrot.slane %v3462_v43, 1  ;;  %v2131_v18 = vrot.slane %v4432_v36, 1  ;;  %v4504_v51 = vcombine.low %v998_v52, %v4484_v32 }
  0x92   : > { %1767 = vrot.lane.b32.xlu1 %v3430_v22, %s3802_s30  ;;  %v4473_v22 = vcombine.low %v1125_v19, %v4459_v39  ;;  %v1170_v9 = vld [vmem:[#allocation2 + $0x3c] sm:$0xe]  ;;  %v1177_v54 = vld [vmem:[#allocation2 + $0x90] sm:$0xe]  ;;  %v2458_v59 = vshrl.u32 %v4468_v41, 16  ;;  %v3407_v36 = vcombine.low %v4486_v34, %v4484_v32  ;;  %v276_v15 = vmul.f32 %v4301_v10, %v237_v55 }
  0x93   : > { %5536 = vst [vmem:[#allocation6_spill] sm:$0xff] %v4504_v51  ;;  %v4509_v17 = vld [vmem:[#allocation2 + $0x38] ss:$0 sps:$4 sm:$0x11]   ;;  %v1141_v4 = vld [vmem:[#allocation2 + $0x9c] sm:$0xf]  ;;  %v3509_v5 = vcombine.low %v1177_v54, %v4452_v3  ;;  %v314_v35 = vadd.f32 %v4313_v48, %v275_v26 }
  0x94   : > { %2151 = vrot.lane.b32.xlu0 %v2108_v28, %s3803_s6  ;;  %v2376_v30 = vshll.u32 %v4473_v22, 16  ;;  %v966_v63 = vld [vmem:[#allocation2 + $0xa4] sm:$0x1]  ;;  %v4514_v19 = vld [vmem:[#allocation2 + $0xa0] sm:$0xf]  ;;  %v2462_v31 = vrot.slane %v2460_v44, 1  ;;  %v2132_v28 = vsel %vm1584_vm7, %v2130_v50, %v2131_v18 }
  0x95   : > { %v4501_v56 = vpop.permute.xlu0 %1633  ;;  %v2465_v25 = vshll.u32 %v4491_v57, 16  ;;  %v967_v6 = vsel %vm3852_vm3, %v775_v45, %v966_v63  ;;  %v1014_v46 = vld [vmem:[#allocation2 + $0x90] sm:$0xf]  ;;  %v2371_v62 = vrot.slane %v2369_v47, 1  ;;  %v2374_v14 = vshrl.u32 %v4473_v22, 16 }
  0x96   : > { %2037 = vrot.lane.b32.xlu1 %v1956_v0, %s3804_s7  ;;  %v4520_v0 = vmul.f32 %v4301_v10, %v252_v33  ;;  %v2378_v20 = vrot.slane %v2376_v30, 1  ;;  %v2615_v38 = vrot.slane %v3501_v42, 1  ;;  %968 = vst [vmem:[#allocation2 + $0xa4] sm:$0x1] %v967_v6  ;;  %v4525_v43 = vld [vmem:[#allocation2 + $0x94] sm:$0xf]  ;;  %v4536_v21 = vcombine.low %v1141_v4, %v4514_v19 }
  0x97   : > { %v4529_v7 = vld [vmem:[#allocation2 + $0x44] ss:$0 sps:$4 sm:$0x11]   ;;  %v1363_v52 = vshll.u32 %v4504_v51, 16  ;;  %v2616_v40 = vrot.slane %v4475_v60, 1  ;;  %v1368_v32 = vshll.u32 %v4509_v17, 16  ;;  %v2463_v44 = vor.u32 %v2462_v31, %v2458_v59 }
  0x98   : > { %2261 = vrot.lane.b32.xlu0 %v4445_v29, %s3805_s8  ;;  %v3502_v29 = vcombine.low %v1170_v9, %v4459_v39  ;;  %v1000_v34 = vld [vmem:[#allocation2 + $0x3c] sm:$0xf]  ;;  %v2381_v3 = vshll.u32 %v4529_v7, 16  ;;  %v2467_v45 = vrot.slane %v2465_v25, 1  ;;  %v4543_v55 = vld [vmem:[#allocation2 + $0x40] sm:$0xf]  ;;  %v2372_v39 = vsel %vm1311_vm8, %v2367_v53, %v2371_v62 }
  0x99   : > { %v2379_v42 = vor.u32 %v2378_v20, %v2374_v14  ;;  %v1361_v60 = vshrl.u32 %v4504_v51, 16  ;;  %v4551_v30 = vcombine.low %v1014_v46, %v4525_v43  ;;  %v4553_v47 = vld [vmem:[#allocation2 + $0x98] ss:$0 sps:$4 sm:$0x11]   ;;  %v365_v33 = vld [vmem:[#allocation2 + $0x48] sm:$0x1]  ;;  %v4561_v59 = vcombine.low %v1000_v34, %v4543_v55 }
  0x9a   : > { %2039 = vrot.lane.b32.xlu1 %v1968_v58, %s3804_s7  ;;  %v2383_v50 = vrot.slane %v2381_v3, 1  ;;  %v1365_v18 = vrot.slane %v1363_v52, 1  ;;  %v2639_v9 = vrot.slane %v3509_v5, 1  ;;  %v2640_v54 = vrot.slane %v4491_v57, 1  ;;  %v1178_v14 = vld [vmem:[#allocation2 + $0x9c] sm:$0xe] }
  0x9b   : > { %5537 = vst [vmem:[#allocation7_spill] sm:$0xff] %v4551_v30  ;;  %v1370_v26 = vrot.slane %v1368_v32, 1  ;;  %v4558_v53 = vrot.slane %v3502_v29, 1  ;;  %5538 = vst [vmem:[#allocation8_spill] sm:$0xff] %v4561_v59  ;;  %v4564_v63 = vsel %vm1311_vm8, %v2463_v44, %v2467_v45  ;;  %v366_v57 = vsel %vm3852_vm3, 0, %v365_v33 }
  0x9c   : > { %v4541_v58 = vpop.permute.xlu0 %1504  ;;  %2263 = vrot.lane.b32.xlu0 %v4473_v22, %s3805_s8  ;;  %v2472_v22 = vshll.u32 %v4536_v21, 16  ;;  %v3548_v31 = vpack.c.bf16 %v314_v35, %v314_v35  ;;  %v1459_v25 = vshll.u32 %v4551_v30, 16  ;;  %v1464_v6 = vshll.u32 %v4553_v47, 16  ;;  %367 = vst [vmem:[#allocation2 + $0x48] sm:$0x1] %v366_v57 }
  0x9d   : > { %v4567_v4 = vld [vmem:[#allocation2 + $0xa4] ss:$0 sps:$4 sm:$0x11]   ;;  %v4574_v46 = vrot.slane %v3407_v36, 1  ;;  %v2384_v20 = vsel %vm1311_vm8, %v2379_v42, %v2383_v50  ;;  %v1016_v52 = vld [vmem:[#allocation2 + $0x9c] sm:$0xf]  ;;  %v4588_v44 = vsel %vm1584_vm7, %v2639_v9, %v2640_v54  ;;  %v3510_v9 = vcombine.low %v1178_v14, %v4514_v19 }
  0x9e   : > { %2165 = vrot.lane.b32.xlu1 %v2129_v27, %s3803_s6  ;;  %v315_v27 = vadd.f32 %v4313_v48, %v276_v15  ;;  %v2617_v15 = vsel %vm1584_vm7, %v2615_v38, %v2616_v40  ;;  %v641_v35 = vshrl.u32 %v3548_v31, 16  ;;  %v2470_v29 = vshrl.u32 %v4536_v21, 16  ;;  %v4584_v32 = vld [vmem:[#allocation2 + $0xa0] sm:$0xf] }
  0x9f   : > { %v2474_v40 = vrot.slane %v2472_v22, 1  ;;  %v1375_v36 = vshll.u32 %v4561_v59, 16  ;;  %v644_v34 = vshll.u32 %v3548_v31, 16  ;;  %v2477_v3 = vshll.u32 %v4567_v4, 16  ;;  %v253_v31 = vld [vmem:[%s3888_s25 + $0xd8] sm:$0xff] }
  0xa0   : > { %2533 = vrot.lane.b32.xlu0 %v2372_v39, %s3806_s9  ;;  %v3549_v62 = vpack.c.bf16 %v315_v27, %v315_v27  ;;  %v4590_v45 = vld [vmem:[#allocation2 + $0x44] ss:$0 sps:$4 sm:$0x11]   ;;  %v643_v27 = vrot.slane %v641_v35, 7  ;;  %v1461_v42 = vrot.slane %v1459_v25, 1  ;;  %v1373_v50 = vshrl.u32 %v4561_v59, 16 }
  0xa1   : > { %v4603_v35 = vcombine.low %v1016_v52, %v4584_v32  ;;  %v389_v25 = vld [vmem:[#allocation2 + $0xa8] sm:$0x1]  ;;  %v2479_v5 = vrot.slane %v2477_v3, 1  ;;  %v330_v3 = vadd.f32 %v4313_v48, %v4520_v0  ;;  %vm3002_vm12 = vcmask 1045504  }
  0xa2   : > { %2167 = vrot.lane.b32.xlu1 %v2132_v28, %s3803_s6  ;;  %v1366_v28 = vor.u32 %v1365_v18, %v1361_v60  ;;  %v649_v39 = vshrl.u32 %v3549_v62, 16  ;;  %v1466_v60 = vrot.slane %v1464_v6, 1  ;;  %v652_v33 = vshll.u32 %v3549_v62, 16  ;;  %v421_v6 = vld [vmem:[#allocation2 + $0x50] sm:$0x1] }
  0xa3   : > { %v646_v18 = vor.u32 %v644_v34, %v643_v27  ;;  %v647_v22 = vrot.slane %v643_v27, 4  ;;  %5539 = vst [vmem:[#allocation9_spill] sm:$0xff] %v4603_v35  ;;  %v2475_v62 = vor.u32 %v2474_v40, %v2470_v29  ;;  %v1380_v27 = vshll.u32 %v4590_v45, 16  ;;  %v913_v14 = vld [vmem:[#allocation2 + $0x48] sm:$0xf] }
  0xa4   : > { %2535 = vrot.lane.b32.xlu0 %v2384_v20, %s3806_s9  ;;  %v4595_v57 = vrot.slane %v649_v39, 7  ;;  %v1371_v54 = vsel %vm1311_vm8, %v1366_v28, %v1370_v26  ;;  %v1377_v20 = vrot.slane %v1375_v36, 1  ;;  %v4608_v39 = vld [vmem:[#allocation2 + $0x3c] sm:$0xe]  ;;  %v2619_v26 = vrot.slane %v4529_v7, 1 }
  0xa5   : > { %v914_v52 = vsel %vm3939_vm9, %v646_v18, %v913_v14  ;;  %v292_v29 = vmul.f32 %v4301_v10, %v253_v31  ;;  %v4618_v40 = vld [vmem:[#allocation2 + $0x90] sm:$0xe]  ;;  %v422_v7 = vsel %vm3874_vm5, 0, %v421_v6  ;;  %v3408_v18 = vcombine.low %v4608_v39, %v4543_v55  ;;  %v4640_v6 = vld [vmem:[#allocation2 + $0x40] sm:$0xf] }
  0xa6   : > { %v4577_v38 = vpop.permute.xlu0 %1745  ;;  %2277 = vrot.lane.b32.xlu1 %v4468_v41, %s3805_s8  ;;  %v1457_v41 = vshrl.u32 %v4551_v30, 16  ;;  %v654_v19 = vor.u32 %v652_v33, %v4595_v57  ;;  %915 = vst [vmem:[#allocation2 + $0x48] sm:$0xf] %v914_v52  ;;  %v1471_v33 = vshll.u32 %v4603_v35, 16  ;;  %423 = vst [vmem:[#allocation2 + $0x50] sm:$0x1] %v422_v7  ;;  %v3415_v39 = vcombine.low %v4618_v40, %v4525_v43 }
  0xa7   : > { %v331_v0 = vadd.f32 %v4313_v48, %v292_v29  ;;  %v1469_v55 = vshrl.u32 %v4603_v35, 16  ;;  %v238_v52 = vld [vmem:[%s3888_s25 + $0x60] sm:$0xff]  ;;  %vm2689_vm13 = vcmask 23552   ;;  %vm2722_vm14 = vcmask 48128  }
  0xa8   : > { %2661 = vrot.lane.b32.xlu0 %v2617_v15, %s3807_s10  ;;  %v1462_v28 = vor.u32 %v1461_v42, %v1457_v41  ;;  %v655_v36 = vsel %vm3947_vm10, %v647_v22, %v654_v19  ;;  %v390_v15 = vsel %vm3852_vm3, 0, %v389_v25  ;;  %v445_v41 = vld [vmem:[#allocation2 + $0xb0] sm:$0x1]  ;;  %v4630_v42 = vrot.slane %v3510_v9, 1  ;;  %v1062_v9 = vld [vmem:[#allocation2 + $0x3c] sm:$0xf] }
  0xa9   : > { %916 = vst.msk [vmem:[#allocation2 + $0x4c] sm:$0xf] %vm336_vm0, %v655_v36  ;;  %391 = vst [vmem:[#allocation2 + $0xa8] sm:$0x1] %v390_v15  ;;  %v2480_v22 = vsel %vm1311_vm8, %v2475_v62, %v2479_v5  ;;  %v1378_v25 = vor.u32 %v1377_v20, %v1373_v50  ;;  %v3564_v19 = vpack.c.bf16 %v330_v3, %v330_v3  ;;  %v446_v5 = vsel %vm3874_vm5, 0, %v445_v41  ;;  %v239_v15 = vld [vmem:[%s3888_s25 + $0x68] sm:$0xff] }
  0xaa   : > { %2279 = vrot.lane.b32.xlu1 %v4536_v21, %s3805_s8  ;;  %v4612_v21 = vpop.permute.xlu1 %1761  ;;  %v3565_v14 = vpack.c.bf16 %v331_v0, %v331_v0  ;;  %v2620_v62 = vsel %vm1584_vm7, %v4558_v53, %v2619_v26  ;;  %v1467_v50 = vsel %vm1311_vm8, %v1462_v28, %v1466_v60  ;;  %447 = vst [vmem:[#allocation2 + $0xb0] sm:$0x1] %v446_v5  ;;  %v4655_v29 = vld [vmem:[#allocation2 + $0xa4] ss:$0 sps:$4 sm:$0x11]   ;;  %v1473_v43 = vrot.slane %v1471_v33, 1 }
  0xab   : > { %v777_v20 = vshrl.u32 %v3564_v19, 16  ;;  %v4658_v40 = vcombine.low %v1062_v9, %v4640_v6  ;;  %v656_v26 = vrot.slane %v4595_v57, 4  ;;  %v3743_v41 = vld [vmem:[%s5513_s1 + $0x8] sm:$0x3f]   ;;  %v277_v33 = vmul.f32 %v4301_v10, %v238_v52 }
  0xac   : > { %v4605_v34 = vpop.permute.xlu0 %1747  ;;  %1512 = vrot.lane.b32.xlu0 %v1371_v54, %s3801_s29  ;;  %v785_v36 = vshrl.u32 %v3565_v14, 16  ;;  %v788_v3 = vshll.u32 %v3565_v14, 16  ;;  %v2643_v0 = vrot.slane %v4567_v4, 1  ;;  %v3808_v9 = vmov 65535  }
  0xad   : > { %v779_v28 = vrot.slane %v777_v20, 7  ;;  %v3003_v57 = vsel %vm3001_vm11, 4294967295, %v3808_v9  ;;  %v278_v20 = vmul.f32 %v4301_v10, %v239_v15  ;;  %v5540_v9 = vrot.slane %v4509_v17, 1  ;;  %v3748_v17 = vld [vmem:[%s5513_s1] sm:$0xff]  }
  0xae   : > { %2549 = vrot.lane.b32.xlu1 %v4564_v63, %s3806_s9  ;;  %v1382_v63 = vrot.slane %v1380_v27, 1  ;;  %v780_v27 = vshll.u32 %v3564_v19, 16  ;;  %v4653_v54 = vpop.permute.xlu1 %1763  ;;  %v787_v7 = vrot.slane %v785_v36, 7  ;;  %v1476_v19 = vshll.u32 %v4655_v29, 16 }
  0xaf   : > { %v3004_v52 = vsel %vm3002_vm12, %v3003_v57, 0  ;;  %v316_v36 = vadd.f32 %v4313_v48, %v277_v33  ;;  %v1599_v33 = vsel %vm1584_vm7, %v4574_v46, %v5540_v9  ;;  %v1622_v46 = vrot.slane %v4553_v47, 1  ;;  %v4715_v47 = vld [vmem:[#allocation2 + $0xa0] sm:$0xf] }
  0xb0   : > { %v4638_v31 = vpop.permute.xlu0 %1635  ;;  %v1383_v53 = vsel %vm1311_vm8, %v1378_v25, %v1382_v63  ;;  %2663 = vrot.lane.b32.xlu0 %v2620_v62, %s3807_s10  ;;  %v783_v25 = vrot.slane %v779_v28, 4  ;;  %v969_v63 = vld [vmem:[#allocation2 + $0xa8] sm:$0xf]  ;;  %v790_v14 = vor.u32 %v788_v3, %v787_v7  ;;  %v792_v5 = vrot.slane %v787_v7, 4  ;;  %v917_v62 = vld [vmem:[#allocation2 + $0x50] sm:$0x1] }
  0xb1   : > { %v1600_v3 = vrot.slane %v3408_v18, 1  ;;  %v1601_v7 = vrot.slane %v4590_v45, 1  ;;  %v1064_v18 = vld [vmem:[#allocation2 + $0x48] sm:$0xf]  ;;  %v4697_v45 = vld [vmem:[#allocation2 + $0x4c] sm:$0xf] }
  0xb2   : > { %2551 = vrot.lane.b32.xlu1 %v2480_v22, %s3806_s9  ;;  %v782_v22 = vor.u32 %v780_v27, %v779_v28  ;;  %v918_v27 = vsel %vm3852_vm3, %v656_v26, %v917_v62  ;;  %v791_v15 = vsel %vm3947_vm10, %v783_v25, %v790_v14  ;;  %v255_v26 = vld [vmem:[%s3888_s25 + $0xe8] sm:$0xff]  ;;  %v3006_v14 = vand.u32 %v3743_v41, %v3004_v52  ;;  %v1051_v62 = vld [vmem:[#allocation2 + $0x9c] sm:$0xe] }
  0xb3   : > { %919 = vst [vmem:[#allocation2 + $0x50] sm:$0x1] %v918_v27  ;;  %972 = vst.msk [vmem:[#allocation2 + $0xac] sm:$0xf] %vm336_vm0, %v791_v15  ;;  %v3550_v27 = vpack.c.bf16 %v316_v36, %v316_v36  ;;  %v392_v15 = vld [vmem:[#allocation2 + $0xb4] sm:$0x1]  ;;  %v2644_v41 = vsel %vm1584_vm7, %v4630_v42, %v2643_v0  ;;  %v1602_v36 = vsel %vm1584_vm7, %v1600_v3, %v1601_v7 }
  0xb4   : > { %v4661_v60 = vpop.permute.xlu0 %2145  ;;  %v970_v4 = vsel %vm3939_vm9, %v782_v22, %v969_v63  ;;  %1514 = vrot.lane.b32.xlu0 %v1383_v53, %s3801_s29  ;;  %v973_v22 = vld [vmem:[#allocation2 + $0xb0] sm:$0x1]  ;;  %v254_v63 = vld [vmem:[%s3888_s25 + $0xe0] sm:$0xff]  ;;  %v4695_v53 = vrot.slane %v3415_v39, 1  ;;  %v317_v39 = vadd.f32 %v4313_v48, %v278_v20  ;;  %v1478_v52 = vrot.slane %v1476_v19, 1  ;;  %3588 = vmatprep.subr.bf16.mxu0 %v3006_v14 }
  0xb5   : > { %971 = vst [vmem:[#allocation2 + $0xa8] sm:$0xf] %v970_v4  ;;  %v974_v25 = vsel %vm3852_vm3, %v792_v5, %v973_v22  ;;  %v1474_v5 = vor.u32 %v1473_v43, %v1469_v55  ;;  %v1078_v22 = vld [vmem:[#allocation2 + $0x9c] sm:$0xf]  ;;  %3624 = vmatprep.subr.bf16.mxu1 %v3006_v14  ;;  %v4722_v42 = vcombine.low %v1064_v18, %v4697_v45  ;;  %v658_v43 = vshrl.u32 %v3550_v27, 16 }
  0xb6   : > { %2677 = vrot.lane.b32.xlu1 %v4588_v44, %s3807_s10  ;;  %v368_v44 = vld [vmem:[#allocation2 + $0x54] sm:$0x1]  ;;  %975 = vst [vmem:[#allocation2 + $0xb0] sm:$0x1] %v974_v25  ;;  %v3551_v55 = vpack.c.bf16 %v317_v39, %v317_v39  ;;  %3589 = vmatpush3.bf16.msra.mxu0 %v3006_v14  ;;  %v293_v9 = vmul.f32 %v4301_v10, %v254_v63  ;;  %v393_v3 = vsel %vm3852_vm3, 0, %v392_v15  ;;  %v661_v18 = vshll.u32 %v3550_v27, 16 }
  0xb7   : > { %v369_v4 = vsel %vm3852_vm3, 0, %v368_v44  ;;  %v4724_v0 = vld [vmem:[#allocation2 + $0x44] ss:$0 sps:$4 sm:$0x11]   ;;  %v3416_v44 = vcombine.low %v1051_v62, %v4584_v32  ;;  %3590 = vmatprep.subr.bf16.mxu0 %v3748_v17  ;;  %v294_v25 = vmul.f32 %v4301_v10, %v255_v26  ;;  %3626 = vmatpush3.bf16.msra.mxu1 %v3006_v14  ;;  %v4735_v7 = vcombine.low %v1078_v22, %v4715_v47 }
  0xb8   : > { %v4681_v28 = vpop.permute.xlu1 %1649  ;;  %v4693_v57 = vpop.permute.xlu0 %2147  ;;  %370 = vst [vmem:[#allocation2 + $0x54] sm:$0x1] %v369_v4  ;;  %1641 = vrot.lane.b32.xlu0 %v1599_v33, %s3800_s28  ;;  %v660_v33 = vrot.slane %v658_v43, 7  ;;  %v666_v39 = vshrl.u32 %v3551_v55, 16  ;;  %394 = vst [vmem:[#allocation2 + $0xb4] sm:$0x1] %v393_v3  ;;  %3625 = vmatprep.subr.bf16.mxu1 %v3748_v17  ;;  %v1479_v32 = vsel %vm1311_vm8, %v1474_v5, %v1478_v52 }
  0xb9   : > { %v1874_v63 = vshrl.u32 %v4658_v40, 16  ;;  %v332_v10 = vadd.f32 %v4313_v48, %v293_v9  ;;  %v1888_v14 = vshll.u32 %v4722_v42, 16  ;;  %v1881_v4 = vshll.u32 %v4724_v0, 16  ;;  %v4757_v9 = vld [vmem:[#allocation2 + $0xa4] ss:$0 sps:$4 sm:$0x11]  }
  0xba   : > { %1528 = vrot.lane.b32.xlu1 %v1467_v50, %s3801_s29  ;;  %v1876_v50 = vshll.u32 %v4658_v40, 16  ;;  %v669_v15 = vshll.u32 %v3551_v55, 16  ;;  %3591 = vmatpush3.bf16.msra.mxu0 %v3748_v17  ;;  %v333_v27 = vadd.f32 %v4313_v48, %v294_v25  ;;  %v4748_v5 = vld [vmem:[#allocation2 + $0x50] ss:$0 sps:$4 sm:$0x11]   ;;  %v4750_v52 = vrot.slane %v666_v39, 7 }
  0xbb   : > { %3627 = vmatpush3.bf16.msra.mxu1 %v3748_v17  ;;  %v1625_v22 = vrot.slane %v4655_v29, 1  ;;  %v663_v43 = vor.u32 %v661_v18, %v660_v33  ;;  %v1623_v55 = vsel %vm1584_vm7, %v4695_v53, %v1622_v46  ;;  %v1106_v48 = vld [vmem:[#allocation2 + $0x3c] sm:$0xe]  ;;  %v664_v25 = vrot.slane %v660_v33, 4 }
  0xbc   : > { %v4717_v20 = vpop.permute.xlu1 %1651  ;;  %v4726_v19 = vpop.permute.xlu0 %1520  ;;  %v1878_v62 = vrot.slane %v1876_v50, 1  ;;  %1643 = vrot.lane.b32.xlu0 %v1602_v36, %s3800_s28  ;;  %v1624_v50 = vrot.slane %v3416_v44, 1  ;;  %v1972_v36 = vshll.u32 %v4735_v7, 16  ;;  %v3566_v35 = vpack.c.bf16 %v332_v10, %v332_v10  ;;  %v1080_v18 = vld [vmem:[#allocation2 + $0xa8] sm:$0xf] }
  0xbd   : > { %v2691_v17 = vsel %vm2689_vm13, %v3943_v13, %v4541_v58  ;;  %v1883_v44 = vrot.slane %v1881_v4, 1  ;;  %v3567_v53 = vpack.c.bf16 %v333_v27, %v333_v27  ;;  %v1886_v33 = vshrl.u32 %v4722_v42, 16  ;;  %v424_v4 = vld [vmem:[#allocation2 + $0x5c] sm:$0x1]  ;;  %v1114_v27 = vld [vmem:[#allocation2 + $0x9c] sm:$0xe] }
  0xbe   : > { %2679 = vrot.lane.b32.xlu1 %v2644_v41, %s3807_s10  ;;  %v1879_v29 = vor.u32 %v1878_v62, %v1874_v63  ;;  %v1890_v10 = vrot.slane %v1888_v14, 1  ;;  %v1893_v30 = vshll.u32 %v4748_v5, 16  ;;  %v671_v13 = vor.u32 %v669_v15, %v4750_v52 }
  0xbf   : > { %v920_v3 = vld [vmem:[#allocation2 + $0x54] sm:$0xf]  ;;  %v1626_v58 = vsel %vm1584_vm7, %v1624_v50, %v1625_v22  ;;  %v1974_v63 = vrot.slane %v1972_v36, 1  ;;  %vm2755_vm15 = vcmask 72704   ;;  %v1977_v14 = vshll.u32 %v4757_v9, 16 }
  0xc0   : > { %v4740_v26 = vpop.permute.xlu1 %2161  ;;  %v4746_v41 = vpop.permute.xlu0 %2017  ;;  %1753 = vrot.lane.b32.xlu0 %v4658_v40, %s3802_s30  ;;  %v1970_v40 = vshrl.u32 %v4735_v7, 16  ;;  %v921_v62 = vsel %vm3939_vm9, %v663_v43, %v920_v3  ;;  %v672_v15 = vsel %vm3947_vm10, %v664_v25, %v671_v13  ;;  %v3455_v50 = vcombine.low %v1106_v48, %v4640_v6  ;;  %v1107_v36 = vld [vmem:[#allocation2 + $0x48] sm:$0xe] }
  0xc1   : > { %922 = vst [vmem:[#allocation2 + $0x54] sm:$0xf] %v921_v62  ;;  %v1884_v43 = vsel %vm1311_vm8, %v1879_v29, %v1883_v44  ;;  %923 = vst.msk [vmem:[#allocation2 + $0x58] sm:$0xf] %vm336_vm0, %v672_v15  ;;  %v797_v3 = vshll.u32 %v3566_v35, 16  ;;  %v1891_v49 = vor.u32 %v1890_v10, %v1886_v33  ;;  %v1895_v25 = vrot.slane %v1893_v30, 1 }
  0xc2   : > { %1530 = vrot.lane.b32.xlu1 %v1479_v32, %s3801_s29  ;;  %v4766_v32 = vld [vmem:[#allocation2 + $0xac] sm:$0xf]  ;;  %v1127_v13 = vld [vmem:[#allocation2 + $0x48] sm:$0xf]  ;;  %v805_v48 = vshll.u32 %v3567_v53, 16  ;;  %v3463_v37 = vcombine.low %v1114_v27, %v4715_v47  ;;  %v425_v30 = vsel %vm3874_vm5, 0, %v424_v4  ;;  %v2724_v33 = vsel %vm2722_vm14, %v2691_v17, %v4501_v56 }
  0xc3   : > { %v4779_v59 = vcombine.low %v1080_v18, %v4766_v32  ;;  %v802_v18 = vshrl.u32 %v3567_v53, 16  ;;  %v4793_v62 = vld [vmem:[#allocation2 + $0x4c] sm:$0xf]  ;;  %v976_v44 = vld [vmem:[#allocation2 + $0xb4] sm:$0xf]  ;;  %v3456_v53 = vcombine.low %v1107_v36, %v4697_v45  ;;  %v2109_v47 = vrot.slane %v3455_v50, 1 }
  0xc4   : > { %v4762_v39 = vpop.permute.xlu1 %2163  ;;  %v4768_v46 = vpop.permute.xlu0 %2019  ;;  %1755 = vrot.lane.b32.xlu0 %v4722_v42, %s3802_s30  ;;  %v4797_v42 = vld [vmem:[#allocation2 + $0xb0] ss:$0 sps:$4 sm:$0x11]   ;;  %426 = vst [vmem:[#allocation2 + $0x5c] sm:$0x1] %v425_v30  ;;  %vm2788_vm1 = vcmask 97280   ;;  %v4818_v17 = vcombine.low %v1127_v13, %v4793_v62 }
  0xc5   : > { %v4799_v29 = vrot.slane %v802_v18, 7  ;;  %v448_v27 = vld [vmem:[#allocation2 + $0xbc] sm:$0x1]  ;;  %v2110_v18 = vrot.slane %v4724_v0, 1  ;;  %v1979_v56 = vrot.slane %v1977_v14, 1  ;;  %v2133_v45 = vrot.slane %v3463_v37, 1 }
  0xc6   : > { %1657 = vrot.lane.b32.xlu1 %v1623_v55, %s3800_s28  ;;  %v794_v55 = vshrl.u32 %v3566_v35, 16  ;;  %v1984_v35 = vshll.u32 %v4779_v59, 16  ;;  %v1982_v0 = vshrl.u32 %v4779_v59, 16  ;;  %v2112_v14 = vrot.slane %v3456_v53, 1  ;;  %v1143_v36 = vld [vmem:[#allocation2 + $0xa8] sm:$0xf] }
  0xc7   : > { %vm2821_vm2 = vcmask 121856   ;;  %v2111_v13 = vsel %vm1584_vm7, %v2109_v47, %v2110_v18  ;;  %vm2854_vm4 = vcmask 146432   ;;  %vm2887_vm6 = vcmask 171008  }
  0xc8   : > { %v4785_v22 = vpop.permute.xlu1 %1506  ;;  %v4791_v51 = vpop.permute.xlu0 %2257  ;;  %v796_v6 = vrot.slane %v794_v55, 7  ;;  %2025 = vrot.lane.b32.xlu0 %v1884_v43, %s3804_s7  ;;  %v1896_v55 = vsel %vm1311_vm8, %v1891_v49, %v1895_v25  ;;  %v4833_v43 = vld [vmem:[#allocation2 + $0xac] sm:$0xf]  ;;  %v1115_v25 = vld [vmem:[#allocation2 + $0xa8] sm:$0xe]  ;;  %vm2920_vm11 = vcmask 195584  }
  0xc9   : > { %v4845_v30 = vld [vmem:[#allocation2 + $0x58] sm:$0xf]  ;;  %vm2968_vm12 = vcmask 220160  }
  0xca   : > { %1659 = vrot.lane.b32.xlu1 %v1626_v58, %s3800_s28  ;;  %v799_v15 = vor.u32 %v797_v3, %v796_v6  ;;  %v800_v24 = vrot.slane %v796_v6, 4  ;;  %v807_v58 = vor.u32 %v805_v48, %v4799_v29  ;;  %v1975_v3 = vor.u32 %v1974_v63, %v1970_v40  ;;  %v4837_v48 = vld [vmem:[#allocation2 + $0x50] ss:$0 sps:$4 sm:$0x11]  }
  0xcb   : > { %v1986_v40 = vrot.slane %v1984_v35, 1  ;;  %v1989_v63 = vshll.u32 %v4797_v42, 16  ;;  %v2113_v6 = vrot.slane %v4748_v5, 1  ;;  %v2388_v35 = vshll.u32 %v4818_v17, 16 }
  0xcc   : > { %v4807_v10 = vpop.permute.xlu1 %1522  ;;  %v977_v4 = vsel %vm3939_vm9, %v799_v15, %v976_v44  ;;  %v808_v50 = vsel %vm3947_vm10, %v800_v24, %v807_v58  ;;  %2027 = vrot.lane.b32.xlu0 %v1896_v55, %s3804_s7  ;;  %v673_v24 = vrot.slane %v4750_v52, 4  ;;  %v2757_v44 = vsel %vm2755_vm15, %v2724_v33, %v4577_v38  ;;  %v1129_v15 = vld [vmem:[#allocation2 + $0x54] sm:$0xf] }
  0xcd   : > { %978 = vst [vmem:[#allocation2 + $0xb4] sm:$0xf] %v977_v4  ;;  %v4822_v49 = vpop.permute.xlu0 %2259  ;;  %979 = vst.msk [vmem:[#allocation2 + $0xb8] sm:$0xf] %vm336_vm0, %v808_v50  ;;  %v2134_v52 = vrot.slane %v4757_v9, 1  ;;  %v1980_v53 = vsel %vm1311_vm8, %v1975_v3, %v1979_v56  ;;  %v1987_v47 = vor.u32 %v1986_v40, %v1982_v0  ;;  %v1991_v58 = vrot.slane %v1989_v63, 1 }
  0xce   : > { %1769 = vrot.lane.b32.xlu1 %v4735_v7, %s3802_s30  ;;  %v449_v7 = vsel %vm3874_vm5, 0, %v448_v27  ;;  %v4849_v5 = vcombine.low %v1143_v36, %v4833_v43  ;;  %v924_v27 = vld [vmem:[#allocation2 + $0x5c] sm:$0x1]  ;;  %v2707_v38 = vsel %vm2689_vm13, %v4077_v61, %v4726_v19  ;;  %v809_v55 = vrot.slane %v4799_v29, 4  ;;  %v1171_v4 = vld [vmem:[#allocation2 + $0x48] sm:$0xe] }
  0xcf   : > { %450 = vst [vmem:[#allocation2 + $0xbc] sm:$0x1] %v449_v7  ;;  %v925_v3 = vsel %vm3852_vm3, %v673_v24, %v924_v27  ;;  %v2114_v18 = vsel %vm1584_vm7, %v2112_v14, %v2113_v6  ;;  %v4863_v56 = vcombine.low %v1129_v15, %v4845_v30  ;;  %v2135_v61 = vsel %vm1584_vm7, %v2133_v45, %v2134_v52  ;;  %v1002_v50 = vld [vmem:[#allocation2 + $0x48] sm:$0xf]  ;;  %v4876_v24 = vld [vmem:[#allocation2 + $0x4c] sm:$0xf] }
  0xd0   : > { %v4829_v37 = vpop.permute.xlu1 %2033  ;;  %2153 = vrot.lane.b32.xlu0 %v2111_v13, %s3803_s6  ;;  %926 = vst [vmem:[#allocation2 + $0x5c] sm:$0x1] %v925_v3  ;;  %v2386_v19 = vshrl.u32 %v4818_v17, 16  ;;  %v2393_v29 = vshll.u32 %v4837_v48, 16  ;;  %v2740_v0 = vsel %vm2722_vm14, %v2707_v38, %v4681_v28  ;;  %v2693_v40 = vsel %vm2689_vm13, %v4044_v23, %v4785_v22  ;;  %v4890_v52 = vld [vmem:[#allocation2 + $0xa8] sm:$0xe] }
  0xd1   : > { %v2530_v33 = vpop.permute.xlu0 %2529  ;;  %v1992_v63 = vsel %vm1311_vm8, %v1987_v47, %v1991_v58  ;;  %v2484_v7 = vshll.u32 %v4849_v5, 16  ;;  %v3503_v36 = vcombine.low %v1171_v4, %v4793_v62  ;;  %v2137_v28 = vrot.slane %v4797_v42, 1  ;;  %v4883_v13 = vld [vmem:[#allocation2 + $0xb0] ss:$0 sps:$4 sm:$0x11]  }
  0xd2   : > { %1771 = vrot.lane.b32.xlu1 %v4779_v59, %s3802_s30  ;;  %v3464_v59 = vcombine.low %v1115_v25, %v4766_v32  ;;  %v2390_v32 = vrot.slane %v2388_v35, 1  ;;  %v2790_v22 = vsel %vm2788_vm1, %v2757_v44, %v4746_v41  ;;  %v2400_v6 = vshll.u32 %v4863_v56, 16 }
  0xd3   : > { %v2726_v62 = vsel %vm2722_vm14, %v2693_v40, %v4638_v31  ;;  %v2773_v42 = vsel %vm2755_vm15, %v2740_v0, %v4612_v21  ;;  %v2709_v41 = vsel %vm2689_vm13, %v4032_v12, %v4807_v10  ;;  %v2482_v58 = vshrl.u32 %v4849_v5, 16 }
  0xd4   : > { %v4855_v9 = vpop.permute.xlu1 %2035  ;;  %2155 = vrot.lane.b32.xlu0 %v2114_v18, %s3803_s6  ;;  %v2136_v25 = vrot.slane %v3464_v59, 1  ;;  %v2391_v15 = vor.u32 %v2390_v32, %v2386_v19  ;;  %v1145_v44 = vld [vmem:[#allocation2 + $0xb4] sm:$0xf]  ;;  %v4902_v47 = vld [vmem:[#allocation2 + $0xb8] sm:$0xf]  ;;  %v2486_v27 = vrot.slane %v2484_v7, 1  ;;  %v4906_v31 = vcombine.low %v1002_v50, %v4876_v24 }
  0xd5   : > { %v2823_v21 = vsel %vm2821_vm2, %v2790_v22, %v4661_v60  ;;  %v3511_v12 = vcombine.low %v4890_v52, %v4833_v43  ;;  %v2759_v3 = vsel %vm2755_vm15, %v2726_v62, %v4605_v34  ;;  %v2398_v18 = vshrl.u32 %v4863_v56, 16  ;;  %v4932_v34 = vld [vmem:[#allocation2 + $0x50] ss:$0 sps:$4 sm:$0x11]   ;;  %v4934_v50 = vld [vmem:[#allocation2 + $0x54] sm:$0xe] }
  0xd6   : > { %2041 = vrot.lane.b32.xlu1 %v1980_v53, %s3804_s7  ;;  %v980_v14 = vld [vmem:[#allocation2 + $0xbc] sm:$0x1]  ;;  %v4897_v35 = vpop.permute.xlu0 %2531  ;;  %v2395_v53 = vrot.slane %v2393_v29, 1  ;;  %v2138_v59 = vsel %vm1584_vm7, %v2136_v25, %v2137_v28  ;;  %v2856_v60 = vsel %vm2854_vm4, %v2823_v21, %v4791_v51  ;;  %v2402_v4 = vrot.slane %v2400_v6, 1  ;;  %v4950_v22 = vld [vmem:[#allocation2 + $0x58] sm:$0xf] }
  0xd7   : > { %v981_v23 = vsel %vm3852_vm3, %v809_v55, %v980_v14  ;;  %v4917_v10 = vld [vmem:[#allocation2 + $0x5c] ss:$0 sps:$4 sm:$0x11]   ;;  %v2489_v55 = vshll.u32 %v4883_v13, 16  ;;  %v2792_v19 = vsel %vm2788_vm1, %v2759_v3, %v4768_v46  ;;  %v2889_v43 = vsel %vm2887_vm6, %v2856_v60, %v2530_v33  ;;  %v1004_v14 = vld [vmem:[#allocation2 + $0x54] sm:$0xf] }
  0xd8   : > { %v4878_v45 = vpop.permute.xlu1 %2273  ;;  %982 = vst [vmem:[#allocation2 + $0xbc] sm:$0x1] %v981_v23  ;;  %2265 = vrot.lane.b32.xlu0 %v4818_v17, %s3805_s8  ;;  %v2742_v17 = vsel %vm2722_vm14, %v2709_v41, %v4717_v20  ;;  %v2405_v29 = vshll.u32 %v4917_v10, 16  ;;  %v4938_v0 = vcombine.low %v1145_v44, %v4902_v47  ;;  %v2621_v20 = vrot.slane %v3503_v36, 1  ;;  %v1018_v23 = vld [vmem:[#allocation2 + $0xa8] sm:$0xf] }
  0xd9   : > { %v2622_v40 = vrot.slane %v4837_v48, 1  ;;  %v2396_v33 = vsel %vm1311_vm8, %v2391_v15, %v2395_v53  ;;  %v1387_v7 = vshll.u32 %v4906_v31, 16  ;;  %v2806_v25 = vsel %vm2788_vm1, %v2773_v42, %v4829_v37  ;;  %v4960_v62 = vld [vmem:[#allocation2 + $0xac] sm:$0xf]  ;;  %v257_v3 = vld [vmem:[%s3888_s25 + $0xf8] sm:$0xff] }
  0xda   : > { %2043 = vrot.lane.b32.xlu1 %v1992_v63, %s3804_s7  ;;  %v2658_v32 = vpop.permute.xlu0 %2657  ;;  %v2491_v63 = vrot.slane %v2489_v55, 1  ;;  %v2825_v36 = vsel %vm2821_vm2, %v2792_v19, %v4693_v57  ;;  %v2403_v48 = vor.u32 %v2402_v4, %v2398_v18  ;;  %v2407_v28 = vrot.slane %v2405_v29, 1  ;;  %v395_v19 = vld [vmem:[#allocation2 + $0xc0] sm:$0x1] }
  0xdb   : > { %v2922_v51 = vsel %vm2920_vm11, %v2889_v43, %v2658_v32  ;;  %v2858_v6 = vsel %vm2854_vm4, %v2825_v36, %v4822_v49  ;;  %v1392_v37 = vshll.u32 %v4932_v34, 16  ;;  %v3504_v57 = vcombine.low %v4934_v50, %v4845_v30  ;;  %v4998_v32 = vld [vmem:[#allocation2 + $0xb4] sm:$0xe] }
  0xdc   : > { %v4910_v38 = vpop.permute.xlu1 %2275  ;;  %2267 = vrot.lane.b32.xlu0 %v4863_v56, %s3805_s8  ;;  %3592 = vmatprep.mubr.msk.bf16.mxu0 %vm2968_vm12, %v2922_v51  ;;  %v2775_v56 = vsel %vm2755_vm15, %v2742_v17, %v4653_v54  ;;  %v2496_v42 = vshll.u32 %v4938_v0, 16  ;;  %v2623_v54 = vsel %vm1584_vm7, %v2621_v20, %v2622_v40  ;;  %v1385_v49 = vshrl.u32 %v4906_v31, 16  ;;  %v3789_v40 = vld [vmem:[%s5515_s3] ss:$0 sm:$0xff] }
  0xdd   : > { %v2839_v53 = vsel %vm2821_vm2, %v2806_v25, %v4740_v26  ;;  %v4976_v30 = vcombine.low %v1004_v14, %v4950_v22  ;;  %v2408_v21 = vsel %vm1311_vm8, %v2403_v48, %v2407_v28  ;;  %v2646_v55 = vrot.slane %v4883_v13, 1  ;;  %v256_v26 = vld [vmem:[%s3888_s25 + $0xf0] sm:$0xff] }
  0xde   : > { %2169 = vrot.lane.b32.xlu1 %v2135_v61, %s3803_s6  ;;  %v2487_v61 = vor.u32 %v2486_v27, %v2482_v58  ;;  %v4957_v52 = vpop.permute.xlu0 %1508  ;;  %v1389_v58 = vrot.slane %v1387_v7, 1  ;;  %v2808_v27 = vsel %vm2788_vm1, %v2775_v56, %v4855_v9  ;;  %v2872_v60 = vsel %vm2854_vm4, %v2839_v53, %v4878_v45  ;;  %v5010_v7 = vld [vmem:[#allocation2 + $0x5c] ss:$0 sps:$4 sm:$0x11]  }
  0xdf   : > { %v4966_v15 = vld [vmem:[#allocation2 + $0xbc] ss:$0 sps:$4 sm:$0x11]   ;;  %v2891_v18 = vsel %vm2887_vm6, %v2858_v6, %v4897_v35  ;;  %v1394_v17 = vrot.slane %v1392_v37, 1  ;;  %v4993_v9 = vcombine.low %v1018_v23, %v4960_v62  ;;  %v2494_v45 = vshrl.u32 %v4938_v0, 16 }
  0xe0   : > { %v2546_v46 = vpop.permute.xlu1 %2545  ;;  %2537 = vrot.lane.b32.xlu0 %v2396_v33, %s3806_s9  ;;  %v2492_v44 = vsel %vm1311_vm8, %v2487_v61, %v2491_v63  ;;  %v2498_v29 = vrot.slane %v2496_v42, 1  ;;  %v2501_v35 = vshll.u32 %v4966_v15, 16  ;;  %v1390_v51 = vor.u32 %v1389_v58, %v1385_v49  ;;  %v3790_v23 = vld [vmem:[%s5516_s4] ss:$0 sm:$0xff]  ;;  %v5028_v42 = vld [vmem:[#allocation2 + $0xb8] sm:$0xf] }
  0xe1   : > { %v2905_v50 = vsel %vm2887_vm6, %v2872_v60, %v2546_v46  ;;  %v1399_v20 = vshll.u32 %v4976_v30, 16  ;;  %v295_v33 = vmul.f32 %v3789_v40, %v256_v26  ;;  %v2624_v63 = vrot.slane %v3504_v57, 1  ;;  %v1020_v57 = vld [vmem:[#allocation2 + $0xb4] sm:$0xf] }
  0xe2   : > { %2171 = vrot.lane.b32.xlu1 %v2138_v59, %s3803_s6  ;;  %v4981_v59 = vrot.slane %v3511_v12, 1  ;;  %v2660_v4 = vpop.permute.xlu0 %2659  ;;  %v4995_v12 = vld [vmem:[#allocation2 + $0xb0] ss:$0 sps:$4 sm:$0x11]   ;;  %v296_v14 = vmul.f32 %v3789_v40, %v257_v3  ;;  %v396_v46 = vsel %vm3852_vm3, 0, %v395_v19  ;;  %v2841_v25 = vsel %vm2821_vm2, %v2808_v27, %v4762_v39 }
  0xe3   : > { %v2924_v43 = vsel %vm2920_vm11, %v2891_v18, %v2660_v4  ;;  %v3512_v36 = vcombine.low %v4998_v32, %v4902_v47  ;;  %v1483_v28 = vshll.u32 %v4993_v9, 16  ;;  %v334_v56 = vadd.f32 %v3790_v23, %v295_v33  ;;  %397 = vst [vmem:[#allocation2 + $0xc0] sm:$0x1] %v396_v46  ;;  %v1044_v18 = vld [vmem:[#allocation2 + $0x48] sm:$0xe] }
  0xe4   : > { %v4971_v41 = vpop.permute.xlu1 %2547  ;;  %2539 = vrot.lane.b32.xlu0 %v2408_v21, %s3806_s9  ;;  %3593 = vmatmul.mubr.msk.bf16.vlgmr.msra.gmra.mxu0 %vm2968_vm12, %v2924_v43  ;;  %v2499_v6 = vor.u32 %v2498_v29, %v2494_v45  ;;  %v2503_v39 = vrot.slane %v2501_v35, 1  ;;  %v1488_v37 = vshll.u32 %v4995_v12, 16  ;;  %v1395_v53 = vsel %vm1311_vm8, %v1390_v51, %v1394_v17  ;;  %v451_v33 = vld [vmem:[#allocation2 + $0xc8] sm:$0x1]  ;;  %v454_v32 = vld [vmem:[#allocation2 + $0xd4] sm:$0x1] }
  0xe5   : > { %v1397_v58 = vshrl.u32 %v4976_v30, 16  ;;  %v1401_v27 = vrot.slane %v1399_v20, 1  ;;  %v3568_v21 = vpack.c.bf16 %v334_v56, %v334_v56  ;;  %v2625_v26 = vrot.slane %v4917_v10, 1  ;;  %v1045_v56 = vld [vmem:[#allocation2 + $0x54] sm:$0xe] }
  0xe6   : > { %2281 = vrot.lane.b32.xlu1 %v4849_v5, %s3805_s8  ;;  %v5021_v48 = vpop.permute.xlu0 %1510  ;;  %v1481_v3 = vshrl.u32 %v4993_v9, 16  ;;  %v1404_v60 = vshll.u32 %v5010_v7, 16  ;;  %v1485_v43 = vrot.slane %v1483_v28, 1  ;;  %v2874_v29 = vsel %vm2854_vm4, %v2841_v25, %v4910_v38 }
  0xe7   : > { %v811_v17 = vshrl.u32 %v3568_v21, 16  ;;  %v814_v45 = vshll.u32 %v3568_v21, 16  ;;  %v2504_v10 = vsel %vm1311_vm8, %v2499_v6, %v2503_v39  ;;  %v3409_v20 = vcombine.low %v1044_v18, %v4876_v24  ;;  %v5063_v39 = vld [vmem:[#allocation2 + $0xbc] ss:$0 sps:$4 sm:$0x11]  }
  0xe8   : > { %v2674_v5 = vpop.permute.xlu1 %2673  ;;  %2665 = vrot.lane.b32.xlu0 %v2623_v54, %s3807_s10  ;;  %v5042_v54 = vcombine.low %v1020_v57, %v5028_v42  ;;  %v1406_v38 = vrot.slane %v1404_v60, 1  ;;  %v1486_v28 = vor.u32 %v1485_v43, %v1481_v3  ;;  %v3410_v21 = vcombine.low %v1045_v56, %v4950_v22  ;;  %v1066_v18 = vld [vmem:[#allocation2 + $0x54] sm:$0xf] }
  0xe9   : > { %v2938_v61 = vsel %vm2920_vm11, %v2905_v50, %v2674_v5  ;;  %v2907_v5 = vsel %vm2887_vm6, %v2874_v29, %v4971_v41  ;;  %v813_v40 = vrot.slane %v811_v17, 7  ;;  %v2648_v8 = vrot.slane %v3512_v36, 1  ;;  %v1052_v17 = vld [vmem:[#allocation2 + $0xa8] sm:$0xe] }
  0xea   : > { %2283 = vrot.lane.b32.xlu1 %v4938_v0, %s3805_s8  ;;  %3608 = vmatprep.mubr.msk.bf16.mxu1 %vm2968_vm12, %v2938_v61  ;;  %v335_v0 = vadd.f32 %v3790_v23, %v296_v14  ;;  %v5039_v19 = vpop.permute.xlu0 %1637  ;;  %v2626_v14 = vsel %vm1584_vm7, %v2624_v63, %v2625_v26  ;;  %v983_v25 = vld [vmem:[#allocation2 + $0xc0] sm:$0xf]  ;;  %v1490_v23 = vrot.slane %v1488_v37, 1  ;;  %v2647_v63 = vsel %vm1584_vm7, %v4981_v59, %v2646_v55  ;;  %v398_v59 = vld [vmem:[#allocation2 + $0xcc] sm:$0x1] }
  0xeb   : > { %v816_v24 = vor.u32 %v814_v45, %v813_v40  ;;  %v817_v6 = vrot.slane %v813_v40, 4  ;;  %v1495_v57 = vshll.u32 %v5042_v54, 16  ;;  %v1604_v37 = vrot.slane %v4932_v34, 1 }
  0xec   : > { %v5030_v49 = vpop.permute.xlu1 %1524  ;;  %v3569_v4 = vpack.c.bf16 %v335_v0, %v335_v0  ;;  %1516 = vrot.lane.b32.xlu0 %v1395_v53, %s3801_s29  ;;  %v452_v53 = vsel %vm3874_vm5, 0, %v451_v33  ;;  %v1491_v34 = vsel %vm1311_vm8, %v1486_v28, %v1490_v23  ;;  %v1493_v60 = vshrl.u32 %v5042_v54, 16 }
  0xed   : > { %v984_v13 = vsel %vm3939_vm9, %v816_v24, %v983_v25  ;;  %453 = vst [vmem:[#allocation2 + $0xc8] sm:$0x1] %v452_v53  ;;  %v2649_v16 = vrot.slane %v4966_v15, 1  ;;  %v1497_v22 = vrot.slane %v1495_v57, 1  ;;  %v1500_v43 = vshll.u32 %v5063_v39, 16 }
  0xee   : > { %2553 = vrot.lane.b32.xlu1 %v2492_v44, %s3806_s9  ;;  %v819_v35 = vshrl.u32 %v3569_v4, 16  ;;  %v822_v50 = vshll.u32 %v3569_v4, 16  ;;  %v1402_v44 = vor.u32 %v1401_v27, %v1397_v58  ;;  %v5057_v41 = vpop.permute.xlu0 %1639  ;;  %v1603_v27 = vrot.slane %v3409_v20, 1  ;;  %985 = vst [vmem:[#allocation2 + $0xc0] sm:$0xf] %v984_v13 }
  0xef   : > { %v5087_v4 = vld [vmem:[#allocation2 + $0x58] sm:$0xf]  ;;  %v399_v45 = vsel %vm3852_vm3, 0, %v398_v59  ;;  %v1607_v15 = vrot.slane %v5010_v7, 1  ;;  %v2650_v40 = vsel %vm1584_vm7, %v2648_v8, %v2649_v16  ;;  %v1498_v33 = vor.u32 %v1497_v22, %v1493_v60  ;;  %v1082_v24 = vld [vmem:[#allocation2 + $0xb4] sm:$0xf] }
  0xf0   : > { %v2676_v51 = vpop.permute.xlu1 %2675  ;;  %v5053_v46 = vrot.slane %v819_v35, 7  ;;  %2667 = vrot.lane.b32.xlu0 %v2626_v14, %s3807_s10  ;;  %v1407_v55 = vsel %vm1311_vm8, %v1402_v44, %v1406_v38  ;;  %400 = vst [vmem:[#allocation2 + $0xcc] sm:$0x1] %v399_v45  ;;  %v1605_v36 = vsel %vm1584_vm7, %v1603_v27, %v1604_v37  ;;  %v3425_v35 = vcombine.low %v1066_v18, %v5087_v4  ;;  %v5105_v44 = vld [vmem:[#allocation2 + $0x64] sm:$0xf] }
  0xf1   : > { %v2940_v61 = vsel %vm2920_vm11, %v2907_v5, %v2676_v51  ;;  %v3417_v51 = vcombine.low %v1052_v17, %v4960_v62  ;;  %v5107_v20 = vld [vmem:[#allocation2 + $0x5c] ss:$0 sps:$4 sm:$0x11]   ;;  %v1053_v14 = vld [vmem:[#allocation2 + $0xb4] sm:$0xe]  ;;  %v455_v7 = vsel %vm3874_vm5, 0, %v454_v32 }
  0xf2   : > { %2555 = vrot.lane.b32.xlu1 %v2504_v10, %s3806_s9  ;;  %3609 = vmatmul.mubr.msk.bf16.vlgmr.msra.gmra.mxu1 %vm2968_vm12, %v2940_v61  ;;  %v824_v0 = vor.u32 %v822_v50, %v5053_v46  ;;  %v5080_v3 = vpop.permute.xlu0 %1749  ;;  %v826_v47 = vrot.slane %v5053_v46, 4  ;;  %v1606_v10 = vrot.slane %v3410_v21, 1  ;;  %v1068_v50 = vld [vmem:[#allocation2 + $0x60] sm:$0xf]  ;;  %v1502_v61 = vrot.slane %v1500_v43, 1 }
  0xf3   : > { %456 = vst [vmem:[#allocation2 + $0xd4] sm:$0x1] %v455_v7  ;;  %v3426_v28 = vcombine.low %v1068_v50, %v5105_v44  ;;  %v1900_v23 = vshll.u32 %v3425_v35, 16  ;;  %v3418_v11 = vcombine.low %v1053_v14, %v5028_v42  ;;  %v1628_v1 = vrot.slane %v4995_v12, 1  ;;  %v5125_v57 = vld [vmem:[#allocation2 + $0xb8] sm:$0xf] }
  0xf4   : > { %v5069_v58 = vpop.permute.xlu1 %1526  ;;  %v825_v26 = vsel %vm3947_vm10, %v817_v6, %v824_v0  ;;  %1518 = vrot.lane.b32.xlu0 %v1407_v55, %s3801_s29  ;;  %v987_v38 = vld [vmem:[#allocation2 + $0xc8] sm:$0x1]  ;;  %v1608_v25 = vsel %vm1584_vm7, %v1606_v10, %v1607_v15  ;;  %v1503_v6 = vsel %vm1311_vm8, %v1498_v33, %v1502_v61  ;;  %v1905_v0 = vshll.u32 %v5107_v20, 16  ;;  %v1108_v32 = vld [vmem:[#allocation2 + $0x54] sm:$0xe] }
  0xf5   : > { %986 = vst.msk [vmem:[#allocation2 + $0xc4] sm:$0xf] %vm336_vm0, %v825_v26  ;;  %v988_v62 = vsel %vm3852_vm3, %v826_v47, %v987_v38  ;;  %v1898_v37 = vshrl.u32 %v3425_v35, 16  ;;  %v1902_v13 = vrot.slane %v1900_v23, 1  ;;  %v1912_v55 = vshll.u32 %v3426_v28, 16 }
  0xf6   : > { %2681 = vrot.lane.b32.xlu1 %v2647_v63, %s3807_s10  ;;  %v5102_v5 = vpop.permute.xlu0 %1751  ;;  %989 = vst [vmem:[#allocation2 + $0xc8] sm:$0x1] %v988_v62  ;;  %v1627_v63 = vrot.slane %v3417_v51, 1  ;;  %v5131_v59 = vld [vmem:[#allocation2 + $0x68] ss:$0 sps:$4 sm:$0x11]   ;;  %v3433_v27 = vcombine.low %v1082_v24, %v5125_v57 }
  0xf7   : > { %v1630_v21 = vrot.slane %v3418_v11, 1  ;;  %v1631_v26 = vrot.slane %v5063_v39, 1  ;;  %v1084_v60 = vld [vmem:[#allocation2 + $0xc0] sm:$0xf]  ;;  %v1903_v16 = vor.u32 %v1902_v13, %v1898_v37  ;;  %v1910_v22 = vshrl.u32 %v3426_v28, 16 }
  0xf8   : > { %v5094_v29 = vpop.permute.xlu1 %1653  ;;  %1645 = vrot.lane.b32.xlu0 %v1605_v36, %s3800_s28  ;;  %v1629_v12 = vsel %vm1584_vm7, %v1627_v63, %v1628_v1  ;;  %v1914_v43 = vrot.slane %v1912_v55, 1  ;;  %v1917_v17 = vshll.u32 %v5131_v59, 16  ;;  %v1996_v47 = vshll.u32 %v3433_v27, 16  ;;  %v5150_v10 = vld [vmem:[#allocation2 + $0xbc] ss:$0 sps:$4 sm:$0x11]  }
  0xf9   : > { %v1632_v39 = vsel %vm1584_vm7, %v1630_v21, %v1631_v26  ;;  %v1994_v61 = vshrl.u32 %v3433_v27, 16  ;;  %v1109_v38 = vld [vmem:[#allocation2 + $0x60] sm:$0xe]  ;;  %v2001_v7 = vshll.u32 %v5150_v10, 16  ;;  %vm3240_vm0 = vcmask 523264  }
  0xfa   : > { %1532 = vrot.lane.b32.xlu1 %v1491_v34, %s3801_s29  ;;  %v5120_v56 = vpop.permute.xlu0 %2021  ;;  %v1907_v34 = vrot.slane %v1905_v0, 1  ;;  %v1915_v50 = vor.u32 %v1914_v43, %v1910_v22  ;;  %v1919_v51 = vrot.slane %v1917_v17, 1  ;;  %v1998_v14 = vrot.slane %v1996_v47, 1  ;;  %v1131_v1 = vld [vmem:[#allocation2 + $0x60] sm:$0xf] }
  0xfb   : > { %v3458_v24 = vcombine.low %v1109_v38, %v5105_v44  ;;  %v5172_v0 = vld [vmem:[#allocation2 + $0x64] sm:$0xf]  ;;  %v2003_v37 = vrot.slane %v2001_v7, 1  ;;  %v5184_v22 = vld [vmem:[#allocation2 + $0x70] sm:$0xf] }
  0xfc   : > { %v5112_v46 = vpop.permute.xlu1 %1655  ;;  %1647 = vrot.lane.b32.xlu0 %v1608_v25, %s3800_s28  ;;  %v5142_v18 = vld [vmem:[#allocation2 + $0xc4] sm:$0xf]  ;;  %v1999_v63 = vor.u32 %v1998_v14, %v1994_v61  ;;  %v1147_v7 = vld [vmem:[#allocation2 + $0xc0] sm:$0xf] }
  0xfd   : > { %v3434_v36 = vcombine.low %v1084_v60, %v5142_v18  ;;  %v5161_v62 = vld [vmem:[#allocation2 + $0xc8] ss:$0 sps:$4 sm:$0x11]   ;;  %v2118_v26 = vrot.slane %v3458_v24, 1 }
  0xfe   : > { %2683 = vrot.lane.b32.xlu1 %v2650_v40, %s3807_s10  ;;  %v5134_v42 = vpop.permute.xlu0 %2023  ;;  %v3457_v40 = vcombine.low %v1108_v32, %v5087_v4  ;;  %v2116_v4 = vrot.slane %v5107_v20, 1  ;;  %v1116_v20 = vld [vmem:[#allocation2 + $0xb4] sm:$0xe]  ;;  %v2004_v43 = vsel %vm1311_vm8, %v1999_v63, %v2003_v37 }
  0xff   : > { %v2008_v25 = vshll.u32 %v3434_v36, 16  ;;  %v2006_v13 = vshrl.u32 %v3434_v36, 16  ;;  %v3465_v32 = vcombine.low %v1116_v20, %v5125_v57  ;;  %v2140_v57 = vrot.slane %v5150_v10, 1  ;;  %v1149_v20 = vld [vmem:[#allocation2 + $0xcc] sm:$0xf] }
 0x100   : > { %v5128_v53 = vpop.permute.xlu1 %1765  ;;  %1757 = vrot.lane.b32.xlu0 %v3425_v35, %s3802_s30  ;;  %v1908_v35 = vsel %vm1311_vm8, %v1903_v16, %v1907_v34  ;;  %v2115_v11 = vrot.slane %v3457_v40, 1  ;;  %v3473_v34 = vcombine.low %v1131_v1, %v5172_v0  ;;  %v1133_v16 = vld [vmem:[#allocation2 + $0x6c] sm:$0xf]  ;;  %v5210_v1 = vld [vmem:[#allocation2 + $0x74] ss:$0 sps:$4 sm:$0x11]  }
 0x101   : > { %v2010_v55 = vrot.slane %v2008_v25, 1  ;;  %v2139_v14 = vrot.slane %v3465_v32, 1  ;;  %v5199_v25 = vld [vmem:[#allocation2 + $0xc4] sm:$0xf] }
 0x102   : > { %1534 = vrot.lane.b32.xlu1 %v1503_v6, %s3801_s29  ;;  %v5146_v45 = vpop.permute.xlu0 %2149  ;;  %v2117_v44 = vsel %vm1584_vm7, %v2115_v11, %v2116_v4  ;;  %v2410_v63 = vshrl.u32 %v3473_v34, 16  ;;  %v5541_v32 = vld [vmem:[#allocation4_spill] sm:$0xff] }
 0x103   : > { %v2011_v17 = vor.u32 %v2010_v55, %v2006_v13  ;;  %v2141_v55 = vsel %vm1584_vm7, %v2139_v14, %v2140_v57  ;;  %v5238_v14 = vld [vmem:[#allocation2 + $0xc8] ss:$0 sps:$4 sm:$0x11]   ;;  %v5542_v57 = vld [vmem:[#allocation3_spill] sm:$0xff] }
 0x104   : > { %v5139_v8 = vpop.permute.xlu1 %1767  ;;  %1759 = vrot.lane.b32.xlu0 %v3426_v28, %s3802_s30  ;;  %v1920_v28 = vsel %vm1311_vm8, %v1915_v50, %v1919_v51  ;;  %v3474_v50 = vcombine.low %v1133_v16, %v5184_v22  ;;  %v2412_v51 = vshll.u32 %v3473_v34, 16 }
 0x106   : > { %1661 = vrot.lane.b32.xlu1 %v1629_v12, %s3800_s28  ;;  %v5158_v33 = vpop.permute.xlu0 %2151  ;;  %v2013_v12 = vshll.u32 %v5161_v62, 16  ;;  %v2414_v10 = vrot.slane %v2412_v51, 1  ;;  %v2422_v16 = vshrl.u32 %v3474_v50, 16 }
 0x108   : > { %v5152_v15 = vpop.permute.xlu1 %2037  ;;  %2029 = vrot.lane.b32.xlu0 %v1908_v35, %s3804_s7  ;;  %v2015_v47 = vrot.slane %v2013_v12, 1  ;;  %v5191_v35 = vld [vmem:[#allocation2 + $0x68] ss:$0 sps:$4 sm:$0x11]  }
 0x109   : > { %v2417_v4 = vshll.u32 %v5191_v35, 16 }
 0x10a   : > { %1663 = vrot.lane.b32.xlu1 %v1632_v39, %s3800_s28  ;;  %v5170_v6 = vpop.permute.xlu0 %2261  ;;  %v2016_v61 = vsel %vm1311_vm8, %v2011_v17, %v2015_v47  ;;  %v2429_v47 = vshll.u32 %v5210_v1, 16 }
 0x10c   : > { %v5163_v23 = vpop.permute.xlu1 %2039  ;;  %2031 = vrot.lane.b32.xlu0 %v1920_v28, %s3804_s7  ;;  %v2695_v28 = vsel %vm2689_vm13, %v4197_v2, %v4957_v52  ;;  %v3481_v52 = vcombine.low %v1147_v7, %v5199_v25 }
 0x10d   : > { %v2728_v24 = vsel %vm2722_vm14, %v2695_v28, %v5039_v19  ;;  %v2143_v19 = vrot.slane %v5161_v62, 1  ;;  %v1173_v62 = vld [vmem:[#allocation2 + $0x60] sm:$0xe] }
 0x10e   : > { %1773 = vrot.lane.b32.xlu1 %v3433_v27, %s3802_s30  ;;  %v2119_v27 = vrot.slane %v5131_v59, 1  ;;  %v5182_v60 = vpop.permute.xlu0 %2263  ;;  %v1117_v59 = vld [vmem:[#allocation2 + $0xc0] sm:$0xe]  ;;  %v2761_v37 = vsel %vm2755_vm15, %v2728_v24, %v5080_v3  ;;  %v2508_v51 = vshll.u32 %v3481_v52, 16  ;;  %v2431_v24 = vrot.slane %v2429_v47, 1 }
 0x10f   : > { %v3466_v38 = vcombine.low %v1117_v59, %v5142_v18  ;;  %v2424_v18 = vshll.u32 %v3474_v50, 16  ;;  %v2794_v13 = vsel %vm2788_vm1, %v2761_v37, %v5120_v56  ;;  %v2697_v59 = vsel %vm2689_vm13, %v5541_v32, %v5021_v48 }
 0x110   : > { %v5175_v21 = vpop.permute.xlu1 %2165  ;;  %2157 = vrot.lane.b32.xlu0 %v2117_v44, %s3803_s6  ;;  %v5220_v44 = vld [vmem:[#allocation2 + $0xd0] sm:$0xf]  ;;  %v3505_v48 = vcombine.low %v1173_v62, %v5172_v0  ;;  %v5543_v62 = vld [vmem:[#allocation5_spill] sm:$0xff] }
 0x111   : > { %v2142_v12 = vrot.slane %v3466_v38, 1  ;;  %v2426_v17 = vrot.slane %v2424_v18, 1  ;;  %v2711_v38 = vsel %vm2689_vm13, %v5542_v57, %v5030_v49  ;;  %v2510_v18 = vrot.slane %v2508_v51, 1 }
 0x112   : > { %1775 = vrot.lane.b32.xlu1 %v3434_v36, %s3802_s30  ;;  %v2120_v36 = vsel %vm1584_vm7, %v2118_v26, %v2119_v27  ;;  %v2534_v40 = vpop.permute.xlu0 %2533  ;;  %v2827_v26 = vsel %vm2821_vm2, %v2794_v13, %v5146_v45  ;;  %v2419_v27 = vrot.slane %v2417_v4, 1  ;;  %v2744_v0 = vsel %vm2722_vm14, %v2711_v38, %v5094_v29  ;;  %s5408_s30 = scalar_lea.vmem %s5517_s5, %s3536_s22 }
 0x113   : > { %v2860_v56 = vsel %vm2854_vm4, %v2827_v26, %v5170_v6  ;;  %v2144_v6 = vsel %vm1584_vm7, %v2142_v12, %v2143_v19  ;;  %v2427_v4 = vor.u32 %v2426_v17, %v2422_v16  ;;  %v2513_v13 = vshll.u32 %v5238_v14, 16  ;;  %v5260_v12 = vld [vmem:[#allocation2 + $0xd4] ss:$0 sps:$4 sm:$0x11]  }
 0x114   : > { %v5188_v39 = vpop.permute.xlu1 %2167  ;;  %2159 = vrot.lane.b32.xlu0 %v2120_v36, %s3803_s6  ;;  %v2893_v45 = vsel %vm2887_vm6, %v2860_v56, %v2534_v40  ;;  %v2730_v40 = vsel %vm2722_vm14, %v2697_v59, %v5057_v41  ;;  %v2627_v26 = vrot.slane %v3505_v48, 1  ;;  %v2713_v32 = vsel %vm2689_vm13, %v5543_v62, %v5069_v58 }
 0x115   : > { %v2515_v47 = vrot.slane %v2513_v13, 1  ;;  %v2746_v51 = vsel %vm2722_vm14, %v2713_v32, %v5112_v46 }
 0x116   : > { %2045 = vrot.lane.b32.xlu1 %v2004_v43, %s3804_s7  ;;  %v2536_v2 = vpop.permute.xlu0 %2535  ;;  %v2415_v43 = vor.u32 %v2414_v10, %v2410_v63  ;;  %v1174_v63 = vld [vmem:[#allocation2 + $0x6c] sm:$0xe]  ;;  %v2763_v10 = vsel %vm2755_vm15, %v2730_v40, %v5102_v5  ;;  %v2777_v5 = vsel %vm2755_vm15, %v2744_v0, %v5128_v53  ;;  %v2779_v48 = vsel %vm2755_vm15, %v2746_v51, %v5139_v8 }
 0x117   : > { %v2796_v41 = vsel %vm2788_vm1, %v2763_v10, %v5134_v42  ;;  %v3506_v29 = vcombine.low %v1174_v63, %v5184_v22  ;;  %v2810_v42 = vsel %vm2788_vm1, %v2777_v5, %v5152_v15  ;;  %v2812_v46 = vsel %vm2788_vm1, %v2779_v48, %v5163_v23 }
 0x118   : > { %v5204_v11 = vpop.permute.xlu1 %2277  ;;  %2269 = vrot.lane.b32.xlu0 %v3473_v34, %s3805_s8  ;;  %v3482_v34 = vcombine.low %v1149_v20, %v5220_v44  ;;  %v2420_v28 = vsel %vm1311_vm8, %v2415_v43, %v2419_v27  ;;  %v2829_v19 = vsel %vm2821_vm2, %v2796_v41, %v5158_v33  ;;  %v2432_v27 = vsel %vm1311_vm8, %v2427_v4, %v2431_v24 }
 0x119   : > { %v2843_v53 = vsel %vm2821_vm2, %v2810_v42, %v5175_v21  ;;  %v2652_v63 = vrot.slane %v5238_v14, 1 }
 0x11a   : > { %2047 = vrot.lane.b32.xlu1 %v2016_v61, %s3804_s7  ;;  %v2662_v36 = vpop.permute.xlu0 %2661  ;;  %v2520_v37 = vshll.u32 %v3482_v34, 16  ;;  %v2518_v16 = vshrl.u32 %v3482_v34, 16  ;;  %v2876_v22 = vsel %vm2854_vm4, %v2843_v53, %v5204_v11 }
 0x11b   : > { %v2926_v61 = vsel %vm2920_vm11, %v2893_v45, %v2662_v36  ;;  %v2630_v45 = vrot.slane %v3506_v29, 1  ;;  %v2631_v36 = vrot.slane %v5210_v1, 1 }
 0x11c   : > { %v5224_v3 = vpop.permute.xlu1 %2279  ;;  %2271 = vrot.lane.b32.xlu0 %v3474_v50, %s3805_s8  ;;  %3596 = vmatprep.mubr.msk.bf16.mxu0 %vm2968_vm12, %v2926_v61  ;;  %v2506_v50 = vshrl.u32 %v3481_v52, 16  ;;  %v2522_v17 = vrot.slane %v2520_v37, 1 }
 0x11d   : > { %v2632_v1 = vsel %vm1584_vm7, %v2630_v45, %v2631_v36 }
 0x11e   : > { %2173 = vrot.lane.b32.xlu1 %v2141_v55, %s3803_s6  ;;  %v5252_v49 = vpop.permute.xlu0 %1512  ;;  %v2628_v55 = vrot.slane %v5191_v35, 1  ;;  %v2862_v35 = vsel %vm2854_vm4, %v2829_v19, %v5182_v60  ;;  %v2511_v43 = vor.u32 %v2510_v18, %v2506_v50  ;;  %v2525_v60 = vshll.u32 %v5260_v12, 16 }
 0x11f   : > { %v2895_v33 = vsel %vm2887_vm6, %v2862_v35, %v2536_v2  ;;  %v2655_v18 = vrot.slane %v5260_v12, 1 }
 0x120   : > { %v2550_v7 = vpop.permute.xlu1 %2549  ;;  %2541 = vrot.lane.b32.xlu0 %v2420_v28, %s3806_s9  ;;  %v2629_v11 = vsel %vm1584_vm7, %v2627_v26, %v2628_v55  ;;  %v2516_v61 = vsel %vm1311_vm8, %v2511_v43, %v2515_v47  ;;  %v2527_v57 = vrot.slane %v2525_v60, 1  ;;  %v5544_v43 = vld [vmem:[#allocation6_spill] sm:$0xff] }
 0x121   : > { %v2909_v21 = vsel %vm2887_vm6, %v2876_v22, %v2550_v7  ;;  %v1182_v7 = vld [vmem:[#allocation2 + $0xcc] sm:$0xe] }
 0x122   : > { %2175 = vrot.lane.b32.xlu1 %v2144_v6, %s3803_s6  ;;  %v2664_v56 = vpop.permute.xlu0 %2663  ;;  %v2523_v6 = vor.u32 %v2522_v17, %v2518_v16  ;;  %v2699_v17 = vsel %vm2689_vm13, %v5544_v43, %v5252_v49 }
 0x123   : > { %v2928_v15 = vsel %vm2920_vm11, %v2895_v33, %v2664_v56 }
 0x124   : > { %v2552_v20 = vpop.permute.xlu1 %2551  ;;  %2543 = vrot.lane.b32.xlu0 %v2432_v27, %s3806_s9  ;;  %3597 = vmatmul.mubr.msk.bf16.gmra.mxu0 %vm2968_vm12, %v2928_v15  ;;  %v2528_v8 = vsel %vm1311_vm8, %v2523_v6, %v2527_v57 }
 0x126   : > { %2285 = vrot.lane.b32.xlu1 %v3481_v52, %s3805_s8  ;;  %v1181_v52 = vld [vmem:[#allocation2 + $0xc0] sm:$0xe]  ;;  %v1515_v58 = vpop.permute.xlu0 %1514 }
 0x127   : > { %v3513_v38 = vcombine.low %v1181_v52, %v5199_v25  ;;  %v3514_v25 = vcombine.low %v1182_v7, %v5220_v44  ;;  %v5545_v52 = vld [vmem:[#allocation8_spill] sm:$0xff] }
 0x128   : > { %v2678_v2 = vpop.permute.xlu1 %2677  ;;  %2669 = vrot.lane.b32.xlu0 %v2629_v11, %s3807_s10 }
 0x129   : > { %v2942_v59 = vsel %vm2920_vm11, %v2909_v21, %v2678_v2  ;;  %v2651_v24 = vrot.slane %v3513_v38, 1 }
 0x12a   : > { %2287 = vrot.lane.b32.xlu1 %v3482_v34, %s3805_s8  ;;  %3612 = vmatprep.mubr.msk.bf16.mxu1 %vm2968_vm12, %v2942_v59  ;;  %v2845_v34 = vsel %vm2821_vm2, %v2812_v46, %v5188_v39  ;;  %v1642_v28 = vpop.permute.xlu0 %1641  ;;  %v2701_v59 = vsel %vm2689_vm13, %v5545_v52, %v1515_v58 }
 0x12b   : > { %v2878_v4 = vsel %vm2854_vm4, %v2845_v34, %v5224_v3  ;;  %v2653_v50 = vsel %vm1584_vm7, %v2651_v24, %v2652_v63  ;;  %v2654_v3 = vrot.slane %v3514_v25, 1  ;;  %v2732_v15 = vsel %vm2722_vm14, %v2699_v17, %v1642_v28 }
 0x12c   : > { %v1529_v40 = vpop.permute.xlu1 %1528  ;;  %v2911_v23 = vsel %vm2887_vm6, %v2878_v4, %v2552_v20  ;;  %2671 = vrot.lane.b32.xlu0 %v2632_v1, %s3807_s10 }
 0x12d   : > { %v2656_v0 = vsel %vm1584_vm7, %v2654_v3, %v2655_v18 }
 0x12e   : > { %2557 = vrot.lane.b32.xlu1 %v2516_v61, %s3806_s9  ;;  %v1644_v44 = vpop.permute.xlu0 %1643  ;;  %v5546_v61 = vld [vmem:[#allocation7_spill] sm:$0xff] }
 0x12f   : > { %v2734_v51 = vsel %vm2722_vm14, %v2701_v59, %v1644_v44  ;;  %v2715_v6 = vsel %vm2689_vm13, %v5546_v61, %v1529_v40 }
 0x130   : > { %v2680_v10 = vpop.permute.xlu1 %2679 }
 0x131   : > { %v2944_v39 = vsel %vm2920_vm11, %v2911_v23, %v2680_v10 }
 0x132   : > { %2559 = vrot.lane.b32.xlu1 %v2528_v8, %s3806_s9  ;;  %3613 = vmatmul.mubr.msk.bf16.gmra.mxu1 %vm2968_vm12, %v2944_v39  ;;  %v1754_v14 = vpop.permute.xlu0 %1753  ;;  %v5547_v39 = vld [vmem:[#allocation9_spill] sm:$0xff] }
 0x133   : > { %v2765_v47 = vsel %vm2755_vm15, %v2732_v15, %v1754_v14 }
 0x134   : > { %v1531_v37 = vpop.permute.xlu1 %1530 }
 0x135   : > { %v2717_v44 = vsel %vm2689_vm13, %v5547_v39, %v1531_v37 }
 0x136   : > { %2685 = vrot.lane.b32.xlu1 %v2653_v50, %s3807_s10  ;;  %v1756_v13 = vpop.permute.xlu0 %1755 }
 0x137   : > { %v2767_v57 = vsel %vm2755_vm15, %v2734_v51, %v1756_v13 }
 0x138   : > { %v1658_v41 = vpop.permute.xlu1 %1657 }
 0x139   : > { %v2748_v7 = vsel %vm2722_vm14, %v2715_v6, %v1658_v41 }
 0x13a   : > { %2687 = vrot.lane.b32.xlu1 %v2656_v0, %s3807_s10  ;;  %v2026_v5 = vpop.permute.xlu0 %2025 }
 0x13b   : > { %v2798_v62 = vsel %vm2788_vm1, %v2765_v47, %v2026_v5 }
 0x13c   : > { %v1660_v55 = vpop.permute.xlu1 %1659 }
 0x13d   : > { %v2750_v3 = vsel %vm2722_vm14, %v2717_v44, %v1660_v55 }
 0x13e   : > { %v2028_v20 = vpop.permute.xlu0 %2027 }
 0x13f   : > { %v2800_v58 = vsel %vm2788_vm1, %v2767_v57, %v2028_v20 }
 0x140   : > { %v1770_v19 = vpop.permute.xlu1 %1769 }
 0x141   : > { %v2781_v48 = vsel %vm2755_vm15, %v2748_v7, %v1770_v19 }
 0x142   : > { %v2154_v29 = vpop.permute.xlu0 %2153 }
 0x143   : > { %v2831_v32 = vsel %vm2821_vm2, %v2798_v62, %v2154_v29 }
 0x144   : > { %v1772_v26 = vpop.permute.xlu1 %1771 }
 0x145   : > { %v2783_v18 = vsel %vm2755_vm15, %v2750_v3, %v1772_v26 }
 0x146   : > { %v2156_v35 = vpop.permute.xlu0 %2155 }
 0x147   : > { %v2833_v46 = vsel %vm2821_vm2, %v2800_v58, %v2156_v35 }
 0x148   : > { %v2042_v42 = vpop.permute.xlu1 %2041 }
 0x149   : > { %v2814_v34 = vsel %vm2788_vm1, %v2781_v48, %v2042_v42 }
 0x14a   : > { %v2266_v12 = vpop.permute.xlu0 %2265 }
 0x14b   : > { %v2864_v2 = vsel %vm2854_vm4, %v2831_v32, %v2266_v12 }
 0x14c   : > { %v2044_v27 = vpop.permute.xlu1 %2043 }
 0x14d   : > { %v2816_v0 = vsel %vm2788_vm1, %v2783_v18, %v2044_v27 }
 0x14e   : > { %v2268_v53 = vpop.permute.xlu0 %2267 }
 0x14f   : > { %v2866_v28 = vsel %vm2854_vm4, %v2833_v46, %v2268_v53 }
 0x150   : > { %v2170_v16 = vpop.permute.xlu1 %2169 }
 0x151   : > { %v2847_v25 = vsel %vm2821_vm2, %v2814_v34, %v2170_v16 }
 0x152   : > { %v2538_v56 = vpop.permute.xlu0 %2537 }
 0x153   : > { %v2897_v11 = vsel %vm2887_vm6, %v2864_v2, %v2538_v56 }
 0x154   : > { %v2172_v33 = vpop.permute.xlu1 %2171 }
 0x155   : > { %v2849_v41 = vsel %vm2821_vm2, %v2816_v0, %v2172_v33 }
 0x156   : > { %v2540_v60 = vpop.permute.xlu0 %2539 }
 0x157   : > { %v2899_v40 = vsel %vm2887_vm6, %v2866_v28, %v2540_v60 }
 0x158   : > { %v2282_v22 = vpop.permute.xlu1 %2281 }
 0x159   : > { %v2880_v8 = vsel %vm2854_vm4, %v2847_v25, %v2282_v22 }
 0x15a   : > { %v2666_v45 = vpop.permute.xlu0 %2665 }
 0x15b   : > { %v2930_v49 = vsel %vm2920_vm11, %v2897_v11, %v2666_v45 }
 0x15c   : > { %v2284_v21 = vpop.permute.xlu1 %2283  ;;  %3600 = vmatprep.mubr.msk.bf16.mxu0 %vm2968_vm12, %v2930_v49 }
 0x15d   : > { %v2882_v5 = vsel %vm2854_vm4, %v2849_v41, %v2284_v21 }
 0x15e   : > { %v1517_v38 = vpop.permute.xlu0 %1516 }
 0x15f   : > { %v2703_v21 = vsel %vm2689_vm13, %v4906_v31, %v1517_v38 }
 0x160   : > { %v2554_v36 = vpop.permute.xlu1 %2553 }
 0x161   : > { %v2913_v63 = vsel %vm2887_vm6, %v2880_v8, %v2554_v36 }
 0x162   : > { %v2668_v4 = vpop.permute.xlu0 %2667 }
 0x163   : > { %v2932_v24 = vsel %vm2920_vm11, %v2899_v40, %v2668_v4 }
 0x164   : > { %v2556_v1 = vpop.permute.xlu1 %2555  ;;  %3601 = vmatmul.mubr.msk.bf16.gmra.mxu0 %vm2968_vm12, %v2932_v24 }
 0x165   : > { %v2915_v19 = vsel %vm2887_vm6, %v2882_v5, %v2556_v1 }
 0x166   : > { %v1519_v50 = vpop.permute.xlu0 %1518 }
 0x167   : > { %v2705_v59 = vsel %vm2689_vm13, %v4976_v30, %v1519_v50 }
 0x168   : > { %v2682_v23 = vpop.permute.xlu1 %2681 }
 0x169   : > { %v2946_v10 = vsel %vm2920_vm11, %v2913_v63, %v2682_v23  ;;  %v5392_v23 = vld [vmem:[%s5514_s2] ss:$0 sm:$0xff] }
 0x16a   : > { %3616 = vmatprep.mubr.msk.bf16.mxu1 %vm2968_vm12, %v2946_v10  ;;  %v1646_v13 = vpop.permute.xlu0 %1645 }
 0x16b   : > { %v2736_v52 = vsel %vm2722_vm14, %v2703_v21, %v1646_v13 }
 0x16c   : > { %v1533_v14 = vpop.permute.xlu1 %1532 }
 0x16d   : > { %v2719_v1 = vsel %vm2689_vm13, %v4993_v9, %v1533_v14 }
 0x16e   : > { %v1648_v29 = vpop.permute.xlu0 %1647 }
 0x16f   : > { %v2738_v61 = vsel %vm2722_vm14, %v2705_v59, %v1648_v29 }
 0x170   : > { %v2684_v20 = vpop.permute.xlu1 %2683 }
 0x171   : > { %v2948_v37 = vsel %vm2920_vm11, %v2915_v19, %v2684_v20 }
 0x172   : > { %3617 = vmatmul.mubr.msk.bf16.gmra.mxu1 %vm2968_vm12, %v2948_v37  ;;  %v1758_v55 = vpop.permute.xlu0 %1757 }
 0x173   : > { %v2769_v11 = vsel %vm2755_vm15, %v2736_v52, %v1758_v55 }
 0x174   : > { %v1535_v42 = vpop.permute.xlu1 %1534 }
 0x175   : > { %v2721_v63 = vsel %vm2689_vm13, %v5042_v54, %v1535_v42 }
 0x176   : > { %v1760_v26 = vpop.permute.xlu0 %1759 }
 0x177   : > { %v2771_v31 = vsel %vm2755_vm15, %v2738_v61, %v1760_v26 }
 0x178   : > { %v1662_v35 = vpop.permute.xlu1 %1661 }
 0x179   : > { %v2752_v25 = vsel %vm2722_vm14, %v2719_v1, %v1662_v35 }
 0x17a   : > { %v2030_v16 = vpop.permute.xlu0 %2029 }
 0x17b   : > { %v2802_v49 = vsel %vm2788_vm1, %v2769_v11, %v2030_v16 }
 0x17c   : > { %v1664_v12 = vpop.permute.xlu1 %1663 }
 0x17d   : > { %v2754_v10 = vsel %vm2722_vm14, %v2721_v63, %v1664_v12 }
 0x17e   : > { %v2032_v53 = vpop.permute.xlu0 %2031 }
 0x17f   : > { %v2804_v7 = vsel %vm2788_vm1, %v2771_v31, %v2032_v53 }
 0x180   : > { %v1774_v27 = vpop.permute.xlu1 %1773 }
 0x181   : > { %v2785_v4 = vsel %vm2755_vm15, %v2752_v25, %v1774_v27 }
 0x182   : > { %v2158_v56 = vpop.permute.xlu0 %2157 }
 0x183   : > { %v2835_v36 = vsel %vm2821_vm2, %v2802_v49, %v2158_v56 }
 0x184   : > { %v1776_v33 = vpop.permute.xlu1 %1775 }
 0x185   : > { %v2787_v44 = vsel %vm2755_vm15, %v2754_v10, %v1776_v33 }
 0x186   : > { %v2160_v17 = vpop.permute.xlu0 %2159 }
 0x187   : > { %v2837_v58 = vsel %vm2821_vm2, %v2804_v7, %v2160_v17 }
 0x188   : > { %v2046_v43 = vpop.permute.xlu1 %2045 }
 0x189   : > { %v2818_v24 = vsel %vm2788_vm1, %v2785_v4, %v2046_v43 }
 0x18a   : > { %v2270_v15 = vpop.permute.xlu0 %2269 }
 0x18b   : > { %v2868_v6 = vsel %vm2854_vm4, %v2835_v36, %v2270_v15 }
 0x18c   : > { %v2048_v22 = vpop.permute.xlu1 %2047 }
 0x18d   : > { %v2820_v14 = vsel %vm2788_vm1, %v2787_v44, %v2048_v22 }
 0x18e   : > { %v2272_v60 = vpop.permute.xlu0 %2271 }
 0x18f   : > { %v2870_v46 = vsel %vm2854_vm4, %v2837_v58, %v2272_v60 }
 0x190   : > { %v2174_v47 = vpop.permute.xlu1 %2173 }
 0x191   : > { %v2851_v9 = vsel %vm2821_vm2, %v2818_v24, %v2174_v47 }
 0x192   : > { %v2542_v32 = vpop.permute.xlu0 %2541 }
 0x193   : > { %v2901_v57 = vsel %vm2887_vm6, %v2868_v6, %v2542_v32 }
 0x194   : > { %v2176_v62 = vpop.permute.xlu1 %2175 }
 0x195   : > { %v2853_v41 = vsel %vm2821_vm2, %v2820_v14, %v2176_v62 }
 0x196   : > { %v2544_v45 = vpop.permute.xlu0 %2543 }
 0x197   : > { %v2903_v34 = vsel %vm2887_vm6, %v2870_v46, %v2544_v45 }
 0x198   : > { %v2286_v2 = vpop.permute.xlu1 %2285 }
 0x199   : > { %v2884_v39 = vsel %vm2854_vm4, %v2851_v9, %v2286_v2 }
 0x19a   : > { %v2670_v38 = vpop.permute.xlu0 %2669 }
 0x19b   : > { %v2934_v30 = vsel %vm2920_vm11, %v2901_v57, %v2670_v38 }
 0x19c   : > { %v2288_v51 = vpop.permute.xlu1 %2287  ;;  %3604 = vmatprep.mubr.msk.bf16.mxu0 %vm2968_vm12, %v2934_v30 }
 0x19d   : > { %v2886_v5 = vsel %vm2854_vm4, %v2853_v41, %v2288_v51 }
 0x19e   : > { %v2672_v28 = vpop.permute.xlu0 %2671 }
 0x19f   : > { %v2936_v40 = vsel %vm2920_vm11, %v2903_v34, %v2672_v28 }
 0x1a0   : > { %v2558_v48 = vpop.permute.xlu1 %2557  ;;  %3605 = vmatmul.mubr.msk.bf16.gmra.mxu0 %vm2968_vm12, %v2936_v40 }
 0x1a1   : > { %v2917_v50 = vsel %vm2887_vm6, %v2884_v39, %v2558_v48 }
 0x1a4   : > { %v2560_v8 = vpop.permute.xlu1 %2559  ;;  %v3594_v18 = vpop.f32.mrf.mxu0 }
 0x1a5   : > { %v3178_v0 = vadd.f32 %v3594_v18, %v5392_v23  ;;  %v2919_v37 = vsel %vm2887_vm6, %v2886_v5, %v2560_v8 }
 0x1a6   : > { %v3042_v13 = vpop.f32.mrf.mxu0 }
 0x1a7   : > { %v3210_v19 = vmax.f32 %v3178_v0, 0.0  ;;  %v3176_v20 = vadd.f32 %v5392_v23, %v3042_v13 }
 0x1a8   : > { %v2686_v3 = vpop.permute.xlu1 %2685  ;;  %v3595_v42 = vpop.f32.mrf.mxu0 }
 0x1a9   : > { %v2950_v54 = vsel %vm2920_vm11, %v2917_v50, %v2686_v3  ;;  %3243 = vst.msk [vmem:[%s5408_s30 + $0x10] sm:$0xff] %vm3240_vm0, %v3210_v19  ;;  %v3208_v35 = vmax.f32 %v3176_v20, 0.0  ;;  %v3179_v26 = vadd.f32 %v3595_v42, %v5392_v23 }
 0x1aa   : > { %3620 = vmatprep.mubr.msk.bf16.mxu1 %vm2968_vm12, %v2950_v54  ;;  %v3045_v12 = vpop.f32.mrf.mxu0 }
 0x1ab   : > { %3241 = vst.msk [vmem:[%s5408_s30] sm:$0xff] %vm3240_vm0, %v3208_v35  ;;  %v3211_v16 = vmax.f32 %v3179_v26, 0.0  ;;  %v3177_v27 = vadd.f32 %v5392_v23, %v3045_v12 }
 0x1ac   : > { %v2688_v29 = vpop.permute.xlu1 %2687 }
 0x1ad   : > { %v2952_v55 = vsel %vm2920_vm11, %v2919_v37, %v2688_v29  ;;  %3244 = vst.msk [vmem:[%s5408_s30 + $0x18] sm:$0xff] %vm3240_vm0, %v3211_v16  ;;  %v3209_v53 = vmax.f32 %v3177_v27, 0.0 }
 0x1ae   : > { %3621 = vmatmul.mubr.msk.bf16.gmra.mxu1 %vm2968_vm12, %v2952_v55 }
 0x1af   : > { %3242 = vst.msk [vmem:[%s5408_s30 + $0x8] sm:$0xff] %vm3240_vm0, %v3209_v53 }
 0x1b2   : > { %v3610_v33 = vpop.f32.mrf.mxu1 }
 0x1b3   : > { %v3194_v56 = vadd.f32 %v3610_v33, %v5392_v23 }
 0x1b4   : > { %v3106_v43 = vpop.f32.mrf.mxu1 }
 0x1b5   : > { %v3226_v17 = vmax.f32 %v3194_v56, 0.0  ;;  %v3192_v22 = vadd.f32 %v5392_v23, %v3106_v43 }
 0x1b6   : > { %v3611_v15 = vpop.f32.mrf.mxu1 }
 0x1b7   : > { %3259 = vst.msk [vmem:[%s5408_s30 + $0x90] sm:$0xff] %vm3240_vm0, %v3226_v17  ;;  %v3224_v47 = vmax.f32 %v3192_v22, 0.0  ;;  %v3195_v60 = vadd.f32 %v3611_v15, %v5392_v23 }
 0x1b8   : > { %v3109_v62 = vpop.f32.mrf.mxu1 }
 0x1b9   : > { %3257 = vst.msk [vmem:[%s5408_s30 + $0x80] sm:$0xff] %vm3240_vm0, %v3224_v47  ;;  %v3227_v32 = vmax.f32 %v3195_v60, 0.0  ;;  %v3193_v21 = vadd.f32 %v5392_v23, %v3109_v62 }
 0x1bb   : > { %3260 = vst.msk [vmem:[%s5408_s30 + $0x98] sm:$0xff] %vm3240_vm0, %v3227_v32  ;;  %v3225_v2 = vmax.f32 %v3193_v21, 0.0 }
 0x1bd   : > { %3258 = vst.msk [vmem:[%s5408_s30 + $0x88] sm:$0xff] %vm3240_vm0, %v3225_v2 }
 0x1e4   : > { %v3598_v52 = vpop.f32.mrf.mxu0 }
 0x1e5   : > { %v3182_v59 = vadd.f32 %v3598_v52, %v5392_v23 }
 0x1e6   : > { %v3058_v11 = vpop.f32.mrf.mxu0 }
 0x1e7   : > { %v3214_v45 = vmax.f32 %v3182_v59, 0.0  ;;  %v3180_v49 = vadd.f32 %v5392_v23, %v3058_v11 }
 0x1e8   : > { %v3599_v36 = vpop.f32.mrf.mxu0 }
 0x1e9   : > { %3247 = vst.msk [vmem:[%s5408_s30 + $0x30] sm:$0xff] %vm3240_vm0, %v3214_v45  ;;  %v3212_v51 = vmax.f32 %v3180_v49, 0.0  ;;  %v3183_v61 = vadd.f32 %v3599_v36, %v5392_v23 }
 0x1ea   : > { %v3061_v6 = vpop.f32.mrf.mxu0 }
 0x1eb   : > { %3245 = vst.msk [vmem:[%s5408_s30 + $0x20] sm:$0xff] %vm3240_vm0, %v3212_v51  ;;  %v3215_v31 = vmax.f32 %v3183_v61, 0.0  ;;  %v3181_v57 = vadd.f32 %v5392_v23, %v3061_v6 }
 0x1ed   : > { %3248 = vst.msk [vmem:[%s5408_s30 + $0x38] sm:$0xff] %vm3240_vm0, %v3215_v31  ;;  %v3213_v38 = vmax.f32 %v3181_v57, 0.0 }
 0x1ef   : > { %3246 = vst.msk [vmem:[%s5408_s30 + $0x28] sm:$0xff] %vm3240_vm0, %v3213_v38 }
 0x1f2   : > { %v3614_v7 = vpop.f32.mrf.mxu1 }
 0x1f3   : > { %v3198_v30 = vadd.f32 %v3614_v7, %v5392_v23 }
 0x1f4   : > { %v3122_v58 = vpop.f32.mrf.mxu1 }
 0x1f5   : > { %v3230_v48 = vmax.f32 %v3198_v30, 0.0  ;;  %v3196_v46 = vadd.f32 %v5392_v23, %v3122_v58 }
 0x1f6   : > { %v3615_v1 = vpop.f32.mrf.mxu1 }
 0x1f7   : > { %3263 = vst.msk [vmem:[%s5408_s30 + $0xb0] sm:$0xff] %vm3240_vm0, %v3230_v48  ;;  %v3228_v34 = vmax.f32 %v3196_v46, 0.0  ;;  %v3199_v28 = vadd.f32 %v3615_v1, %v5392_v23 }
 0x1f8   : > { %v3125_v25 = vpop.f32.mrf.mxu1 }
 0x1f9   : > { %3261 = vst.msk [vmem:[%s5408_s30 + $0xa0] sm:$0xff] %vm3240_vm0, %v3228_v34  ;;  %v3231_v40 = vmax.f32 %v3199_v28, 0.0  ;;  %v3197_v4 = vadd.f32 %v5392_v23, %v3125_v25 }
 0x1fb   : > { %3264 = vst.msk [vmem:[%s5408_s30 + $0xb8] sm:$0xff] %vm3240_vm0, %v3231_v40  ;;  %v3229_v8 = vmax.f32 %v3197_v4, 0.0 }
 0x1fd   : > { %3262 = vst.msk [vmem:[%s5408_s30 + $0xa8] sm:$0xff] %vm3240_vm0, %v3229_v8 }
 0x224   : > { %v3602_v24 = vpop.f32.mrf.mxu0 }
 0x225   : > { %v3186_v63 = vadd.f32 %v3602_v24, %v5392_v23 }
 0x226   : > { %v3074_v9 = vpop.f32.mrf.mxu0 }
 0x227   : > { %v3218_v10 = vmax.f32 %v3186_v63, 0.0  ;;  %v3184_v39 = vadd.f32 %v5392_v23, %v3074_v9 }
 0x228   : > { %v3603_v44 = vpop.f32.mrf.mxu0 }
 0x229   : > { %3251 = vst.msk [vmem:[%s5408_s30 + $0x50] sm:$0xff] %vm3240_vm0, %v3218_v10  ;;  %v3216_v50 = vmax.f32 %v3184_v39, 0.0  ;;  %v3187_v3 = vadd.f32 %v3603_v44, %v5392_v23 }
 0x22a   : > { %v3077_v18 = vpop.f32.mrf.mxu0 }
 0x22b   : > { %3249 = vst.msk [vmem:[%s5408_s30 + $0x40] sm:$0xff] %vm3240_vm0, %v3216_v50  ;;  %v3219_v14 = vmax.f32 %v3187_v3, 0.0  ;;  %v3185_v54 = vadd.f32 %v5392_v23, %v3077_v18 }
 0x22d   : > { %3252 = vst.msk [vmem:[%s5408_s30 + $0x58] sm:$0xff] %vm3240_vm0, %v3219_v14  ;;  %v3217_v0 = vmax.f32 %v3185_v54, 0.0 }
 0x22f   : > { %3250 = vst.msk [vmem:[%s5408_s30 + $0x48] sm:$0xff] %vm3240_vm0, %v3217_v0 }
 0x232   : > { %v3618_v41 = vpop.f32.mrf.mxu1 }
 0x233   : > { %v3202_v13 = vadd.f32 %v3618_v41, %v5392_v23 }
 0x234   : > { %v3138_v5 = vpop.f32.mrf.mxu1 }
 0x235   : > { %v3234_v19 = vmax.f32 %v3202_v13, 0.0  ;;  %v3200_v20 = vadd.f32 %v5392_v23, %v3138_v5 }
 0x236   : > { %v3619_v37 = vpop.f32.mrf.mxu1 }
 0x237   : > { %3267 = vst.msk [vmem:[%s5408_s30 + $0xd0] sm:$0xff] %vm3240_vm0, %v3234_v19  ;;  %v3232_v29 = vmax.f32 %v3200_v20, 0.0  ;;  %v3203_v42 = vadd.f32 %v3619_v37, %v5392_v23 }
 0x238   : > { %v3141_v55 = vpop.f32.mrf.mxu1 }
 0x239   : > { %3265 = vst.msk [vmem:[%s5408_s30 + $0xc0] sm:$0xff] %vm3240_vm0, %v3232_v29  ;;  %v3235_v35 = vmax.f32 %v3203_v42, 0.0  ;;  %v3201_v26 = vadd.f32 %v5392_v23, %v3141_v55 }
 0x23b   : > { %3268 = vst.msk [vmem:[%s5408_s30 + $0xd8] sm:$0xff] %vm3240_vm0, %v3235_v35  ;;  %v3233_v12 = vmax.f32 %v3201_v26, 0.0 }
 0x23d   : > { %3266 = vst.msk [vmem:[%s5408_s30 + $0xc8] sm:$0xff] %vm3240_vm0, %v3233_v12 }
 0x260   : > { %v3606_v16 = vpop.f32.mrf.mxu0 }
 0x261   : > { %v3190_v27 = vadd.f32 %v3606_v16, %v5392_v23 }
 0x262   : > { %v3090_v53 = vpop.f32.mrf.mxu0 }
 0x263   : > { %v3222_v33 = vmax.f32 %v3190_v27, 0.0  ;;  %v3188_v56 = vadd.f32 %v5392_v23, %v3090_v53 }
 0x264   : > { %v3607_v43 = vpop.f32.mrf.mxu0 }
 0x265   : > { %3255 = vst.msk [vmem:[%s5408_s30 + $0x70] sm:$0xff] %vm3240_vm0, %v3222_v33  ;;  %v3220_v17 = vmax.f32 %v3188_v56, 0.0  ;;  %v3191_v22 = vadd.f32 %v3607_v43, %v5392_v23 }
 0x266   : > { %v3093_v15 = vpop.f32.mrf.mxu0 }
 0x267   : > { %3253 = vst.msk [vmem:[%s5408_s30 + $0x60] sm:$0xff] %vm3240_vm0, %v3220_v17  ;;  %v3223_v47 = vmax.f32 %v3191_v22, 0.0  ;;  %v3189_v60 = vadd.f32 %v5392_v23, %v3093_v15 }
 0x269   : > { %3256 = vst.msk [vmem:[%s5408_s30 + $0x78] sm:$0xff] %vm3240_vm0, %v3223_v47  ;;  %v3221_v62 = vmax.f32 %v3189_v60, 0.0 }
 0x26b   : > { %3254 = vst.msk [vmem:[%s5408_s30 + $0x68] sm:$0xff] %vm3240_vm0, %v3221_v62 }
 0x26e   : > { %v3622_v32 = vpop.f32.mrf.mxu1 }
 0x26f   : > { %v3206_v21 = vadd.f32 %v3622_v32, %v5392_v23 }
 0x270   : > { %v3154_v2 = vpop.f32.mrf.mxu1 }
 0x271   : > { %v3238_v52 = vmax.f32 %v3206_v21, 0.0  ;;  %v3204_v59 = vadd.f32 %v5392_v23, %v3154_v2 }
 0x272   : > { %v3623_v11 = vpop.f32.mrf.mxu1 }
 0x273   : > { %3271 = vst.msk [vmem:[%s5408_s30 + $0xf0] sm:$0xff] %vm3240_vm0, %v3238_v52  ;;  %v3236_v45 = vmax.f32 %v3204_v59, 0.0  ;;  %v3207_v49 = vadd.f32 %v3623_v11, %v5392_v23 }
 0x274   : > { %v3157_v36 = vpop.f32.mrf.mxu1 }
 0x275   : > { %3269 = vst.msk [vmem:[%s5408_s30 + $0xe0] sm:$0xff] %vm3240_vm0, %v3236_v45  ;;  %v3239_v51 = vmax.f32 %v3207_v49, 0.0  ;;  %v3205_v61 = vadd.f32 %v5392_v23, %v3157_v36 }
 0x277   : > { %3272 = vst.msk [vmem:[%s5408_s30 + $0xf8] sm:$0xff] %vm3240_vm0, %v3239_v51  ;;  %v3237_v6 = vmax.f32 %v3205_v61, 0.0 }
 0x279   : > { %3270 = vst.msk [vmem:[%s5408_s30 + $0xe8] sm:$0xff] %vm3240_vm0, %v3237_v6 }
 0x27a PF: > { %s15_s18 = sadd.s32 1, %s3797_s18  }
 0x27b   : > { %p12_p4 = scmp.ge.s32.totalorder %s15_s18, 4  }
 0x27d   :  { %14 = sbr.rel (!%p12_p4) target bundleno = 1 (0x1), region = 73 }

// kernel: lte_forward.5
= control target key start
LH: loop header
LB: loop body
LE: loop exit
PB: predicated region body
PF: predicated region fallthrough
CT: control target
= control target key end

     0   :  { %10 = vsyncpa [#allocation5], 0  ;;  %s6462_s0 = inlined_call_operand.vmem [shape: f32[2,8,8,128], index: 0, kind: input, shape index: {}]   ;;  %s6463_s1 = inlined_call_operand.vmem [shape: bf16[1152,128], index: 1, kind: input, shape index: {}]   ;;  %s6464_s2 = inlined_call_operand.vmem [shape: f32[1,128], index: 2, kind: input, shape index: {}]   ;;  %s6465_s3 = inlined_call_operand.vmem [shape: bf16[1152,256], index: 3, kind: input, shape index: {}]   ;;  %s6466_s4 = inlined_call_operand.vmem [shape: f32[1,256], index: 4, kind: input, shape index: {}]   ;;  %s6467_s5 = inlined_call_operand.hbm [shape: f32[2,4,4,256], index: 5, kind: output, shape index: {}]  }
   0x1   :  { %12 = vsyncpa [#allocation5 + $0x1], 0  ;;  %s5105_s18 = smov 0   ;;  %s5107_s19 = smov 0  }
   0x2   :  { %s5109_s20 = smov 0   ;;  %s5111_s21 = smov 0  }
   0x3 LB: > { %s5126_s22 = sadd.s32 4294967295, %s5068_s21   ;;  %s4002_s23 = sadd.s32 4294967294, %s5068_s21   ;;  %s5068_s21 = sphi %s5111_s21, %s6485_s21   ;;  %s5064_s20 = sphi %s5109_s20, %s6484_s20   ;;  %s5060_s19 = sphi %s5107_s19, %s6483_s19   ;;  %s5056_s18 = sphi %s5105_s18, %s6482_s18  }
   0x4   : > { %s5130_s24 = sadd.s32 1, %s5068_s21   ;;  %s135_s25 = sadd.s32 1, %s5064_s20 }
   0x5   : > { %s132_s26 = ssub.s32 %s5068_s21, %s5130_s24  ;;  %p145_p0 = scmp.ne.s32.totalorder %s5064_s20, %s5060_s19 }
   0x6   : > { %p133_p1 = scmp.eq.s32.totalorder %s132_s26, 0  ;;  %p146_p2 = scmp.eq.s32.totalorder %s5126_s22, 1 }
   0x7   : > { %p151_p3 = scmp.ne.s32.totalorder %s5060_s19, %s5056_s18  ;;  %p152_p4 = scmp.eq.s32.totalorder %s4002_s23, 1 }
   0x8   : > { %s5141_s27 = scalar_select %p133_p1, %s5064_s20, %s135_s25  }
   0x9   : > { %p5143_p5 = por %p146_p2, %p145_p0  ;;  %p5147_p6 = por %p152_p4, %p151_p3 }
   0xa   : > { %p4005_p7 = scmp.ge.s32.totalorder %s5068_s21, 1  ;;  %p190_p8 = scmp.lt.s32.totalorder %s5068_s21, 3 }
   0xc   : > { %p191_p9 = pnand %p4005_p7, %p190_p8 }
   0xd   : > { %p218_p10 = scmp.lt.s32.totalorder (!%p191_p9), %s5126_s22, 1  ;;  %s215_s16 = sand.u32 (!%p191_p9), 1, %s5060_s19  }
   0xe   : > { %194 = sbr.rel (%p191_p9) target bundleno = 753 (0x2f1), region = 40  ;;  %s4006_s17 = sshll.u32 (!%p191_p9), %s215_s16, 5 }
   0xf   : > { %s217_s23 = scalar_lea.vmem (!%p191_p9), [#allocation4], %s4006_s17  ;;  %s4396_s30 = sshll.u32 (!%p191_p9), %s5126_s22, 9 }
  0x10   : > { %s3940_s26 = sshll.u32 (!%p191_p9), %s217_s23, 4  ;;  %s6416_s8 = scalar_lea.hbm (!%p191_p9), %s6467_s5, %s4396_s30  ;;  %s6418_s26 = int_to_ptr.vmem [resolvable:$true] %s3940_s26 }
  0x11   : > { %s5008_s9 = scalar_lea.vmem (!%p191_p9), %s6418_s26, 512  ;;  %s5072_s10 = smov (!%p191_p9), [#allocation4]  }
  0x12   : > { %p5009_p11 = scmp.ne.s32.totalorder (!%p191_p9), %s6418_s26, %s5008_s9 }
  0x13   : > { %v4636_v0 = vld [vmem:[%s6463_s1 + $0x78] sm:$0xff]   ;;  %v6468_v3 = vmov 0   ;;  %v4640_v5 = vld [vmem:[%s6463_s1 + $0x70] sm:$0xff]   ;;  %v4644_v9 = vld [vmem:[%s6463_s1 + $0x68] sm:$0xff]   ;;  %s219_s25 = scalar_select %p218_p10, %s5126_s22, 1  ;;  %vm237_vm0 = vcmask 1040384  }
  0x14   : > { %v4637_v1 = vld [vmem:[%s6463_s1 + $0xf8] sm:$0xff]   ;;  %4397 = vmatprep.subr.bf16.mxu0 %v4636_v0  ;;  %232 = vst [vmem:[#allocation2] sm:$0xf] %v6468_v3  ;;  %233 = vst [vmem:[#allocation2 + $0x4] sm:$0xf] %v6468_v3  ;;  %v4641_v6 = vld [vmem:[%s6463_s1 + $0xf0] sm:$0xff]   ;;  %p5010_p12 = pnand %p5009_p11, %p5143_p5 }
  0x15   : > { %v4638_v2 = vld [vmem:[%s6463_s1 + $0x38] sm:$0xff]   ;;  %235 = vst [vmem:[#allocation2 + $0x48] sm:$0xf] %v6468_v3  ;;  %236 = vst [vmem:[#allocation2 + $0x4c] sm:$0xf] %v6468_v3  ;;  %4437 = vmatprep.subr.bf16.mxu1 %v4637_v1  ;;  %v4642_v7 = vld [vmem:[%s6463_s1 + $0x30] sm:$0xff]  }
  0x16   : > { %2171 = vst [vmem:[#allocation3] sm:$0xf] %v6468_v3  ;;  %2173 = vst [vmem:[#allocation3 + $0x14] sm:$0xf] %v6468_v3  ;;  %v4639_v4 = vld [vmem:[%s6463_s1 + $0xb8] sm:$0xff]   ;;  %4398 = vmatpush3.bf16.msra.mxu0 %v4638_v2  ;;  %v4643_v8 = vld [vmem:[%s6463_s1 + $0xb0] sm:$0xff]   ;;  %p5011_p13 = pneg %p5010_p12 }
  0x17   : > { %4438 = vmatpush3.bf16.msra.mxu1 %v4639_v4  ;;  %4399 = vmatprep.subr.bf16.mxu0 %v4640_v5  ;;  %v4645_v10 = vld [vmem:[%s6463_s1 + $0xe8] sm:$0xff]   ;;  %v4648_v13 = vld [vmem:[%s6463_s1 + $0x60] sm:$0xff]   ;;  %v4652_v17 = vld [vmem:[%s6463_s1 + $0x58] sm:$0xff]   ;;  %s4371_s12 = sshll.u32 %s219_s25, 6  ;;  %vm415_vm1 = vcmask 1043456   ;;  %vm2192_vm7 = vcmask 1042434  }
  0x18   : > { %4439 = vmatprep.subr.bf16.mxu1 %v4641_v6  ;;  %v4646_v11 = vld [vmem:[%s6463_s1 + $0x28] sm:$0xff]   ;;  %v4649_v14 = vld [vmem:[%s6463_s1 + $0xe0] sm:$0xff]   ;;  %v4653_v18 = vld [vmem:[%s6463_s1 + $0xd8] sm:$0xff]   ;;  %s5254_s6 = scalar_lea.vmem %s6462_s0, %s4371_s12  ;;  %vm238_vm2 = vsmask.f32 256  ;;  %vm2058_vm10 = vcmask 1041408  }
  0x19   : > { %v4647_v12 = vld [vmem:[%s6463_s1 + $0xa8] sm:$0xff]   ;;  %v4650_v15 = vld [vmem:[%s6463_s1 + $0x20] sm:$0xff]   ;;  %v4654_v19 = vld [vmem:[%s6463_s1 + $0x18] sm:$0xff]   ;;  %vm270_vm4 = vsmask.f32 7938  ;;  %vm2295_vm11 = vcmask 1043459  }
  0x1a   : > { %4400 = vmatpush3.bf16.msra.mxu0 %v4642_v7  ;;  %v4651_v16 = vld [vmem:[%s6463_s1 + $0xa0] sm:$0xff]   ;;  %v4655_v20 = vld [vmem:[%s6463_s1 + $0x98] sm:$0xff]   ;;  %v4656_v21 = vld [vmem:[%s6463_s1 + $0x50] sm:$0xff]   ;;  %vm2193_vm8 = vsmask.f32 7946  ;;  %vm2297_vm12 = vcmask 1044484  }
  0x1b   : > { %4440 = vmatpush3.bf16.msra.mxu1 %v4643_v8  ;;  %4401 = vmatprep.subr.bf16.mxu0 %v4644_v9  ;;  %v4657_v22 = vld [vmem:[%s6463_s1 + $0xd0] sm:$0xff]   ;;  %v4660_v25 = vld [vmem:[%s6463_s1 + $0x48] sm:$0xff]   ;;  %v4664_v29 = vld [vmem:[%s6463_s1 + $0x40] sm:$0xff]   ;;  %vm2317_vm13 = vcmask 1042432   ;;  %vm2318_vm14 = vsmask.f32 2306 }
  0x1c   : > { %4441 = vmatprep.subr.bf16.mxu1 %v4645_v10  ;;  %v4658_v23 = vld [vmem:[%s6463_s1 + $0x10] sm:$0xff]   ;;  %v4661_v26 = vld [vmem:[%s6463_s1 + $0xc8] sm:$0xff]   ;;  %v4665_v30 = vld [vmem:[%s6463_s1 + $0xc0] sm:$0xff]   ;;  %s6422_s22 = scalar_lea.sflag [#allocation5], %s215_s16 }
  0x1d   : > { %v4659_v24 = vld [vmem:[%s6463_s1 + $0x90] sm:$0xff]   ;;  %v4662_v27 = vld [vmem:[%s6463_s1 + $0x8] sm:$0xff]   ;;  %v4666_v31 = vld [vmem:[%s6463_s1] sm:$0xff]  }
  0x1e   : > { %4402 = vmatpush3.bf16.msra.mxu0 %v4646_v11  ;;  %v4663_v28 = vld [vmem:[%s6463_s1 + $0x88] sm:$0xff]   ;;  %v4667_v32 = vld [vmem:[%s6463_s1 + $0x80] sm:$0xff]   ;;  %vm5265_vm3 = vmand %vm237_vm0, %vm238_vm2 }
  0x1f   : > { %4442 = vmatpush3.bf16.msra.mxu1 %v4647_v12  ;;  %4403 = vmatprep.subr.bf16.mxu0 %v4648_v13  ;;  %v224_v33 = vld [vmem:[%s5254_s6] sm:$0xff]  ;;  %v225_v35 = vld [vmem:[%s5254_s6 + $0x8] sm:$0xff]  ;;  %vm5275_vm5 = vmand %vm237_vm0, %vm270_vm4 }
  0x20   : > { %4443 = vmatprep.subr.bf16.mxu1 %v4649_v14  ;;  %v240_v34 = vld [vmem:[#allocation2] sm:$0x1]  ;;  %v243_v37 = vld [vmem:[#allocation2 + $0x8] sm:$0x1]  ;;  %v272_v38 = vld [vmem:[#allocation2 + $0x4] sm:$0x1]  ;;  %v4372_v39 = vpack.c.bf16 %v224_v33, %v224_v33  ;;  %v4373_v40 = vpack.c.bf16 %v225_v35, %v225_v35 }
  0x21   : > { %v241_v41 = vsel %vm5265_vm3, 0, %v240_v34  ;;  %v244_v42 = vsel %vm5265_vm3, 0, %v243_v37  ;;  %v275_v44 = vld [vmem:[#allocation2 + $0xc] sm:$0x1]  ;;  %v246_v45 = vld [vmem:[#allocation2 + $0x10] sm:$0x1]  ;;  %vm5295_vm6 = vmand %vm415_vm1, %vm270_vm4 }
  0x22   : > { %4404 = vmatpush3.bf16.msra.mxu0 %v4650_v15  ;;  %242 = vst [vmem:[#allocation2] sm:$0x1] %v241_v41  ;;  %245 = vst [vmem:[#allocation2 + $0x8] sm:$0x1] %v244_v42  ;;  %v273_v46 = vsel %vm5275_vm5, 0, %v272_v38  ;;  %v276_v47 = vsel %vm5275_vm5, 0, %v275_v44 }
  0x23   : > { %4444 = vmatpush3.bf16.msra.mxu1 %v4651_v16  ;;  %4405 = vmatprep.subr.bf16.mxu0 %v4652_v17  ;;  %v335_v48 = vshrl.u32 %v4372_v39, 16  ;;  %v338_v49 = vshll.u32 %v4372_v39, 16  ;;  %v278_v50 = vld [vmem:[#allocation2 + $0x14] sm:$0x1]  ;;  %274 = vst [vmem:[#allocation2 + $0x4] sm:$0x1] %v273_v46  ;;  %vm5712_vm9 = vmand %vm2192_vm7, %vm2193_vm8 }
  0x24   : > { %4445 = vmatprep.subr.bf16.mxu1 %v4653_v18  ;;  %277 = vst [vmem:[#allocation2 + $0xc] sm:$0x1] %v276_v47  ;;  %v247_v51 = vsel %vm5265_vm3, 0, %v246_v45  ;;  %v279_v52 = vsel %vm5275_vm5, 0, %v278_v50  ;;  %v343_v53 = vshrl.u32 %v4373_v40, 16  ;;  %v346_v54 = vshll.u32 %v4373_v40, 16  ;;  %vm6072_vm15 = vmand %vm2317_vm13, %vm2318_vm14 }
  0x25   : > { %v337_v55 = vrot.slane %v335_v48, 7  ;;  %248 = vst [vmem:[#allocation2 + $0x10] sm:$0x1] %v247_v51  ;;  %280 = vst [vmem:[#allocation2 + $0x14] sm:$0x1] %v279_v52  ;;  %v4678_v56 = vld [vmem:[%s6463_s1 + $0x178] sm:$0xff]  }
  0x26   : > { %4406 = vmatpush3.bf16.msra.mxu0 %v4654_v19  ;;  %v345_v57 = vrot.slane %v343_v53, 7  ;;  %v4680_v59 = vld [vmem:[%s6463_s1 + $0x1f8] sm:$0xff]   ;;  %v481_v12 = vld [vmem:[#allocation2] sm:$0xe]  ;;  %v226_v13 = vld [vmem:[%s5254_s6 + $0x10] sm:$0xff] }
  0x27   : > { %4446 = vmatpush3.bf16.msra.mxu1 %v4655_v20  ;;  %4407 = vmatprep.subr.bf16.mxu0 %v4656_v21  ;;  %v340_v58 = vor.u32 %v338_v49, %v337_v55  ;;  %v341_v60 = vrot.slane %v337_v55, 4  ;;  %v249_v14 = vld [vmem:[#allocation2 + $0x18] sm:$0x1]  ;;  %v281_v16 = vld [vmem:[#allocation2 + $0x1c] sm:$0x1]  ;;  %v4374_v17 = vpack.c.bf16 %v226_v13, %v226_v13  ;;  %v4733_v61 = vld [vmem:[%s6463_s1 + $0x180] sm:$0xff]  }
  0x28   : > { %4447 = vmatprep.subr.bf16.mxu1 %v4657_v22  ;;  %v348_v62 = vor.u32 %v346_v54, %v345_v57  ;;  %v349_v63 = vrot.slane %v345_v57, 4  ;;  %v250_v15 = vsel %vm5265_vm3, 0, %v249_v14  ;;  %v227_v18 = vld [vmem:[%s5254_s6 + $0x18] sm:$0xff]  ;;  %v252_v19 = vld [vmem:[#allocation2 + $0x20] sm:$0x1]  ;;  %v282_v21 = vsel %vm5275_vm5, 0, %v281_v16 }
  0x29   : > { %v417_v0 = vld [vmem:[#allocation2 + $0x8] sm:$0xf]  ;;  %v5299_v1 = vld [vmem:[#allocation2] sm:$0xf]  ;;  %251 = vst [vmem:[#allocation2 + $0x18] sm:$0x1] %v250_v15 }
  0x2a   : > { %4408 = vmatpush3.bf16.msra.mxu0 %v4658_v23  ;;  %v418_v2 = vsel %vm5295_vm6, %v340_v58, %v417_v0  ;;  %v473_v5 = vld [vmem:[#allocation2 + $0x4] sm:$0x1]  ;;  %v253_v22 = vsel %vm5265_vm3, 0, %v252_v19  ;;  %283 = vst [vmem:[#allocation2 + $0x1c] sm:$0x1] %v282_v21  ;;  %v354_v38 = vshll.u32 %v4374_v17, 16 }
  0x2b   : > { %4448 = vmatpush3.bf16.msra.mxu1 %v4659_v24  ;;  %4409 = vmatprep.subr.bf16.mxu0 %v4660_v25  ;;  %v420_v4 = vld [vmem:[#allocation2 + $0xc] sm:$0x1]  ;;  %419 = vst [vmem:[#allocation2 + $0x8] sm:$0xf] %v418_v2  ;;  %v4017_v7 = vcombine.low %v5299_v1, %v473_v5  ;;  %v284_v23 = vld [vmem:[#allocation2 + $0x24] sm:$0x1] }
  0x2c   : > { %4449 = vmatprep.subr.bf16.mxu1 %v4661_v26  ;;  %v421_v6 = vsel %vm5265_vm3, %v341_v60, %v420_v4  ;;  %v423_v8 = vld [vmem:[#allocation2 + $0x10] sm:$0xf]  ;;  %v426_v9 = vld [vmem:[#allocation2 + $0x14] sm:$0x1]  ;;  %254 = vst [vmem:[#allocation2 + $0x20] sm:$0x1] %v253_v22  ;;  %v4375_v26 = vpack.c.bf16 %v227_v18, %v227_v18 }
  0x2d   : > { %422 = vst [vmem:[#allocation2 + $0xc] sm:$0x1] %v421_v6  ;;  %v424_v10 = vsel %vm5295_vm6, %v348_v62, %v423_v8  ;;  %v427_v11 = vsel %vm5265_vm3, %v349_v63, %v426_v9  ;;  %v581_v20 = vshll.u32 %v4017_v7, 16  ;;  %v285_v24 = vsel %vm5275_vm5, 0, %v284_v23  ;;  %v4681_v55 = vld [vmem:[%s6463_s1 + $0x1b8] sm:$0xff]   ;;  %v4696_v16 = vld [vmem:[%s6463_s1 + $0x1e8] sm:$0xff]  }
  0x2e   : > { %4410 = vmatpush3.bf16.msra.mxu0 %v4662_v27  ;;  %425 = vst [vmem:[#allocation2 + $0x10] sm:$0xf] %v424_v10  ;;  %428 = vst [vmem:[#allocation2 + $0x14] sm:$0x1] %v427_v11  ;;  %v351_v25 = vshrl.u32 %v4374_v17, 16  ;;  %v359_v41 = vshrl.u32 %v4375_v26, 16 }
  0x2f   : > { %4450 = vmatpush3.bf16.msra.mxu1 %v4663_v28  ;;  %4411 = vmatprep.subr.bf16.mxu0 %v4664_v29  ;;  %286 = vst [vmem:[#allocation2 + $0x24] sm:$0x1] %v285_v24  ;;  %v4025_v29 = vcombine.low %v481_v12, %v473_v5  ;;  %v362_v54 = vshll.u32 %v4375_v26, 16  ;;  %v4679_v62 = vld [vmem:[%s6463_s1 + $0x138] sm:$0xff]   ;;  %v4682_v5 = vld [vmem:[%s6463_s1 + $0x170] sm:$0xff]   ;;  %v4694_v17 = vld [vmem:[%s6463_s1 + $0x168] sm:$0xff]  }
  0x30   : > { %4451 = vmatprep.subr.bf16.mxu1 %v4665_v30  ;;  %v353_v40 = vrot.slane %v351_v25, 7  ;;  %v429_v47 = vld [vmem:[#allocation2 + $0x18] sm:$0xf]  ;;  %v361_v58 = vrot.slane %v359_v41, 7  ;;  %v4690_v11 = vld [vmem:[%s6463_s1 + $0x1b0] sm:$0xff]   ;;  %v228_v18 = vld [vmem:[%s5254_s6 + $0x20] sm:$0xff] }
  0x31   : > { %v658_v45 = vrot.slane %v4025_v29, 1  ;;  %v432_v53 = vld [vmem:[#allocation2 + $0x1c] sm:$0x1]  ;;  %v4683_v12 = vld [vmem:[%s6463_s1 + $0x130] sm:$0xff]   ;;  %v255_v19 = vld [vmem:[#allocation2 + $0x28] sm:$0x1]  ;;  %v4376_v25 = vpack.c.bf16 %v228_v18, %v228_v18 }
  0x32   : > { %4412 = vmatpush3.bf16.msra.mxu0 %v4666_v31  ;;  %v466_v27 = vld [vmem:[#allocation2 + $0x8] sm:$0xf]  ;;  %v579_v31 = vshrl.u32 %v4017_v7, 16  ;;  %v356_v52 = vor.u32 %v354_v38, %v353_v40  ;;  %v357_v57 = vrot.slane %v353_v40, 4  ;;  %v364_v9 = vor.u32 %v362_v54, %v361_v58  ;;  %v4698_v40 = vld [vmem:[%s6463_s1 + $0x160] sm:$0xff]  }
  0x33   : > { %4452 = vmatpush3.bf16.msra.mxu1 %v4667_v32  ;;  %4477 = vmatprep.subr.bf16.mxu0 %v4678_v56  ;;  %v5320_v28 = vld [vmem:[#allocation2 + $0x8] sm:$0xf]  ;;  %v583_v32 = vrot.slane %v581_v20, 1  ;;  %v4684_v56 = vld [vmem:[%s6463_s1 + $0x1f0] sm:$0xff]   ;;  %v435_v2 = vld [vmem:[#allocation2 + $0x20] sm:$0xf]  ;;  %v4065_v4 = vcombine.low %v5299_v1, %v466_v27 }
  0x34   : > { %4517 = vmatprep.subr.bf16.mxu1 %v4680_v59  ;;  %v474_v30 = vld [vmem:[#allocation2 + $0xc] sm:$0x1]  ;;  %v482_v33 = vld [vmem:[#allocation2 + $0x8] sm:$0xe]  ;;  %v430_v63 = vsel %vm5295_vm6, %v356_v52, %v429_v47  ;;  %v433_v6 = vsel %vm5265_vm3, %v357_v57, %v432_v53  ;;  %v365_v10 = vrot.slane %v361_v58, 4  ;;  %v436_v14 = vsel %vm5295_vm6, %v364_v9, %v435_v2 }
  0x35   : > { %v4018_v34 = vcombine.low %v466_v27, %v474_v30  ;;  %v5322_v35 = vld [vmem:[#allocation2 + $0x10] sm:$0xf]  ;;  %v4026_v37 = vcombine.low %v482_v33, %v474_v30  ;;  %v584_v46 = vor.u32 %v583_v32, %v579_v31  ;;  %v5328_v49 = vld [vmem:[#allocation2 + $0x14] sm:$0x1]  ;;  %431 = vst [vmem:[#allocation2 + $0x18] sm:$0xf] %v430_v63 }
  0x36   : > { %v4068_v39 = vcombine.low %v5320_v28, %v5322_v35  ;;  %v5326_v48 = vld [vmem:[#allocation2 + $0x10] sm:$0xf]  ;;  %v438_v7 = vld [vmem:[#allocation2 + $0x24] sm:$0x1]  ;;  %434 = vst [vmem:[#allocation2 + $0x1c] sm:$0x1] %v433_v6 }
  0x37   : > { %v586_v42 = vshrl.u32 %v4018_v34, 16  ;;  %v588_v44 = vshll.u32 %v4018_v34, 16  ;;  %v659_v51 = vrot.slane %v4026_v37, 1  ;;  %v5343_v0 = vcombine.low %v5326_v48, %v5328_v49  ;;  %v483_v1 = vld [vmem:[#allocation2 + $0x10] sm:$0xe]  ;;  %v4697_v22 = vld [vmem:[%s6463_s1 + $0x1a8] sm:$0xff]  }
  0x38   : > { %1715 = vmatprep.mubr.bf16.mxu1 %v4068_v39  ;;  %v439_v15 = vsel %vm5265_vm3, %v365_v10, %v438_v7  ;;  %437 = vst [vmem:[#allocation2 + $0x20] sm:$0xf] %v436_v14  ;;  %v287_v20 = vld [vmem:[#allocation2 + $0x2c] sm:$0x1]  ;;  %v4027_v21 = vcombine.low %v483_v1, %v5328_v49  ;;  %v256_v23 = vsel %vm5265_vm3, 0, %v255_v19  ;;  %v4700_v33 = vld [vmem:[%s6463_s1 + $0x1e0] sm:$0xff]  }
  0x39   : > { %v590_v50 = vrot.slane %v588_v44, 1  ;;  %v4067_v60 = vcombine.low %v658_v45, %v659_v51  ;;  %v595_v13 = vshll.u32 %v5343_v0, 16  ;;  %440 = vst [vmem:[#allocation2 + $0x24] sm:$0x1] %v439_v15  ;;  %v288_v24 = vsel %vm5275_vm5, 0, %v287_v20  ;;  %v229_v26 = vld [vmem:[%s5254_s6 + $0x28] sm:$0xff] }
  0x3a   : > { %v258_v27 = vld [vmem:[#allocation2 + $0x30] sm:$0x1]  ;;  %v593_v30 = vshrl.u32 %v5343_v0, 16  ;;  %v4695_v32 = vld [vmem:[%s6463_s1 + $0x128] sm:$0xff]   ;;  %257 = vst [vmem:[#allocation2 + $0x28] sm:$0x1] %v256_v23  ;;  %v4377_v34 = vpack.c.bf16 %v229_v26, %v229_v26 }
  0x3b   : > { %v591_v59 = vor.u32 %v590_v50, %v586_v42  ;;  %1716 = vmatmul.mubr.bf16.vlgmr.msra.gmra.mxu1 %v4067_v60  ;;  %289 = vst [vmem:[#allocation2 + $0x2c] sm:$0x1] %v288_v24  ;;  %v597_v38 = vrot.slane %v595_v13, 1  ;;  %v367_v41 = vshrl.u32 %v4376_v25, 16  ;;  %v370_v45 = vshll.u32 %v4376_v25, 16  ;;  %v4710_v1 = vld [vmem:[%s6463_s1 + $0x158] sm:$0xff]  }
  0x3c   : > { %4518 = vmatpush3.bf16.msra.mxu1 %v4681_v55  ;;  %v5378_v29 = vld [vmem:[#allocation2 + $0x18] sm:$0xf]  ;;  %v290_v47 = vld [vmem:[#allocation2 + $0x34] sm:$0x1]  ;;  %v660_v49 = vrot.slane %v4027_v21, 1  ;;  %v375_v52 = vshrl.u32 %v4377_v34, 16 }
  0x3d   : > { %v4066_v8 = vcombine.low %v584_v46, %v591_v59  ;;  %4519 = vmatprep.subr.bf16.mxu1 %v4684_v56  ;;  %v484_v31 = vld [vmem:[#allocation2 + $0x18] sm:$0xe]  ;;  %v476_v37 = vld [vmem:[#allocation2 + $0x1c] sm:$0x1]  ;;  %v259_v46 = vsel %vm5265_vm3, 0, %v258_v27  ;;  %v369_v50 = vrot.slane %v367_v41, 7  ;;  %v598_v0 = vor.u32 %v597_v38, %v593_v30 }
  0x3e   : > { %v5387_v39 = vld [vmem:[#allocation2 + $0x18] sm:$0xf]  ;;  %v4020_v42 = vcombine.low %v5378_v29, %v476_v37  ;;  %v4028_v44 = vcombine.low %v484_v31, %v476_v37  ;;  %260 = vst [vmem:[#allocation2 + $0x30] sm:$0x1] %v259_v46  ;;  %v291_v51 = vsel %vm5275_vm5, 0, %v290_v47  ;;  %v4706_v56 = vld [vmem:[%s6463_s1 + $0x1a0] sm:$0xff]  }
  0x3f   : > { %1650 = vmatprep.mubr.bf16.mxu0 %v4066_v8  ;;  %v5397_v55 = vld [vmem:[#allocation2 + $0x20] sm:$0xf]  ;;  %292 = vst [vmem:[#allocation2 + $0x34] sm:$0x1] %v291_v51  ;;  %v5402_v57 = vld [vmem:[#allocation2 + $0xc] sm:$0x1] }
  0x40   : > { %1651 = vmatmul.mubr.bf16.vlgmr.msra.gmra.mxu0 %v4065_v4  ;;  %4520 = vmatpush3.bf16.msra.mxu1 %v4690_v11  ;;  %v600_v53 = vshrl.u32 %v4020_v42, 16  ;;  %v602_v54 = vshll.u32 %v4020_v42, 16  ;;  %v4077_v58 = vcombine.low %v5387_v39, %v5397_v55  ;;  %v661_v59 = vrot.slane %v4028_v44, 1  ;;  %v5406_v60 = vld [vmem:[#allocation2 + $0x20] sm:$0xf]  ;;  %v4711_v20 = vld [vmem:[%s6463_s1 + $0x118] sm:$0xff]  }
  0x41   : > { %4478 = vmatpush3.bf16.msra.mxu0 %v4679_v62  ;;  %4521 = vmatprep.subr.bf16.mxu1 %v4696_v16  ;;  %v5408_v62 = vld [vmem:[#allocation2 + $0x24] sm:$0x1]  ;;  %v378_v63 = vshll.u32 %v4377_v34, 16  ;;  %v373_v6 = vrot.slane %v369_v50, 4  ;;  %v441_v8 = vld [vmem:[#allocation2 + $0x28] sm:$0xf] }
  0x42   : > { %4479 = vmatprep.subr.bf16.mxu0 %v4682_v5  ;;  %v604_v2 = vrot.slane %v602_v54, 1  ;;  %v4699_v4 = vld [vmem:[%s6463_s1 + $0x120] sm:$0xff]   ;;  %v372_v5 = vor.u32 %v370_v45, %v369_v50  ;;  %1723 = vmatprep.mubr.bf16.mxu1 %v4077_v58  ;;  %v4076_v7 = vcombine.low %v660_v49, %v661_v59  ;;  %v444_v9 = vld [vmem:[#allocation2 + $0x2c] sm:$0x1]  ;;  %v5415_v10 = vcombine.low %v5406_v60, %v5408_v62  ;;  %v4712_v21 = vld [vmem:[%s6463_s1 + $0x1d8] sm:$0xff]  }
  0x43   : > { %v377_v11 = vrot.slane %v375_v52, 7  ;;  %v445_v15 = vsel %vm5265_vm3, %v373_v6, %v444_v9  ;;  %v485_v16 = vld [vmem:[#allocation2 + $0x20] sm:$0xe]  ;;  %v4713_v27 = vld [vmem:[%s6463_s1 + $0x198] sm:$0xff]   ;;  %v506_v31 = vld [vmem:[#allocation2 + $0x10] sm:$0xe] }
  0x44   : > { %4522 = vmatpush3.bf16.msra.mxu1 %v4697_v22  ;;  %v605_v13 = vor.u32 %v604_v2, %v600_v53  ;;  %v442_v14 = vsel %vm5295_vm6, %v372_v5, %v441_v8  ;;  %446 = vst [vmem:[#allocation2 + $0x2c] sm:$0x1] %v445_v15  ;;  %v5436_v22 = vcombine.low %v5320_v28, %v5402_v57  ;;  %v609_v24 = vshll.u32 %v5415_v10, 16  ;;  %v4714_v34 = vld [vmem:[%s6463_s1 + $0x150] sm:$0xff]   ;;  %v261_v44 = vld [vmem:[#allocation2 + $0x38] sm:$0x1] }
  0x45   : > { %4480 = vmatpush3.bf16.msra.mxu0 %v4683_v12  ;;  %4523 = vmatprep.subr.bf16.mxu1 %v4700_v33  ;;  %v5420_v12 = vld [vmem:[#allocation2 + $0x14] sm:$0x1]  ;;  %443 = vst [vmem:[#allocation2 + $0x28] sm:$0xf] %v442_v14  ;;  %v380_v18 = vor.u32 %v378_v63, %v377_v11  ;;  %v381_v19 = vrot.slane %v377_v11, 4  ;;  %v4029_v30 = vcombine.low %v485_v16, %v5408_v62  ;;  %v231_v58 = vld [vmem:[%s5254_s6 + $0x38] sm:$0xff] }
  0x46   : > { %4481 = vmatprep.subr.bf16.mxu0 %v4694_v17  ;;  %v4074_v17 = vcombine.low %v5326_v48, %v5378_v29  ;;  %1724 = vmatmul.mubr.bf16.gmra.mxu1 %v4076_v7  ;;  %v4075_v23 = vcombine.low %v598_v0, %v605_v13  ;;  %v447_v48 = vld [vmem:[#allocation2 + $0x30] sm:$0xf]  ;;  %v450_v26 = vld [vmem:[#allocation2 + $0x34] sm:$0x1]  ;;  %v505_v29 = vld [vmem:[#allocation2 + $0x8] sm:$0xe]  ;;  %v4042_v59 = vcombine.low %v506_v31, %v5420_v12 }
  0x47   : > { %v448_v25 = vsel %vm5295_vm6, %v380_v18, %v447_v48  ;;  %v451_v28 = vsel %vm5265_vm3, %v381_v19, %v450_v26  ;;  %v707_v33 = vshrl.u32 %v5436_v22, 16  ;;  %v709_v37 = vshll.u32 %v5436_v22, 16  ;;  %v4715_v38 = vld [vmem:[%s6463_s1 + $0x110] sm:$0xff]   ;;  %v293_v63 = vld [vmem:[#allocation2 + $0x3c] sm:$0x1]  ;;  %v4726_v18 = vld [vmem:[%s6463_s1 + $0x148] sm:$0xff]  }
  0x48   : > { %4524 = vmatpush3.bf16.msra.mxu1 %v4706_v56  ;;  %1658 = vmatprep.mubr.bf16.mxu0 %v4075_v23  ;;  %449 = vst [vmem:[#allocation2 + $0x30] sm:$0xf] %v448_v25  ;;  %452 = vst [vmem:[#allocation2 + $0x34] sm:$0x1] %v451_v28  ;;  %v4716_v41 = vld [vmem:[%s6463_s1 + $0x1d0] sm:$0xff]   ;;  %v611_v47 = vrot.slane %v609_v24, 1  ;;  %v4041_v51 = vcombine.low %v505_v29, %v5402_v57 }
  0x49   : > { %4482 = vmatpush3.bf16.msra.mxu0 %v4695_v32  ;;  %4525 = vmatprep.subr.bf16.mxu1 %v4712_v21  ;;  %v5449_v32 = vcombine.low %v5322_v35, %v5420_v12  ;;  %v607_v35 = vshrl.u32 %v5415_v10, 16  ;;  %v230_v42 = vld [vmem:[%s5254_s6 + $0x30] sm:$0xff]  ;;  %v662_v49 = vrot.slane %v4029_v30, 1  ;;  %v262_v56 = vsel %vm5265_vm3, 0, %v261_v44  ;;  %v5482_v10 = vld [vmem:[#allocation2 + $0x1c] sm:$0x1] }
  0x4a   : > { %4483 = vmatprep.subr.bf16.mxu0 %v4698_v40  ;;  %1659 = vmatmul.mubr.bf16.gmra.mxu0 %v4074_v17  ;;  %v4378_v50 = vpack.c.bf16 %v230_v42, %v230_v42  ;;  %263 = vst [vmem:[#allocation2 + $0x38] sm:$0x1] %v262_v56  ;;  %v294_v7 = vsel %vm5275_vm5, 0, %v293_v63  ;;  %v4722_v13 = vld [vmem:[%s6463_s1 + $0x190] sm:$0xff]   ;;  %v5489_v14 = vrot.slane %v4041_v51, 1  ;;  %v4379_v17 = vpack.c.bf16 %v231_v58, %v231_v58  ;;  %v4727_v48 = vld [vmem:[%s6463_s1 + $0x108] sm:$0xff]  }
  0x4b   : > { %v714_v40 = vshrl.u32 %v5449_v32, 16  ;;  %v478_v46 = vld [vmem:[#allocation2 + $0x2c] sm:$0x1]  ;;  %v716_v9 = vshll.u32 %v5449_v32, 16  ;;  %295 = vst [vmem:[#allocation2 + $0x3c] sm:$0x1] %v294_v7  ;;  %v612_v15 = vor.u32 %v611_v47, %v607_v35  ;;  %v5501_v24 = vcombine.low %v5387_v39, %v5482_v10 }
  0x4c   : > { %4526 = vmatpush3.bf16.msra.mxu1 %v4713_v27  ;;  %v5465_v45 = vld [vmem:[#allocation2 + $0x28] sm:$0xf]  ;;  %v383_v0 = vshrl.u32 %v4378_v50, 16  ;;  %v386_v2 = vshll.u32 %v4378_v50, 16  ;;  %v5494_v19 = vrot.slane %v4042_v59, 1  ;;  %v391_v29 = vshrl.u32 %v4379_v17, 16 }
  0x4d   : > { %4484 = vmatpush3.bf16.msra.mxu0 %v4699_v4  ;;  %v4022_v52 = vcombine.low %v5465_v45, %v478_v46  ;;  %v5469_v53 = vld [vmem:[#allocation2 + $0x28] sm:$0xf]  ;;  %4527 = vmatprep.subr.bf16.mxu1 %v4716_v41  ;;  %v264_v4 = vld [vmem:[#allocation2 + $0x40] sm:$0x1]  ;;  %v296_v23 = vld [vmem:[#allocation2 + $0x44] sm:$0x1]  ;;  %v4083_v39 = vcombine.low %v5406_v60, %v5465_v45 }
  0x4e   : > { %4485 = vmatprep.subr.bf16.mxu0 %v4710_v1  ;;  %v486_v54 = vld [vmem:[#allocation2 + $0x28] sm:$0xe]  ;;  %v265_v8 = vsel %vm5265_vm3, 0, %v264_v4  ;;  %v385_v12 = vrot.slane %v383_v0, 7  ;;  %v297_v27 = vsel %vm5275_vm5, 0, %v296_v23  ;;  %v5510_v30 = vrot.slane %v709_v37, 1 }
  0x4f   : > { %v4030_v62 = vcombine.low %v486_v54, %v478_v46  ;;  %v614_v57 = vshrl.u32 %v4022_v52, 16  ;;  %v616_v5 = vshll.u32 %v4022_v52, 16  ;;  %v5475_v6 = vld [vmem:[#allocation2 + $0x30] sm:$0xf]  ;;  %266 = vst [vmem:[#allocation2 + $0x40] sm:$0x1] %v265_v8 }
  0x50   : > { %v4086_v11 = vcombine.low %v5469_v53, %v5475_v6  ;;  %v388_v21 = vor.u32 %v386_v2, %v385_v12  ;;  %4528 = vmatpush3.bf16.msra.mxu1 %v4722_v13  ;;  %v5503_v26 = vld [vmem:[#allocation2 + $0x30] sm:$0xf]  ;;  %v4728_v28 = vld [vmem:[%s6463_s1 + $0x1c8] sm:$0xff]   ;;  %v5512_v31 = vld [vmem:[#allocation2 + $0x24] sm:$0x1]  ;;  %v394_v35 = vshll.u32 %v4379_v17, 16 }
  0x51   : > { %4486 = vmatpush3.bf16.msra.mxu0 %v4711_v20  ;;  %v663_v1 = vrot.slane %v4030_v62, 1  ;;  %v618_v16 = vrot.slane %v616_v5, 1  ;;  %298 = vst [vmem:[#allocation2 + $0x44] sm:$0x1] %v297_v27  ;;  %v4729_v41 = vld [vmem:[%s6463_s1 + $0x188] sm:$0xff]   ;;  %v393_v46 = vrot.slane %v391_v29, 7  ;;  %4529 = vmatprep.subr.bf16.mxu1 %v4728_v28  ;;  %v5535_v62 = vcombine.low %v5397_v55, %v5512_v31 }
  0x52   : > { %4487 = vmatprep.subr.bf16.mxu0 %v4714_v34  ;;  %1731 = vmatprep.mubr.bf16.mxu1 %v4086_v11  ;;  %v389_v34 = vrot.slane %v385_v12, 4  ;;  %v453_v44 = vld [vmem:[#allocation2 + $0x38] sm:$0xf]  ;;  %v4730_v37 = vld [vmem:[%s6463_s1 + $0x140] sm:$0xff]   ;;  %v5522_v47 = vrot.slane %v716_v9, 1  ;;  %v721_v28 = vshrl.u32 %v5501_v24, 16 }
  0x53   : > { %v4085_v20 = vcombine.low %v662_v49, %v663_v1  ;;  %v619_v25 = vor.u32 %v618_v16, %v614_v57  ;;  %v454_v60 = vsel %vm5295_vm6, %v388_v21, %v453_v44  ;;  %v4731_v45 = vld [vmem:[%s6463_s1 + $0x100] sm:$0xff]   ;;  %v723_v49 = vshll.u32 %v5501_v24, 16  ;;  %v456_v50 = vld [vmem:[#allocation2 + $0x3c] sm:$0x1]  ;;  %v487_v56 = vld [vmem:[#allocation2 + $0x30] sm:$0xe] }
  0x54   : > { %4530 = vmatpush3.bf16.msra.mxu1 %v4729_v41  ;;  %455 = vst [vmem:[#allocation2 + $0x38] sm:$0xf] %v454_v60  ;;  %v396_v51 = vor.u32 %v394_v35, %v393_v46  ;;  %v397_v52 = vrot.slane %v393_v46, 4  ;;  %v457_v58 = vsel %vm5265_vm3, %v389_v34, %v456_v50  ;;  %v4732_v5 = vld [vmem:[%s6463_s1 + $0x1c0] sm:$0xff]   ;;  %v730_v7 = vshll.u32 %v5535_v62, 16  ;;  %v5555_v1 = vld [vmem:[%s6463_s1 + $0x238] sm:$0xff]  }
  0x55   : > { %4488 = vmatpush3.bf16.msra.mxu0 %v4715_v38  ;;  %1732 = vmatmul.mubr.bf16.gmra.mxu1 %v4085_v20  ;;  %v479_v38 = vld [vmem:[#allocation2 + $0x34] sm:$0x1]  ;;  %v4084_v42 = vcombine.low %v612_v15, %v619_v25  ;;  %458 = vst [vmem:[#allocation2 + $0x3c] sm:$0x1] %v457_v58  ;;  %v5557_v12 = vld [vmem:[#allocation2 + $0x10] sm:$0xf] }
  0x56   : > { %4489 = vmatprep.subr.bf16.mxu0 %v4726_v18  ;;  %v459_v54 = vld [vmem:[#allocation2 + $0x40] sm:$0xf]  ;;  %v4023_v59 = vcombine.low %v5503_v26, %v479_v38  ;;  %v4031_v57 = vcombine.low %v487_v56, %v479_v38  ;;  %4531 = vmatprep.subr.bf16.mxu1 %v4732_v5  ;;  %v5559_v13 = vld [vmem:[#allocation2 + $0x18] sm:$0xf]  ;;  %v5561_v18 = vld [vmem:[#allocation2 + $0x14] sm:$0x1] }
  0x57   : > { %1666 = vmatprep.mubr.bf16.mxu0 %v4084_v42  ;;  %v460_v63 = vsel %vm5295_vm6, %v396_v51, %v459_v54  ;;  %v4049_v25 = vcombine.low %v5557_v12, %v5561_v18  ;;  %v507_v41 = vld [vmem:[#allocation2 + $0x18] sm:$0xe]  ;;  %v728_v42 = vshrl.u32 %v5535_v62, 16  ;;  %v5579_v44 = vld [vmem:[#allocation2 + $0x2c] sm:$0x1]  ;;  %v5581_v56 = vrot.slane %v730_v7, 1 }
  0x58   : > { %1667 = vmatmul.mubr.bf16.gmra.mxu0 %v4083_v39  ;;  %461 = vst [vmem:[#allocation2 + $0x40] sm:$0xf] %v460_v63  ;;  %v462_v0 = vld [vmem:[#allocation2 + $0x44] sm:$0x1]  ;;  %v623_v2 = vshll.u32 %v4023_v59, 16  ;;  %v621_v11 = vshrl.u32 %v4023_v59, 16  ;;  %4532 = vmatpush3.bf16.msra.mxu1 %v4733_v61 }
  0x59   : > { %4490 = vmatpush3.bf16.msra.mxu0 %v4727_v48  ;;  %v463_v4 = vsel %vm5265_vm3, %v397_v52, %v462_v0  ;;  %v664_v17 = vrot.slane %v4031_v57, 1  ;;  %v5567_v48 = vld [vmem:[#allocation2 + $0x1c] sm:$0x1]  ;;  %v5576_v39 = vrot.slane %v723_v49, 1  ;;  %v835_v46 = vshrl.u32 %v4049_v25, 16  ;;  %v4741_v24 = vld [vmem:[%s6463_s1 + $0x228] sm:$0xff]  }
  0x5a   : > { %4491 = vmatprep.subr.bf16.mxu0 %v4730_v37  ;;  %464 = vst [vmem:[#allocation2 + $0x44] sm:$0x1] %v463_v4  ;;  %v625_v16 = vrot.slane %v623_v2, 1  ;;  %v4050_v29 = vcombine.low %v5559_v13, %v5567_v48  ;;  %v837_v37 = vshll.u32 %v4049_v25, 16  ;;  %v508_v50 = vld [vmem:[#allocation2 + $0x20] sm:$0xe]  ;;  %v4070_v57 = vcombine.low %v5489_v14, %v5494_v19 }
  0x5b   : > { %v5548_v55 = vld [vmem:[#allocation2 + $0x38] sm:$0xf]  ;;  %v5583_v59 = vld [vmem:[#allocation2 + $0x20] sm:$0xf]  ;;  %v5585_v63 = vld [vmem:[#allocation2 + $0x28] sm:$0xf]  ;;  %v4071_v25 = vcombine.low %v5557_v12, %v5559_v13 }
  0x5c   : > { %v5550_v8 = vld [vmem:[#allocation2 + $0x38] sm:$0xf]  ;;  %v480_v15 = vld [vmem:[#allocation2 + $0x3c] sm:$0x1]  ;;  %v842_v60 = vshrl.u32 %v4050_v29, 16  ;;  %v626_v51 = vor.u32 %v625_v16, %v621_v11  ;;  %v839_v49 = vrot.slane %v837_v37, 1  ;;  %v4092_v4 = vcombine.low %v5503_v26, %v5548_v55 }
  0x5d   : > { %4492 = vmatpush3.bf16.msra.mxu0 %v4731_v45  ;;  %v488_v9 = vld [vmem:[#allocation2 + $0x38] sm:$0xe]  ;;  %v4024_v20 = vcombine.low %v5548_v55, %v480_v15  ;;  %v844_v45 = vshll.u32 %v4050_v29, 16  ;;  %v5587_v0 = vld [vmem:[#allocation2 + $0x34] sm:$0x1]  ;;  %v4043_v11 = vcombine.low %v507_v41, %v5482_v10  ;;  %v5602_v16 = vcombine.low %v5469_v53, %v5579_v44  ;;  %s5012_s6 = sshll.u32 %s5072_s10, 4  ;;  %s5013_s6 = int_to_ptr.vmem [resolvable:$false] %s5012_s6 }
  0x5e   : > { %v4032_v23 = vcombine.low %v488_v9, %v480_v15  ;;  %4569 = vmatprep.subr.bf16.mxu0 %v5555_v1  ;;  %v5593_v5 = vld [vmem:[#allocation2 + $0x24] sm:$0x1]  ;;  %v5595_v7 = vld [vmem:[#allocation2 + $0x2c] sm:$0x1]  ;;  %v840_v61 = vor.u32 %v839_v49, %v835_v46  ;;  %v4044_v55 = vcombine.low %v508_v50, %v5512_v31  ;;  %v5609_v19 = vcombine.low %v5475_v6, %v5587_v0  ;;  %v510_v29 = vld [vmem:[#allocation2 + $0x30] sm:$0xe]  ;;  %p5015_p0 = scmp.lt.s32.totalorder %s6418_s26, %s5013_s6 }
  0x5f   : > { %v5564_v21 = vld [vmem:[#allocation2 + $0x40] sm:$0xf]  ;;  %v628_v34 = vshrl.u32 %v4024_v20, 16  ;;  %v630_v38 = vshll.u32 %v4024_v20, 16  ;;  %v846_v58 = vrot.slane %v844_v45, 1  ;;  %v4051_v15 = vcombine.low %v5583_v59, %v5593_v5  ;;  %s5014_s11 = scalar_lea.vmem %s5013_s6, 1024 }
  0x60   : > { %v4095_v27 = vcombine.low %v5550_v8, %v5564_v21  ;;  %v665_v35 = vrot.slane %v4032_v23, 1  ;;  %v4052_v14 = vcombine.low %v5585_v63, %v5595_v7  ;;  %v509_v23 = vld [vmem:[#allocation2 + $0x28] sm:$0xe]  ;;  %v712_v31 = vor.u32 %v5510_v30, %v707_v33  ;;  %v5621_v41 = vld [vmem:[#allocation2 + $0x38] sm:$0xf]  ;;  %p5016_p1 = scmp.lt.s32.totalorder %s5014_s11, %s5008_s9 }
  0x61   : > { %v632_v52 = vrot.slane %v630_v38, 1  ;;  %v847_v9 = vor.u32 %v846_v58, %v842_v60  ;;  %v849_v20 = vshrl.u32 %v4051_v15, 16  ;;  %v851_v10 = vshll.u32 %v4051_v15, 16  ;;  %v5623_v46 = vld [vmem:[#allocation2 + $0x34] sm:$0x1] }
  0x62   : > { %1739 = vmatprep.mubr.bf16.mxu1 %v4095_v27  ;;  %v4094_v54 = vcombine.low %v664_v17, %v665_v35  ;;  %v856_v53 = vshrl.u32 %v4052_v14, 16  ;;  %v858_v27 = vshll.u32 %v4052_v14, 16  ;;  %v719_v6 = vor.u32 %v5522_v47, %v714_v40  ;;  %v5619_v35 = vld [vmem:[#allocation2 + $0x30] sm:$0xf]  ;;  %v5625_v22 = vld [vmem:[#allocation2 + $0x3c] sm:$0x1]  ;;  %p5017_p2 = por %p5016_p1, %p5015_p0 }
  0x63   : > { %v633_v2 = vor.u32 %v632_v52, %v628_v34  ;;  %v4072_v17 = vcombine.low %v840_v61, %v847_v9  ;;  %v788_v34 = vrot.slane %v4043_v11, 1  ;;  %v853_v38 = vrot.slane %v851_v10, 1  ;;  %v503_v61 = vld [vmem:[#allocation2 + $0x3c] sm:$0x1]  ;;  %v504_v9 = vld [vmem:[#allocation2 + $0x44] sm:$0x1] }
  0x64   : > { %1740 = vmatmul.mubr.bf16.gmra.mxu1 %v4094_v54  ;;  %v789_v12 = vrot.slane %v4044_v55, 1  ;;  %v860_v13 = vrot.slane %v858_v27, 1  ;;  %v737_v33 = vshll.u32 %v5602_v16, 16  ;;  %v744_v32 = vshll.u32 %v5609_v19, 16  ;;  %v4738_v54 = vld [vmem:[%s6463_s1 + $0x230] sm:$0xff]   ;;  %p5018_p3 = pnand %p5017_p2, %p5011_p13 }
  0x65   : > { %v4093_v26 = vcombine.low %v626_v51, %v633_v2  ;;  %1845 = vmatprep.mubr.bf16.mxu1 %v4072_v17  ;;  %v854_v40 = vor.u32 %v853_v38, %v849_v20  ;;  %v4053_v30 = vcombine.low %v5619_v35, %v5623_v46  ;;  %v4045_v37 = vcombine.low %v509_v23, %v5579_v44  ;;  %v299_v11 = vld [vmem:[#allocation2 + $0x4c] sm:$0x1]  ;;  %v5642_v17 = vld [vmem:[#allocation2 + $0x40] sm:$0xf]  ;;  %v5652_v23 = vld [vmem:[#allocation2 + $0x44] sm:$0x1] }
  0x66   : > { %v861_v47 = vor.u32 %v860_v13, %v856_v53  ;;  %v4046_v60 = vcombine.low %v510_v29, %v5587_v0  ;;  %v4054_v45 = vcombine.low %v5621_v41, %v5625_v22  ;;  %v4069_v50 = vcombine.low %v712_v31, %v719_v6  ;;  %v511_v53 = vld [vmem:[#allocation2 + $0x38] sm:$0xe]  ;;  %v512_v27 = vld [vmem:[#allocation2 + $0x40] sm:$0xe]  ;;  %v4842_v36 = vld [vmem:[%s6465_s3 + $0x1b4] ss:$8 sps:$4 sm:$0xff]  }
  0x67   : > { %1674 = vmatprep.mubr.bf16.mxu0 %v4093_v26  ;;  %v863_v51 = vshrl.u32 %v4053_v30, 16  ;;  %v865_v52 = vshll.u32 %v4053_v30, 16  ;;  %v4079_v49 = vcombine.low %v788_v34, %v789_v12  ;;  %v4080_v44 = vcombine.low %v5583_v59, %v5585_v63  ;;  %v4747_v6 = vld [vmem:[%s6463_s1 + $0x220] sm:$0xff]  }
  0x68   : > { %1675 = vmatmul.mubr.bf16.gmra.mxu0 %v4092_v4  ;;  %v4081_v58 = vcombine.low %v854_v40, %v861_v47  ;;  %v870_v2 = vshrl.u32 %v4054_v45, 16  ;;  %v872_v4 = vshll.u32 %v4054_v45, 16  ;;  %v790_v15 = vrot.slane %v4045_v37, 1  ;;  %v4750_v40 = vld [vmem:[%s6463_s1 + $0x218] sm:$0xff]  }
  0x69   : > { %1780 = vmatprep.mubr.bf16.mxu0 %v4070_v57  ;;  %v267_v57 = vld [vmem:[#allocation2 + $0x48] sm:$0x1]  ;;  %v867_v0 = vrot.slane %v865_v52, 1  ;;  %v791_v26 = vrot.slane %v4046_v60, 1  ;;  %v726_v20 = vor.u32 %v5576_v39, %v721_v28  ;;  %v733_v59 = vor.u32 %v5581_v56, %v728_v42  ;;  %v530_v60 = vld [vmem:[#allocation2 + $0x10] sm:$0xe] }
  0x6a   : > { %v874_v55 = vrot.slane %v872_v4, 1  ;;  %v268_v14 = vsel %vm5265_vm3, 0, %v267_v57  ;;  %v300_v10 = vsel %vm5275_vm5, 0, %v299_v11  ;;  %v735_v62 = vshrl.u32 %v5602_v16, 16  ;;  %v531_v45 = vld [vmem:[#allocation2 + $0x18] sm:$0xe] }
  0x6b   : > { %v868_v63 = vor.u32 %v867_v0, %v863_v51  ;;  %269 = vst [vmem:[#allocation2 + $0x48] sm:$0x1] %v268_v14  ;;  %301 = vst [vmem:[#allocation2 + $0x4c] sm:$0x1] %v300_v10  ;;  %v739_v28 = vrot.slane %v737_v33, 1  ;;  %v742_v43 = vshrl.u32 %v5609_v19, 16  ;;  %v4055_v39 = vcombine.low %v5642_v17, %v5652_v23 }
  0x6c   : > { %1846 = vmatmul.mubr.bf16.vlgmr.msra.gmra.mxu1 %v4071_v25  ;;  %v875_v25 = vor.u32 %v874_v55, %v870_v2  ;;  %v4040_v42 = vcombine.low %v5564_v21, %v504_v9  ;;  %v746_v56 = vrot.slane %v744_v32, 1  ;;  %v4078_v31 = vcombine.low %v726_v20, %v733_v59  ;;  %v4757_v59 = vld [vmem:[%s6463_s1 + $0x208] sm:$0xff]   ;;  %v534_v10 = vld [vmem:[#allocation2 + $0x30] sm:$0xe] }
  0x6d   : > { %1853 = vmatprep.mubr.bf16.mxu1 %v4081_v58  ;;  %v4047_v34 = vcombine.low %v511_v53, %v503_v61  ;;  %v4048_v16 = vcombine.low %v512_v27, %v504_v9  ;;  %v4088_v38 = vcombine.low %v790_v15, %v791_v26  ;;  %v879_v19 = vshll.u32 %v4055_v39, 16  ;;  %v4754_v58 = vld [vmem:[%s6463_s1 + $0x210] sm:$0xff]   ;;  %v532_v15 = vld [vmem:[#allocation2 + $0x20] sm:$0xe]  ;;  %v533_v26 = vld [vmem:[#allocation2 + $0x28] sm:$0xe] }
  0x6e   : > { %v4090_v29 = vcombine.low %v868_v63, %v875_v25  ;;  %v740_v12 = vor.u32 %v739_v28, %v735_v62  ;;  %v747_v33 = vor.u32 %v746_v56, %v742_v43  ;;  %v4089_v21 = vcombine.low %v5619_v35, %v5621_v41  ;;  %v535_v25 = vld [vmem:[#allocation2 + $0x38] sm:$0xe]  ;;  %v4761_v28 = vld [vmem:[%s6463_s1 + $0x200] sm:$0xff]  }
  0x6f   : > { %v792_v30 = vrot.slane %v4047_v34, 1  ;;  %v793_v47 = vrot.slane %v4048_v16, 1  ;;  %v877_v51 = vshrl.u32 %v4055_v39, 16  ;;  %v881_v52 = vrot.slane %v879_v19, 1  ;;  %v4770_v19 = vld [vmem:[%s6465_s3 + $0x174] ss:$8 sps:$4 sm:$0xff]  }
  0x70   : > { %1781 = vmatmul.mubr.bf16.vlgmr.msra.gmra.mxu0 %v4069_v50  ;;  %v4087_v35 = vcombine.low %v740_v12, %v747_v33  ;;  %v756_v57 = vshrl.u32 %v4040_v42, 16  ;;  %v4057_v0 = vcombine.low %v530_v60, %v5561_v18  ;;  %v4058_v11 = vcombine.low %v531_v45, %v5567_v48  ;;  %v4768_v12 = vld [vmem:[%s6465_s3 + $0x170] ss:$8 sps:$4 sm:$0xff]   ;;  %v4774_v33 = vld [vmem:[%s6465_s3 + $0x160] ss:$8 sps:$4 sm:$0xff]  }
  0x71   : > { %4570 = vmatpush3.bf16.msra.mxu0 %v5555_v1  ;;  %1788 = vmatprep.mubr.bf16.mxu0 %v4079_v49  ;;  %v4039_v1 = vcombine.low %v5550_v8, %v503_v61  ;;  %v758_v8 = vshll.u32 %v4040_v42, 16  ;;  %v4097_v2 = vcombine.low %v792_v30, %v793_v47  ;;  %v882_v9 = vor.u32 %v881_v52, %v877_v51  ;;  %v537_v42 = vld [vmem:[#allocation2 + $0x48] sm:$0xe]  ;;  %v2195_v47 = vld [vmem:[#allocation3] sm:$0x4] }
  0x72   : > { %4571 = vmatprep.subr.bf16.mxu0 %v4738_v54  ;;  %v521_v32 = vld [vmem:[#allocation2 + $0x48] sm:$0xf]  ;;  %v5672_v37 = vld [vmem:[#allocation2 + $0x4c] sm:$0x1]  ;;  %v914_v53 = vrot.slane %v4057_v0, 1  ;;  %v915_v48 = vrot.slane %v4058_v11, 1  ;;  %v4059_v27 = vcombine.low %v532_v15, %v5593_v5  ;;  %v4061_v43 = vcombine.low %v534_v10, %v5623_v46 }
  0x73   : > { %v751_v13 = vshll.u32 %v4039_v1, 16  ;;  %v4056_v50 = vcombine.low %v521_v32, %v5672_v37  ;;  %v749_v41 = vshrl.u32 %v4039_v1, 16  ;;  %v760_v61 = vrot.slane %v758_v8, 1  ;;  %v536_v1 = vld [vmem:[#allocation2 + $0x40] sm:$0xe] }
  0x74   : > { %1854 = vmatmul.mubr.bf16.gmra.mxu1 %v4080_v44  ;;  %v4098_v63 = vcombine.low %v5642_v17, %v521_v32  ;;  %v4073_v17 = vcombine.low %v914_v53, %v915_v48  ;;  %v4062_v39 = vcombine.low %v535_v25, %v5625_v22  ;;  %v916_v56 = vrot.slane %v4059_v27, 1  ;;  %v4771_v8 = vld [vmem:[%s6465_s3 + $0x70] ss:$8 sps:$4 sm:$0xff]   ;;  %v2204_v51 = vld [vmem:[#allocation3 + $0xc] sm:$0x4] }
  0x75   : > { %4572 = vmatpush3.bf16.msra.mxu0 %v4738_v54  ;;  %1861 = vmatprep.mubr.bf16.mxu1 %v4090_v29  ;;  %v884_v54 = vshrl.u32 %v4056_v50, 16  ;;  %v886_v49 = vshll.u32 %v4056_v50, 16  ;;  %v753_v4 = vrot.slane %v751_v13, 1  ;;  %v761_v20 = vor.u32 %v760_v61, %v756_v57  ;;  %v4776_v13 = vld [vmem:[%s6465_s3 + $0x164] ss:$8 sps:$4 sm:$0xff]  }
  0x76   : > { %4573 = vmatprep.subr.bf16.mxu0 %v4741_v24  ;;  %v918_v5 = vrot.slane %v4061_v43, 1  ;;  %v4064_v34 = vcombine.low %v537_v42, %v5672_v37  ;;  %v2198_v37 = vld [vmem:[#allocation3 + $0x4] sm:$0x4]  ;;  %v2196_v45 = vsel %vm5712_vm9, 0, %v2195_v47  ;;  %v2207_v52 = vld [vmem:[#allocation3 + $0x10] sm:$0x4] }
  0x77   : > { %v888_v44 = vrot.slane %v886_v49, 1  ;;  %v754_v14 = vor.u32 %v753_v4, %v749_v41  ;;  %v2199_v50 = vsel %vm5712_vm9, 0, %v2198_v37  ;;  %2197 = vst [vmem:[#allocation3] sm:$0x4] %v2196_v45  ;;  %v2208_v41 = vsel %vm5712_vm9, 0, %v2207_v52 }
  0x78   : > { %1789 = vmatmul.mubr.bf16.gmra.mxu0 %v4078_v31  ;;  %v921_v16 = vrot.slane %v4064_v34, 1  ;;  %2200 = vst [vmem:[#allocation3 + $0x4] sm:$0x4] %v2199_v50  ;;  %2209 = vst [vmem:[#allocation3 + $0x10] sm:$0x4] %v2208_v41 }
  0x79   : > { %4574 = vmatpush3.bf16.msra.mxu0 %v4741_v24  ;;  %1796 = vmatprep.mubr.bf16.mxu0 %v4088_v38  ;;  %v889_v55 = vor.u32 %v888_v44, %v884_v54  ;;  %v4060_v24 = vcombine.low %v533_v26, %v5595_v7  ;;  %v4096_v62 = vcombine.low %v754_v14, %v761_v20  ;;  %v919_v7 = vrot.slane %v4062_v39, 1  ;;  %v2210_v54 = vld [vmem:[#allocation3 + $0x14] sm:$0x4]  ;;  %v4782_v61 = vld [vmem:[%s6465_s3 + $0x154] ss:$8 sps:$4 sm:$0xff]  }
  0x7a   : > { %4575 = vmatprep.subr.bf16.mxu0 %v4747_v6  ;;  %v2211_v49 = vsel %vm5712_vm9, 0, %v2210_v54  ;;  %v4779_v57 = vld [vmem:[%s6465_s3 + $0x64] ss:$8 sps:$4 sm:$0xff]   ;;  %v4777_v44 = vld [vmem:[%s6465_s3 + $0x60] ss:$8 sps:$4 sm:$0xff]  }
  0x7b   : > { %v4099_v18 = vcombine.low %v882_v9, %v889_v55  ;;  %v917_v29 = vrot.slane %v4060_v24, 1  ;;  %v4091_v46 = vcombine.low %v918_v5, %v919_v7  ;;  %2212 = vst [vmem:[#allocation3 + $0x14] sm:$0x4] %v2211_v49  ;;  %v4780_v0 = vld [vmem:[%s6465_s3 + $0x150] ss:$8 sps:$4 sm:$0xff]  }
  0x7c   : > { %1862 = vmatmul.mubr.bf16.gmra.mxu1 %v4089_v21  ;;  %v2180_v21 = vld [vmem:[#allocation3 + $0x8] sm:$0x1]  ;;  %v4785_v15 = vld [vmem:[%s6465_s3 + $0x54] ss:$8 sps:$4 sm:$0xff]   ;;  %v4788_v26 = vld [vmem:[%s6465_s3 + $0x144] ss:$8 sps:$4 sm:$0xff]  }
  0x7d   : > { %4576 = vmatpush3.bf16.msra.mxu0 %v4747_v6  ;;  %1869 = vmatprep.mubr.bf16.mxu1 %v4099_v18  ;;  %v4082_v31 = vcombine.low %v916_v56, %v917_v29  ;;  %v4063_v6 = vcombine.low %v536_v1, %v5652_v23  ;;  %v4773_v23 = vld [vmem:[%s6465_s3 + $0x74] ss:$8 sps:$4 sm:$0xff]   ;;  %v2181_v30 = vsel %vm5265_vm3, 0, %v2180_v21  ;;  %v4783_v14 = vld [vmem:[%s6465_s3 + $0x50] ss:$8 sps:$4 sm:$0xff]  }
  0x7e   : > { %4577 = vmatprep.subr.bf16.mxu0 %v4750_v40  ;;  %3675 = vmatprep.subr.bf16.mxu1 %v4773_v23  ;;  %2182 = vst [vmem:[#allocation3 + $0x8] sm:$0x1] %v2181_v30  ;;  %v4786_v20 = vld [vmem:[%s6465_s3 + $0x140] ss:$8 sps:$4 sm:$0xff]   ;;  %v4794_v10 = vld [vmem:[%s6465_s3 + $0x134] ss:$8 sps:$4 sm:$0xff]  }
  0x7f   : > { %v920_v22 = vrot.slane %v4063_v6, 1  ;;  %3676 = vmatpush1.bf16.msra.mxu1 %v4771_v8  ;;  %v4789_v18 = vld [vmem:[%s6465_s3 + $0x40] ss:$8 sps:$4 sm:$0xff]   ;;  %v4792_v53 = vld [vmem:[%s6465_s3 + $0x130] ss:$8 sps:$4 sm:$0xff]  }
  0x80   : > { %1797 = vmatmul.mubr.bf16.gmra.mxu0 %v4087_v35  ;;  %v2205_v35 = vsel %vm5712_vm9, 0, %v2204_v51  ;;  %3677 = vmatprep.subr.bf16.mxu1 %v4779_v57  ;;  %v4797_v27 = vld [vmem:[%s6465_s3 + $0x34] ss:$8 sps:$4 sm:$0xff]   ;;  %v4800_v24 = vld [vmem:[%s6465_s3 + $0x124] ss:$8 sps:$4 sm:$0xff]  }
  0x81   : > { %4578 = vmatpush3.bf16.msra.mxu0 %v4750_v40  ;;  %1804 = vmatprep.mubr.bf16.mxu0 %v4097_v2  ;;  %v4100_v38 = vcombine.low %v920_v22, %v921_v16  ;;  %v2201_v40 = vld [vmem:[#allocation3 + $0x8] sm:$0x4]  ;;  %2206 = vst [vmem:[#allocation3 + $0xc] sm:$0x4] %v2205_v35  ;;  %v2186_v39 = vld [vmem:[#allocation3 + $0x10] sm:$0x1] }
  0x82   : > { %4579 = vmatprep.subr.bf16.mxu0 %v4754_v58  ;;  %v2202_v60 = vsel %vm5712_vm9, 0, %v2201_v40  ;;  %v4803_v1 = vld [vmem:[%s6465_s3 + $0x24] ss:$8 sps:$4 sm:$0xff]   ;;  %v4806_v42 = vld [vmem:[%s6465_s3 + $0x114] ss:$8 sps:$4 sm:$0xff]   ;;  %v2187_v29 = vsel %vm5265_vm3, 0, %v2186_v39 }
  0x83   : > { %2203 = vst [vmem:[#allocation3 + $0x8] sm:$0x4] %v2202_v60  ;;  %3678 = vmatpush1.bf16.msra.mxu1 %v4777_v44  ;;  %v4801_v5 = vld [vmem:[%s6465_s3 + $0x20] ss:$8 sps:$4 sm:$0xff]   ;;  %v4804_v7 = vld [vmem:[%s6465_s3 + $0x110] ss:$8 sps:$4 sm:$0xff]  }
  0x84   : > { %1870 = vmatmul.mubr.bf16.gmra.mxu1 %v4098_v63  ;;  %3679 = vmatprep.subr.bf16.mxu1 %v4785_v15  ;;  %v4791_v63 = vld [vmem:[%s6465_s3 + $0x44] ss:$8 sps:$4 sm:$0xff]   ;;  %2188 = vst [vmem:[#allocation3 + $0x10] sm:$0x1] %v2187_v29  ;;  %v4809_v34 = vld [vmem:[%s6465_s3 + $0x14] ss:$8 sps:$4 sm:$0xff]  }
  0x85   : > { %4580 = vmatpush3.bf16.msra.mxu0 %v4754_v58  ;;  %v2177_v58 = vld [vmem:[#allocation3 + $0x4] sm:$0x1]  ;;  %v4807_v22 = vld [vmem:[%s6465_s3 + $0x10] ss:$8 sps:$4 sm:$0xff]   ;;  %v4810_v16 = vld [vmem:[%s6465_s3 + $0x100] ss:$8 sps:$4 sm:$0xff]  }
  0x86   : > { %4581 = vmatprep.subr.bf16.mxu0 %v4757_v59  ;;  %v2178_v4 = vsel %vm5265_vm3, 0, %v2177_v58  ;;  %v4818_v23 = vld [vmem:[%s6465_s3 + $0x1f4] ss:$8 sps:$4 sm:$0xff]   ;;  %v4816_v8 = vld [vmem:[%s6465_s3 + $0x1f0] ss:$8 sps:$4 sm:$0xff]  }
  0x87   : > { %2179 = vst [vmem:[#allocation3 + $0x4] sm:$0x1] %v2178_v4  ;;  %3680 = vmatpush1.bf16.msra.mxu1 %v4783_v14  ;;  %v4821_v30 = vld [vmem:[%s6465_s3 + $0xf4] ss:$8 sps:$4 sm:$0xff]   ;;  %v4824_v47 = vld [vmem:[%s6465_s3 + $0x1e4] ss:$8 sps:$4 sm:$0xff]  }
  0x88   : > { %1805 = vmatmul.mubr.bf16.gmra.mxu0 %v4096_v62  ;;  %3681 = vmatprep.subr.bf16.mxu1 %v4791_v63  ;;  %v4819_v37 = vld [vmem:[%s6465_s3 + $0xf0] ss:$8 sps:$4 sm:$0xff]   ;;  %v4822_v60 = vld [vmem:[%s6465_s3 + $0x1e0] ss:$8 sps:$4 sm:$0xff]   ;;  %v4827_v35 = vld [vmem:[%s6465_s3 + $0xe4] ss:$8 sps:$4 sm:$0xff]  }
  0x89   : > { %4582 = vmatpush3.bf16.msra.mxu0 %v4757_v59  ;;  %4585 = vmatprep.mubr.bf16.mxu0 %v4073_v17  ;;  %v4798_v17 = vld [vmem:[%s6465_s3 + $0x120] ss:$8 sps:$4 sm:$0xff]   ;;  %v2174_v45 = vld [vmem:[#allocation3] sm:$0x1]  ;;  %v4830_v41 = vld [vmem:[%s6465_s3 + $0x1d4] ss:$8 sps:$4 sm:$0xff]  }
  0x8a   : > { %4583 = vmatprep.subr.bf16.mxu0 %v4761_v28  ;;  %v2175_v50 = vsel %vm5265_vm3, 0, %v2174_v45  ;;  %v4825_v54 = vld [vmem:[%s6465_s3 + $0xe0] ss:$8 sps:$4 sm:$0xff]   ;;  %v4828_v49 = vld [vmem:[%s6465_s3 + $0x1d0] ss:$8 sps:$4 sm:$0xff]  }
  0x8b   : > { %3682 = vmatpush1.bf16.msra.mxu1 %v4789_v18  ;;  %2176 = vst [vmem:[#allocation3] sm:$0x1] %v2175_v50  ;;  %v4836_v15 = vld [vmem:[%s6465_s3 + $0x1c4] ss:$8 sps:$4 sm:$0xff]   ;;  %v4831_v14 = vld [vmem:[%s6465_s3 + $0xd0] ss:$8 sps:$4 sm:$0xff]  }
  0x8c   : > { %3683 = vmatprep.subr.bf16.mxu1 %v4797_v27  ;;  %v4837_v27 = vld [vmem:[%s6465_s3 + $0xc0] ss:$8 sps:$4 sm:$0xff]   ;;  %v4851_v29 = vld [vmem:[%s6465_s3 + $0xa4] ss:$8 sps:$4 sm:$0xff]  }
  0x8d   : > { %4584 = vmatpush3.bf16.msra.mxu0 %v4761_v28  ;;  %v4795_v28 = vld [vmem:[%s6465_s3 + $0x30] ss:$8 sps:$4 sm:$0xff]  }
  0x8e   : > { %3718 = vmatprep.subr.bf16.mxu0 %v4770_v19 }
  0x8f   : > { %3684 = vmatpush1.bf16.msra.mxu1 %v4795_v28  ;;  %v4845_v28 = vld [vmem:[%s6465_s3 + $0xb4] ss:$8 sps:$4 sm:$0xff]  }
  0x90   : > { %4586 = vmatmul.mubr.bf16.vlgmr.msra.gmra.mxu0 %v4082_v31  ;;  %3685 = vmatprep.subr.bf16.mxu1 %v4803_v1  ;;  %v4843_v1 = vld [vmem:[%s6465_s3 + $0xb0] ss:$8 sps:$4 sm:$0xff]  }
  0x91   : > { %4589 = vmatprep.mubr.bf16.mxu0 %v4091_v46  ;;  %3719 = vmatpush1.bf16.msra.mxu0 %v4768_v12  ;;  %v4812_v46 = vld [vmem:[%s6465_s3 + $0x104] ss:$8 sps:$4 sm:$0xff]  }
  0x92   : > { %3720 = vmatprep.subr.bf16.mxu0 %v4776_v13  ;;  %v4815_v12 = vld [vmem:[%s6465_s3 + $0x4] ss:$8 sps:$4 sm:$0xff]   ;;  %v4813_v13 = vld [vmem:[%s6465_s3] ss:$8 sps:$4 sm:$0xff]  }
  0x93   : > { %3686 = vmatpush1.bf16.msra.mxu1 %v4801_v5  ;;  %v4854_v5 = vld [vmem:[%s6465_s3 + $0x194] ss:$8 sps:$4 sm:$0xff]  }
  0x94   : > { %3687 = vmatprep.subr.bf16.mxu1 %v4809_v34  ;;  %v4849_v34 = vld [vmem:[%s6465_s3 + $0xa0] ss:$8 sps:$4 sm:$0xff]  }
  0x95   : > { %3721 = vmatpush1.bf16.msra.mxu0 %v4774_v33  ;;  %v2183_v33 = vld [vmem:[#allocation3 + $0xc] sm:$0x1] }
  0x96   : > { %3722 = vmatprep.subr.bf16.mxu0 %v4782_v61  ;;  %v2184_v32 = vsel %vm5265_vm3, 0, %v2183_v33  ;;  %v2189_v61 = vld [vmem:[#allocation3 + $0x14] sm:$0x1]  ;;  %v4858_v33 = vld [vmem:[%s6465_s3 + $0x180] ss:$8 sps:$4 sm:$0xff]  }
  0x97   : > { %3688 = vmatpush1.bf16.msra.mxu1 %v4807_v22  ;;  %2185 = vst [vmem:[#allocation3 + $0xc] sm:$0x1] %v2184_v32  ;;  %v4857_v22 = vld [vmem:[%s6465_s3 + $0x94] ss:$8 sps:$4 sm:$0xff]   ;;  %v4863_v32 = vld [vmem:[%s6465_s3 + $0x84] ss:$8 sps:$4 sm:$0xff]  }
  0x98   : > { %4590 = vmatmul.mubr.bf16.gmra.mxu0 %v4100_v38  ;;  %3689 = vmatprep.subr.bf16.mxu1 %v4815_v12  ;;  %v4860_v12 = vld [vmem:[%s6465_s3 + $0x184] ss:$8 sps:$4 sm:$0xff]  }
  0x99   : > { %3723 = vmatpush1.bf16.msra.mxu0 %v4780_v0  ;;  %v4833_v0 = vld [vmem:[%s6465_s3 + $0xd4] ss:$8 sps:$4 sm:$0xff]  }
  0x9a   : > { %3724 = vmatprep.subr.bf16.mxu0 %v4788_v26  ;;  %v2190_v26 = vsel %vm5265_vm3, 0, %v2189_v61  ;;  %v4877_v61 = vld [vmem:[%s6465_s3 + $0x274] ss:$8 sps:$4 sm:$0xff]  }
  0x9b   : > { %3690 = vmatpush1.bf16.msra.mxu1 %v4813_v13  ;;  %2191 = vst [vmem:[#allocation3 + $0x14] sm:$0x1] %v2190_v26  ;;  %v4855_v13 = vld [vmem:[%s6465_s3 + $0x90] ss:$8 sps:$4 sm:$0xff]  }
  0x9c   : > { %3691 = vmatprep.subr.bf16.mxu1 %v4821_v30 }
  0x9d   : > { %3725 = vmatpush1.bf16.msra.mxu0 %v4786_v20  ;;  %v4834_v20 = vld [vmem:[%s6465_s3 + $0x1c0] ss:$8 sps:$4 sm:$0xff]  }
  0x9e   : > { %3726 = vmatprep.subr.bf16.mxu0 %v4794_v10  ;;  %v4839_v10 = vld [vmem:[%s6465_s3 + $0xc4] ss:$8 sps:$4 sm:$0xff]  }
  0x9f   : > { %3692 = vmatpush2.bf16.msra.mxu1 %v4819_v37 }
  0xa0   : > { %3693 = vmatprep.subr.bf16.mxu1 %v4827_v35 }
  0xa1   : > { %3727 = vmatpush1.bf16.msra.mxu0 %v4792_v53 }
  0xa2   : > { %3728 = vmatprep.subr.bf16.mxu0 %v4800_v24  ;;  %v4840_v24 = vld [vmem:[%s6465_s3 + $0x1b0] ss:$8 sps:$4 sm:$0xff]  }
  0xa3   : > { %3694 = vmatpush2.bf16.msra.mxu1 %v4825_v54 }
  0xa4   : > { %3695 = vmatprep.subr.bf16.mxu1 %v4833_v0 }
  0xa5   : > { %3729 = vmatpush1.bf16.msra.mxu0 %v4798_v17  ;;  %v4848_v17 = vld [vmem:[%s6465_s3 + $0x1a4] ss:$8 sps:$4 sm:$0xff]  }
  0xa6   : > { %3730 = vmatprep.subr.bf16.mxu0 %v4806_v42  ;;  %v4846_v42 = vld [vmem:[%s6465_s3 + $0x1a0] ss:$8 sps:$4 sm:$0xff]  }
  0xa7   : > { %3696 = vmatpush2.bf16.msra.mxu1 %v4831_v14 }
  0xa8   : > { %3697 = vmatprep.subr.bf16.mxu1 %v4839_v10 }
  0xa9   : > { %3731 = vmatpush1.bf16.msra.mxu0 %v4804_v7 }
  0xaa   : > { %3732 = vmatprep.subr.bf16.mxu0 %v4812_v46  ;;  %v4852_v46 = vld [vmem:[%s6465_s3 + $0x190] ss:$8 sps:$4 sm:$0xff]  }
  0xab   : > { %3698 = vmatpush2.bf16.msra.mxu1 %v4837_v27 }
  0xac   : > { %3699 = vmatprep.subr.bf16.mxu1 %v4845_v28 }
  0xad   : > { %3733 = vmatpush1.bf16.msra.mxu0 %v4810_v16 }
  0xae   : > { %3734 = vmatprep.subr.bf16.mxu0 %v4818_v23 }
  0xaf   : > { %3700 = vmatpush2.bf16.msra.mxu1 %v4843_v1 }
  0xb0   : > { %3701 = vmatprep.subr.bf16.mxu1 %v4851_v29 }
  0xb1   : > { %3735 = vmatpush2.bf16.msra.mxu0 %v4816_v8 }
  0xb2   : > { %3736 = vmatprep.subr.bf16.mxu0 %v4824_v47 }
  0xb3   : > { %3702 = vmatpush2.bf16.msra.mxu1 %v4849_v34 }
  0xb4   : > { %3703 = vmatprep.subr.bf16.mxu1 %v4857_v22 }
  0xb5   : > { %3737 = vmatpush2.bf16.msra.mxu0 %v4822_v60  ;;  %v4861_v60 = vld [vmem:[%s6465_s3 + $0x80] ss:$8 sps:$4 sm:$0xff]  }
  0xb6   : > { %3738 = vmatprep.subr.bf16.mxu0 %v4830_v41 }
  0xb7   : > { %3704 = vmatpush2.bf16.msra.mxu1 %v4855_v13 }
  0xb8   : > { %3705 = vmatprep.subr.bf16.mxu1 %v4863_v32 }
  0xb9   : > { %3739 = vmatpush2.bf16.msra.mxu0 %v4828_v49 }
  0xba   : > { %3740 = vmatprep.subr.bf16.mxu0 %v4836_v15 }
  0xbb   : > { %3706 = vmatpush2.bf16.msra.mxu1 %v4861_v60 }
  0xbc   : > { %3761 = vmatprep.subr.bf16.mxu1 %v4877_v61 }
  0xbd   : > { %3741 = vmatpush2.bf16.msra.mxu0 %v4834_v20 }
  0xbe   : > { %3742 = vmatprep.subr.bf16.mxu0 %v4842_v36 }
  0xc1   : > { %3743 = vmatpush2.bf16.msra.mxu0 %v4840_v24 }
  0xc2   : > { %3744 = vmatprep.subr.bf16.mxu0 %v4848_v17 }
  0xc5   : > { %3745 = vmatpush2.bf16.msra.mxu0 %v4846_v42 }
  0xc6   : > { %3746 = vmatprep.subr.bf16.mxu0 %v4854_v5 }
  0xc9   : > { %3747 = vmatpush2.bf16.msra.mxu0 %v4852_v46 }
  0xca   : > { %3748 = vmatprep.subr.bf16.mxu0 %v4860_v12 }
  0xcd   : > { %3749 = vmatpush2.bf16.msra.mxu0 %v4858_v33 }
  0xfb   : > { %v5730_v2 = vpop.f32.mrf.mxu1 }
  0xfd   : > { %v5748_v11 = vpop.f32.mrf.mxu1 }
  0xfe   : > { %v4455_v13 = vadd.f32 %v5748_v11, %v5730_v2 }
  0xff   : > { %v5764_v59 = vpop.f32.mrf.mxu1 }
 0x100   : > { %v5740_v9 = vpop.f32.mrf.mxu0 }
 0x101   : > { %v5780_v48 = vpop.f32.mrf.mxu1 }
 0x102   : > { %v5756_v55 = vpop.f32.mrf.mxu0 }
 0x103   : > { %v4415_v12 = vadd.f32 %v5756_v55, %v5740_v9  ;;  %v4458_v9 = vadd.f32 %v5780_v48, %v5764_v59 }
 0x104   : > { %v5772_v25 = vpop.f32.mrf.mxu0 }
 0x105   : > { %v1718_v61 = vadd.f32 %v4455_v13, %v4415_v12 }
 0x106   : > { %v5788_v62 = vpop.f32.mrf.mxu0  ;;  %v5796_v43 = vpop.f32.mrf.mxu1 }
 0x108   : > { %v5814_v31 = vpop.f32.mrf.mxu1 }
 0x109   : > { %v4461_v34 = vadd.f32 %v5814_v31, %v5796_v43 }
 0x10a   : > { %v5804_v56 = vpop.f32.mrf.mxu0  ;;  %v5830_v38 = vpop.f32.mrf.mxu1 }
 0x10c   : > { %v5816_v6 = vpop.f32.mrf.mxu0  ;;  %v5846_v21 = vpop.f32.mrf.mxu1 }
 0x10d   : > { %v4421_v5 = vadd.f32 %v5816_v6, %v5804_v56  ;;  %v4464_v56 = vadd.f32 %v5846_v21, %v5830_v38  ;;  %v4418_v6 = vadd.f32 %v5788_v62, %v5772_v25  ;;  %v5071_v62 = vmov 1983009808  }
 0x10e   : > { %v5832_v19 = vpop.f32.mrf.mxu0  ;;  %v1976_v3 = vunpack.c.l.s4 %v5071_v62 }
 0x10f   : > { %v1726_v60 = vadd.f32 %v4461_v34, %v4421_v5  ;;  %v1721_v34 = vadd.f32 %v4458_v9, %v4418_v6 }
 0x110   : > { %v5850_v40 = vpop.f32.mrf.mxu0 }
 0x115   : > { %v5866_v51 = vpop.f32.mrf.mxu1 }
 0x117   : > { %v5882_v57 = vpop.f32.mrf.mxu1 }
 0x118   : > { %v4425_v52 = vpop.f32.mrf.mxu0 }
 0x119   : > { %v5904_v18 = vpop.f32.mrf.mxu1 }
 0x11a   : > { %v4426_v58 = vpop.f32.mrf.mxu0 }
 0x11b   : > { %v5880_v4 = vadd.f32 %v4426_v58, %v4425_v52  ;;  %v5920_v39 = vpop.f32.mrf.mxu1  ;;  %v4870_v52 = vld [vmem:[%s6465_s3 + $0x374] ss:$8 sps:$4 sm:$0xff]  }
 0x11c   : > { %v4428_v44 = vpop.f32.mrf.mxu0  ;;  %3804 = vmatprep.subr.bf16.mxu0 %v4870_v52  ;;  %v4424_v52 = vadd.f32 %v5850_v40, %v5832_v19 }
 0x11e   : > { %v4429_v63 = vpop.f32.mrf.mxu0  ;;  %v1729_v5 = vadd.f32 %v4464_v56, %v4424_v52 }
 0x11f   : > { %v5906_v53 = vadd.f32 %v4429_v63, %v4428_v44 }
 0x124   : > { %v5934_v7 = vpop.f32.mrf.mxu1 }
 0x126   : > { %v5945_v16 = vpop.f32.mrf.mxu1 }
 0x127   : > { %v4473_v19 = vadd.f32 %v5945_v16, %v5934_v7  ;;  %v1978_v7 = vlaneseq }
 0x128   : > { %v5950_v23 = vpop.f32.mrf.mxu1  ;;  %v4431_v8 = vpop.f32.mrf.mxu0 }
 0x12a   : > { %v5961_v30 = vpop.f32.mrf.mxu1  ;;  %v4432_v47 = vpop.f32.mrf.mxu0 }
 0x12c   : > { %v4533_v37 = vpop.f32.mrf.mxu1  ;;  %v5966_v45 = vpop.f32.mrf.mxu0 }
 0x12e   : > { %v4534_v50 = vpop.f32.mrf.mxu1  ;;  %v5971_v35 = vpop.f32.mrf.mxu0 }
 0x12f   : > { %v4535_v21 = vadd.f32 %v4534_v50, %v4533_v37 }
 0x130   : > { %v5973_v41 = vpop.f32.mrf.mxu1  ;;  %v4493_v54 = vpop.f32.mrf.mxu0 }
 0x132   : > { %v4537_v49 = vpop.f32.mrf.mxu1  ;;  %v4494_v58 = vpop.f32.mrf.mxu0 }
 0x133   : > { %v4495_v43 = vadd.f32 %v4494_v58, %v4493_v54 }
 0x134   : > { %v4539_v44 = vpop.f32.mrf.mxu1  ;;  %v4496_v0 = vpop.f32.mrf.mxu0 }
 0x135   : > { %v1783_v38 = vadd.f32 %v4495_v43, %v1718_v61 }
 0x136   : > { %v4540_v15 = vpop.f32.mrf.mxu1  ;;  %v4497_v26 = vpop.f32.mrf.mxu0 }
 0x137   : > { %v4541_v11 = vadd.f32 %v4540_v15, %v4539_v44  ;;  %v4498_v54 = vadd.f32 %v4497_v26, %v4496_v0  ;;  %v4538_v15 = vadd.f32 %v4537_v49, %v5973_v41  ;;  %v1848_v0 = vadd.f32 %v4535_v21, %v1783_v38 }
 0x138   : > { %v4542_v14 = vpop.f32.mrf.mxu1  ;;  %v4499_v20 = vpop.f32.mrf.mxu0  ;;  %v4436_v26 = vadd.f32 %v5971_v35, %v5966_v45  ;;  %v4470_v45 = vadd.f32 %v5920_v39, %v5904_v18 }
 0x139   : > { %v1786_v16 = vadd.f32 %v4498_v54, %v1721_v34 }
 0x13a   : > { %v4543_v63 = vpop.f32.mrf.mxu1  ;;  %v4500_v10 = vpop.f32.mrf.mxu0 }
 0x13b   : > { %v4501_v33 = vadd.f32 %v4500_v10, %v4499_v20  ;;  %v4433_v10 = vadd.f32 %v4432_v47, %v4431_v8  ;;  %v4544_v48 = vadd.f32 %v4543_v63, %v4542_v14  ;;  %v4467_v8 = vadd.f32 %v5882_v57, %v5866_v51  ;;  %v6018_v51 = vld [vmem:[%s6464_s2] ss:$0 sm:$0xff] }
 0x13c   : > { %v5978_v36 = vpop.f32.mrf.mxu1  ;;  %v4502_v27 = vpop.f32.mrf.mxu0  ;;  %v4476_v14 = vadd.f32 %v5961_v30, %v5950_v23  ;;  %v6023_v23 = vshrl.u32 %v1978_v7, 7  ;;  %v1851_v52 = vadd.f32 %v4538_v15, %v1786_v16 }
 0x13d   : > { %v1791_v2 = vadd.f32 %v4501_v33, %v1726_v60  ;;  %v1742_v47 = vadd.f32 %v4473_v19, %v4433_v10 }
 0x13e   : > { %v5980_v24 = vpop.f32.mrf.mxu1  ;;  %v4503_v28 = vpop.f32.mrf.mxu0  ;;  %v1745_v56 = vadd.f32 %v4476_v14, %v4436_v26 }
 0x13f   : > { %v4504_v20 = vadd.f32 %v4503_v28, %v4502_v27  ;;  %v1856_v13 = vadd.f32 %v4541_v11, %v1791_v2  ;;  %v1977_v27 = vunpack.c.0.s8 %v1976_v3  ;;  %v4547_v43 = vadd.f32 %v5980_v24, %v5978_v36 }
 0x140   : > { %v4505_v17 = vpop.f32.mrf.mxu0  ;;  %v5982_v1 = vpop.f32.mrf.mxu1 }
 0x141   : > { %v1794_v59 = vadd.f32 %v4504_v20, %v1729_v5  ;;  %v6034_v11 = vsub.s32 %v1977_v27, %v6023_v23 }
 0x142   : > { %v4506_v42 = vpop.f32.mrf.mxu0  ;;  %v5990_v46 = vpop.f32.mrf.mxu1 }
 0x143   : > { %v4507_v63 = vadd.f32 %v4506_v42, %v4505_v17  ;;  %v1859_v49 = vadd.f32 %v4544_v48, %v1794_v59  ;;  %v4550_v19 = vadd.f32 %v5990_v46, %v5982_v1 }
 0x144   : > { %v5984_v29 = vpop.f32.mrf.mxu0  ;;  %v4551_v31 = vpop.f32.mrf.mxu1 }
 0x146   : > { %v5992_v22 = vpop.f32.mrf.mxu0  ;;  %v4552_v58 = vpop.f32.mrf.mxu1 }
 0x147   : > { %v4553_v33 = vadd.f32 %v4552_v58, %v4551_v31 }
 0x148   : > { %v4511_v32 = vpop.f32.mrf.mxu0  ;;  %v4554_v37 = vpop.f32.mrf.mxu1 }
 0x14a   : > { %v4512_v55 = vpop.f32.mrf.mxu0  ;;  %v4555_v30 = vpop.f32.mrf.mxu1 }
 0x14b   : > { %v4513_v12 = vadd.f32 %v4512_v55, %v4511_v32  ;;  %v1734_v32 = vadd.f32 %v4467_v8, %v5880_v4  ;;  %v4510_v4 = vadd.f32 %v5992_v22, %v5984_v29  ;;  %v1737_v55 = vadd.f32 %v4470_v45, %v5906_v53 }
 0x14c   : > { %v4514_v40 = vpop.f32.mrf.mxu0  ;;  %v4556_v2 = vadd.f32 %v4555_v30, %v4554_v37 }
 0x14d   : > { %v1807_v28 = vadd.f32 %v4513_v12, %v1742_v47  ;;  %v1799_v3 = vadd.f32 %v4507_v63, %v1734_v32  ;;  %v1802_v22 = vadd.f32 %v4510_v4, %v1737_v55 }
 0x14e   : > { %v4515_v25 = vpop.f32.mrf.mxu0 }
 0x14f   : > { %v4516_v35 = vadd.f32 %v4515_v25, %v4514_v40  ;;  %v1872_v9 = vadd.f32 %v4553_v33, %v1807_v28  ;;  %v1864_v40 = vadd.f32 %v4547_v43, %v1799_v3  ;;  %v6044_v1 = vadd.f32 %v4550_v19, %v1802_v22 }
 0x150   : > { %v4587_v44 = vpop.f32.mrf.mxu0 }
 0x151   : > { %v1921_v50 = vadd.f32 %v4587_v44, %v1856_v13  ;;  %v1810_v61 = vadd.f32 %v4516_v35, %v1745_v56 }
 0x152   : > { %v1912_v57 = vpop.f32.mrf.mxu0 }
 0x153   : > { %v1913_v41 = vadd.f32 %v1912_v57, %v1848_v0  ;;  %v1952_v17 = vadd.f32 %v6018_v51, %v1921_v50  ;;  %v1875_v34 = vadd.f32 %v4556_v2, %v1810_v61 }
 0x154   : > { %v4588_v60 = vpop.f32.mrf.mxu0 }
 0x155   : > { %v1924_v42 = vadd.f32 %v4588_v60, %v1859_v49  ;;  %v1950_v18 = vadd.f32 %v6018_v51, %v1913_v41  ;;  %v1960_v10 = vmax.f32 %v1952_v17, 0.0 }
 0x156   : > { %v1915_v31 = vpop.f32.mrf.mxu0 }
 0x157   : > { %v1953_v39 = vadd.f32 %v6018_v51, %v1924_v42  ;;  %v1916_v6 = vadd.f32 %v1915_v31, %v1851_v52  ;;  %v1958_v38 = vmax.f32 %v1950_v18, 0.0 }
 0x158   : > { %v4591_v20 = vpop.f32.mrf.mxu0 }
 0x159   : > { %v1961_v36 = vmax.f32 %v1953_v39, 0.0  ;;  %v1951_v24 = vadd.f32 %v6018_v51, %v1916_v6  ;;  %v1937_v29 = vadd.f32 %v4591_v20, %v1872_v9 }
 0x15a   : > { %v1928_v5 = vpop.f32.mrf.mxu0 }
 0x15b   : > { %v1967_v21 = vmax.f32 %v1960_v10, %v1961_v36  ;;  %v1959_v53 = vmax.f32 %v1951_v24, 0.0  ;;  %v6040_v54 = vadd.f32 %v6018_v51, %v1937_v29  ;;  %v1929_v58 = vadd.f32 %v1928_v5, %v1864_v40 }
 0x15c   : > { %v4592_v25 = vpop.f32.mrf.mxu0 }
 0x15d   : > { %v1991_v62 = vcombine.high %v1967_v21, %v1967_v21  ;;  %v1998_v59 = vrot.slane %v1967_v21, %v6034_v11  ;;  %v1966_v48 = vmax.f32 %v1958_v38, %v1959_v53  ;;  %v1964_v12 = vmax.f32 %v6040_v54, 0.0 }
 0x15e   : > { %v1940_v13 = vadd.f32 %v4592_v25, %v1875_v34  ;;  %v6050_v15 = vadd.f32 %v6018_v51, %v1929_v58 }
 0x15f   : > { %v2005_v46 = vrot.slane %v1991_v62, %v6034_v11  ;;  %v2006_v8 = vcombine.high %v1998_v59, %v1998_v59  ;;  %v2087_v47 = vsel %vm2058_vm10, %v1998_v59, -inf  ;;  %v1974_v44 = vcombine.high %v1966_v48, %v1966_v48 }
 0x160   : > { %v2088_v7 = vrot.slane %v2087_v47, 4  ;;  %v1981_v16 = vrot.slane %v1966_v48, %v6034_v11  ;;  %v6053_v37 = vadd.f32 %v6018_v51, %v1940_v13 }
 0x161   : > { %v2007_v50 = vcombine.high %v2005_v46, %v2005_v46  ;;  %v2094_v0 = vsel %vm2058_vm10, %v2006_v8, -inf  ;;  %v2101_v26 = vsel %vm2058_vm10, %v2005_v46, -inf  ;;  %v1988_v14 = vrot.slane %v1974_v44, %v6034_v11 }
 0x162   : > { %v2089_v63 = vmax.f32 %v2087_v47, %v2088_v7  ;;  %v2095_v57 = vrot.slane %v2094_v0, 4  ;;  %v2102_v27 = vrot.slane %v2101_v26, 4  ;;  %v1989_v28 = vcombine.high %v1981_v16, %v1981_v16 }
 0x163   : > { %v2108_v33 = vsel %vm2058_vm10, %v2007_v50, -inf  ;;  %v1990_v41 = vcombine.high %v1988_v14, %v1988_v14  ;;  %v2059_v49 = vsel %vm2058_vm10, %v1981_v16, -inf  ;;  %v2073_v32 = vsel %vm2058_vm10, %v1988_v14, -inf }
 0x164   : > { %v2090_v45 = vrot.slane %v2089_v63, 2  ;;  %v2096_v35 = vmax.f32 %v2094_v0, %v2095_v57  ;;  %v2103_v60 = vmax.f32 %v2101_v26, %v2102_v27  ;;  %v2109_v30 = vrot.slane %v2108_v33, 4 }
 0x165   : > { %v2060_v17 = vrot.slane %v2059_v49, 4  ;;  %v2066_v42 = vsel %vm2058_vm10, %v1989_v28, -inf  ;;  %v2074_v52 = vrot.slane %v2073_v32, 4  ;;  %v2080_v56 = vsel %vm2058_vm10, %v1990_v41, -inf }
 0x166   : > { %v2091_v3 = vmax.f32 %v2089_v63, %v2090_v45  ;;  %v2097_v43 = vrot.slane %v2096_v35, 2  ;;  %v2104_v4 = vrot.slane %v2103_v60, 2  ;;  %v2110_v31 = vmax.f32 %v2108_v33, %v2109_v30  ;;  %v1931_v63 = vpop.f32.mrf.mxu0 }
 0x167   : > { %v2061_v18 = vmax.f32 %v2059_v49, %v2060_v17  ;;  %v2067_v39 = vrot.slane %v2066_v42, 4  ;;  %v2075_v6 = vmax.f32 %v2073_v32, %v2074_v52  ;;  %v2081_v9 = vrot.slane %v2080_v56, 4 }
 0x168   : > { %v2092_v55 = vrot.slane %v2091_v3, 1  ;;  %v2098_v61 = vmax.f32 %v2096_v35, %v2097_v43  ;;  %v2105_v2 = vmax.f32 %v2103_v60, %v2104_v4  ;;  %v2111_v20 = vrot.slane %v2110_v31, 2  ;;  %v2323_v4 = vld [vmem:[#allocation3 + $0x8] sm:$0x7] }
 0x169   : > { %v2062_v10 = vrot.slane %v2061_v18, 2  ;;  %v2068_v36 = vmax.f32 %v2066_v42, %v2067_v39  ;;  %v2076_v24 = vrot.slane %v2075_v6, 2  ;;  %v2082_v29 = vmax.f32 %v2080_v56, %v2081_v9 }
 0x16a   : > { %v2093_v22 = vmax.f32 %v2091_v3, %v2092_v55  ;;  %v2099_v19 = vrot.slane %v2098_v61, 1  ;;  %v2106_v40 = vrot.slane %v2105_v2, 1  ;;  %v2112_v5 = vmax.f32 %v2110_v31, %v2111_v20 }
 0x16b   : > { %v2063_v38 = vmax.f32 %v2061_v18, %v2062_v10  ;;  %v2069_v21 = vrot.slane %v2068_v36, 2  ;;  %v2077_v53 = vmax.f32 %v2075_v6, %v2076_v24  ;;  %v2083_v58 = vrot.slane %v2082_v29, 2 }
 0x16c   : > { %v2100_v34 = vmax.f32 %v2098_v61, %v2099_v19  ;;  %v2107_v25 = vmax.f32 %v2105_v2, %v2106_v40  ;;  %v2113_v62 = vrot.slane %v2112_v5, 1  ;;  %v4384_v59 = vpack.c.bf16 %v2093_v22, %v2093_v22  ;;  %v2320_v40 = vld [vmem:[#allocation3 + $0x4] sm:$0x7] }
 0x16d   : > { %v2064_v48 = vrot.slane %v2063_v38, 1  ;;  %v2070_v13 = vmax.f32 %v2068_v36, %v2069_v21  ;;  %v2078_v46 = vrot.slane %v2077_v53, 1  ;;  %v2084_v8 = vmax.f32 %v2082_v29, %v2083_v58 }
 0x16e   : > { %v2114_v47 = vmax.f32 %v2112_v5, %v2113_v62  ;;  %v4385_v44 = vpack.c.bf16 %v2100_v34, %v2100_v34  ;;  %v4386_v7 = vpack.c.bf16 %v2107_v25, %v2107_v25  ;;  %v2281_v16 = vunpack.c.l.b16 %v4384_v59 }
 0x16f   : > { %v2065_v50 = vmax.f32 %v2063_v38, %v2064_v48  ;;  %v2071_v0 = vrot.slane %v2070_v13, 1  ;;  %v2079_v26 = vmax.f32 %v2077_v53, %v2078_v46  ;;  %v2085_v14 = vrot.slane %v2084_v8, 1 }
 0x170   : > { %v4387_v57 = vpack.c.bf16 %v2114_v47, %v2114_v47  ;;  %v2282_v27 = vunpack.c.l.b16 %v4385_v44  ;;  %v2283_v28 = vunpack.c.l.b16 %v4386_v7  ;;  %v1965_v33 = vmax.f32 %v6053_v37, 0.0 }
 0x171   : > { %v2072_v41 = vmax.f32 %v2070_v13, %v2071_v0  ;;  %v2086_v49 = vmax.f32 %v2084_v8, %v2085_v14  ;;  %v4380_v32 = vpack.c.bf16 %v2065_v50, %v2065_v50  ;;  %v4382_v45 = vpack.c.bf16 %v2079_v26, %v2079_v26 }
 0x172   : > { %v2284_v35 = vunpack.c.l.b16 %v4387_v57  ;;  %v2299_v60 = vsel %vm2192_vm7, %v2282_v27, %v2281_v16  ;;  %v1969_v30 = vmax.f32 %v1964_v12, %v1965_v33  ;;  %v1932_v17 = vadd.f32 %v1931_v63, %v6044_v1 }
 0x173   : > { %v2300_v42 = vsel %vm2295_vm11, %v2283_v28, %v2299_v60  ;;  %v4381_v52 = vpack.c.bf16 %v2072_v41, %v2072_v41  ;;  %v4383_v56 = vpack.c.bf16 %v2086_v49, %v2086_v49  ;;  %v2277_v3 = vunpack.c.l.b16 %v4380_v32 }
 0x174   : > { %v2301_v43 = vsel %vm2297_vm12, %v2284_v35, %v2300_v42  ;;  %v2279_v31 = vunpack.c.l.b16 %v4382_v45  ;;  %v2025_v18 = vcombine.high %v1969_v30, %v1969_v30  ;;  %v2032_v54 = vrot.slane %v1969_v30, %v6034_v11 }
 0x175   : > { %v2309_v12 = vpack.c.b16 %v2301_v43, %v2301_v43  ;;  %v2278_v1 = vunpack.c.l.b16 %v4381_v52  ;;  %v2280_v39 = vunpack.c.l.b16 %v4383_v56  ;;  %v1955_v6 = vadd.f32 %v6018_v51, %v1932_v17 }
 0x176   : > { %v1962_v9 = vmax.f32 %v6050_v15, 0.0  ;;  %v2039_v55 = vrot.slane %v2025_v18, %v6034_v11  ;;  %v2040_v61 = vcombine.high %v2032_v54, %v2032_v54  ;;  %v2143_v2 = vsel %vm2058_vm10, %v2032_v54, -inf }
 0x177   : > { %v2324_v20 = vsel %vm6072_vm15, %v2309_v12, %v2323_v4  ;;  %v2294_v10 = vsel %vm2192_vm7, %v2278_v1, %v2277_v3  ;;  %v2144_v36 = vrot.slane %v2143_v2, 4  ;;  %v1963_v24 = vmax.f32 %v1955_v6, 0.0 }
 0x178   : > { %2325 = vst [vmem:[#allocation3 + $0x8] sm:$0x7] %v2324_v20  ;;  %v2296_v29 = vsel %vm2295_vm11, %v2279_v31, %v2294_v10  ;;  %v2041_v22 = vcombine.high %v2039_v55, %v2039_v55  ;;  %v2150_v51 = vsel %vm2058_vm10, %v2040_v61, -inf  ;;  %v2157_v15 = vsel %vm2058_vm10, %v2039_v55, -inf }
 0x179   : > { %v2298_v19 = vsel %vm2297_vm12, %v2280_v39, %v2296_v29  ;;  %v2145_v5 = vmax.f32 %v2143_v2, %v2144_v36  ;;  %v2151_v38 = vrot.slane %v2150_v51, 4  ;;  %v2158_v21 = vrot.slane %v2157_v15, 4 }
 0x17a   : > { %v2308_v53 = vpack.c.b16 %v2298_v19, %v2298_v19  ;;  %v2164_v58 = vsel %vm2058_vm10, %v2041_v22, -inf  ;;  %v1968_v34 = vmax.f32 %v1962_v9, %v1963_v24  ;;  %v4871_v19 = vld [vmem:[#allocation3] ss:$0 sps:$4 sm:$0x77]  }
 0x17b   : > { %v2146_v25 = vrot.slane %v2145_v5, 2  ;;  %v2152_v62 = vmax.f32 %v2150_v51, %v2151_v38  ;;  %v2159_v59 = vmax.f32 %v2157_v15, %v2158_v21  ;;  %v2165_v48 = vrot.slane %v2164_v58, 4 }
 0x17c   : > { %v2321_v13 = vsel %vm6072_vm15, %v2308_v53, %v2320_v40  ;;  %v2008_v46 = vcombine.high %v1968_v34, %v1968_v34  ;;  %v2015_v8 = vrot.slane %v1968_v34, %v6034_v11 }
 0x17d   : > { %2322 = vst [vmem:[#allocation3 + $0x4] sm:$0x7] %v2321_v13  ;;  %v2147_v47 = vmax.f32 %v2145_v5, %v2146_v25  ;;  %v2153_v44 = vrot.slane %v2152_v62, 2  ;;  %v2160_v7 = vrot.slane %v2159_v59, 2  ;;  %v2166_v16 = vmax.f32 %v2164_v58, %v2165_v48  ;;  %v2329_v25 = vld [vmem:[#allocation3 + $0x10] sm:$0x7] }
 0x17e   : > { %v2022_v50 = vrot.slane %v2008_v46, %v6034_v11  ;;  %v2023_v0 = vcombine.high %v2015_v8, %v2015_v8  ;;  %v2115_v26 = vsel %vm2058_vm10, %v2015_v8, -inf }
 0x17f   : > { %v2148_v14 = vrot.slane %v2147_v47, 1  ;;  %v2154_v63 = vmax.f32 %v2152_v62, %v2153_v44  ;;  %v2161_v57 = vmax.f32 %v2159_v59, %v2160_v7  ;;  %v2167_v27 = vrot.slane %v2166_v16, 2 }
 0x180   : > { %v2024_v28 = vcombine.high %v2022_v50, %v2022_v50  ;;  %v2116_v33 = vrot.slane %v2115_v26, 4  ;;  %v2122_v41 = vsel %vm2058_vm10, %v2023_v0, -inf  ;;  %v2129_v49 = vsel %vm2058_vm10, %v2022_v50, -inf }
 0x181   : > { %v2149_v32 = vmax.f32 %v2147_v47, %v2148_v14  ;;  %v2155_v45 = vrot.slane %v2154_v63, 1  ;;  %v2162_v35 = vrot.slane %v2161_v57, 1  ;;  %v2168_v60 = vmax.f32 %v2166_v16, %v2167_v27  ;;  %v4884_v47 = vld [vmem:[#allocation3 + $0x14] ss:$0 sps:$4 sm:$0x77]  }
 0x182   : > { %v2117_v30 = vmax.f32 %v2115_v26, %v2116_v33  ;;  %v2123_v17 = vrot.slane %v2122_v41, 4  ;;  %v2130_v42 = vrot.slane %v2129_v49, 4  ;;  %v2136_v52 = vsel %vm2058_vm10, %v2024_v28, -inf  ;;  %v4864_v33 = vld [vmem:[#allocation3] ss:$0 sps:$4 sm:$0x66]  }
 0x183   : > { %v2156_v56 = vmax.f32 %v2154_v63, %v2155_v45  ;;  %v2163_v3 = vmax.f32 %v2161_v57, %v2162_v35  ;;  %v2169_v43 = vrot.slane %v2168_v60, 1  ;;  %v4392_v4 = vpack.c.bf16 %v2149_v32, %v2149_v32 }
 0x184   : > { %v2118_v31 = vrot.slane %v2117_v30, 2  ;;  %v2124_v18 = vmax.f32 %v2122_v41, %v2123_v17  ;;  %v2131_v54 = vmax.f32 %v2129_v49, %v2130_v42  ;;  %v2137_v12 = vrot.slane %v2136_v52, 4  ;;  %v4872_v59 = vld [vmem:[#allocation3 + $0x4] ss:$0 sps:$4 sm:$0x77]  }
 0x185   : > { %v2170_v1 = vmax.f32 %v2168_v60, %v2169_v43  ;;  %v4393_v39 = vpack.c.bf16 %v2156_v56, %v2156_v56  ;;  %v4394_v6 = vpack.c.bf16 %v2163_v3, %v2163_v3  ;;  %v2289_v10 = vunpack.c.l.b16 %v4392_v4  ;;  %v4865_v26 = vld [vmem:[#allocation3 + $0x4] ss:$0 sps:$4 sm:$0x66]   ;;  %v4881_v3 = vld [vmem:[#allocation3 + $0x8] ss:$0 sps:$4 sm:$0x77]  }
 0x186   : > { %v2119_v9 = vmax.f32 %v2117_v30, %v2118_v31  ;;  %v2125_v55 = vrot.slane %v2124_v18, 2  ;;  %v2132_v61 = vrot.slane %v2131_v54, 2  ;;  %v2138_v2 = vmax.f32 %v2136_v52, %v2137_v12  ;;  %v4873_v30 = vld [vmem:[#allocation3 + $0x8] ss:$0 sps:$4 sm:$0x77]  }
 0x187   : > { %v4395_v20 = vpack.c.bf16 %v2170_v1, %v2170_v1  ;;  %v2290_v36 = vunpack.c.l.b16 %v4393_v39  ;;  %v2291_v24 = vunpack.c.l.b16 %v4394_v6  ;;  %v2384_v7 = vshll.u32 %v4871_v19, 16  ;;  %v2326_v52 = vld [vmem:[#allocation3 + $0xc] sm:$0x7]  ;;  %v2345_v43 = vld [vmem:[#allocation3 + $0x8] sm:$0x3] }
 0x188   : > { %v2120_v29 = vrot.slane %v2119_v9, 1  ;;  %v2126_v22 = vmax.f32 %v2124_v18, %v2125_v55  ;;  %v2133_v51 = vmax.f32 %v2131_v54, %v2132_v61  ;;  %v2139_v15 = vrot.slane %v2138_v2, 2  ;;  %v2344_v12 = vld [vmem:[#allocation3 + $0x4] sm:$0x3]  ;;  %v2332_v61 = vld [vmem:[#allocation3] sm:$0x3] }
 0x189   : > { %v2292_v40 = vunpack.c.l.b16 %v4395_v20  ;;  %v2305_v5 = vsel %vm2192_vm7, %v2290_v36, %v2289_v10  ;;  %v2391_v63 = vshll.u32 %v4872_v59, 16  ;;  %v2517_v41 = vshll.u32 %v4884_v47, 16  ;;  %v4885_v6 = vld [vmem:[#allocation3 + $0x4] ss:$0 sps:$4 sm:$0x77]  }
 0x18a   : > { %v2306_v38 = vsel %vm2295_vm11, %v2291_v24, %v2305_v5  ;;  %v2121_v21 = vmax.f32 %v2119_v9, %v2120_v29  ;;  %v2127_v53 = vrot.slane %v2126_v22, 1  ;;  %v2134_v58 = vrot.slane %v2133_v51, 1  ;;  %v4866_v29 = vld [vmem:[#allocation3 + $0x8] ss:$0 sps:$4 sm:$0x66]  }
 0x18b   : > { %v2307_v34 = vsel %vm2297_vm12, %v2292_v40, %v2306_v38  ;;  %v2140_v62 = vmax.f32 %v2138_v2, %v2139_v15  ;;  %v2382_v32 = vshrl.u32 %v4871_v19, 16  ;;  %v2386_v45 = vrot.slane %v2384_v7, 1  ;;  %v4886_v15 = vld [vmem:[#allocation3 + $0x8] ss:$0 sps:$4 sm:$0x77]  }
 0x18c   : > { %v2311_v48 = vpack.c.b16 %v2307_v34, %v2307_v34  ;;  %v2128_v13 = vmax.f32 %v2126_v22, %v2127_v53  ;;  %v2135_v46 = vmax.f32 %v2133_v51, %v2134_v58  ;;  %v4388_v8 = vpack.c.bf16 %v2121_v21, %v2121_v21  ;;  %v2333_v19 = vld [vmem:[#allocation3 + $0x4] sm:$0x3]  ;;  %v2360_v5 = vld [vmem:[#allocation3 + $0x14] sm:$0x3] }
 0x18d   : > { %v2141_v44 = vrot.slane %v2140_v62, 1  ;;  %v2422_v60 = vrot.slane %v4865_v26, 1  ;;  %v2393_v56 = vrot.slane %v2391_v63, 1  ;;  %v2421_v4 = vrot.slane %v4864_v33, 1 }
 0x18e   : > { %v2330_v16 = vsel %vm6072_vm15, %v2311_v48, %v2329_v25  ;;  %v4389_v50 = vpack.c.bf16 %v2128_v13, %v2128_v13  ;;  %v4390_v0 = vpack.c.bf16 %v2135_v46, %v2135_v46  ;;  %v2285_v57 = vunpack.c.l.b16 %v4388_v8  ;;  %v4889_v7 = vld [vmem:[#allocation3 + $0x4] ss:$0 sps:$4 sm:$0x66]  }
 0x18f   : > { %2331 = vst [vmem:[#allocation3 + $0x10] sm:$0x7] %v2330_v16  ;;  %v2142_v14 = vmax.f32 %v2140_v62, %v2141_v44  ;;  %v2515_v31 = vshrl.u32 %v4884_v47, 16  ;;  %v2519_v18 = vrot.slane %v2517_v41, 1  ;;  %v2387_v1 = vor.u32 %v2386_v45, %v2382_v32  ;;  %v2334_v41 = vld [vmem:[#allocation3 + $0x8] sm:$0x3] }
 0x190   : > { %v2286_v27 = vunpack.c.l.b16 %v4389_v50  ;;  %v2287_v28 = vunpack.c.l.b16 %v4390_v0  ;;  %v2389_v39 = vshrl.u32 %v4872_v59, 16  ;;  %v2591_v55 = vcombine.low %v2422_v60, %v2345_v43 }
 0x191   : > { %v4391_v49 = vpack.c.bf16 %v2142_v14, %v2142_v14  ;;  %v2398_v2 = vshll.u32 %v4873_v30, 16  ;;  %v2496_v36 = vshll.u32 %v4881_v3, 16  ;;  %v2550_v22 = vcombine.low %v2421_v4, %v2344_v12 }
 0x192   : > { %v2302_v35 = vsel %vm2192_vm7, %v2286_v27, %v2285_v57  ;;  %v2394_v20 = vor.u32 %v2393_v56, %v2389_v39  ;;  %v2520_v51 = vor.u32 %v2519_v18, %v2515_v31  ;;  %v2549_v40 = vcombine.low %v2332_v61, %v2387_v1 }
 0x193   : > { %v2288_v17 = vunpack.c.l.b16 %v4391_v49  ;;  %v2303_v42 = vsel %vm2295_vm11, %v2287_v28, %v2302_v35  ;;  %v2440_v21 = vshll.u32 %v4885_v6, 16  ;;  %v2605_v53 = vrot.slane %v2591_v55, %v6034_v11  ;;  %v4890_v28 = vld [vmem:[#allocation3 + $0x8] ss:$0 sps:$4 sm:$0x66]  }
 0x194   : > { %v2400_v34 = vrot.slane %v2398_v2, 1  ;;  %v2590_v25 = vcombine.low %v2333_v19, %v2394_v20  ;;  %v2498_v62 = vrot.slane %v2496_v36, 1  ;;  %v2564_v59 = vrot.slane %v2550_v22, %v6034_v11  ;;  %v2357_v49 = vld [vmem:[#allocation3 + $0x8] sm:$0x3] }
 0x195   : > { %v2304_v54 = vsel %vm2297_vm12, %v2288_v17, %v2303_v42  ;;  %v2690_v48 = vcombine.low %v2360_v5, %v2520_v51  ;;  %v2447_v13 = vshll.u32 %v4886_v15, 16  ;;  %v2396_v46 = vshrl.u32 %v4873_v30, 16 }
 0x196   : > { %v2310_v9 = vpack.c.b16 %v2304_v54, %v2304_v54  ;;  %v4883_v10 = vld [vmem:[#allocation3 + $0x10] ss:$0 sps:$4 sm:$0x77]   ;;  %v6110_v8 = vrot.slane %v2549_v40, %v6034_v11  ;;  %v2494_v47 = vshrl.u32 %v4881_v3, 16  ;;  %v2442_v44 = vrot.slane %v2440_v21, 1 }
 0x197   : > { %v2510_v38 = vshll.u32 %v4883_v10, 16  ;;  %v4888_v58 = vld [vmem:[#allocation3 + $0x10] ss:$0 sps:$4 sm:$0x77]   ;;  %v2423_v16 = vrot.slane %v4866_v29, 1  ;;  %v4215_v50 = vcombine.low %v2564_v59, %v2605_v53  ;;  %v2508_v0 = vshrl.u32 %v4883_v10, 16 }
 0x198   : > { %v2327_v24 = vsel %vm6072_vm15, %v2310_v9, %v2326_v52  ;;  %v2461_v26 = vshll.u32 %v4888_v58, 16  ;;  %v2401_v14 = vor.u32 %v2400_v34, %v2396_v46  ;;  %v6113_v63 = vrot.slane %v2590_v25, %v6034_v11  ;;  %v2347_v42 = vld [vmem:[#allocation3 + $0x10] sm:$0x3] }
 0x199   : > { %2328 = vst [vmem:[#allocation3 + $0xc] sm:$0x7] %v2327_v24  ;;  %v2512_v37 = vrot.slane %v2510_v38, 1  ;;  %v6115_v57 = vor.u32 %v2498_v62, %v2494_v47  ;;  %v2438_v27 = vshrl.u32 %v4885_v6, 16  ;;  %v2445_v45 = vshrl.u32 %v4886_v15, 16 }
 0x19a   : > { %v2449_v35 = vrot.slane %v2447_v13, 1  ;;  %v2477_v17 = vrot.slane %v4889_v7, 1  ;;  %v6118_v56 = vrot.slane %v4215_v50, %v6034_v11  ;;  %v2359_v43 = vld [vmem:[#allocation3 + $0x10] sm:$0x3]  ;;  %v6121_v4 = vrot.slane %v2690_v48, %v6034_v11 }
 0x19b   : > { %v2513_v32 = vor.u32 %v2512_v37, %v2508_v0  ;;  %v2443_v30 = vor.u32 %v2442_v44, %v2438_v27  ;;  %v2463_v31 = vrot.slane %v2461_v26, 1  ;;  %v4892_v18 = vld [vmem:[#allocation3 + $0x10] ss:$0 sps:$4 sm:$0x66]   ;;  %v2631_v12 = vcombine.low %v2334_v41, %v2401_v14 }
 0x19c   : > { %v4214_v1 = vcombine.low %v6110_v8, %v6113_v63  ;;  %v2567_v6 = vcombine.low %v2357_v49, %v6115_v57  ;;  %v2450_v61 = vor.u32 %v2449_v35, %v2445_v45  ;;  %v2459_v2 = vshrl.u32 %v4888_v58, 16  ;;  %v4868_v49 = vld [vmem:[%s6465_s3 + $0x370] ss:$8 sps:$4 sm:$0xff]  }
 0x19d   : > { %v2649_v55 = vcombine.low %v2359_v43, %v2513_v32  ;;  %v2478_v24 = vrot.slane %v4890_v28, 1  ;;  %v2566_v29 = vcombine.low %v2443_v30, %v2477_v17  ;;  %v2480_v58 = vrot.slane %v4892_v18, 1 }
 0x19e   : > { %v2464_v19 = vor.u32 %v2463_v31, %v2459_v2  ;;  %v2639_v8 = vrot.slane %v2631_v12, %v6034_v11  ;;  %v2581_v57 = vrot.slane %v2567_v6, %v6034_v11  ;;  %v4875_v12 = vld [vmem:[%s6465_s3 + $0x270] ss:$8 sps:$4 sm:$0xff]  }
 0x19f   : > { %v2663_v25 = vrot.slane %v2649_v55, %v6034_v11  ;;  %v2607_v62 = vcombine.low %v2450_v61, %v2478_v24  ;;  %v2574_v7 = vrot.slane %v2566_v29, %v6034_v11  ;;  %v4895_v55 = vld [vmem:[%s6465_s3 + $0x264] ss:$8 sps:$4 sm:$0xff]   ;;  %v4898_v61 = vld [vmem:[%s6465_s3 + $0x354] ss:$8 sps:$4 sm:$0xff]   ;;  %v4899_v29 = vld [vmem:[%s6465_s3 + $0x250] ss:$8 sps:$4 sm:$0xff]  }
 0x1a0   : > { %v2346_v33 = vld [vmem:[#allocation3 + $0xc] sm:$0x3]  ;;  %v4904_v24 = vld [vmem:[%s6465_s3 + $0x344] ss:$8 sps:$4 sm:$0xff]  }
 0x1a1   : > { %v4867_v60 = vld [vmem:[#allocation3 + $0xc] ss:$0 sps:$4 sm:$0x66]   ;;  %v2632_v52 = vcombine.low %v2423_v16, %v2346_v33  ;;  %v2689_v16 = vcombine.low %v2464_v19, %v2480_v58  ;;  %v4221_v27 = vcombine.low %v2663_v25, %v6121_v4  ;;  %v2615_v28 = vrot.slane %v2607_v62, %v6034_v11  ;;  %v4905_v19 = vld [vmem:[%s6465_s3 + $0x240] ss:$8 sps:$4 sm:$0xff]  }
 0x1a2   : > { %v4874_v3 = vld [vmem:[#allocation3 + $0xc] ss:$0 sps:$4 sm:$0x77]   ;;  %v2424_v54 = vrot.slane %v4867_v60, 1  ;;  %v4880_v60 = vld [vmem:[%s6465_s3 + $0x364] ss:$8 sps:$4 sm:$0xff]  }
 0x1a3   : > { %v4882_v39 = vld [vmem:[#allocation3 + $0xc] ss:$0 sps:$4 sm:$0x77]   ;;  %v2405_v9 = vshll.u32 %v4874_v3, 16  ;;  %v2646_v22 = vrot.slane %v2632_v52, %v6034_v11  ;;  %v2403_v51 = vshrl.u32 %v4874_v3, 16  ;;  %v4218_v52 = vcombine.low %v2574_v7, %v2615_v28 }
 0x1a4   : > { %v2673_v20 = vcombine.low %v2424_v54, %v2347_v42  ;;  %v2503_v10 = vshll.u32 %v4882_v39, 16  ;;  %v4887_v36 = vld [vmem:[#allocation3 + $0xc] ss:$0 sps:$4 sm:$0x77]   ;;  %v2501_v5 = vshrl.u32 %v4882_v39, 16  ;;  %v2697_v42 = vrot.slane %v2689_v16, %v6034_v11 }
 0x1a5   : > { %v2407_v15 = vrot.slane %v2405_v9, 1  ;;  %v2454_v21 = vshll.u32 %v4887_v36, 16  ;;  %v4891_v53 = vld [vmem:[#allocation3 + $0xc] ss:$0 sps:$4 sm:$0x66]   ;;  %v2452_v13 = vshrl.u32 %v4887_v36, 16  ;;  %v6153_v4 = vrot.slane %v4221_v27, %v6034_v11 }
 0x1a6   : > { %v2687_v40 = vrot.slane %v2673_v20, %v6034_v11  ;;  %v2505_v38 = vrot.slane %v2503_v10, 1  ;;  %v2335_v37 = vld [vmem:[#allocation3 + $0xc] sm:$0x3]  ;;  %v2479_v14 = vrot.slane %v4891_v53, 1  ;;  %v6164_v6 = vrot.slane %v4218_v52, %v6034_v11  ;;  %v4893_v20 = vld [vmem:[%s6465_s3 + $0x260] ss:$8 sps:$4 sm:$0xff]  }
 0x1a7   : > { %v2408_v34 = vor.u32 %v2407_v15, %v2403_v51  ;;  %v2456_v46 = vrot.slane %v2454_v21, 1  ;;  %v2358_v44 = vld [vmem:[#allocation3 + $0xc] sm:$0x3]  ;;  %v4896_v10 = vld [vmem:[%s6465_s3 + $0x350] ss:$8 sps:$4 sm:$0xff]  }
 0x1a8   : > { %v4217_v59 = vcombine.low %v2646_v22, %v2687_v40  ;;  %v2506_v48 = vor.u32 %v2505_v38, %v2501_v5  ;;  %v4901_v36 = vld [vmem:[%s6465_s3 + $0x254] ss:$8 sps:$4 sm:$0xff]   ;;  %v4902_v22 = vld [vmem:[%s6465_s3 + $0x340] ss:$8 sps:$4 sm:$0xff]   ;;  %v4907_v51 = vld [vmem:[%s6465_s3 + $0x244] ss:$8 sps:$4 sm:$0xff]  }
 0x1a9   : > { %v2672_v47 = vcombine.low %v2335_v37, %v2408_v34  ;;  %v2457_v26 = vor.u32 %v2456_v46, %v2452_v13  ;;  %v4910_v15 = vld [vmem:[%s6465_s3 + $0x334] ss:$8 sps:$4 sm:$0xff]   ;;  %v4908_v40 = vld [vmem:[%s6465_s3 + $0x330] ss:$8 sps:$4 sm:$0xff]   ;;  %v4916_v38 = vld [vmem:[%s6465_s3 + $0x324] ss:$8 sps:$4 sm:$0xff]  }
 0x1aa   : > { %v2888_v50 = vrot.slane %v4217_v59, %v6034_v11  ;;  %v2608_v0 = vcombine.low %v2358_v44, %v2506_v48  ;;  %v4913_v5 = vld [vmem:[%s6465_s3 + $0x234] ss:$8 sps:$4 sm:$0xff]   ;;  %v4911_v21 = vld [vmem:[%s6465_s3 + $0x230] ss:$8 sps:$4 sm:$0xff]   ;;  %v4914_v53 = vld [vmem:[%s6465_s3 + $0x320] ss:$8 sps:$4 sm:$0xff]  }
 0x1ab   : > { %v2680_v63 = vrot.slane %v2672_v47, %v6034_v11  ;;  %v2648_v45 = vcombine.low %v2457_v26, %v2479_v14  ;;  %v4919_v34 = vld [vmem:[%s6465_s3 + $0x224] ss:$8 sps:$4 sm:$0xff]   ;;  %v4922_v25 = vld [vmem:[%s6465_s3 + $0x314] ss:$8 sps:$4 sm:$0xff]   ;;  %v4917_v58 = vld [vmem:[%s6465_s3 + $0x220] ss:$8 sps:$4 sm:$0xff]  }
 0x1ac   : > { %v2891_v33 = vcombine.low %v6118_v56, %v2888_v50  ;;  %v2892_v41 = vcombine.high %v6118_v56, %v2888_v50  ;;  %v2622_v32 = vrot.slane %v2608_v0, %v6034_v11  ;;  %v2867_v56 = vrot.slane %v4214_v1, %v6034_v11  ;;  %v4878_v1 = vld [vmem:[%s6465_s3 + $0x360] ss:$8 sps:$4 sm:$0xff]   ;;  %v4920_v62 = vld [vmem:[%s6465_s3 + $0x310] ss:$8 sps:$4 sm:$0xff]   ;;  %v4925_v59 = vld [vmem:[%s6465_s3 + $0x214] ss:$8 sps:$4 sm:$0xff]  }
 0x1ad   : > { %v4216_v35 = vcombine.low %v2639_v8, %v2680_v63  ;;  %v2656_v17 = vrot.slane %v2648_v45, %v6034_v11  ;;  %v4928_v37 = vld [vmem:[%s6465_s3 + $0x304] ss:$8 sps:$4 sm:$0xff]   ;;  %v4923_v48 = vld [vmem:[%s6465_s3 + $0x210] ss:$8 sps:$4 sm:$0xff]   ;;  %v4926_v13 = vld [vmem:[%s6465_s3 + $0x300] ss:$8 sps:$4 sm:$0xff]  }
 0x1ae   : > { %3750 = vmatprep.mubr.bf16.mxu0 %v2892_v41  ;;  %v4219_v30 = vcombine.low %v2581_v57, %v2622_v32  ;;  %v4931_v46 = vld [vmem:[%s6465_s3 + $0x204] ss:$8 sps:$4 sm:$0xff]   ;;  %v4934_v8 = vld [vmem:[%s6465_s3 + $0x3f4] ss:$8 sps:$4 sm:$0xff]   ;;  %v4929_v47 = vld [vmem:[%s6465_s3 + $0x200] ss:$8 sps:$4 sm:$0xff]  }
 0x1af   : > { %3751 = vmatmul.mubr.bf16.vlgmr.msra.gmra.mxu0 %v2891_v33  ;;  %v2881_v3 = vrot.slane %v4216_v35, %v6034_v11  ;;  %v4220_v31 = vcombine.low %v2656_v17, %v2697_v42  ;;  %v4932_v44 = vld [vmem:[%s6465_s3 + $0x3f0] ss:$8 sps:$4 sm:$0xff]   ;;  %v4937_v7 = vld [vmem:[%s6465_s3 + $0x2f4] ss:$8 sps:$4 sm:$0xff]   ;;  %v4940_v16 = vld [vmem:[%s6465_s3 + $0x3e4] ss:$8 sps:$4 sm:$0xff]  }
 0x1b0   : > { %3805 = vmatpush1.bf16.msra.mxu0 %v4868_v49  ;;  %v6150_v43 = vrot.slane %v4219_v30, %v6034_v11  ;;  %v4935_v50 = vld [vmem:[%s6465_s3 + $0x2f0] ss:$8 sps:$4 sm:$0xff]   ;;  %v4938_v0 = vld [vmem:[%s6465_s3 + $0x3e0] ss:$8 sps:$4 sm:$0xff]   ;;  %v4943_v26 = vld [vmem:[%s6465_s3 + $0x2e4] ss:$8 sps:$4 sm:$0xff]  }
 0x1b1   : > { %v2889_v18 = vcombine.low %v2867_v56, %v2881_v3  ;;  %v2890_v54 = vcombine.high %v2867_v56, %v2881_v3  ;;  %3806 = vmatprep.subr.bf16.mxu0 %v4880_v60  ;;  %v6167_v9 = vrot.slane %v4220_v31, %v6034_v11  ;;  %v4946_v14 = vld [vmem:[%s6465_s3 + $0x3d4] ss:$8 sps:$4 sm:$0xff]   ;;  %v4941_v63 = vld [vmem:[%s6465_s3 + $0x2e0] ss:$8 sps:$4 sm:$0xff]   ;;  %v4944_v57 = vld [vmem:[%s6465_s3 + $0x3d0] ss:$8 sps:$4 sm:$0xff]  }
 0x1b2   : > { %v2928_v39 = vcombine.high %v6150_v43, %v6153_v4  ;;  %v4949_v27 = vld [vmem:[%s6465_s3 + $0x2d4] ss:$8 sps:$4 sm:$0xff]   ;;  %v4952_v28 = vld [vmem:[%s6465_s3 + $0x3c4] ss:$8 sps:$4 sm:$0xff]   ;;  %v4947_v33 = vld [vmem:[%s6465_s3 + $0x2d0] ss:$8 sps:$4 sm:$0xff]  }
 0x1b3   : > { %3707 = vmatprep.mubr.bf16.mxu1 %v2890_v54  ;;  %v2926_v2 = vcombine.high %v6164_v6, %v6167_v9  ;;  %v4950_v41 = vld [vmem:[%s6465_s3 + $0x3c0] ss:$8 sps:$4 sm:$0xff]   ;;  %v4955_v49 = vld [vmem:[%s6465_s3 + $0x2c4] ss:$8 sps:$4 sm:$0xff]   ;;  %v4958_v32 = vld [vmem:[%s6465_s3 + $0x3b4] ss:$8 sps:$4 sm:$0xff]  }
 0x1b4   : > { %3836 = vmatprep.mubr.bf16.mxu0 %v2928_v39  ;;  %3708 = vmatmul.mubr.bf16.vlgmr.msra.gmra.mxu1 %v2889_v18  ;;  %v4953_v45 = vld [vmem:[%s6465_s3 + $0x2c0] ss:$8 sps:$4 sm:$0xff]   ;;  %v4956_v35 = vld [vmem:[%s6465_s3 + $0x3b0] ss:$8 sps:$4 sm:$0xff]   ;;  %v4961_v60 = vld [vmem:[%s6465_s3 + $0x2b4] ss:$8 sps:$4 sm:$0xff]  }
 0x1b5   : > { %3762 = vmatpush1.bf16.msra.mxu1 %v4875_v12  ;;  %3807 = vmatpush1.bf16.msra.mxu0 %v4878_v1  ;;  %v4964_v30 = vld [vmem:[%s6465_s3 + $0x3a4] ss:$8 sps:$4 sm:$0xff]   ;;  %v4959_v17 = vld [vmem:[%s6465_s3 + $0x2b0] ss:$8 sps:$4 sm:$0xff]   ;;  %v4962_v42 = vld [vmem:[%s6465_s3 + $0x3a0] ss:$8 sps:$4 sm:$0xff]  }
 0x1b6   : > { %3793 = vmatprep.mubr.bf16.mxu1 %v2926_v2  ;;  %3763 = vmatprep.subr.bf16.mxu1 %v4895_v55  ;;  %v4967_v52 = vld [vmem:[%s6465_s3 + $0x2a4] ss:$8 sps:$4 sm:$0xff]   ;;  %v4970_v56 = vld [vmem:[%s6465_s3 + $0x394] ss:$8 sps:$4 sm:$0xff]   ;;  %v4965_v3 = vld [vmem:[%s6465_s3 + $0x2a0] ss:$8 sps:$4 sm:$0xff]  }
 0x1b7   : > { %3808 = vmatprep.subr.bf16.mxu0 %v4898_v61  ;;  %v4968_v31 = vld [vmem:[%s6465_s3 + $0x390] ss:$8 sps:$4 sm:$0xff]   ;;  %v4973_v18 = vld [vmem:[%s6465_s3 + $0x294] ss:$8 sps:$4 sm:$0xff]   ;;  %v4976_v54 = vld [vmem:[%s6465_s3 + $0x384] ss:$8 sps:$4 sm:$0xff]   ;;  %v2927_v61 = vcombine.low %v6150_v43, %v6153_v4 }
 0x1b8   : > { %v4971_v12 = vld [vmem:[%s6465_s3 + $0x290] ss:$8 sps:$4 sm:$0xff]   ;;  %v4974_v1 = vld [vmem:[%s6465_s3 + $0x380] ss:$8 sps:$4 sm:$0xff]   ;;  %v4979_v39 = vld [vmem:[%s6465_s3 + $0x284] ss:$8 sps:$4 sm:$0xff]  }
 0x1b9   : > { %3764 = vmatpush1.bf16.msra.mxu1 %v4893_v20  ;;  %3809 = vmatpush1.bf16.msra.mxu0 %v4896_v10  ;;  %v4977_v55 = vld [vmem:[%s6465_s3 + $0x280] ss:$8 sps:$4 sm:$0xff]   ;;  %v4982_v2 = vld [vmem:[%s6465_s3 + $0x474] ss:$8 sps:$4 sm:$0xff]   ;;  %v4980_v20 = vld [vmem:[%s6465_s3 + $0x470] ss:$8 sps:$4 sm:$0xff]   ;;  %v2925_v10 = vcombine.low %v6164_v6, %v6167_v9 }
 0x1ba   : > { %3765 = vmatprep.subr.bf16.mxu1 %v4901_v36  ;;  %3810 = vmatprep.subr.bf16.mxu0 %v4904_v24  ;;  %v4985_v36 = vld [vmem:[%s6465_s3 + $0x464] ss:$8 sps:$4 sm:$0xff]   ;;  %v4983_v43 = vld [vmem:[%s6465_s3 + $0x460] ss:$8 sps:$4 sm:$0xff]   ;;  %v6481_v4 = vmov 0  }
 0x1bb   : > { %v4988_v24 = vld [vmem:[%s6465_s3 + $0x454] ss:$8 sps:$4 sm:$0xff]   ;;  %v4986_v6 = vld [vmem:[%s6465_s3 + $0x450] ss:$8 sps:$4 sm:$0xff]   ;;  %v4991_v9 = vld [vmem:[%s6465_s3 + $0x444] ss:$8 sps:$4 sm:$0xff]  }
 0x1bd   : > { %3766 = vmatpush1.bf16.msra.mxu1 %v4899_v29  ;;  %3811 = vmatpush1.bf16.msra.mxu0 %v4902_v22  ;;  %v4989_v29 = vld [vmem:[%s6465_s3 + $0x440] ss:$8 sps:$4 sm:$0xff]   ;;  %v4994_v22 = vld [vmem:[%s6465_s3 + $0x434] ss:$8 sps:$4 sm:$0xff]  }
 0x1be   : > { %3767 = vmatprep.subr.bf16.mxu1 %v4907_v51  ;;  %3812 = vmatprep.subr.bf16.mxu0 %v4910_v15  ;;  %v5005_v51 = vld [vmem:[#allocation3 + $0xc] ss:$0 sps:$4 sm:$0x66]   ;;  %v5007_v15 = vld [vmem:[#allocation3 + $0x14] ss:$0 sps:$4 sm:$0x66]  }
 0x1c1   : > { %3768 = vmatpush1.bf16.msra.mxu1 %v4905_v19  ;;  %3813 = vmatpush1.bf16.msra.mxu0 %v4908_v40  ;;  %v5004_v19 = vld [vmem:[#allocation3 + $0x8] ss:$0 sps:$4 sm:$0x66]   ;;  %v5006_v40 = vld [vmem:[#allocation3 + $0x10] ss:$0 sps:$4 sm:$0x66]  }
 0x1c2   : > { %3769 = vmatprep.subr.bf16.mxu1 %v4913_v5  ;;  %3814 = vmatprep.subr.bf16.mxu0 %v4916_v38  ;;  %v4992_v5 = vld [vmem:[%s6465_s3 + $0x430] ss:$8 sps:$4 sm:$0xff]   ;;  %v4997_v38 = vld [vmem:[%s6465_s3 + $0x424] ss:$8 sps:$4 sm:$0xff]  }
 0x1c5   : > { %3770 = vmatpush1.bf16.msra.mxu1 %v4911_v21  ;;  %3815 = vmatpush1.bf16.msra.mxu0 %v4914_v53  ;;  %v2534_v21 = vrot.slane %v5005_v51, 1  ;;  %v2533_v53 = vrot.slane %v5004_v19, 1 }
 0x1c6   : > { %3771 = vmatprep.subr.bf16.mxu1 %v4919_v34  ;;  %3816 = vmatprep.subr.bf16.mxu0 %v4922_v25  ;;  %v2535_v34 = vrot.slane %v5006_v40, 1  ;;  %v2536_v25 = vrot.slane %v5007_v15, 1 }
 0x1c9   : > { %3772 = vmatpush1.bf16.msra.mxu1 %v4917_v58  ;;  %3817 = vmatpush1.bf16.msra.mxu0 %v4920_v62  ;;  %v4995_v58 = vld [vmem:[%s6465_s3 + $0x420] ss:$8 sps:$4 sm:$0xff]   ;;  %v5000_v62 = vld [vmem:[%s6465_s3 + $0x414] ss:$8 sps:$4 sm:$0xff]  }
 0x1ca   : > { %3773 = vmatprep.subr.bf16.mxu1 %v4925_v59  ;;  %3818 = vmatprep.subr.bf16.mxu0 %v4928_v37  ;;  %v2630_v59 = vrot.slane %v2534_v21, %v6034_v11  ;;  %v2589_v37 = vrot.slane %v2533_v53, %v6034_v11 }
 0x1cd   : > { %3774 = vmatpush1.bf16.msra.mxu1 %v4923_v48  ;;  %3819 = vmatpush1.bf16.msra.mxu0 %v4926_v13  ;;  %v2671_v48 = vrot.slane %v2535_v34, %v6034_v11  ;;  %v2712_v13 = vrot.slane %v2536_v25, %v6034_v11 }
 0x1ce   : > { %3775 = vmatprep.subr.bf16.mxu1 %v4931_v46  ;;  %3820 = vmatprep.subr.bf16.mxu0 %v4934_v8  ;;  %v4998_v46 = vld [vmem:[%s6465_s3 + $0x410] ss:$8 sps:$4 sm:$0xff]   ;;  %v5003_v8 = vld [vmem:[%s6465_s3 + $0x404] ss:$8 sps:$4 sm:$0xff]  }
 0x1d1   : > { %3776 = vmatpush1.bf16.msra.mxu1 %v4929_v47  ;;  %3821 = vmatpush2.bf16.msra.mxu0 %v4932_v44  ;;  %v2929_v47 = vcombine.low %v2589_v37, %v2630_v59  ;;  %v2930_v44 = vcombine.low %v2671_v48, %v2712_v13 }
 0x1d2   : > { %3777 = vmatprep.subr.bf16.mxu1 %v4937_v7  ;;  %3822 = vmatprep.subr.bf16.mxu0 %v4940_v16  ;;  %v5001_v7 = vld [vmem:[%s6465_s3 + $0x400] ss:$8 sps:$4 sm:$0xff]  }
 0x1d3   : > { %v2937_v16 = vrot.slane %v2929_v47, %v6034_v11 }
 0x1d5   : > { %3778 = vmatpush2.bf16.msra.mxu1 %v4935_v50  ;;  %3823 = vmatpush2.bf16.msra.mxu0 %v4938_v0  ;;  %v2944_v50 = vrot.slane %v2930_v44, %v6034_v11  ;;  %v3910_v11 = vsub.s32 1, %v6023_v23 }
 0x1d6   : > { %3779 = vmatprep.subr.bf16.mxu1 %v4943_v26  ;;  %3824 = vmatprep.subr.bf16.mxu0 %v4946_v14 }
 0x1d7   : > { %v2945_v0 = vcombine.low %v2937_v16, %v2944_v50 }
 0x1d9   : > { %3780 = vmatpush2.bf16.msra.mxu1 %v4941_v63  ;;  %3825 = vmatpush2.bf16.msra.mxu0 %v4944_v57 }
 0x1da   : > { %3781 = vmatprep.subr.bf16.mxu1 %v4949_v27  ;;  %3826 = vmatprep.subr.bf16.mxu0 %v4952_v28 }
 0x1dd   : > { %3782 = vmatpush2.bf16.msra.mxu1 %v4947_v33  ;;  %3827 = vmatpush2.bf16.msra.mxu0 %v4950_v41 }
 0x1de   : > { %3783 = vmatprep.subr.bf16.mxu1 %v4955_v49  ;;  %3828 = vmatprep.subr.bf16.mxu0 %v4958_v32 }
 0x1e1   : > { %3784 = vmatpush2.bf16.msra.mxu1 %v4953_v45  ;;  %3829 = vmatpush2.bf16.msra.mxu0 %v4956_v35 }
 0x1e2   : > { %3785 = vmatprep.subr.bf16.mxu1 %v4961_v60  ;;  %3830 = vmatprep.subr.bf16.mxu0 %v4964_v30 }
 0x1e5   : > { %3786 = vmatpush2.bf16.msra.mxu1 %v4959_v17  ;;  %3831 = vmatpush2.bf16.msra.mxu0 %v4962_v42  ;;  %v3906_v17 = vsub.s32 0, %v6023_v23 }
 0x1e6   : > { %3787 = vmatprep.subr.bf16.mxu1 %v4967_v52  ;;  %3832 = vmatprep.subr.bf16.mxu0 %v4970_v56  ;;  %v3902_v52 = vld [vmem:[%s6466_s4] sm:$0x3] }
 0x1e9   : > { %3788 = vmatpush2.bf16.msra.mxu1 %v4965_v3  ;;  %3833 = vmatpush2.bf16.msra.mxu0 %v4968_v31 }
 0x1ea   : > { %3789 = vmatprep.subr.bf16.mxu1 %v4973_v18  ;;  %3834 = vmatprep.subr.bf16.mxu0 %v4976_v54 }
 0x1ed   : > { %3790 = vmatpush2.bf16.msra.mxu1 %v4971_v12  ;;  %3835 = vmatpush2.bf16.msra.mxu0 %v4974_v1  ;;  %v3907_v12 = vrot.slane %v3902_v52, %v3906_v17  ;;  %v3911_v1 = vrot.slane %v3902_v52, %v3910_v11 }
 0x1ee   : > { %3791 = vmatprep.subr.bf16.mxu1 %v4979_v39 }
 0x1f0   : > { %3837 = vmatmul.mubr.bf16.vlgmr.msra.gmra.mxu0 %v2927_v61 }
 0x1f1   : > { %3792 = vmatpush2.bf16.msra.mxu1 %v4977_v55 }
 0x1f2   : > { %3847 = vmatprep.subr.bf16.mxu1 %v4982_v2 }
 0x1f4   : > { %3794 = vmatmul.mubr.bf16.vlgmr.msra.gmra.mxu1 %v2925_v10 }
 0x1f5   : > { %3848 = vmatpush1.bf16.msra.mxu1 %v4980_v20  ;;  %3879 = vmatprep.mubr.bf16.mxu1 %v6481_v4  ;;  %v3912_v4 = vcombine.low %v3907_v12, %v3911_v1 }
 0x1f6   : > { %3849 = vmatprep.subr.bf16.mxu1 %v4985_v36 }
 0x1f9   : > { %3850 = vmatpush1.bf16.msra.mxu1 %v4983_v43 }
 0x1fa   : > { %3851 = vmatprep.subr.bf16.mxu1 %v4988_v24 }
 0x1fd   : > { %3852 = vmatpush1.bf16.msra.mxu1 %v4986_v6 }
 0x1fe   : > { %3853 = vmatprep.subr.bf16.mxu1 %v4991_v9 }
 0x201   : > { %3854 = vmatpush1.bf16.msra.mxu1 %v4989_v29 }
 0x202   : > { %3855 = vmatprep.subr.bf16.mxu1 %v4994_v22 }
 0x205   : > { %3856 = vmatpush1.bf16.msra.mxu1 %v4992_v5 }
 0x206   : > { %3857 = vmatprep.subr.bf16.mxu1 %v4997_v38 }
 0x209   : > { %3858 = vmatpush1.bf16.msra.mxu1 %v4995_v58 }
 0x20a   : > { %3859 = vmatprep.subr.bf16.mxu1 %v5000_v62 }
 0x20d   : > { %3860 = vmatpush1.bf16.msra.mxu1 %v4998_v46 }
 0x20e   : > { %3861 = vmatprep.subr.bf16.mxu1 %v5003_v8 }
 0x211   : > { %3862 = vmatpush1.bf16.msra.mxu1 %v5001_v7 }
 0x214   : > { %3880 = vmatmul.mubr.bf16.vlgmr.msra.gmra.mxu1 %v2945_v0 }
 0x26f   : > { %v3752_v63 = vpop.f32.mrf.mxu0 }
 0x271   : > { %v3754_v27 = vpop.f32.mrf.mxu0 }
 0x273   : > { %v3756_v33 = vpop.f32.mrf.mxu0 }
 0x274   : > { %v3709_v26 = vpop.f32.mrf.mxu1 }
 0x275   : > { %v3758_v49 = vpop.f32.mrf.mxu0  ;;  %v3753_v60 = vadd.f32 %v3752_v63, %v3709_v26 }
 0x276   : > { %v3711_v14 = vpop.f32.mrf.mxu1 }
 0x277   : > { %v3755_v30 = vadd.f32 %v3754_v27, %v3711_v14 }
 0x278   : > { %v3713_v57 = vpop.f32.mrf.mxu1 }
 0x279   : > { %v3757_v18 = vadd.f32 %v3756_v33, %v3713_v57 }
 0x27a   : > { %v3715_v28 = vpop.f32.mrf.mxu1 }
 0x27b   : > { %v3759_v54 = vadd.f32 %v3758_v49, %v3715_v28 }
 0x2b0   : > { %v3838_v45 = vpop.f32.mrf.mxu0 }
 0x2b2   : > { %v3840_v42 = vpop.f32.mrf.mxu0 }
 0x2b4   : > { %v3795_v41 = vpop.f32.mrf.mxu1  ;;  %v3842_v39 = vpop.f32.mrf.mxu0 }
 0x2b5   : > { %v3796_v56 = vadd.f32 %v3795_v41, %v3753_v60 }
 0x2b6   : > { %v3797_v32 = vpop.f32.mrf.mxu1  ;;  %v3844_v24 = vpop.f32.mrf.mxu0 }
 0x2b7   : > { %v3798_v3 = vadd.f32 %v3797_v32, %v3755_v30  ;;  %v3839_v20 = vadd.f32 %v3838_v45, %v3796_v56 }
 0x2b8   : > { %v3799_v35 = vpop.f32.mrf.mxu1 }
 0x2b9   : > { %v3800_v61 = vadd.f32 %v3799_v35, %v3757_v18  ;;  %v3841_v23 = vadd.f32 %v3840_v42, %v3798_v3 }
 0x2ba   : > { %v3801_v31 = vpop.f32.mrf.mxu1 }
 0x2bb   : > { %v3802_v2 = vadd.f32 %v3801_v31, %v3759_v54  ;;  %v3843_v22 = vadd.f32 %v3842_v39, %v3800_v61 }
 0x2bd   : > { %v3845_v51 = vadd.f32 %v3844_v24, %v3802_v2 }
 0x2d4   : > { %v3881_v55 = vpop.f32.mrf.mxu1 }
 0x2d5   : > { %v3882_v36 = vadd.f32 %v3881_v55, %v3839_v20 }
 0x2d6   : > { %v3883_v10 = vpop.f32.mrf.mxu1 }
 0x2d7   : > { %v3884_v43 = vadd.f32 %v3883_v10, %v3841_v23 }
 0x2d8   : > { %v3885_v6 = vpop.f32.mrf.mxu1 }
 0x2d9   : > { %v3894_v9 = vcombine.low %v3882_v36, %v3884_v43  ;;  %v3895_v29 = vcombine.high %v3882_v36, %v3884_v43  ;;  %v3886_v5 = vadd.f32 %v3885_v6, %v3843_v22 }
 0x2da   : > { %v3887_v15 = vpop.f32.mrf.mxu1 }
 0x2db   : > { %v3914_v19 = vadd.f32 %v3912_v4, %v3894_v9  ;;  %v3915_v40 = vadd.f32 %v3912_v4, %v3895_v29  ;;  %v3888_v38 = vadd.f32 %v3887_v15, %v3845_v51 }
 0x2dd   : > { %v3918_v21 = vmax.f32 %v3914_v19, 0.0  ;;  %v3919_v53 = vmax.f32 %v3915_v40, 0.0  ;;  %v3896_v34 = vcombine.low %v3886_v5, %v3888_v38  ;;  %v3897_v25 = vcombine.high %v3886_v5, %v3888_v38 }
 0x2df   : > { %3922 = vst [vmem:[%s217_s23] sm:$0xff] %v3918_v21  ;;  %3923 = vst [vmem:[%s217_s23 + $0x8] sm:$0xff] %v3919_v53  ;;  %v3916_v58 = vadd.f32 %v3912_v4, %v3896_v34  ;;  %v3917_v62 = vadd.f32 %v3912_v4, %v3897_v25 }
 0x2e1   : > { %v3920_v59 = vmax.f32 %v3916_v58, 0.0  ;;  %v3921_v37 = vmax.f32 %v3917_v62, 0.0 }
 0x2e3   : > { %3924 = vst [vmem:[%s217_s23 + $0x10] sm:$0xff] %v3920_v59  ;;  %3925 = vst [vmem:[%s217_s23 + $0x18] sm:$0xff] %v3921_v37 }
 0x2e4   : > { %5021 = shalt.err (!%p5018_p3)
}
 0x2e5   : > { %s5022_s12 = scalar_lea.hbm %s6416_s8, 512  ;;  %s5026_s15 = scalar_lea.hbm %s6467_s5, 1024 }
 0x2e6   : > { %p5023_p4 = scmp.ne.s32.totalorder %s6416_s8, %s5022_s12  ;;  %p5027_p9 = scmp.lt.s32.totalorder %s6416_s8, %s6467_s5 }
 0x2e7   : > { %p5028_p10 = scmp.lt.s32.totalorder %s5026_s15, %s5022_s12 }
 0x2e8   : > { %p5024_p7 = pnand %p5023_p4, %p5143_p5 }
 0x2e9   : > { %p5029_p11 = por %p5028_p10, %p5027_p9 }
 0x2ea   : > { %p5025_p8 = pneg %p5024_p7 }
 0x2ec   : > { %p5030_p12 = pnand %p5029_p11, %p5025_p8 }
 0x2ee   : > { %5033 = shalt.err (!%p5030_p12)
}
 0x2ef   : > { %s5073_s23 = smov 128   ;;  %s5074_s30 = smov 8  }
 0x2f0   : > { %4593 = dma.vmem_to_hbm [thread:$0]  (%p5143_p5), %s6418_s26, 512, %s6416_s8, %s6422_s22, %s5073_s23, %s5073_s23, %s5074_s30  }
 0x2f1 PF: > { %p4599_p13 = scmp.ge.s32.totalorder %s5068_s21, 2  ;;  %s3955_s25 = sand.u32 1, %s5056_s18  }
 0x2f2   : > { %s3956_s7 = scalar_lea.sflag [#allocation5], %s3955_s25 }
 0x2f3   : > { %p4596_p0 = pnand %p4599_p13, %p5147_p6 }
 0x2f5   : > { %p4597_p1 = pneg %p4596_p0 }
 0x2f7   : > { %5051 = dma.done.wait (%p4597_p1), %s3956_s7, 512  }
 0x2f8   : > { %5053 = vsyncadd (%p4597_p1), %s3956_s7, 4294966784  ;;  %p15_p2 = scmp.ge.s32.totalorder %s5130_s24, 4   ;;  %s6482_s18 = smov %s5060_s19 }
 0x2f9   : > { %s6483_s19 = smov %s5064_s20  ;;  %s6484_s20 = smov %s5141_s27 }
 0x2fa   : > { %s6485_s21 = smov %s5130_s24  ;;  %17 = sbr.rel (!%p15_p2) target bundleno = 3 (0x3), region = 81 }
 0x2ff   :  { %3961 = vsyncpa [#allocation5], 1 }
 0x300   :  { %3963 = vsyncpa [#allocation5 + $0x1], 1 }

// kernel: lte_forward.4
= control target key start
LH: loop header
LB: loop body
LE: loop exit
PB: predicated region body
PF: predicated region fallthrough
CT: control target
= control target key end

     0   :  { %s7586_s18 = smov 0   ;;  %s9909_s0 = inlined_call_operand.vmem [shape: f32[2,16,16,64], index: 0, kind: input, shape index: {}]   ;;  %s9910_s1 = inlined_call_operand.vmem [shape: bf16[576,64], index: 1, kind: input, shape index: {}]   ;;  %s9911_s2 = inlined_call_operand.vmem [shape: f32[1,64], index: 2, kind: input, shape index: {}]   ;;  %s9912_s3 = inlined_call_operand.vmem [shape: bf16[576,128], index: 3, kind: input, shape index: {}]   ;;  %s9913_s4 = inlined_call_operand.vmem [shape: f32[1,128], index: 4, kind: input, shape index: {}]   ;;  %s9914_s5 = inlined_call_operand.vmem [shape: f32[2,8,8,128], index: 5, kind: output, shape index: {}]  }
   0x1 LB: > { %s6281_s19 = sadd.s32 4294967295, %s7551_s18   ;;  %p6285_p0 = scmp.ge.s32.totalorder %s7551_s18, 1  ;;  %s7551_s18 = sphi %s7586_s18, %s15_s18  }
   0x2   : > { %p187_p1 = scmp.lt.s32.totalorder %s7551_s18, 3 }
   0x4   : > { %p188_p2 = pnand %p6285_p0, %p187_p1 }
   0x6   : > { %191 = sbr.rel (%p188_p2) target bundleno = 1146 (0x47a), region = 40 }
   0xb   : > { %p215_p3 = scmp.lt.s32.totalorder %s6281_s19, 1  ;;  %vm258_vm0 = vcmask 519168   ;;  %vm266_vm1 = vcmask 516096   ;;  %vm267_vm2 = vsmask.f32 256  ;;  %v9958_v0 = vmov 0 }
   0xc   : > { %vm7595_vm3 = vmand %vm266_vm1, %vm267_vm2  ;;  %v272_v1 = vld [vmem:[#allocation2 + $0xc] sm:$0x1]  ;;  %vm323_vm4 = vsmask.f32 7938  ;;  %v9961_v3 = vmov 0  ;;  %v7553_v6 = vmov 0  }
   0xd   : > { %v9959_v0 = vsel %vm7595_vm3, 4294967295, %v9958_v0  ;;  %s10093_s19 = smov (!%p215_p3, %s6281_s19), 1  ;;  %v273_v2 = vsel %vm7595_vm3, 0, %v272_v1  ;;  %vm7604_vm5 = vmand %vm266_vm1, %vm323_vm4  ;;  %v275_v4 = vld [vmem:[#allocation2 + $0x18] sm:$0x1]  ;;  %v9966_v46 = vmov 0 }
   0xe   : > { %9960 = vst [vmem:[#allocation4_spill] sm:$0xff] %v9959_v0  ;;  %v9962_v3 = vsel %vm7604_vm5, 4294967295, %v9961_v3  ;;  %274 = vst [vmem:[#allocation2 + $0xc] sm:$0x1] %v273_v2  ;;  %v276_v5 = vsel %vm7595_vm3, 0, %v275_v4  ;;  %s6710_s20 = sshll.u32 %s10093_s19, 8 }
   0xf   : > { %9963 = vst [vmem:[#allocation5_spill] sm:$0xff] %v9962_v3  ;;  %259 = vst.msk [vmem:[#allocation2] sm:$0xf] %vm258_vm0, %v7553_v6  ;;  %v328_v7 = vld [vmem:[#allocation2 + $0x14] sm:$0x1]  ;;  %s7626_s23 = scalar_lea.vmem %s9909_s0, %s6710_s20  ;;  %s7554_s24 = smov 64  }
  0x10   : > { %260 = vst.msk [vmem:[#allocation2 + $0x4] sm:$0xf] %vm258_vm0, %v7553_v6  ;;  %261 = vst.msk [vmem:[#allocation2 + $0x8] sm:$0xf] %vm258_vm0, %v7553_v6  ;;  %v329_v8 = vsel %vm7604_vm5, 0, %v328_v7  ;;  %v226_v15 = vld [vmem:[%s7626_s23] sm:$0xff] }
  0x11   : > { %263 = vst.msk [vmem:[#allocation2 + $0xcc] sm:$0xf] %vm258_vm0, %v7553_v6  ;;  %264 = vst.msk [vmem:[#allocation2 + $0xd0] sm:$0xf] %vm258_vm0, %v7553_v6  ;;  %v278_v9 = vld [vmem:[#allocation2 + $0x24] sm:$0x1]  ;;  %v6712_v20 = vpack.c.bf16 %v226_v15, %v226_v15 }
  0x12   : > { %265 = vst.msk [vmem:[#allocation2 + $0xd4] sm:$0xf] %vm258_vm0, %v7553_v6  ;;  %4447 = vst.msk [vmem:[#allocation3] sm:$0xf] %vm258_vm0, %v7553_v6  ;;  %v331_v10 = vld [vmem:[#allocation2 + $0x20] sm:$0x1] }
  0x13   : > { %4448 = vst.msk [vmem:[#allocation3 + $0x4] sm:$0xf] %vm258_vm0, %v7553_v6  ;;  %4450 = vst.msk [vmem:[#allocation3 + $0x48] sm:$0xf] %vm258_vm0, %v7553_v6  ;;  %v279_v11 = vsel %vm7595_vm3, 0, %v278_v9  ;;  %v332_v12 = vsel %vm7604_vm5, 0, %v331_v10 }
  0x14   : > { %4451 = vst.msk [vmem:[#allocation3 + $0x4c] sm:$0xf] %vm258_vm0, %v7553_v6  ;;  %277 = vst [vmem:[#allocation2 + $0x18] sm:$0x1] %v276_v5  ;;  %v281_v13 = vld [vmem:[#allocation2 + $0x30] sm:$0x1] }
  0x15   : > { %330 = vst [vmem:[#allocation2 + $0x14] sm:$0x1] %v329_v8  ;;  %v334_v14 = vld [vmem:[#allocation2 + $0x2c] sm:$0x1]  ;;  %v228_v17 = vld [vmem:[%s7626_s23 + $0x10] sm:$0xff]  ;;  %v282_v18 = vsel %vm7595_vm3, 0, %v281_v13  ;;  %vm7655_vm8 = vmand %vm258_vm0, %vm323_vm4 }
  0x16   : > { %v227_v16 = vld [vmem:[%s7626_s23 + $0x8] sm:$0xff]  ;;  %280 = vst [vmem:[#allocation2 + $0x24] sm:$0x1] %v279_v11  ;;  %333 = vst [vmem:[#allocation2 + $0x20] sm:$0x1] %v332_v12  ;;  %v335_v19 = vsel %vm7604_vm5, 0, %v334_v14  ;;  %v6714_v23 = vpack.c.bf16 %v228_v17, %v228_v17 }
  0x17   : > { %v6713_v21 = vpack.c.bf16 %v227_v16, %v227_v16  ;;  %v229_v22 = vld [vmem:[%s7626_s23 + $0x18] sm:$0xff]  ;;  %v230_v24 = vld [vmem:[%s7626_s23 + $0x20] sm:$0xff]  ;;  %v231_v25 = vld [vmem:[%s7626_s23 + $0x28] sm:$0xff]  ;;  %283 = vst [vmem:[#allocation2 + $0x30] sm:$0x1] %v282_v18  ;;  %v478_v31 = vshrl.u32 %v6712_v20, 16 }
  0x18   : > { %336 = vst [vmem:[#allocation2 + $0x2c] sm:$0x1] %v335_v19  ;;  %vm475_vm6 = vsmask.f32 4368  ;;  %v6715_v26 = vpack.c.bf16 %v229_v22, %v229_v22  ;;  %v6716_v27 = vpack.c.bf16 %v230_v24, %v230_v24  ;;  %v7642_v28 = vpack.c.bf16 %v231_v25, %v231_v25  ;;  %v232_v29 = vld [vmem:[%s7626_s23 + $0x30] sm:$0xff]  ;;  %v233_v30 = vld [vmem:[%s7626_s23 + $0x38] sm:$0xff] }
  0x19   : > { %v481_v32 = vshll.u32 %v6712_v20, 16  ;;  %v486_v33 = vshrl.u32 %v6713_v21, 16  ;;  %v489_v34 = vshll.u32 %v6713_v21, 16  ;;  %v495_v35 = vshrl.u32 %v6714_v23, 16  ;;  %vm7647_vm7 = vmor %vm267_vm2, %vm475_vm6  ;;  %v800_v42 = vld [vmem:[#allocation2 + $0xc] sm:$0xf] }
  0x1a   : > { %v498_v36 = vshll.u32 %v6714_v23, 16  ;;  %v503_v37 = vshrl.u32 %v6715_v26, 16  ;;  %v506_v38 = vshll.u32 %v6715_v26, 16  ;;  %v480_v40 = vrot.slane %v478_v31, 7  ;;  %v269_v43 = vld [vmem:[#allocation2] sm:$0x1] }
  0x1b   : > { %v488_v41 = vrot.slane %v486_v33, 7  ;;  %v6718_v44 = vpack.c.bf16 %v232_v29, %v232_v29  ;;  %v7651_v45 = vpack.c.bf16 %v233_v30, %v233_v30  ;;  %v9967_v46 = vsel %vm7655_vm8, 4294967295, %v9966_v46  ;;  %v325_v50 = vld [vmem:[#allocation2 + $0x8] sm:$0x1]  ;;  %v807_v56 = vld [vmem:[#allocation2 + $0x18] sm:$0xf] }
  0x1c   : > { %9968 = vst [vmem:[#allocation6_spill] sm:$0xff] %v9967_v46  ;;  %v497_v47 = vrot.slane %v495_v35, 7  ;;  %v505_v48 = vrot.slane %v503_v37, 7  ;;  %v270_v49 = vsel %vm7595_vm3, 0, %v269_v43  ;;  %v512_v51 = vshrl.u32 %v6716_v27, 16  ;;  %v234_v20 = vld [vmem:[%s7626_s23 + $0x40] sm:$0xff] }
  0x1d   : > { %v483_v52 = vor.u32 %v481_v32, %v480_v40  ;;  %v484_v53 = vrot.slane %v480_v40, 4  ;;  %v491_v54 = vor.u32 %v489_v34, %v488_v41  ;;  %v493_v55 = vrot.slane %v488_v41, 4  ;;  %271 = vst [vmem:[#allocation2] sm:$0x1] %v270_v49  ;;  %v804_v57 = vld [vmem:[#allocation2 + $0x14] sm:$0x1] }
  0x1e   : > { %v500_v58 = vor.u32 %v498_v36, %v497_v47  ;;  %v501_v59 = vrot.slane %v497_v47, 4  ;;  %v508_v60 = vor.u32 %v506_v38, %v505_v48  ;;  %v510_v61 = vrot.slane %v505_v48, 4  ;;  %v811_v62 = vld [vmem:[#allocation2 + $0x20] sm:$0x1]  ;;  %v284_v9 = vld [vmem:[#allocation2 + $0x3c] sm:$0x1] }
  0x1f   : > { %v492_v63 = vsel %vm7647_vm7, %v484_v53, %v491_v54  ;;  %v801_v1 = vsel %vm7655_vm8, %v483_v52, %v800_v42  ;;  %v326_v2 = vsel %vm7604_vm5, 0, %v325_v50  ;;  %v805_v4 = vsel %vm7595_vm3, %v493_v55, %v804_v57  ;;  %v814_v12 = vld [vmem:[#allocation2 + $0x24] sm:$0xf]  ;;  %v821_v24 = vld [vmem:[#allocation2 + $0x30] sm:$0xf]  ;;  %v235_v48 = vld [vmem:[%s7626_s23 + $0x48] sm:$0xff] }
  0x20   : > { %802 = vst [vmem:[#allocation2 + $0xc] sm:$0xf] %v801_v1  ;;  %803 = vst.msk [vmem:[#allocation2 + $0x10] sm:$0xf] %vm258_vm0, %v492_v63  ;;  %v509_v5 = vsel %vm7647_vm7, %v501_v59, %v508_v60  ;;  %v808_v6 = vsel %vm7655_vm8, %v500_v58, %v807_v56  ;;  %v514_v7 = vrot.slane %v512_v51, 7  ;;  %v515_v8 = vshll.u32 %v6716_v27, 16 }
  0x21   : > { %327 = vst [vmem:[#allocation2 + $0x8] sm:$0x1] %v326_v2  ;;  %806 = vst [vmem:[#allocation2 + $0x14] sm:$0x1] %v805_v4  ;;  %v520_v10 = vshrl.u32 %v7642_v28, 16  ;;  %v523_v11 = vshll.u32 %v7642_v28, 16  ;;  %v812_v13 = vsel %vm7595_vm3, %v510_v61, %v811_v62  ;;  %v6720_v33 = vpack.c.bf16 %v234_v20, %v234_v20 }
  0x22   : > { %809 = vst [vmem:[#allocation2 + $0x18] sm:$0xf] %v808_v6  ;;  %810 = vst.msk [vmem:[#allocation2 + $0x1c] sm:$0xf] %vm258_vm0, %v509_v5  ;;  %v529_v14 = vshrl.u32 %v6718_v44, 16  ;;  %v517_v16 = vor.u32 %v515_v8, %v514_v7  ;;  %v518_v17 = vrot.slane %v514_v7, 4  ;;  %v6721_v57 = vpack.c.bf16 %v235_v48, %v235_v48 }
  0x23   : > { %v913_v15 = vld [vmem:[#allocation2 + $0x4] sm:$0xf]  ;;  %813 = vst [vmem:[#allocation2 + $0x20] sm:$0x1] %v812_v13  ;;  %v532_v18 = vshll.u32 %v6718_v44, 16  ;;  %v537_v19 = vshrl.u32 %v7651_v45, 16 }
  0x24   : > { %v522_v21 = vrot.slane %v520_v10, 7  ;;  %v531_v22 = vrot.slane %v529_v14, 7  ;;  %v540_v23 = vshll.u32 %v7651_v45, 16  ;;  %v285_v25 = vsel %vm7595_vm3, 0, %v284_v9  ;;  %v912_v26 = vld [vmem:[#allocation2] sm:$0xf] }
  0x25   : > { %v815_v27 = vsel %vm7655_vm8, %v517_v16, %v814_v12  ;;  %v7686_v28 = vrot.slane %v537_v19, 7  ;;  %v818_v29 = vld [vmem:[#allocation2 + $0x2c] sm:$0x1]  ;;  %286 = vst [vmem:[#allocation2 + $0x3c] sm:$0x1] %v285_v25  ;;  %v7688_v34 = vcombine.low %v912_v26, %v913_v15  ;;  %v546_v51 = vshrl.u32 %v6720_v33, 16 }
  0x26   : > { %v525_v30 = vor.u32 %v523_v11, %v522_v21  ;;  %v527_v31 = vrot.slane %v522_v21, 4  ;;  %816 = vst [vmem:[#allocation2 + $0x24] sm:$0xf] %v815_v27  ;;  %v534_v32 = vor.u32 %v532_v18, %v531_v22  ;;  %v535_v35 = vrot.slane %v531_v22, 4  ;;  %v236_v18 = vld [vmem:[%s7626_s23 + $0x50] sm:$0xff]  ;;  %s6711_s29 = sshll.u32 %s10093_s19, 6 }
  0x27   : > { %v542_v36 = vor.u32 %v540_v23, %v7686_v28  ;;  %v976_v37 = vld [vmem:[#allocation2 + $0xc] sm:$0xf]  ;;  %v7691_v38 = vld [vmem:[#allocation2 + $0x10] sm:$0xf]  ;;  %v1235_v52 = vshrl.u32 %v7688_v34, 16  ;;  %v1237_v53 = vshll.u32 %v7688_v34, 16  ;;  %s9887_s7 = scalar_lea.vmem %s9914_s5, %s6711_s29 }
  0x28   : > { %v526_v40 = vsel %vm7647_vm7, %v518_v17, %v525_v30  ;;  %v822_v41 = vsel %vm7655_vm8, %v534_v32, %v821_v24  ;;  %v819_v42 = vsel %vm7595_vm3, %v527_v31, %v818_v29  ;;  %v7700_v43 = vcombine.low %v976_v37, %v7691_v38  ;;  %v7228_v50 = vld [vmem:[#allocation2 + $0x8] ss:$0 sps:$4 sm:$0x11]   ;;  %v914_v54 = vld [vmem:[#allocation2 + $0xc] sm:$0xf] }
  0x29   : > { %v978_v44 = vld [vmem:[#allocation2 + $0x18] sm:$0xf]  ;;  %v7702_v45 = vld [vmem:[#allocation2 + $0x1c] sm:$0xf]  ;;  %817 = vst.msk [vmem:[#allocation2 + $0x28] sm:$0xf] %vm258_vm0, %v526_v40  ;;  %v543_v47 = vsel %vm7647_vm7, %v535_v35, %v542_v36  ;;  %v6722_v36 = vpack.c.bf16 %v236_v18, %v236_v18 }
  0x2a   : > { %823 = vst [vmem:[#allocation2 + $0x30] sm:$0xf] %v822_v41  ;;  %820 = vst [vmem:[#allocation2 + $0x2c] sm:$0x1] %v819_v42  ;;  %v7709_v49 = vcombine.low %v978_v44, %v7702_v45  ;;  %1635 = vrot.lane.b32.xlu0 %v7700_v43, %s7554_s24  ;;  %v1242_v55 = vshll.u32 %v7228_v50, 16  ;;  %v1239_v58 = vrot.slane %v1237_v53, 1 }
  0x2b   : > { %824 = vst.msk [vmem:[#allocation2 + $0x34] sm:$0xf] %vm258_vm0, %v543_v47  ;;  %v915_v56 = vld [vmem:[#allocation2 + $0x10] sm:$0xf]  ;;  %vm1233_vm9 = vsmask.f32 7424 }
  0x2c   : > { %1637 = vrot.lane.b32.xlu1 %v7709_v49, %s7554_s24  ;;  %v7718_v59 = vcombine.low %v914_v54, %v915_v56  ;;  %v1244_v60 = vrot.slane %v1242_v55, 1  ;;  %v7230_v61 = vld [vmem:[#allocation2 + $0x14] ss:$0 sps:$4 sm:$0x11]   ;;  %v7720_v62 = vrot.slane %v546_v51, 7  ;;  %v549_v63 = vshll.u32 %v6720_v33, 16 }
  0x2d   : > { %v1240_v1 = vor.u32 %v1239_v58, %v1235_v52  ;;  %v980_v5 = vld [vmem:[#allocation2 + $0x24] sm:$0xf]  ;;  %v916_v6 = vld [vmem:[#allocation2 + $0x18] sm:$0xf]  ;;  %v1254_v7 = vshll.u32 %v7230_v61, 16  ;;  %v554_v10 = vshrl.u32 %v6721_v57, 16 }
  0x2e   : > { %v1247_v2 = vshrl.u32 %v7718_v59, 16  ;;  %v1249_v4 = vshll.u32 %v7718_v59, 16  ;;  %v917_v9 = vld [vmem:[#allocation2 + $0x1c] sm:$0xf]  ;;  %v551_v17 = vor.u32 %v549_v63, %v7720_v62  ;;  %v337_v23 = vld [vmem:[#allocation2 + $0x38] sm:$0x1] }
  0x2f   : > { %v1245_v11 = vsel %vm1233_vm9, %v1240_v1, %v1244_v60  ;;  %v7234_v13 = vld [vmem:[#allocation2 + $0x20] ss:$0 sps:$4 sm:$0x11]   ;;  %v1256_v14 = vrot.slane %v1254_v7, 1  ;;  %v7731_v16 = vcombine.low %v916_v6, %v917_v9  ;;  %v918_v26 = vld [vmem:[#allocation2 + $0x24] sm:$0xf] }
  0x30   : > { %v7724_v8 = vld [vmem:[#allocation2 + $0x28] sm:$0xf]  ;;  %v1251_v12 = vrot.slane %v1249_v4, 1  ;;  %1426 = vrot.lane.b32.xlu0 %v1245_v11, %s7554_s24  ;;  %v1266_v20 = vshll.u32 %v7234_v13, 16  ;;  %v7742_v32 = vrot.slane %v554_v10, 7  ;;  %v237_v35 = vld [vmem:[%s7626_s23 + $0x58] sm:$0xff] }
  0x31   : > { %v7729_v15 = vcombine.low %v980_v5, %v7724_v8  ;;  %v982_v21 = vld [vmem:[#allocation2 + $0x30] sm:$0xf]  ;;  %v1259_v24 = vshrl.u32 %v7731_v16, 16  ;;  %v1261_v25 = vshll.u32 %v7731_v16, 16  ;;  %v919_v27 = vld [vmem:[#allocation2 + $0x28] sm:$0xf]  ;;  %v6723_v56 = vpack.c.bf16 %v237_v35, %v237_v35 }
  0x32   : > { %v1252_v19 = vor.u32 %v1251_v12, %v1247_v2  ;;  %v7735_v22 = vld [vmem:[#allocation2 + $0x34] sm:$0xf]  ;;  %v287_v29 = vld [vmem:[#allocation2 + $0x48] sm:$0x1]  ;;  %v7740_v31 = vcombine.low %v918_v26, %v919_v27  ;;  %v828_v33 = vld [vmem:[#allocation2 + $0x3c] sm:$0xf] }
  0x33   : > { %v1263_v37 = vrot.slane %v1261_v25, 1  ;;  %v1268_v40 = vrot.slane %v1266_v20, 1  ;;  %v7749_v41 = vcombine.low %v982_v21, %v7735_v22  ;;  %v7238_v42 = vld [vmem:[#allocation2 + $0x2c] ss:$0 sps:$4 sm:$0x11]   ;;  %v829_v44 = vsel %vm7655_vm8, %v551_v17, %v828_v33  ;;  %v238_v47 = vld [vmem:[%s7626_s23 + $0x60] sm:$0xff] }
  0x34   : > { %v1257_v30 = vsel %vm1233_vm9, %v1252_v19, %v1256_v14  ;;  %1639 = vrot.lane.b32.xlu0 %v7729_v15, %s7554_s24  ;;  %v1271_v48 = vshrl.u32 %v7740_v31, 16  ;;  %v1273_v50 = vshll.u32 %v7740_v31, 16  ;;  %v552_v51 = vrot.slane %v7720_v62, 4  ;;  %830 = vst [vmem:[#allocation2 + $0x3c] sm:$0xf] %v829_v44  ;;  %v239_v58 = vld [vmem:[%s7626_s23 + $0x68] sm:$0xff] }
  0x35   : > { %1428 = vrot.lane.b32.xlu1 %v1257_v30, %s7554_s24  ;;  %9969 = vst [vmem:[#allocation7_spill] sm:$0xff] %v7749_v41  ;;  %v557_v52 = vshll.u32 %v6721_v57, 16  ;;  %v1264_v53 = vor.u32 %v1263_v37, %v1259_v24  ;;  %v1278_v54 = vshll.u32 %v7238_v42, 16  ;;  %v338_v55 = vsel %vm7604_vm5, 0, %v337_v23  ;;  %v340_v1 = vld [vmem:[#allocation2 + $0x44] sm:$0x1] }
  0x36   : > { %v1275_v60 = vrot.slane %v1273_v50, 1  ;;  %339 = vst [vmem:[#allocation2 + $0x38] sm:$0x1] %v338_v55  ;;  %v288_v63 = vsel %vm7595_vm3, 0, %v287_v29  ;;  %v290_v2 = vld [vmem:[#allocation2 + $0x54] sm:$0x1]  ;;  %v6724_v62 = vpack.c.bf16 %v238_v47, %v238_v47  ;;  %v6725_v14 = vpack.c.bf16 %v239_v58, %v239_v58 }
  0x37   : > { %v559_v61 = vor.u32 %v557_v52, %v7742_v32  ;;  %v1269_v57 = vsel %vm1233_vm9, %v1264_v53, %v1268_v40  ;;  %v1280_v4 = vrot.slane %v1278_v54, 1  ;;  %289 = vst [vmem:[#allocation2 + $0x48] sm:$0x1] %v288_v63  ;;  %v563_v5 = vshrl.u32 %v6722_v36, 16  ;;  %v240_v7 = vld [vmem:[%s7626_s23 + $0x70] sm:$0xff]  ;;  %v241_v33 = vld [vmem:[%s7626_s23 + $0x78] sm:$0xff] }
  0x38   : > { %1641 = vrot.lane.b32.xlu0 %v7749_v41, %s7554_s24  ;;  %v566_v6 = vshll.u32 %v6722_v36, 16  ;;  %v544_v9 = vrot.slane %v7686_v28, 4  ;;  %v1276_v10 = vor.u32 %v1275_v60, %v1271_v48  ;;  %v920_v12 = vld [vmem:[#allocation2 + $0x30] sm:$0xf]  ;;  %v921_v13 = vld [vmem:[#allocation2 + $0x34] sm:$0xf]  ;;  %v7777_v25 = vpack.c.bf16 %v240_v7, %v240_v7 }
  0x39   : > { %1430 = vrot.lane.b32.xlu1 %v1269_v57, %s7554_s24  ;;  %v560_v11 = vsel %vm7647_vm7, %v552_v51, %v559_v61  ;;  %v565_v17 = vrot.slane %v563_v5, 7  ;;  %v571_v18 = vshrl.u32 %v6723_v56, 16  ;;  %v574_v19 = vshll.u32 %v6723_v56, 16  ;;  %v343_v24 = vld [vmem:[#allocation2 + $0x50] sm:$0x1] }
  0x3a   : > { %831 = vst.msk [vmem:[#allocation2 + $0x40] sm:$0xf] %vm258_vm0, %v560_v11  ;;  %v341_v20 = vsel %vm7604_vm5, 0, %v340_v1  ;;  %v1281_v21 = vsel %vm1233_vm9, %v1276_v10, %v1280_v4  ;;  %v291_v28 = vsel %vm7595_vm3, 0, %v290_v2  ;;  %v580_v23 = vshrl.u32 %v6724_v62, 16 }
  0x3b   : > { %342 = vst [vmem:[#allocation2 + $0x44] sm:$0x1] %v341_v20  ;;  %v561_v26 = vrot.slane %v7742_v32, 4  ;;  %v568_v27 = vor.u32 %v566_v6, %v565_v17  ;;  %v569_v29 = vrot.slane %v565_v17, 4  ;;  %v7780_v30 = vrot.slane %v571_v18, 7 }
  0x3c   : > { %292 = vst [vmem:[#allocation2 + $0x54] sm:$0x1] %v291_v28  ;;  %v7784_v35 = vcombine.low %v920_v12, %v921_v13  ;;  %v582_v36 = vrot.slane %v580_v23, 7  ;;  %v583_v37 = vshll.u32 %v6724_v62, 16  ;;  %v588_v40 = vshrl.u32 %v6725_v14, 16 }
  0x3d   : > { %1432 = vrot.lane.b32.xlu1 %v1281_v21, %s7554_s24  ;;  %v293_v42 = vld [vmem:[#allocation2 + $0x60] sm:$0x1]  ;;  %v984_v44 = vld [vmem:[#allocation2 + $0x3c] sm:$0xf]  ;;  %v825_v47 = vld [vmem:[#allocation2 + $0x38] sm:$0x1]  ;;  %v576_v48 = vor.u32 %v574_v19, %v7780_v30  ;;  %v6727_v56 = vpack.c.bf16 %v241_v33, %v241_v33 }
  0x3e   : > { %v591_v50 = vshll.u32 %v6725_v14, 16  ;;  %v344_v32 = vsel %vm7604_vm5, 0, %v343_v24  ;;  %v826_v51 = vsel %vm7595_vm3, %v544_v9, %v825_v47  ;;  %v835_v52 = vld [vmem:[#allocation2 + $0x48] sm:$0xf]  ;;  %v922_v53 = vld [vmem:[#allocation2 + $0x3c] sm:$0xf]  ;;  %v585_v4 = vor.u32 %v583_v37, %v582_v36 }
  0x3f   : > { %v586_v54 = vrot.slane %v582_v36, 4  ;;  %v7791_v55 = vrot.slane %v588_v40, 7  ;;  %345 = vst [vmem:[#allocation2 + $0x50] sm:$0x1] %v344_v32  ;;  %827 = vst [vmem:[#allocation2 + $0x38] sm:$0x1] %v826_v51  ;;  %v577_v58 = vsel %vm7647_vm7, %v569_v29, %v576_v48  ;;  %v836_v60 = vsel %vm7655_vm8, %v568_v27, %v835_v52 }
  0x40   : > { %v294_v61 = vsel %vm7595_vm3, 0, %v293_v42  ;;  %v597_v63 = vshrl.u32 %v7777_v25, 16  ;;  %v1285_v2 = vshll.u32 %v7784_v35, 16  ;;  %v578_v62 = vrot.slane %v7780_v30, 4  ;;  %837 = vst [vmem:[#allocation2 + $0x48] sm:$0xf] %v836_v60 }
  0x41   : > { %v7800_v1 = vld [vmem:[#allocation2 + $0x40] sm:$0xf]  ;;  %838 = vst.msk [vmem:[#allocation2 + $0x4c] sm:$0xf] %vm258_vm0, %v577_v58  ;;  %v593_v5 = vor.u32 %v591_v50, %v7791_v55  ;;  %295 = vst [vmem:[#allocation2 + $0x60] sm:$0x1] %v294_v61 }
  0x42   : > { %v923_v57 = vld [vmem:[#allocation2 + $0x40] sm:$0xf]  ;;  %v346_v6 = vld [vmem:[#allocation2 + $0x5c] sm:$0x1]  ;;  %v1041_v7 = vld [vmem:[#allocation2 + $0x18] sm:$0xf]  ;;  %v7807_v9 = vcombine.low %v984_v44, %v7800_v1 }
  0x43   : > { %v832_v10 = vld [vmem:[#allocation2 + $0x44] sm:$0x1]  ;;  %v7809_v11 = vcombine.low %v922_v53, %v923_v57  ;;  %v599_v12 = vrot.slane %v597_v63, 7  ;;  %v600_v13 = vshll.u32 %v7777_v25, 16  ;;  %v1042_v14 = vld [vmem:[#allocation2 + $0x1c] sm:$0xf]  ;;  %v594_v18 = vsel %vm7647_vm7, %v586_v54, %v593_v5 }
  0x44   : > { %9970 = vst [vmem:[#allocation8_spill] sm:$0xff] %v7807_v9  ;;  %v833_v17 = vsel %vm7595_vm3, %v561_v26, %v832_v10  ;;  %v842_v19 = vld [vmem:[#allocation2 + $0x54] sm:$0xf]  ;;  %v605_v20 = vshrl.u32 %v6727_v56, 16  ;;  %v608_v21 = vshll.u32 %v6727_v56, 16  ;;  %1643 = vrot.lane.b32.xlu0 %v7807_v9, %s7554_s24  ;;  %v1283_v28 = vshrl.u32 %v7784_v35, 16 }
  0x45   : > { %9971 = vst [vmem:[#allocation9_spill] sm:$0xff] %v7809_v11  ;;  %834 = vst [vmem:[#allocation2 + $0x44] sm:$0x1] %v833_v17  ;;  %v1287_v23 = vrot.slane %v1285_v2, 1  ;;  %v843_v24 = vsel %vm7655_vm8, %v585_v4, %v842_v19  ;;  %v603_v25 = vrot.slane %v599_v12, 4  ;;  %v1297_v27 = vshll.u32 %v7809_v11, 16 }
  0x46   : > { %845 = vst.msk [vmem:[#allocation2 + $0x58] sm:$0xf] %vm258_vm0, %v594_v18  ;;  %v7822_v26 = vrot.slane %v605_v20, 7  ;;  %844 = vst [vmem:[#allocation2 + $0x54] sm:$0xf] %v843_v24  ;;  %v347_v30 = vsel %vm7604_vm5, 0, %v346_v6  ;;  %v7827_v33 = vcombine.low %v1041_v7, %v1042_v14  ;;  %v602_v40 = vor.u32 %v600_v13, %v599_v12 }
  0x47   : > { %v839_v29 = vld [vmem:[#allocation2 + $0x50] sm:$0x1]  ;;  %v7242_v36 = vld [vmem:[#allocation2 + $0x38] ss:$0 sps:$4 sm:$0x11]   ;;  %v1288_v50 = vor.u32 %v1287_v23, %v1283_v28  ;;  %v1295_v56 = vshrl.u32 %v7809_v11, 16 }
  0x48   : > { %v840_v37 = vsel %vm7595_vm3, %v578_v62, %v839_v29  ;;  %v610_v42 = vor.u32 %v608_v21, %v7822_v26  ;;  %348 = vst [vmem:[#allocation2 + $0x5c] sm:$0x1] %v347_v30  ;;  %v7256_v44 = vld [vmem:[#allocation2 + $0x20] ss:$0 sps:$4 sm:$0x11]   ;;  %v1290_v32 = vshll.u32 %v7242_v36, 16 }
  0x49   : > { %v986_v47 = vld [vmem:[#allocation2 + $0x48] sm:$0xf]  ;;  %v7832_v48 = vld [vmem:[#allocation2 + $0x4c] sm:$0xf]  ;;  %841 = vst [vmem:[#allocation2 + $0x50] sm:$0x1] %v840_v37 }
  0x4a   : > { %v7835_v51 = vcombine.low %v986_v47, %v7832_v48  ;;  %v924_v52 = vld [vmem:[#allocation2 + $0x48] sm:$0xf]  ;;  %v925_v53 = vld [vmem:[#allocation2 + $0x4c] sm:$0xf]  ;;  %v611_v54 = vsel %vm7647_vm7, %v603_v25, %v610_v42  ;;  %v1299_v58 = vrot.slane %v1297_v27, 1  ;;  %v2166_v63 = vshll.u32 %v7827_v33, 16 }
  0x4b   : > { %v7840_v60 = vcombine.low %v924_v52, %v925_v53  ;;  %v849_v61 = vld [vmem:[#allocation2 + $0x60] sm:$0xf]  ;;  %852 = vst.msk [vmem:[#allocation2 + $0x64] sm:$0xf] %vm258_vm0, %v611_v54  ;;  %v1292_v2 = vrot.slane %v1290_v32, 1  ;;  %v595_v62 = vrot.slane %v7791_v55, 4 }
  0x4c   : > { %1645 = vrot.lane.b32.xlu0 %v7835_v51, %s7554_s24  ;;  %v850_v57 = vsel %vm7655_vm8, %v602_v40, %v849_v61  ;;  %v242_v4 = vld [vmem:[%s7626_s23 + $0x80] sm:$0xff]  ;;  %v2164_v7 = vshrl.u32 %v7827_v33, 16  ;;  %v2171_v17 = vshll.u32 %v7256_v44, 16  ;;  %v243_v18 = vld [vmem:[%s7626_s23 + $0x88] sm:$0xff]  ;;  %v1300_v55 = vor.u32 %v1299_v58, %v1295_v56  ;;  %v7302_v40 = vld [vmem:[%s9910_s1 + $0x78] sm:$0xff]  }
  0x4d   : > { %9972 = vst [vmem:[#allocation10_spill] sm:$0xff] %v7840_v60  ;;  %v7246_v5 = vld [vmem:[#allocation2 + $0x44] ss:$0 sps:$4 sm:$0x11]   ;;  %v989_v6 = vld [vmem:[#allocation2 + $0x58] sm:$0xf]  ;;  %v1293_v10 = vsel %vm1233_vm9, %v1288_v50, %v1292_v2  ;;  %v6728_v37 = vpack.c.bf16 %v242_v4, %v242_v4  ;;  %v6729_v32 = vpack.c.bf16 %v243_v18, %v243_v18  ;;  %6816 = vmatprep.subr.bf16.mxu0 %v7302_v40 }
  0x4e   : > { %851 = vst [vmem:[#allocation2 + $0x60] sm:$0xf] %v850_v57  ;;  %v988_v12 = vld [vmem:[#allocation2 + $0x54] sm:$0xf]  ;;  %v1307_v13 = vshrl.u32 %v7840_v60, 16  ;;  %v1309_v14 = vshll.u32 %v7840_v60, 16  ;;  %1434 = vrot.lane.b32.xlu1 %v1293_v10, %s7554_s24 }
  0x4f   : > { %v296_v19 = vld [vmem:[#allocation2 + $0x6c] sm:$0x1]  ;;  %v1302_v20 = vshll.u32 %v7246_v5, 16  ;;  %v7856_v21 = vcombine.low %v988_v12, %v989_v6  ;;  %v846_v28 = vld [vmem:[#allocation2 + $0x5c] sm:$0x1]  ;;  %v2168_v24 = vrot.slane %v2166_v63, 1 }
  0x50   : > { %v926_v23 = vld [vmem:[#allocation2 + $0x54] sm:$0xf]  ;;  %v7250_v25 = vld [vmem:[#allocation2 + $0x50] ss:$0 sps:$4 sm:$0x11]   ;;  %v1311_v27 = vrot.slane %v1309_v14, 1  ;;  %v847_v29 = vsel %vm7595_vm3, %v595_v62, %v846_v28 }
  0x51   : > { %v1304_v30 = vrot.slane %v1302_v20, 1  ;;  %1647 = vrot.lane.b32.xlu0 %v7856_v21, %s7554_s24  ;;  %848 = vst [vmem:[#allocation2 + $0x5c] sm:$0x1] %v847_v29  ;;  %v927_v36 = vld [vmem:[#allocation2 + $0x58] sm:$0xf]  ;;  %v1314_v44 = vshll.u32 %v7250_v25, 16  ;;  %v2169_v61 = vor.u32 %v2168_v24, %v2164_v7 }
  0x52   : > { %v1312_v42 = vor.u32 %v1311_v27, %v1307_v13  ;;  %v991_v47 = vld [vmem:[#allocation2 + $0x64] sm:$0xf]  ;;  %v7865_v50 = vcombine.low %v926_v23, %v927_v36  ;;  %v1024_v52 = vld [vmem:[#allocation2 + $0xc] sm:$0xe]  ;;  %v297_v54 = vsel %vm7595_vm3, 0, %v296_v19  ;;  %v2173_v63 = vrot.slane %v2171_v17, 1 }
  0x53   : > { %v1305_v53 = vsel %vm1233_vm9, %v1300_v55, %v1304_v30  ;;  %v1316_v56 = vrot.slane %v1314_v44, 1  ;;  %298 = vst [vmem:[#allocation2 + $0x6c] sm:$0x1] %v297_v54  ;;  %v349_v2 = vld [vmem:[#allocation2 + $0x68] sm:$0x1]  ;;  %v7305_v6 = vld [vmem:[%s9910_s1 + $0x38] sm:$0xff]   ;;  %v6402_v18 = vcombine.low %v1024_v52, %v7691_v38 }
  0x54   : > { %9973 = vst [vmem:[#allocation11_spill] sm:$0xff] %v7865_v50  ;;  %1436 = vrot.lane.b32.xlu1 %v1305_v53, %s7554_s24  ;;  %v1319_v57 = vshrl.u32 %v7865_v50, 16  ;;  %v1321_v4 = vshll.u32 %v7865_v50, 16  ;;  %v1043_v5 = vld [vmem:[#allocation2 + $0x24] sm:$0xf]  ;;  %v614_v12 = vshrl.u32 %v6728_v37, 16  ;;  %6817 = vmatpush3.bf16.msra.mxu0 %v7305_v6  ;;  %v2174_v24 = vsel %vm1233_vm9, %v2169_v61, %v2173_v63 }
  0x55   : > { %v990_v58 = vld [vmem:[#allocation2 + $0x60] sm:$0xf]  ;;  %v1317_v10 = vsel %vm1233_vm9, %v1312_v42, %v1316_v56  ;;  %v617_v13 = vshll.u32 %v6728_v37, 16  ;;  %v622_v7 = vshrl.u32 %v6729_v32, 16  ;;  %v1044_v14 = vld [vmem:[#allocation2 + $0x28] sm:$0xf] }
  0x56   : > { %v7871_v62 = vcombine.low %v990_v58, %v991_v47  ;;  %v7308_v17 = vld [vmem:[%s9910_s1 + $0x70] sm:$0xff]   ;;  %v1323_v19 = vrot.slane %v1321_v4, 1  ;;  %v625_v20 = vshll.u32 %v6729_v32, 16  ;;  %v616_v25 = vrot.slane %v614_v12, 7  ;;  %v245_v30 = vld [vmem:[%s7626_s23 + $0x98] sm:$0xff] }
  0x57   : > { %v7257_v55 = vld [vmem:[#allocation2 + $0x14] ss:$0 sps:$4 sm:$0x11]   ;;  %6818 = vmatprep.subr.bf16.mxu0 %v7308_v17  ;;  %vm1506_vm10 = vcmask 1046528   ;;  %v7888_v27 = vrot.slane %v622_v7, 7  ;;  %v350_v38 = vsel %vm7604_vm5, 0, %v349_v2  ;;  %v7892_v29 = vcombine.low %v1043_v5, %v1044_v14 }
  0x58   : > { %9974 = vst [vmem:[#allocation12_spill] sm:$0xff] %v7871_v62  ;;  %1649 = vrot.lane.b32.xlu0 %v7871_v62, %s7554_s24  ;;  %v244_v28 = vld [vmem:[%s7626_s23 + $0x90] sm:$0xff]  ;;  %1438 = vrot.lane.b32.xlu1 %v1317_v10, %s7554_s24  ;;  %v7254_v23 = vld [vmem:[#allocation2 + $0x5c] ss:$0 sps:$4 sm:$0x11]   ;;  %v1324_v37 = vor.u32 %v1323_v19, %v1319_v57  ;;  %v619_v42 = vor.u32 %v617_v13, %v616_v25  ;;  %v620_v44 = vrot.slane %v616_v25, 4 }
  0x59   : > { %v7310_v36 = vld [vmem:[%s9910_s1 + $0x30] sm:$0xff]   ;;  %v1326_v40 = vshll.u32 %v7254_v23, 16  ;;  %351 = vst [vmem:[#allocation2 + $0x68] sm:$0x1] %v350_v38  ;;  %v929_v47 = vld [vmem:[#allocation2 + $0x64] sm:$0xf]  ;;  %v627_v53 = vor.u32 %v625_v20, %v7888_v27  ;;  %v6730_v58 = vpack.c.bf16 %v244_v28, %v244_v28  ;;  %v6731_v4 = vpack.c.bf16 %v245_v30, %v245_v30 }
  0x5a   : > { %v1955_v32 = vrot.slane %v6402_v18, 1  ;;  %v1956_v52 = vrot.slane %v7257_v55, 1  ;;  %v856_v54 = vld [vmem:[#allocation2 + $0x6c] sm:$0xf]  ;;  %v928_v56 = vld [vmem:[#allocation2 + $0x60] sm:$0xf]  ;;  %6819 = vmatpush3.bf16.msra.mxu0 %v7310_v36 }
  0x5b   : > { %v1328_v61 = vrot.slane %v1326_v40, 1  ;;  %v857_v63 = vsel %vm7655_vm8, %v619_v42, %v856_v54  ;;  %v7263_v2 = vld [vmem:[#allocation2 + $0x2c] ss:$0 sps:$4 sm:$0x11]   ;;  %v299_v57 = vld [vmem:[#allocation2 + $0x78] sm:$0x1]  ;;  %v628_v10 = vsel %vm7647_vm7, %v620_v44, %v627_v53  ;;  %v7914_v18 = vcombine.low %v928_v56, %v929_v47 }
  0x5c   : > { %2355 = vrot.lane.b32.xlu0 %v2174_v24, %s7554_s24  ;;  %v1718_v6 = vshll.u32 %v7700_v43, 16  ;;  %858 = vst [vmem:[#allocation2 + $0x6c] sm:$0xf] %v857_v63  ;;  %v2178_v12 = vshll.u32 %v7892_v29, 16  ;;  %v7313_v13 = vld [vmem:[%s9910_s1 + $0x68] sm:$0xff]   ;;  %v612_v14 = vrot.slane %v7822_v26, 4  ;;  %v1957_v20 = vsel %vm1506_vm10, %v1955_v32, %v1956_v52 }
  0x5d   : > { %v1329_v17 = vsel %vm1233_vm9, %v1324_v37, %v1328_v61  ;;  %859 = vst.msk [vmem:[#allocation2 + $0x70] sm:$0xf] %vm258_vm0, %v628_v10  ;;  %9975 = vst [vmem:[#allocation13_spill] sm:$0xff] %v7914_v18  ;;  %v352_v19 = vld [vmem:[#allocation2 + $0x74] sm:$0x1]  ;;  %v246_v55 = vld [vmem:[%s7626_s23 + $0xa0] sm:$0xff]  ;;  %6820 = vmatprep.subr.bf16.mxu0 %v7313_v13 }
  0x5e   : > { %1440 = vrot.lane.b32.xlu1 %v1329_v17, %s7554_s24  ;;  %v2176_v28 = vshrl.u32 %v7892_v29, 16  ;;  %v300_v23 = vsel %vm7595_vm3, 0, %v299_v57  ;;  %v631_v24 = vshrl.u32 %v6730_v58, 16  ;;  %v1045_v25 = vld [vmem:[#allocation2 + $0x30] sm:$0xf]  ;;  %v7316_v26 = vld [vmem:[%s9910_s1 + $0x28] sm:$0xff]   ;;  %v7944_v10 = vpack.c.bf16 %v246_v55, %v246_v55 }
  0x5f   : > { %v7925_v38 = vld [vmem:[#allocation2 + $0x18] sm:$0xe]  ;;  %v2183_v30 = vshll.u32 %v7263_v2, 16  ;;  %301 = vst [vmem:[#allocation2 + $0x78] sm:$0x1] %v300_v23  ;;  %v634_v36 = vshll.u32 %v6730_v58, 16  ;;  %6821 = vmatpush3.bf16.msra.mxu0 %v7316_v26 }
  0x60   : > { %v639_v37 = vshrl.u32 %v6731_v4, 16  ;;  %v642_v40 = vshll.u32 %v6731_v4, 16  ;;  %v1046_v42 = vld [vmem:[#allocation2 + $0x34] sm:$0xf]  ;;  %v853_v44 = vld [vmem:[#allocation2 + $0x68] sm:$0x1] }
  0x61   : > { %v2180_v47 = vrot.slane %v2178_v12, 1  ;;  %v633_v32 = vrot.slane %v631_v24, 7  ;;  %v353_v52 = vsel %vm7604_vm5, 0, %v352_v19  ;;  %v7319_v53 = vld [vmem:[%s9910_s1 + $0x60] sm:$0xff]   ;;  %v1730_v54 = vshll.u32 %v7709_v49, 16  ;;  %v247_v4 = vld [vmem:[%s7626_s23 + $0xa8] sm:$0xff] }
  0x62   : > { %v854_v56 = vsel %vm7595_vm3, %v612_v14, %v853_v44  ;;  %v1333_v58 = vshll.u32 %v7914_v18, 16  ;;  %v7936_v61 = vrot.slane %v639_v37, 7  ;;  %354 = vst [vmem:[#allocation2 + $0x74] sm:$0x1] %v353_v52  ;;  %v7938_v63 = vrot.slane %v1718_v6, 1  ;;  %2003 = vrot.lane.b32.xlu1 %v1957_v20, %s7554_s24  ;;  %6822 = vmatprep.subr.bf16.mxu0 %v7319_v53 }
  0x63   : > { %855 = vst [vmem:[#allocation2 + $0x68] sm:$0x1] %v854_v56  ;;  %v637_v2 = vrot.slane %v633_v32, 4  ;;  %v7941_v57 = vcombine.low %v1045_v25, %v1046_v42  ;;  %v1026_v12 = vld [vmem:[#allocation2 + $0x24] sm:$0xe]  ;;  %v1331_v14 = vshrl.u32 %v7914_v18, 16  ;;  %v636_v19 = vor.u32 %v634_v36, %v633_v32 }
  0x64   : > { %v992_v13 = vld [vmem:[#allocation2 + $0x6c] sm:$0xf]  ;;  %v2185_v17 = vrot.slane %v2183_v30, 1  ;;  %v644_v23 = vor.u32 %v642_v40, %v7936_v61  ;;  %v7270_v6 = vld [vmem:[#allocation2 + $0x38] ss:$0 sps:$4 sm:$0x11]   ;;  %v6403_v20 = vcombine.low %v7925_v38, %v7702_v45  ;;  %v2181_v25 = vor.u32 %v2180_v47, %v2176_v28 }
  0x65   : > { %9976 = vst [vmem:[#allocation14_spill] sm:$0xff] %v7941_v57  ;;  %v302_v24 = vld [vmem:[#allocation2 + $0x84] sm:$0x1]  ;;  %v993_v26 = vld [vmem:[#allocation2 + $0x70] sm:$0xf]  ;;  %v629_v55 = vrot.slane %v7888_v27, 4  ;;  %v6733_v56 = vpack.c.bf16 %v247_v4, %v247_v4 }
  0x66   : > { %v930_v37 = vld [vmem:[#allocation2 + $0x6c] sm:$0xf]  ;;  %v931_v42 = vld [vmem:[#allocation2 + $0x70] sm:$0xf]  ;;  %v7951_v44 = vcombine.low %v992_v13, %v993_v26  ;;  %v1335_v52 = vrot.slane %v1333_v58, 1  ;;  %v645_v30 = vsel %vm7647_vm7, %v637_v2, %v644_v23  ;;  %v7321_v36 = vld [vmem:[%s9910_s1 + $0x20] sm:$0xff]   ;;  %v6404_v23 = vcombine.low %v1026_v12, %v7724_v8 }
  0x67   : > { %v7958_v40 = vld [vmem:[#allocation2 + $0x20] ss:$0 sps:$4 sm:$0x11]   ;;  %v863_v32 = vld [vmem:[#allocation2 + $0x78] sm:$0xf]  ;;  %v7961_v45 = vcombine.low %v930_v37, %v931_v42  ;;  %v2190_v28 = vshll.u32 %v7941_v57, 16  ;;  %6823 = vmatpush3.bf16.msra.mxu0 %v7321_v36 }
  0x68   : > { %866 = vst.msk [vmem:[#allocation2 + $0x7c] sm:$0xf] %vm258_vm0, %v645_v30  ;;  %v303_v27 = vsel %vm7595_vm3, 0, %v302_v24  ;;  %v648_v38 = vshrl.u32 %v7944_v10, 16  ;;  %v7967_v47 = vrot.slane %v1730_v54, 1  ;;  %1651 = vrot.lane.b32.xlu0 %v7951_v44, %s7554_s24  ;;  %v864_v53 = vsel %vm7655_vm8, %v636_v19, %v863_v32  ;;  %v7322_v13 = vld [vmem:[%s9910_s1 + $0x58] sm:$0xff]  }
  0x69   : > { %9977 = vst [vmem:[#allocation15_spill] sm:$0xff] %v7961_v45  ;;  %304 = vst [vmem:[#allocation2 + $0x84] sm:$0x1] %v303_v27  ;;  %v355_v58 = vld [vmem:[#allocation2 + $0x80] sm:$0x1]  ;;  %v2186_v54 = vsel %vm1233_vm9, %v2181_v25, %v2185_v17  ;;  %v1958_v24 = vrot.slane %v6403_v20, 1  ;;  %v1336_v19 = vor.u32 %v1335_v52, %v1331_v14  ;;  %6824 = vmatprep.subr.bf16.mxu0 %v7322_v13 }
  0x6a   : > { %v1047_v2 = vld [vmem:[#allocation2 + $0x3c] sm:$0xf]  ;;  %865 = vst [vmem:[#allocation2 + $0x78] sm:$0xf] %v864_v53  ;;  %v860_v26 = vld [vmem:[#allocation2 + $0x74] sm:$0x1] }
  0x6b   : > { %v650_v37 = vrot.slane %v648_v38, 7  ;;  %v1048_v42 = vld [vmem:[#allocation2 + $0x40] sm:$0xf]  ;;  %v7261_v30 = vld [vmem:[#allocation2 + $0x68] ss:$0 sps:$4 sm:$0x11]   ;;  %v861_v4 = vsel %vm7595_vm3, %v629_v55, %v860_v26 }
  0x6c   : > { %v2195_v36 = vshll.u32 %v7270_v6, 16  ;;  %862 = vst [vmem:[#allocation2 + $0x74] sm:$0x1] %v861_v4  ;;  %v1345_v32 = vshll.u32 %v7961_v45, 16  ;;  %v2188_v8 = vshrl.u32 %v7941_v57, 16  ;;  %v2192_v12 = vrot.slane %v2190_v28, 1  ;;  %2357 = vrot.lane.b32.xlu0 %v2186_v54, %s7554_s24 }
  0x6d   : > { %v651_v17 = vshll.u32 %v7944_v10, 16  ;;  %v7323_v20 = vld [vmem:[%s9910_s1 + $0x18] sm:$0xff]   ;;  %v1338_v25 = vshll.u32 %v7261_v30, 16  ;;  %v656_v14 = vshrl.u32 %v6733_v56, 16  ;;  %v659_v52 = vshll.u32 %v6733_v56, 16  ;;  %v248_v55 = vld [vmem:[%s7626_s23 + $0xb0] sm:$0xff] }
  0x6e   : > { %v356_v6 = vsel %vm7604_vm5, 0, %v355_v58  ;;  %v249_v27 = vld [vmem:[%s7626_s23 + $0xb8] sm:$0xff]  ;;  %v1959_v38 = vrot.slane %v7958_v40, 1  ;;  %v7992_v53 = vld [vmem:[#allocation2 + $0x2c] ss:$0 sps:$4 sm:$0x11]   ;;  %v7996_v13 = vcombine.low %v1047_v2, %v1048_v42  ;;  %6825 = vmatpush3.bf16.msra.mxu0 %v7323_v20  ;;  %v2193_v40 = vor.u32 %v2192_v12, %v2188_v8 }
  0x6f   : > { %v7994_v28 = vrot.slane %v6404_v23, 1  ;;  %v653_v10 = vor.u32 %v651_v17, %v650_v37  ;;  %357 = vst [vmem:[#allocation2 + $0x80] sm:$0x1] %v356_v6  ;;  %v1340_v26 = vrot.slane %v1338_v25, 1  ;;  %v7998_v54 = vld [vmem:[#allocation2 + $0x7c] sm:$0xf]  ;;  %v6734_v23 = vpack.c.bf16 %v248_v55, %v248_v55 }
  0x70   : > { %9978 = vst [vmem:[#allocation16_spill] sm:$0xff] %v7996_v13  ;;  %v2197_v56 = vrot.slane %v2195_v36, 1  ;;  %v654_v30 = vrot.slane %v650_v37, 4  ;;  %v8000_v4 = vrot.slane %v656_v14, 7  ;;  %v1343_v58 = vshrl.u32 %v7961_v45, 16  ;;  %v7326_v37 = vld [vmem:[%s9910_s1 + $0x50] sm:$0xff]  }
  0x71   : > { %v1347_v7 = vrot.slane %v1345_v32, 1  ;;  %v870_v5 = vld [vmem:[#allocation2 + $0x84] sm:$0xf]  ;;  %v305_v62 = vld [vmem:[#allocation2 + $0x90] sm:$0x1]  ;;  %v1341_v17 = vsel %vm1233_vm9, %v1336_v19, %v1340_v26  ;;  %v646_v36 = vrot.slane %v7936_v61, 4  ;;  %v6735_v25 = vpack.c.bf16 %v249_v27, %v249_v27  ;;  %6826 = vmatprep.subr.bf16.mxu0 %v7326_v37 }
  0x72   : > { %v994_v6 = vld [vmem:[#allocation2 + $0x78] sm:$0xf]  ;;  %v661_v2 = vor.u32 %v659_v52, %v8000_v4  ;;  %v871_v42 = vsel %vm7655_vm8, %v653_v10, %v870_v5  ;;  %v7277_v20 = vld [vmem:[#allocation2 + $0x44] ss:$0 sps:$4 sm:$0x11]   ;;  %1442 = vrot.lane.b32.xlu1 %v1341_v17, %s7554_s24  ;;  %v2202_v12 = vshll.u32 %v7996_v13, 16  ;;  %v1960_v5 = vsel %vm1506_vm10, %v1958_v24, %v1959_v38 }
  0x73   : > { %v8013_v32 = vcombine.low %v994_v6, %v7998_v54  ;;  %872 = vst [vmem:[#allocation2 + $0x84] sm:$0xf] %v871_v42  ;;  %v932_v19 = vld [vmem:[#allocation2 + $0x78] sm:$0xf]  ;;  %v933_v8 = vld [vmem:[#allocation2 + $0x7c] sm:$0xf]  ;;  %v1348_v61 = vor.u32 %v1347_v7, %v1343_v58  ;;  %v2198_v26 = vsel %vm1233_vm9, %v2193_v40, %v2197_v56 }
  0x74   : > { %v358_v14 = vld [vmem:[#allocation2 + $0x8c] sm:$0x1]  ;;  %v7268_v52 = vld [vmem:[#allocation2 + $0x74] ss:$0 sps:$4 sm:$0x11]   ;;  %v662_v55 = vsel %vm7647_vm7, %v654_v30, %v661_v2  ;;  %v306_v10 = vsel %vm7595_vm3, 0, %v305_v62  ;;  %v8026_v2 = vcombine.low %v932_v19, %v933_v8 }
  0x75   : > { %1653 = vrot.lane.b32.xlu0 %v8013_v32, %s7554_s24  ;;  %v1962_v17 = vrot.slane %v7992_v53, 1  ;;  %873 = vst.msk [vmem:[#allocation2 + $0x88] sm:$0xf] %vm258_vm0, %v662_v55  ;;  %307 = vst [vmem:[#allocation2 + $0x90] sm:$0x1] %v306_v10  ;;  %v665_v24 = vshrl.u32 %v6734_v23, 16 }
  0x76   : > { %v1049_v27 = vld [vmem:[#allocation2 + $0x48] sm:$0xf]  ;;  %v1050_v38 = vld [vmem:[#allocation2 + $0x4c] sm:$0xf]  ;;  %v1350_v6 = vshll.u32 %v7268_v52, 16  ;;  %9979 = vst [vmem:[#allocation17_spill] sm:$0xff] %v8026_v2  ;;  %2005 = vrot.lane.b32.xlu1 %v1960_v5, %s7554_s24 }
  0x77   : > { %v867_v30 = vld [vmem:[#allocation2 + $0x80] sm:$0x1]  ;;  %v2200_v62 = vshrl.u32 %v7996_v13, 16  ;;  %v668_v42 = vshll.u32 %v6734_v23, 16  ;;  %v2207_v56 = vshll.u32 %v7277_v20, 16  ;;  %v667_v53 = vrot.slane %v665_v24, 7 }
  0x78   : > { %v868_v7 = vsel %vm7595_vm3, %v646_v36, %v867_v30  ;;  %v673_v58 = vshrl.u32 %v6735_v25, 16  ;;  %v7328_v40 = vld [vmem:[%s9910_s1 + $0x10] sm:$0xff]   ;;  %v1352_v37 = vrot.slane %v1350_v6, 1  ;;  %v2204_v52 = vrot.slane %v2202_v12, 1  ;;  %v7329_v12 = vld [vmem:[%s9910_s1 + $0x48] sm:$0xff]   ;;  %v254_v13 = vld [vmem:[%s7626_s23 + $0xe0] sm:$0xff] }
  0x79   : > { %869 = vst [vmem:[#allocation2 + $0x80] sm:$0x1] %v868_v7  ;;  %v676_v19 = vshll.u32 %v6735_v25, 16  ;;  %v359_v23 = vsel %vm7604_vm5, 0, %v358_v14  ;;  %v1027_v8 = vld [vmem:[#allocation2 + $0x30] sm:$0xe]  ;;  %2359 = vrot.lane.b32.xlu0 %v2198_v26, %s7554_s24  ;;  %v670_v36 = vor.u32 %v668_v42, %v667_v53  ;;  %v8040_v55 = vcombine.low %v1049_v27, %v1050_v38  ;;  %6827 = vmatpush3.bf16.msra.mxu0 %v7328_v40 }
  0x7a   : > { %v671_v20 = vrot.slane %v667_v53, 4  ;;  %v8038_v5 = vrot.slane %v673_v58, 7  ;;  %360 = vst [vmem:[#allocation2 + $0x8c] sm:$0x1] %v359_v23  ;;  %v1353_v25 = vsel %vm1233_vm9, %v1348_v61, %v1352_v37  ;;  %v663_v10 = vrot.slane %v8000_v4, 4  ;;  %v250_v26 = vld [vmem:[%s7626_s23 + $0xc0] sm:$0xff]  ;;  %6828 = vmatprep.subr.bf16.mxu0 %v7329_v12 }
  0x7b   : > { %9980 = vst [vmem:[#allocation18_spill] sm:$0xff] %v8040_v55  ;;  %v996_v14 = vld [vmem:[#allocation2 + $0x84] sm:$0xf]  ;;  %v1357_v24 = vshll.u32 %v8026_v2, 16  ;;  %v251_v6 = vld [vmem:[%s7626_s23 + $0xc8] sm:$0xff]  ;;  %1444 = vrot.lane.b32.xlu1 %v1353_v25, %s7554_s24  ;;  %v2209_v30 = vrot.slane %v2207_v56, 1  ;;  %v6405_v4 = vcombine.low %v1027_v8, %v7735_v22  ;;  %v1963_v53 = vsel %vm1506_vm10, %v7994_v28, %v1962_v17 }
  0x7c   : > { %v678_v27 = vor.u32 %v676_v19, %v8038_v5  ;;  %v934_v38 = vld [vmem:[#allocation2 + $0x84] sm:$0xf]  ;;  %v8052_v42 = vld [vmem:[#allocation2 + $0x50] ss:$0 sps:$4 sm:$0x11]   ;;  %v7330_v61 = vld [vmem:[%s9910_s1 + $0x8] sm:$0xff]   ;;  %v2205_v40 = vor.u32 %v2204_v52, %v2200_v62  ;;  %v6736_v8 = vpack.c.bf16 %v250_v26, %v250_v26  ;;  %v8159_v11 = vpack.c.bf16 %v254_v13, %v254_v13 }
  0x7d   : > { %v308_v7 = vld [vmem:[#allocation2 + $0x9c] sm:$0x1]  ;;  %v8060_v58 = vld [vmem:[#allocation2 + $0x88] sm:$0xf]  ;;  %v877_v56 = vld [vmem:[#allocation2 + $0x90] sm:$0xf]  ;;  %6829 = vmatpush3.bf16.msra.mxu0 %v7330_v61 }
  0x7e   : > { %v935_v37 = vld [vmem:[#allocation2 + $0x88] sm:$0xf]  ;;  %v8063_v19 = vcombine.low %v996_v14, %v8060_v58  ;;  %v8065_v23 = vld [vmem:[#allocation2 + $0x38] ss:$0 sps:$4 sm:$0x11]   ;;  %v679_v12 = vsel %vm7647_vm7, %v671_v20, %v678_v27  ;;  %v878_v25 = vsel %vm7655_vm8, %v670_v36, %v877_v56  ;;  %v2214_v22 = vshll.u32 %v8040_v55, 16 }
  0x7f   : > { %v7333_v28 = vld [vmem:[%s9910_s1 + $0x40] sm:$0xff]   ;;  %v1355_v62 = vshrl.u32 %v8026_v2, 16  ;;  %v1359_v52 = vrot.slane %v1357_v24, 1  ;;  %879 = vst [vmem:[#allocation2 + $0x90] sm:$0xf] %v878_v25  ;;  %2007 = vrot.lane.b32.xlu1 %v1963_v53, %s7554_s24  ;;  %v8085_v14 = vcombine.low %v934_v38, %v935_v37  ;;  %v309_v24 = vsel %vm7595_vm3, 0, %v308_v7 }
  0x80   : > { %880 = vst.msk [vmem:[#allocation2 + $0x94] sm:$0xf] %vm258_vm0, %v679_v12  ;;  %v7335_v36 = vld [vmem:[%s9910_s1] sm:$0xff]   ;;  %1655 = vrot.lane.b32.xlu0 %v8063_v19, %s7554_s24  ;;  %v8089_v27 = vpack.c.bf16 %v251_v6, %v251_v6  ;;  %v361_v61 = vld [vmem:[#allocation2 + $0x98] sm:$0x1]  ;;  %v2210_v56 = vsel %vm1233_vm9, %v2205_v40, %v2209_v30  ;;  %v1964_v12 = vrot.slane %v6405_v4, 1  ;;  %6830 = vmatprep.subr.bf16.mxu0 %v7333_v28 }
  0x81   : > { %9981 = vst [vmem:[#allocation19_spill] sm:$0xff] %v8085_v14  ;;  %v7275_v26 = vld [vmem:[#allocation2 + $0x80] ss:$0 sps:$4 sm:$0x11]   ;;  %v874_v25 = vld [vmem:[#allocation2 + $0x8c] sm:$0x1]  ;;  %6831 = vmatpush3.bf16.msra.mxu0 %v7335_v36  ;;  %v1360_v7 = vor.u32 %v1359_v52, %v1355_v62 }
  0x82   : > { %310 = vst [vmem:[#allocation2 + $0x9c] sm:$0x1] %v309_v24  ;;  %v875_v53 = vsel %vm7595_vm3, %v663_v10, %v874_v25  ;;  %v2212_v17 = vshrl.u32 %v8040_v55, 16  ;;  %v2216_v38 = vrot.slane %v2214_v22, 1  ;;  %v2219_v37 = vshll.u32 %v8052_v42, 16  ;;  %v7336_v6 = vld [vmem:[%s9910_s1 + $0xf8] sm:$0xff]  }
  0x83   : > { %v1362_v20 = vshll.u32 %v7275_v26, 16  ;;  %876 = vst [vmem:[#allocation2 + $0x8c] sm:$0x1] %v875_v53  ;;  %v682_v30 = vshrl.u32 %v6736_v8, 16  ;;  %v685_v4 = vshll.u32 %v6736_v8, 16  ;;  %v8102_v10 = vld [vmem:[%s9910_s1 + $0x118] sm:$0xff]   ;;  %6928 = vmatprep.subr.bf16.mxu1 %v7336_v6 }
  0x84   : > { %v8104_v40 = vld [vmem:[#allocation2 + $0x3c] sm:$0xe]  ;;  %2361 = vrot.lane.b32.xlu0 %v2210_v56, %s7554_s24  ;;  %v1965_v42 = vrot.slane %v8065_v23, 1  ;;  %v1369_v22 = vshll.u32 %v8085_v14, 16  ;;  %v690_v28 = vshrl.u32 %v8089_v27, 16  ;;  %v362_v62 = vsel %vm7604_vm5, 0, %v361_v61  ;;  %7148 = vmatprep.subr.bf16.mxu0 %v8102_v10 }
  0x85   : > { %v1364_v52 = vrot.slane %v1362_v20, 1  ;;  %v684_v8 = vrot.slane %v682_v30, 7  ;;  %363 = vst [vmem:[#allocation2 + $0x98] sm:$0x1] %v362_v62  ;;  %v1051_v36 = vld [vmem:[#allocation2 + $0x54] sm:$0xf]  ;;  %v2217_v53 = vor.u32 %v2216_v38, %v2212_v17 }
  0x86   : > { %v1052_v24 = vld [vmem:[#allocation2 + $0x58] sm:$0xf]  ;;  %v252_v26 = vld [vmem:[%s7626_s23 + $0xd0] sm:$0xff]  ;;  %v8114_v56 = vld [vmem:[#allocation2 + $0x48] sm:$0xe]  ;;  %v2221_v2 = vrot.slane %v2219_v37, 1 }
  0x87   : > { %v998_v23 = vld [vmem:[#allocation2 + $0x90] sm:$0xf]  ;;  %v8116_v25 = vld [vmem:[#allocation2 + $0x94] sm:$0xf]  ;;  %v693_v45 = vshll.u32 %v8089_v27, 16  ;;  %v253_v61 = vld [vmem:[%s7626_s23 + $0xd8] sm:$0xff]  ;;  %v1365_v20 = vsel %vm1233_vm9, %v1360_v7, %v1364_v52  ;;  %v687_v18 = vor.u32 %v685_v4, %v684_v8  ;;  %v8131_v60 = vcombine.low %v1051_v36, %v1052_v24 }
  0x88   : > { %v8122_v6 = vcombine.low %v998_v23, %v8116_v25  ;;  %v1367_v30 = vshrl.u32 %v8085_v14, 16  ;;  %v8125_v62 = vld [vmem:[#allocation2 + $0x44] ss:$0 sps:$4 sm:$0x11]   ;;  %v936_v55 = vld [vmem:[#allocation2 + $0x90] sm:$0xf]  ;;  %1446 = vrot.lane.b32.xlu1 %v1365_v20, %s7554_s24  ;;  %v6406_v4 = vcombine.low %v8104_v40, %v7800_v1  ;;  %v1966_v23 = vsel %vm1506_vm10, %v1964_v12, %v1965_v42 }
  0x89   : > { %v937_v50 = vld [vmem:[#allocation2 + $0x94] sm:$0xf]  ;;  %v1371_v17 = vrot.slane %v1369_v22, 1  ;;  %v688_v38 = vrot.slane %v684_v8, 4  ;;  %v8129_v37 = vrot.slane %v690_v28, 7  ;;  %9982 = vst [vmem:[#allocation20_spill] sm:$0xff] %v8131_v60  ;;  %v2222_v24 = vsel %vm1233_vm9, %v2217_v53, %v2221_v2 }
  0x8a   : > { %v884_v27 = vld [vmem:[#allocation2 + $0x9c] sm:$0xf]  ;;  %v680_v20 = vrot.slane %v8038_v5, 4  ;;  %1657 = vrot.lane.b32.xlu0 %v8122_v6, %s7554_s24  ;;  %v311_v28 = vld [vmem:[#allocation2 + $0xa8] sm:$0x1]  ;;  %v7341_v8 = vld [vmem:[%s9910_s1 + $0xf0] sm:$0xff]   ;;  %v8151_v12 = vcombine.low %v936_v55, %v937_v50  ;;  %v6738_v5 = vpack.c.bf16 %v252_v26, %v252_v26 }
  0x8b   : > { %v8133_v7 = vld [vmem:[#allocation2 + $0x5c] ss:$0 sps:$4 sm:$0x11]   ;;  %v885_v22 = vsel %vm7655_vm8, %v687_v18, %v884_v27  ;;  %v7282_v36 = vld [vmem:[#allocation2 + $0x8c] ss:$0 sps:$4 sm:$0x11]   ;;  %v695_v1 = vor.u32 %v693_v45, %v8129_v37  ;;  %v6407_v18 = vcombine.low %v8114_v56, %v7832_v48  ;;  %v6739_v27 = vpack.c.bf16 %v253_v61, %v253_v61 }
  0x8c   : > { %v7338_v52 = vld [vmem:[%s9910_s1 + $0xb8] sm:$0xff]   ;;  %886 = vst [vmem:[#allocation2 + $0x9c] sm:$0xf] %v885_v22  ;;  %9983 = vst [vmem:[#allocation21_spill] sm:$0xff] %v8151_v12  ;;  %v9984_v40 = vshll.u32 %v7729_v15, 16  ;;  %2009 = vrot.lane.b32.xlu1 %v1966_v23, %s7554_s24  ;;  %v1372_v45 = vor.u32 %v1371_v17, %v1367_v30  ;;  %v1374_v2 = vshll.u32 %v7282_v36, 16 }
  0x8d   : > { %6929 = vmatpush3.bf16.msra.mxu1 %v7338_v52  ;;  %v364_v14 = vld [vmem:[#allocation2 + $0xa4] sm:$0x1]  ;;  %v696_v50 = vsel %vm7647_vm7, %v688_v38, %v695_v1  ;;  %v881_v55 = vld [vmem:[#allocation2 + $0x98] sm:$0x1]  ;;  %v2226_v26 = vshll.u32 %v8131_v60, 16  ;;  %v7343_v53 = vld [vmem:[%s9910_s1 + $0xb0] sm:$0xff]  }
  0x8e   : > { %v8155_v42 = vrot.slane %v9984_v40, 1  ;;  %6930 = vmatprep.subr.bf16.mxu1 %v7341_v8  ;;  %2363 = vrot.lane.b32.xlu0 %v2222_v24, %s7554_s24  ;;  %v1967_v48 = vrot.slane %v6406_v4, 1  ;;  %v1968_v13 = vrot.slane %v8125_v62, 1  ;;  %887 = vst.msk [vmem:[#allocation2 + $0xa0] sm:$0xf] %vm258_vm0, %v696_v50  ;;  %v882_v56 = vsel %vm7595_vm3, %v680_v20, %v881_v55  ;;  %v7344_v17 = vld [vmem:[%s9910_s1 + $0xe8] sm:$0xff]  }
  0x8f   : > { %v312_v61 = vsel %vm7595_vm3, 0, %v311_v28  ;;  %v1053_v30 = vld [vmem:[#allocation2 + $0x60] sm:$0xf]  ;;  %v1376_v38 = vrot.slane %v1374_v2, 1  ;;  %883 = vst [vmem:[#allocation2 + $0x98] sm:$0x1] %v882_v56 }
  0x90   : > { %v1381_v52 = vshll.u32 %v8151_v12, 16  ;;  %v2231_v4 = vshll.u32 %v8133_v7, 16  ;;  %313 = vst [vmem:[#allocation2 + $0xa8] sm:$0x1] %v312_v61  ;;  %v699_v62 = vshrl.u32 %v6738_v5, 16  ;;  %v702_v22 = vshll.u32 %v6738_v5, 16 }
  0x91   : > { %v1054_v23 = vld [vmem:[#allocation2 + $0x64] sm:$0xf]  ;;  %6931 = vmatpush3.bf16.msra.mxu1 %v7343_v53  ;;  %v707_v20 = vshrl.u32 %v6739_v27, 16  ;;  %v710_v8 = vshll.u32 %v6739_v27, 16  ;;  %v365_v28 = vsel %vm7604_vm5, 0, %v364_v14  ;;  %v7345_v36 = vld [vmem:[%s9910_s1 + $0xa8] sm:$0xff]   ;;  %v1377_v24 = vsel %vm1233_vm9, %v1372_v45, %v1376_v38 }
  0x92   : > { %6932 = vmatprep.subr.bf16.mxu1 %v7344_v17  ;;  %v2224_v7 = vshrl.u32 %v8131_v60, 16  ;;  %v2228_v1 = vrot.slane %v2226_v26, 1  ;;  %v8187_v40 = vld [vmem:[#allocation2 + $0x50] ss:$0 sps:$4 sm:$0x11]   ;;  %v701_v2 = vrot.slane %v699_v62, 7  ;;  %1448 = vrot.lane.b32.xlu1 %v1377_v24, %s7554_s24  ;;  %v8197_v45 = vcombine.low %v1053_v30, %v1054_v23 }
  0x93   : > { %366 = vst [vmem:[#allocation2 + $0xa4] sm:$0x1] %v365_v28  ;;  %v7348_v5 = vld [vmem:[%s9910_s1 + $0xe0] sm:$0xff]   ;;  %v697_v14 = vrot.slane %v8129_v37, 4  ;;  %v1379_v27 = vshrl.u32 %v8151_v12, 16  ;;  %v8195_v50 = vrot.slane %v707_v20, 7  ;;  %v1969_v53 = vsel %vm1506_vm10, %v1967_v48, %v1968_v13 }
  0x94   : > { %9985 = vst [vmem:[#allocation22_spill] sm:$0xff] %v8197_v45  ;;  %v255_v55 = vld [vmem:[%s7626_s23 + $0xe8] sm:$0xff]  ;;  %v314_v26 = vld [vmem:[#allocation2 + $0xb4] sm:$0x1]  ;;  %v1000_v56 = vld [vmem:[#allocation2 + $0x9c] sm:$0xf]  ;;  %v704_v28 = vor.u32 %v702_v22, %v701_v2  ;;  %v2229_v13 = vor.u32 %v2228_v1, %v2224_v7 }
  0x95   : > { %v2233_v61 = vrot.slane %v2231_v4, 1  ;;  %v8201_v17 = vrot.slane %v6407_v18, 1  ;;  %v705_v38 = vrot.slane %v701_v2, 4  ;;  %v8203_v62 = vld [vmem:[#allocation2 + $0x68] ss:$0 sps:$4 sm:$0x11]   ;;  %6933 = vmatpush3.bf16.msra.mxu1 %v7345_v36  ;;  %v712_v30 = vor.u32 %v710_v8, %v8195_v50 }
  0x96   : > { %v7350_v37 = vld [vmem:[%s9910_s1 + $0xa0] sm:$0xff]   ;;  %v1383_v20 = vrot.slane %v1381_v52, 1  ;;  %v938_v23 = vld [vmem:[#allocation2 + $0x9c] sm:$0xf]  ;;  %6934 = vmatprep.subr.bf16.mxu1 %v7348_v5  ;;  %v315_v36 = vsel %vm7595_vm3, 0, %v314_v26  ;;  %v716_v24 = vshrl.u32 %v8159_v11, 16  ;;  %2011 = vrot.lane.b32.xlu1 %v1969_v53, %s7554_s24  ;;  %v6741_v5 = vpack.c.bf16 %v255_v55, %v255_v55 }
  0x97   : > { %v7351_v48 = vld [vmem:[%s9910_s1 + $0xd8] sm:$0xff]   ;;  %v8212_v18 = vld [vmem:[#allocation2 + $0xa0] sm:$0xf]  ;;  %v713_v8 = vsel %vm7647_vm7, %v705_v38, %v712_v30  ;;  %v2238_v2 = vshll.u32 %v8197_v45, 16  ;;  %316 = vst [vmem:[#allocation2 + $0xb4] sm:$0x1] %v315_v36 }
  0x98   : > { %v939_v4 = vld [vmem:[#allocation2 + $0xa0] sm:$0xf]  ;;  %v8219_v52 = vcombine.low %v1000_v56, %v8212_v18  ;;  %v7289_v22 = vld [vmem:[#allocation2 + $0x98] ss:$0 sps:$4 sm:$0x11]   ;;  %v1971_v7 = vrot.slane %v8187_v40, 1  ;;  %v1384_v38 = vor.u32 %v1383_v20, %v1379_v27 }
  0x99   : > { %v891_v1 = vld [vmem:[#allocation2 + $0xa8] sm:$0xf]  ;;  %894 = vst.msk [vmem:[#allocation2 + $0xac] sm:$0xf] %vm258_vm0, %v713_v8  ;;  %v8226_v26 = vcombine.low %v938_v23, %v939_v4  ;;  %v718_v12 = vrot.slane %v716_v24, 7  ;;  %v719_v53 = vshll.u32 %v8159_v11, 16  ;;  %6935 = vmatpush3.bf16.msra.mxu1 %v7350_v37  ;;  %v2234_v37 = vsel %vm1233_vm9, %v2229_v13, %v2233_v61 }
  0x9a   : > { %v7352_v56 = vld [vmem:[%s9910_s1 + $0x98] sm:$0xff]   ;;  %1659 = vrot.lane.b32.xlu0 %v8219_v52, %s7554_s24  ;;  %v1386_v55 = vshll.u32 %v7289_v22, 16  ;;  %v892_v40 = vsel %vm7655_vm8, %v704_v28, %v891_v1  ;;  %v888_v30 = vld [vmem:[#allocation2 + $0xa4] sm:$0x1]  ;;  %v367_v36 = vld [vmem:[#allocation2 + $0xb0] sm:$0x1]  ;;  %6936 = vmatprep.subr.bf16.mxu1 %v7351_v48 }
  0x9b   : > { %9986 = vst [vmem:[#allocation23_spill] sm:$0xff] %v8226_v26  ;;  %v7355_v11 = vld [vmem:[%s9910_s1 + $0xd0] sm:$0xff]   ;;  %893 = vst [vmem:[#allocation2 + $0xa8] sm:$0xf] %v892_v40  ;;  %v889_v23 = vsel %vm7595_vm3, %v697_v14, %v888_v30  ;;  %v2236_v4 = vshrl.u32 %v8197_v45, 16  ;;  %v2243_v27 = vshll.u32 %v8203_v62, 16  ;;  %v721_v48 = vor.u32 %v719_v53, %v718_v12 }
  0x9c   : > { %v1030_v20 = vld [vmem:[#allocation2 + $0x54] sm:$0xe]  ;;  %v1388_v24 = vrot.slane %v1386_v55, 1  ;;  %890 = vst [vmem:[#allocation2 + $0xa4] sm:$0x1] %v889_v23  ;;  %v2240_v28 = vrot.slane %v2238_v2, 1 }
  0x9d   : > { %v724_v22 = vshrl.u32 %v6741_v5, 16  ;;  %v1055_v8 = vld [vmem:[#allocation2 + $0x6c] sm:$0xf]  ;;  %v1393_v1 = vshll.u32 %v8226_v26, 16  ;;  %v722_v60 = vrot.slane %v718_v12, 4  ;;  %v727_v61 = vshll.u32 %v6741_v5, 16  ;;  %6937 = vmatpush3.bf16.msra.mxu1 %v7352_v56 }
  0x9e   : > { %v368_v13 = vsel %vm7604_vm5, 0, %v367_v36  ;;  %v1056_v14 = vld [vmem:[#allocation2 + $0x70] sm:$0xf]  ;;  %v1389_v40 = vsel %vm1233_vm9, %v1384_v38, %v1388_v24  ;;  %2365 = vrot.lane.b32.xlu0 %v2234_v37, %s7554_s24  ;;  %v7307_v53 = vld [vmem:[#allocation2 + $0x74] ss:$0 sps:$4 sm:$0x11]   ;;  %6938 = vmatprep.subr.bf16.mxu1 %v7355_v11  ;;  %v1972_v56 = vsel %vm1506_vm10, %v8201_v17, %v1971_v7 }
  0x9f   : > { %v8249_v62 = vrot.slane %v724_v22, 7  ;;  %369 = vst [vmem:[#allocation2 + $0xb0] sm:$0x1] %v368_v13  ;;  %v8251_v2 = vcombine.low %v1055_v8, %v1056_v14  ;;  %v256_v55 = vld [vmem:[%s7626_s23 + $0xf0] sm:$0xff]  ;;  %1450 = vrot.lane.b32.xlu1 %v1389_v40, %s7554_s24  ;;  %v714_v38 = vrot.slane %v8195_v50, 4  ;;  %v257_v24 = vld [vmem:[%s7626_s23 + $0xf8] sm:$0xff]  ;;  %v2241_v40 = vor.u32 %v2240_v28, %v2236_v4 }
  0xa0   : > { %v8255_v12 = vld [vmem:[#allocation2 + $0x5c] ss:$0 sps:$4 sm:$0x11]   ;;  %v898_v5 = vld [vmem:[#allocation2 + $0xb4] sm:$0xf]  ;;  %v1391_v8 = vshrl.u32 %v8226_v26, 16  ;;  %v6742_v4 = vpack.c.bf16 %v256_v55, %v256_v55 }
  0xa1   : > { %9987 = vst [vmem:[#allocation24_spill] sm:$0xff] %v8251_v2  ;;  %v8260_v30 = vld [vmem:[#allocation2 + $0xac] sm:$0xf]  ;;  %v729_v36 = vor.u32 %v727_v61, %v8249_v62  ;;  %v899_v37 = vsel %vm7655_vm8, %v721_v48, %v898_v5  ;;  %v7472_v11 = vld [vmem:[#allocation2 + $0x58] sm:$0xf]  ;;  %v1395_v13 = vrot.slane %v1393_v1, 1  ;;  %v6743_v5 = vpack.c.bf16 %v257_v24, %v257_v24 }
  0xa2   : > { %v941_v23 = vld [vmem:[#allocation2 + $0xac] sm:$0xf]  ;;  %v6408_v22 = vcombine.low %v1030_v20, %v7472_v11  ;;  %900 = vst [vmem:[#allocation2 + $0xb4] sm:$0xf] %v899_v37  ;;  %v1002_v14 = vld [vmem:[#allocation2 + $0xa8] sm:$0xf] }
  0xa3   : > { %v2245_v17 = vrot.slane %v2243_v27, 1  ;;  %v730_v50 = vsel %vm7647_vm7, %v722_v60, %v729_v36  ;;  %v940_v7 = vld [vmem:[#allocation2 + $0xa8] sm:$0xf]  ;;  %v2250_v61 = vshll.u32 %v8251_v2, 16  ;;  %2013 = vrot.lane.b32.xlu1 %v1972_v56, %s7554_s24  ;;  %v8273_v48 = vcombine.low %v1002_v14, %v8260_v30  ;;  %v317_v45 = vld [vmem:[#allocation2 + $0xc0] sm:$0x1] }
  0xa4   : > { %v7296_v20 = vld [vmem:[#allocation2 + $0xa4] ss:$0 sps:$4 sm:$0x11]   ;;  %901 = vst.msk [vmem:[#allocation2 + $0xb8] sm:$0xf] %vm258_vm0, %v730_v50  ;;  %v8276_v1 = vcombine.low %v940_v7, %v941_v23  ;;  %v1754_v27 = vshll.u32 %v7749_v41, 16  ;;  %v1396_v36 = vor.u32 %v1395_v13, %v1391_v8 }
  0xa5   : > { %9988 = vst [vmem:[#allocation25_spill] sm:$0xff] %v8273_v48  ;;  %v1766_v60 = vshll.u32 %v7807_v9, 16  ;;  %v2255_v28 = vshll.u32 %v7307_v53, 16  ;;  %1661 = vrot.lane.b32.xlu0 %v8273_v48, %s7554_s24  ;;  %v1398_v56 = vshll.u32 %v7296_v20, 16  ;;  %v1973_v37 = vrot.slane %v6408_v22, 1 }
  0xa6   : > { %9989 = vst [vmem:[#allocation26_spill] sm:$0xff] %v8276_v1  ;;  %v1974_v11 = vrot.slane %v8255_v12, 1  ;;  %v895_v14 = vld [vmem:[#allocation2 + $0xb0] sm:$0x1]  ;;  %v2246_v50 = vsel %vm1233_vm9, %v2241_v40, %v2245_v17  ;;  %v2248_v23 = vshrl.u32 %v8251_v2, 16  ;;  %v2252_v7 = vrot.slane %v2250_v61, 1  ;;  %v8290_v17 = vpop.permute.xlu0 %1635 }
  0xa7   : > { %v896_v55 = vsel %vm7595_vm3, %v714_v38, %v895_v14  ;;  %v1400_v53 = vrot.slane %v1398_v56, 1  ;;  %v1405_v24 = vshll.u32 %v8276_v1, 16  ;;  %v318_v8 = vsel %vm7595_vm3, 0, %v317_v45  ;;  %v1031_v13 = vld [vmem:[#allocation2 + $0x60] sm:$0xe]  ;;  %v7357_v45 = vld [vmem:[%s9910_s1 + $0x90] sm:$0xff]  }
  0xa8   : > { %897 = vst [vmem:[#allocation2 + $0xb0] sm:$0x1] %v896_v55  ;;  %v733_v22 = vshrl.u32 %v6742_v4, 16  ;;  %v2257_v20 = vrot.slane %v2255_v28, 1  ;;  %319 = vst [vmem:[#allocation2 + $0xc0] sm:$0x1] %v318_v8  ;;  %6939 = vmatpush3.bf16.msra.mxu1 %v7357_v45 }
  0xa9   : > { %v1004_v12 = vld [vmem:[#allocation2 + $0xb4] sm:$0xf]  ;;  %v736_v40 = vshll.u32 %v6742_v4, 16  ;;  %v1401_v38 = vsel %vm1233_vm9, %v1396_v36, %v1400_v53  ;;  %2367 = vrot.lane.b32.xlu0 %v2246_v50, %s7554_s24  ;;  %v1403_v61 = vshrl.u32 %v8276_v1, 16  ;;  %v741_v14 = vshrl.u32 %v6743_v5, 16 }
  0xaa   : > { %v735_v56 = vrot.slane %v733_v22, 7  ;;  %v370_v55 = vld [vmem:[#allocation2 + $0xbc] sm:$0x1]  ;;  %1452 = vrot.lane.b32.xlu1 %v1401_v38, %s7554_s24  ;;  %v2253_v4 = vor.u32 %v2252_v7, %v2248_v23  ;;  %v744_v8 = vshll.u32 %v6743_v5, 16  ;;  %v942_v53 = vld [vmem:[#allocation2 + $0xb4] sm:$0xf]  ;;  %v1975_v50 = vsel %vm1506_vm10, %v1973_v37, %v1974_v11 }
  0xab   : > { %v8299_v28 = vld [vmem:[#allocation2 + $0xb8] sm:$0xf]  ;;  %v371_v36 = vsel %vm7604_vm5, 0, %v370_v55  ;;  %v1407_v1 = vrot.slane %v1405_v24, 1  ;;  %v7358_v38 = vld [vmem:[%s9910_s1 + $0xc8] sm:$0xff]   ;;  %v8310_v7 = vrot.slane %v741_v14, 7 }
  0xac   : > { %v8305_v22 = vcombine.low %v1004_v12, %v8299_v28  ;;  %372 = vst [vmem:[#allocation2 + $0xbc] sm:$0x1] %v371_v36  ;;  %v943_v26 = vld [vmem:[#allocation2 + $0xb8] sm:$0xf]  ;;  %v738_v23 = vor.u32 %v736_v40, %v735_v56  ;;  %v739_v5 = vrot.slane %v735_v56, 4  ;;  %v8312_v48 = vrot.slane %v1754_v27, 1  ;;  %6940 = vmatprep.subr.bf16.mxu1 %v7358_v38  ;;  %v8324_v36 = vpop.permute.xlu0 %1426 }
  0xad   : > { %v7309_v2 = vld [vmem:[#allocation2 + $0x68] ss:$0 sps:$4 sm:$0x11]   ;;  %v1057_v55 = vld [vmem:[#allocation2 + $0x78] sm:$0xf]  ;;  %v8317_v45 = vrot.slane %v1766_v60, 1  ;;  %v2258_v56 = vsel %vm1233_vm9, %v2253_v4, %v2257_v20  ;;  %v746_v14 = vor.u32 %v744_v8, %v8310_v7  ;;  %v8329_v60 = vcombine.low %v942_v53, %v943_v26 }
  0xae   : > { %9990 = vst [vmem:[#allocation27_spill] sm:$0xff] %v8305_v22  ;;  %9991 = vst [vmem:[#allocation28_spill] sm:$0xff] %v8312_v48  ;;  %v7473_v11 = vld [vmem:[#allocation2 + $0x64] sm:$0xf]  ;;  %1663 = vrot.lane.b32.xlu0 %v8305_v22, %s7554_s24  ;;  %v1058_v24 = vld [vmem:[#allocation2 + $0x7c] sm:$0xf]  ;;  %2015 = vrot.lane.b32.xlu1 %v1975_v50, %s7554_s24  ;;  %v1408_v50 = vor.u32 %v1407_v1, %v1403_v61 }
  0xaf   : > { %v6409_v12 = vcombine.low %v1031_v13, %v7473_v11  ;;  %9992 = vst [vmem:[#allocation29_spill] sm:$0xff] %v8317_v45  ;;  %v7304_v40 = vld [vmem:[#allocation2 + $0xb0] ss:$0 sps:$4 sm:$0x11]   ;;  %v8322_v27 = vcombine.low %v1057_v55, %v1058_v24  ;;  %v731_v37 = vrot.slane %v8249_v62, 4  ;;  %9994 = vst [vmem:[#allocation31_spill] sm:$0xff] %v8329_v60  ;;  %v8331_v45 = vpop.permute.xlu1 %1637  ;;  %v747_v20 = vsel %vm7647_vm7, %v739_v5, %v746_v14 }
  0xb0   : > { %v905_v38 = vld [vmem:[#allocation2 + $0xc0] sm:$0xf]  ;;  %v1410_v9 = vshll.u32 %v7304_v40, 16  ;;  %v7359_v55 = vld [vmem:[%s9910_s1 + $0x88] sm:$0xff]   ;;  %908 = vst.msk [vmem:[#allocation2 + $0xc4] sm:$0xf] %vm258_vm0, %v747_v20  ;;  %v8343_v5 = vpop.permute.xlu0 %1639 }
  0xb1   : > { %9993 = vst [vmem:[#allocation30_spill] sm:$0xff] %v8322_v27  ;;  %v906_v4 = vsel %vm7655_vm8, %v738_v23, %v905_v38  ;;  %v7318_v8 = vld [vmem:[#allocation2 + $0x80] ss:$0 sps:$4 sm:$0x11]   ;;  %v1976_v62 = vrot.slane %v6409_v12, 1  ;;  %v2262_v26 = vshll.u32 %v8322_v27, 16  ;;  %6941 = vmatpush3.bf16.msra.mxu1 %v7359_v55 }
  0xb2   : > { %2369 = vrot.lane.b32.xlu0 %v2258_v56, %s7554_s24  ;;  %907 = vst [vmem:[#allocation2 + $0xc0] sm:$0xf] %v906_v4  ;;  %v1032_v1 = vld [vmem:[#allocation2 + $0x6c] sm:$0xe]  ;;  %v1412_v61 = vrot.slane %v1410_v9, 1  ;;  %v1977_v39 = vrot.slane %v7309_v2, 1 }
  0xb3   : > { %v902_v53 = vld [vmem:[#allocation2 + $0xbc] sm:$0x1]  ;;  %v1033_v23 = vld [vmem:[#allocation2 + $0x78] sm:$0xe]  ;;  %v1417_v40 = vshll.u32 %v8329_v60, 16  ;;  %v2260_v12 = vshrl.u32 %v8322_v27, 16  ;;  %v8351_v9 = vpop.permute.xlu1 %1428 }
  0xb4   : > { %v903_v24 = vsel %vm7595_vm3, %v731_v37, %v902_v53  ;;  %v1413_v56 = vsel %vm1233_vm9, %v1408_v50, %v1412_v61  ;;  %v2264_v14 = vrot.slane %v2262_v26, 1  ;;  %v2267_v38 = vshll.u32 %v7318_v8, 16  ;;  %v1034_v20 = vld [vmem:[#allocation2 + $0x84] sm:$0xe]  ;;  %v1060_v55 = vld [vmem:[#allocation2 + $0x88] sm:$0xf]  ;;  %v8360_v27 = vpop.permute.xlu0 %1641 }
  0xb5   : > { %904 = vst [vmem:[#allocation2 + $0xbc] sm:$0x1] %v903_v24  ;;  %1454 = vrot.lane.b32.xlu1 %v1413_v56, %s7554_s24  ;;  %v1978_v2 = vsel %vm1506_vm10, %v1976_v62, %v1977_v39  ;;  %v1059_v4 = vld [vmem:[#allocation2 + $0x84] sm:$0xf]  ;;  %v7474_v13 = vld [vmem:[#allocation2 + $0x70] sm:$0xf]  ;;  %v6411_v50 = vcombine.low %v1033_v23, %v7998_v54  ;;  %v6412_v62 = vcombine.low %v1034_v20, %v8060_v58 }
  0xb6   : > { %v6410_v37 = vcombine.low %v1032_v1, %v7474_v13  ;;  %v1415_v53 = vshrl.u32 %v8329_v60, 16  ;;  %v8355_v11 = vcombine.low %v1059_v4, %v1060_v55  ;;  %v7325_v46 = vld [vmem:[#allocation2 + $0x8c] ss:$0 sps:$4 sm:$0x11]   ;;  %v1419_v61 = vrot.slane %v1417_v40, 1 }
  0xb7   : > { %v8358_v8 = vld [vmem:[#allocation2 + $0xc4] sm:$0xf]  ;;  %v2265_v24 = vor.u32 %v2264_v14, %v2260_v12  ;;  %v2269_v56 = vrot.slane %v2267_v38, 1  ;;  %v8369_v54 = vld [vmem:[#allocation2 + $0x74] ss:$0 sps:$4 sm:$0x11]   ;;  %v8375_v14 = vpop.permute.xlu1 %1430 }
  0xb8   : > { %9995 = vst [vmem:[#allocation32_spill] sm:$0xff] %v8355_v11  ;;  %v2272_v1 = vshrl.u32 %v8355_v11, 16  ;;  %v2274_v39 = vshll.u32 %v8355_v11, 16  ;;  %v2279_v23 = vshll.u32 %v7325_v46, 16  ;;  %v1035_v58 = vld [vmem:[#allocation2 + $0x90] sm:$0xe]  ;;  %v1420_v22 = vor.u32 %v1419_v61, %v1415_v53 }
  0xb9   : > { %v1006_v26 = vld [vmem:[#allocation2 + $0xc0] sm:$0xf]  ;;  %2017 = vrot.lane.b32.xlu1 %v1978_v2, %s7554_s24  ;;  %v2270_v20 = vsel %vm1233_vm9, %v2265_v24, %v2269_v56  ;;  %v1979_v2 = vrot.slane %v6410_v37, 1  ;;  %v1982_v55 = vrot.slane %v6411_v50, 1  ;;  %v8378_v60 = vrot.slane %v6412_v62, 1 }
  0xba   : > { %v8365_v13 = vcombine.low %v1006_v26, %v8358_v8  ;;  %v2276_v40 = vrot.slane %v2274_v39, 1  ;;  %v8373_v12 = vld [vmem:[#allocation2 + $0x80] ss:$0 sps:$4 sm:$0x11]   ;;  %v2281_v4 = vrot.slane %v2279_v23, 1  ;;  %v1980_v39 = vrot.slane %v8369_v54, 1 }
  0xbb   : > { %9997 = vst [vmem:[#allocation34_spill] sm:$0xff] %v8373_v12  ;;  %v7475_v11 = vld [vmem:[#allocation2 + $0x8] ss:$0 sps:$4 sm:$0x11]   ;;  %v1061_v48 = vld [vmem:[#allocation2 + $0x90] sm:$0xf]  ;;  %v6413_v56 = vcombine.low %v1035_v58, %v8116_v25  ;;  %v8389_v61 = vpop.permute.xlu1 %1432 }
  0xbc   : > { %9996 = vst [vmem:[#allocation33_spill] sm:$0xff] %v8365_v13  ;;  %1665 = vrot.lane.b32.xlu0 %v8365_v13, %s7554_s24  ;;  %v7315_v38 = vld [vmem:[#allocation2 + $0xbc] ss:$0 sps:$4 sm:$0x11]   ;;  %v2277_v26 = vor.u32 %v2276_v40, %v2272_v1  ;;  %v1508_v46 = vrot.slane %v7475_v11, 1  ;;  %v8381_v13 = vpop.permute.xlu0 %1643  ;;  %vm2483_vm11 = vcmask 523264   ;;  %v1981_v58 = vsel %vm1506_vm10, %v1979_v2, %v1980_v39 }
  0xbd   : > { %v1422_v57 = vshll.u32 %v7315_v38, 16  ;;  %v1983_v50 = vrot.slane %v8373_v12, 1  ;;  %v1062_v24 = vld [vmem:[#allocation2 + $0x94] sm:$0xf]  ;;  %v1036_v62 = vld [vmem:[#allocation2 + $0x9c] sm:$0xe] }
  0xbe   : > { %v2282_v37 = vsel %vm1233_vm9, %v2277_v26, %v2281_v4  ;;  %v8387_v11 = vcombine.low %v1061_v48, %v1062_v24  ;;  %v7332_v53 = vld [vmem:[#allocation2 + $0x98] ss:$0 sps:$4 sm:$0x11]   ;;  %v7362_v1 = vld [vmem:[%s9910_s1 + $0xc0] sm:$0xff]   ;;  %v1988_v24 = vrot.slane %v6413_v56, 1  ;;  %v2485_v56 = vsel %vm2483_vm11, %v7688_v34, %v8324_v36 }
  0xbf   : > { %v1424_v41 = vrot.slane %v1422_v57, 1  ;;  %v2291_v40 = vshll.u32 %v7332_v53, 16  ;;  %v8399_v48 = vld [vmem:[#allocation2 + $0x8c] ss:$0 sps:$4 sm:$0x11]   ;;  %6942 = vmatprep.subr.bf16.mxu1 %v7362_v1  ;;  %v1984_v1 = vsel %vm1506_vm10, %v1982_v55, %v1983_v50  ;;  %vm3998_vm12 = vcmask 517120  }
  0xc0   : > { %2371 = vrot.lane.b32.xlu0 %v2270_v20, %s7554_s24  ;;  %9998 = vst [vmem:[#allocation35_spill] sm:$0xff] %v8387_v11  ;;  %v2284_v57 = vshrl.u32 %v8387_v11, 16  ;;  %v2286_v25 = vshll.u32 %v8387_v11, 16  ;;  %v960_v38 = vld [vmem:[#allocation2] sm:$0xe]  ;;  %v8402_v20 = vpop.permute.xlu0 %1645  ;;  %v1986_v2 = vrot.slane %v8399_v48, 1  ;;  %v8410_v12 = vpop.permute.xlu1 %1434 }
  0xc1   : > { %v1425_v23 = vsel %vm1233_vm9, %v1420_v22, %v1424_v41  ;;  %v2293_v26 = vrot.slane %v2291_v40, 1  ;;  %v7476_v41 = vld [vmem:[#allocation2 + $0x4] sm:$0xf]  ;;  %v1063_v11 = vld [vmem:[#allocation2 + $0x9c] sm:$0xf]  ;;  %vm4832_vm13 = vcmask 1042434  }
  0xc2   : > { %1456 = vrot.lane.b32.xlu1 %v1425_v23, %s7554_s24  ;;  %v2288_v4 = vrot.slane %v2286_v25, 1  ;;  %v6354_v22 = vcombine.low %v960_v38, %v7476_v41  ;;  %v6414_v23 = vcombine.low %v1036_v62, %v8212_v18  ;;  %v1064_v25 = vld [vmem:[#allocation2 + $0xa0] sm:$0xf]  ;;  %v8425_v50 = vld [vmem:[#allocation2 + $0x98] ss:$0 sps:$4 sm:$0x11]  }
  0xc3   : > { %v8418_v62 = vcombine.low %v1063_v11, %v1064_v25  ;;  %v1037_v41 = vld [vmem:[#allocation2 + $0xa8] sm:$0xe]  ;;  %v7492_v3 = vld [vmem:[#allocation2 + $0x58] sm:$0xf]  ;;  %vm4834_vm14 = vcmask 1043459   ;;  %vm4836_vm15 = vcmask 1044484  }
  0xc4   : > { %2373 = vrot.lane.b32.xlu0 %v2282_v37, %s7554_s24  ;;  %v7364_v37 = vld [vmem:[%s9910_s1 + $0x80] sm:$0xff]   ;;  %v2289_v53 = vor.u32 %v2288_v4, %v2284_v57  ;;  %v1507_v39 = vrot.slane %v6354_v22, 1  ;;  %v8420_v4 = vpop.permute.xlu0 %1647  ;;  %v1991_v34 = vrot.slane %v6414_v23, 1  ;;  %v1987_v22 = vsel %vm1506_vm10, %v8378_v60, %v1986_v2  ;;  %v8440_v2 = vld [vmem:[#allocation2 + $0xac] sm:$0xf] }
  0xc5   : > { %6943 = vmatpush3.bf16.msra.mxu1 %v7364_v37  ;;  %9999 = vst [vmem:[#allocation36_spill] sm:$0xff] %v8418_v62  ;;  %v7340_v57 = vld [vmem:[#allocation2 + $0xa4] ss:$0 sps:$4 sm:$0x11]   ;;  %v2296_v36 = vshrl.u32 %v8418_v62, 16  ;;  %vm4838_vm0 = vcmask 1045509  }
  0xc6   : > { %2019 = vrot.lane.b32.xlu1 %v1981_v58, %s7554_s24  ;;  %v2294_v40 = vsel %vm1233_vm9, %v2289_v53, %v2293_v26  ;;  %v1509_v18 = vsel %vm1506_vm10, %v1507_v39, %v1508_v46  ;;  %v7477_v58 = vld [vmem:[#allocation2 + $0x14] ss:$0 sps:$4 sm:$0x11]   ;;  %v2298_v46 = vshll.u32 %v8418_v62, 16  ;;  %v2303_v11 = vshll.u32 %v7340_v57, 16  ;;  %v8436_v23 = vpop.permute.xlu1 %1436 }
  0xc7   : > { %v1511_v38 = vrot.slane %v7477_v58, 1  ;;  %v2534_v55 = vsel %vm2483_vm11, %v1509_v18, %v8290_v17  ;;  %v7365_v26 = vld [vmem:[%s9910_s1 + $0x110] sm:$0xff]   ;;  %v1989_v17 = vrot.slane %v8425_v50, 1  ;;  %v961_v37 = vld [vmem:[#allocation2 + $0xc] sm:$0xe]  ;;  %vm4840_vm1 = vcmask 1046534  }
  0xc8   : > { %2375 = vrot.lane.b32.xlu0 %v2294_v40, %s7554_s24  ;;  %3076 = vmatprep.mubr.bf16.mxu0 %v2534_v55  ;;  %v7478_v53 = vld [vmem:[#allocation2 + $0x14] ss:$0 sps:$4 sm:$0x11]   ;;  %v2305_v25 = vrot.slane %v2303_v11, 1  ;;  %v7479_v40 = vld [vmem:[#allocation2 + $0x10] sm:$0xf] }
  0xc9   : > { %3077 = vmatmul.mubr.bf16.vlgmr.msra.gmra.mxu0 %v2485_v56  ;;  %v1723_v39 = vshll.u32 %v7478_v53, 16  ;;  %v6355_v18 = vcombine.low %v961_v37, %v7479_v40  ;;  %v1065_v57 = vld [vmem:[#allocation2 + $0xa8] sm:$0xf]  ;;  %v7480_v56 = vld [vmem:[#allocation2 + $0x20] ss:$0 sps:$4 sm:$0x11]   ;;  %v1990_v53 = vsel %vm1506_vm10, %v1988_v24, %v1989_v17  ;;  %v6415_v37 = vcombine.low %v1037_v41, %v8260_v30 }
  0xca   : > { %2021 = vrot.lane.b32.xlu1 %v1984_v1, %s7554_s24  ;;  %7149 = vmatpush3.bf16.msra.mxu0 %v8102_v10  ;;  %v2300_v1 = vrot.slane %v2298_v46, 1  ;;  %v1514_v55 = vrot.slane %v7480_v56, 1  ;;  %v8442_v62 = vpop.permute.xlu0 %1649  ;;  %v8446_v10 = vcombine.low %v1065_v57, %v8440_v2  ;;  %v8448_v46 = vld [vmem:[#allocation2 + $0xb0] ss:$0 sps:$4 sm:$0x11]   ;;  %v8456_v40 = vpop.permute.xlu1 %1438  ;;  %vm4842_vm2 = vcmask 1047559  }
  0xcb   : > { %7150 = vmatprep.subr.bf16.mxu0 %v7365_v26  ;;  %v1510_v60 = vrot.slane %v6355_v18, 1  ;;  %v1725_v11 = vrot.slane %v1723_v39, 1  ;;  %v2315_v41 = vshll.u32 %v8448_v46, 16  ;;  %v8464_v39 = vld [vmem:[#allocation2 + $0xa4] ss:$0 sps:$4 sm:$0x11]  }
  0xcc   : > { %v2301_v58 = vor.u32 %v2300_v1, %v2296_v36  ;;  %10000 = vst [vmem:[#allocation37_spill] sm:$0xff] %v8446_v10  ;;  %v2488_v1 = vsel %vm2483_vm11, %v7718_v59, %v8351_v9  ;;  %v2308_v17 = vshrl.u32 %v8446_v10, 16  ;;  %v2310_v30 = vshll.u32 %v8446_v10, 16  ;;  %v962_v59 = vld [vmem:[#allocation2 + $0x18] sm:$0xe] }
  0xcd   : > { %v1512_v36 = vsel %vm1506_vm10, %v1510_v60, %v1511_v38  ;;  %v10001_v38 = vshrl.u32 %v7700_v43, 16  ;;  %v1992_v18 = vrot.slane %v8464_v39, 1  ;;  %v7481_v57 = vld [vmem:[#allocation2 + $0x1c] sm:$0xf]  ;;  %v7369_v60 = vld [vmem:[%s9910_s1 + $0x108] sm:$0xff]  }
  0xce   : > { %2023 = vrot.lane.b32.xlu1 %v1987_v22, %s7554_s24  ;;  %v2306_v22 = vsel %vm1233_vm9, %v2301_v58, %v2305_v25  ;;  %7151 = vmatpush3.bf16.msra.mxu0 %v7365_v26  ;;  %v2538_v24 = vsel %vm2483_vm11, %v1512_v36, %v8331_v45  ;;  %v2356_v9 = vpop.permute.xlu0 %2355  ;;  %v2312_v25 = vrot.slane %v2310_v30, 1  ;;  %v2317_v45 = vrot.slane %v2315_v41, 1  ;;  %v1038_v56 = vld [vmem:[#allocation2 + $0xb4] sm:$0xe] }
  0xcf   : > { %2377 = vrot.lane.b32.xlu0 %v2306_v22, %s7554_s24  ;;  %3084 = vmatprep.mubr.bf16.mxu0 %v2538_v24  ;;  %v1721_v26 = vor.u32 %v7938_v63, %v10001_v38  ;;  %v6356_v58 = vcombine.low %v962_v59, %v7481_v57  ;;  %v2661_v22 = vsel %vm2483_vm11, %v7827_v33, %v2356_v9  ;;  %v1994_v24 = vrot.slane %v6415_v37, 1  ;;  %v8483_v41 = vld [vmem:[#allocation2 + $0xbc] ss:$0 sps:$4 sm:$0x11]  }
  0xd0   : > { %v2313_v36 = vor.u32 %v2312_v25, %v2308_v17  ;;  %v1993_v43 = vsel %vm1506_vm10, %v1991_v34, %v1992_v18  ;;  %3237 = vmatprep.mubr.bf16.mxu1 %v2661_v22  ;;  %7152 = vmatprep.subr.bf16.mxu0 %v7369_v60  ;;  %v7482_v59 = vld [vmem:[#allocation2 + $0x2c] ss:$0 sps:$4 sm:$0x11]   ;;  %v8485_v57 = vpop.permute.xlu1 %1440  ;;  %v2491_v37 = vsel %vm2483_vm11, %v7731_v16, %v8375_v14 }
  0xd1   : > { %3085 = vmatmul.mubr.bf16.gmra.mxu0 %v2488_v1  ;;  %v1513_v63 = vrot.slane %v6356_v58, 1  ;;  %v8477_v1 = vld [vmem:[#allocation2 + $0xb8] sm:$0xf]  ;;  %v1517_v38 = vrot.slane %v7482_v59, 1  ;;  %v1726_v17 = vsel %vm1233_vm9, %v1721_v26, %v1725_v11  ;;  %v2327_v58 = vshll.u32 %v8483_v41, 16 }
  0xd2   : > { %2025 = vrot.lane.b32.xlu1 %v1990_v53, %s7554_s24  ;;  %v1067_v53 = vld [vmem:[#allocation2 + $0xb4] sm:$0xf]  ;;  %7153 = vmatpush3.bf16.msra.mxu0 %v7369_v60  ;;  %v2318_v33 = vsel %vm1233_vm9, %v2313_v36, %v2317_v45  ;;  %v8499_v45 = vld [vmem:[#allocation2 + $0xb0] ss:$0 sps:$4 sm:$0x11]  }
  0xd3   : > { %v8481_v30 = vcombine.low %v1067_v53, %v8477_v1  ;;  %v1515_v34 = vsel %vm1506_vm10, %v1513_v63, %v1514_v55  ;;  %2379 = vrot.lane.b32.xlu0 %v2318_v33, %s7554_s24  ;;  %v6416_v55 = vcombine.low %v1038_v56, %v8299_v28  ;;  %v963_v60 = vld [vmem:[#allocation2 + $0x24] sm:$0xe]  ;;  %v2329_v14 = vrot.slane %v2327_v58, 1  ;;  %v7483_v26 = vld [vmem:[#allocation2 + $0x28] sm:$0xf] }
  0xd4   : > { %v2542_v9 = vsel %vm2483_vm11, %v1515_v34, %v8343_v5  ;;  %v1995_v11 = vrot.slane %v8499_v45, 1  ;;  %v6357_v53 = vcombine.low %v963_v60, %v7483_v26  ;;  %v2004_v22 = vpop.permute.xlu1 %2003  ;;  %v7370_v5 = vld [vmem:[%s9910_s1 + $0x100] sm:$0xff]   ;;  %v373_v36 = vld [vmem:[#allocation2 + $0xc8] sm:$0x1] }
  0xd5   : > { %10002 = vst [vmem:[#allocation38_spill] sm:$0xff] %v8481_v30  ;;  %v2320_v25 = vshrl.u32 %v8481_v30, 16  ;;  %v2322_v18 = vshll.u32 %v8481_v30, 16  ;;  %3092 = vmatprep.mubr.bf16.mxu0 %v2542_v9  ;;  %v374_v59 = vsel %vm7604_vm5, 0, %v373_v36  ;;  %v1069_v33 = vld [vmem:[#allocation2 + $0xc0] sm:$0xf]  ;;  %7154 = vmatprep.subr.bf16.mxu0 %v7370_v5 }
  0xd6   : > { %2027 = vrot.lane.b32.xlu1 %v1993_v43, %s7554_s24  ;;  %v2598_v43 = vsel %vm2483_vm11, %v1726_v17, %v2004_v22  ;;  %v1996_v28 = vsel %vm1506_vm10, %v1994_v24, %v1995_v11  ;;  %v1516_v56 = vrot.slane %v6357_v53, 1  ;;  %v8510_v34 = vld [vmem:[#allocation2 + $0xc4] sm:$0xf]  ;;  %375 = vst [vmem:[#allocation2 + $0xc8] sm:$0x1] %v374_v59  ;;  %7155 = vmatpush3.bf16.msra.mxu0 %v7370_v5  ;;  %v1997_v24 = vrot.slane %v6416_v55, 1 }
  0xd7   : > { %v2324_v16 = vrot.slane %v2322_v18, 1  ;;  %3238 = vmatmul.mubr.bf16.vlgmr.msra.gmra.mxu1 %v2598_v43  ;;  %v8515_v9 = vld [vmem:[#allocation2 + $0xbc] ss:$0 sps:$4 sm:$0x11]   ;;  %v748_v5 = vrot.slane %v8310_v7, 4  ;;  %v8533_v36 = vcombine.low %v1069_v33, %v8510_v34  ;;  %v1814_v7 = vshll.u32 %v7951_v44, 16 }
  0xd8   : > { %v1518_v17 = vsel %vm1506_vm10, %v1516_v56, %v1517_v38  ;;  %v2494_v38 = vsel %vm2483_vm11, %v7740_v31, %v8389_v61  ;;  %v1998_v55 = vrot.slane %v8515_v9, 1  ;;  %v7485_v53 = vld [vmem:[#allocation2 + $0x38] ss:$0 sps:$4 sm:$0x11]   ;;  %v376_v43 = vld [vmem:[#allocation2 + $0xd4] sm:$0x1] }
  0xd9   : > { %3093 = vmatmul.mubr.bf16.gmra.mxu0 %v2491_v37  ;;  %v2325_v63 = vor.u32 %v2324_v16, %v2320_v25  ;;  %v10003_v25 = vshll.u32 %v7835_v51, 16  ;;  %v2546_v60 = vsel %vm2483_vm11, %v1518_v17, %v8360_v27  ;;  %v964_v16 = vld [vmem:[#allocation2 + $0x30] sm:$0xe]  ;;  %v1520_v22 = vrot.slane %v7485_v53, 1  ;;  %10004 = vst [vmem:[#allocation39_spill] sm:$0xff] %v8533_v36 }
  0xda   : > { %2029 = vrot.lane.b32.xlu1 %v1996_v28, %s7554_s24  ;;  %v8525_v11 = vpop.permute.xlu0 %1651  ;;  %3100 = vmatprep.mubr.bf16.mxu0 %v2546_v60  ;;  %v320_v27 = vld [vmem:[#allocation2 + $0xcc] sm:$0x1]  ;;  %v1999_v56 = vsel %vm1506_vm10, %v1997_v24, %v1998_v55  ;;  %v377_v61 = vsel %vm7604_vm5, 0, %v376_v43  ;;  %v1826_v33 = vshll.u32 %v8013_v32, 16  ;;  %v1838_v17 = vshll.u32 %v8063_v19, 16 }
  0xdb   : > { %v2330_v37 = vsel %vm1233_vm9, %v2325_v63, %v2329_v14  ;;  %v8519_v18 = vrot.slane %v10003_v25, 1  ;;  %v7484_v14 = vld [vmem:[#allocation2 + $0x34] sm:$0xf]  ;;  %v7486_v63 = vld [vmem:[#allocation2 + $0x20] ss:$0 sps:$4 sm:$0x11]  }
  0xdc   : > { %2381 = vrot.lane.b32.xlu0 %v2330_v37, %s7554_s24  ;;  %v6358_v26 = vcombine.low %v964_v16, %v7484_v14  ;;  %v1735_v28 = vshll.u32 %v7486_v63, 16  ;;  %v321_v31 = vsel %vm7595_vm3, 0, %v320_v27  ;;  %378 = vst [vmem:[#allocation2 + $0xd4] sm:$0x1] %v377_v61  ;;  %v965_v25 = vld [vmem:[#allocation2 + $0x3c] sm:$0xe] }
  0xdd   : > { %322 = vst [vmem:[#allocation2 + $0xcc] sm:$0x1] %v321_v31  ;;  %v909_v60 = vld [vmem:[#allocation2 + $0xc8] sm:$0x1]  ;;  %v7487_v14 = vld [vmem:[#allocation2 + $0x40] sm:$0xf] }
  0xde   : > { %v1519_v59 = vrot.slane %v6358_v26, 1  ;;  %2031 = vrot.lane.b32.xlu1 %v1999_v56, %s7554_s24  ;;  %v2358_v24 = vpop.permute.xlu0 %2357  ;;  %v6359_v26 = vcombine.low %v965_v25, %v7487_v14  ;;  %v7488_v53 = vld [vmem:[#allocation2 + $0x44] ss:$0 sps:$4 sm:$0x11]   ;;  %v966_v43 = vld [vmem:[#allocation2 + $0x48] sm:$0xe] }
  0xdf   : > { %v2664_v55 = vsel %vm2483_vm11, %v7892_v29, %v2358_v24  ;;  %v1523_v27 = vrot.slane %v7488_v53, 1  ;;  %v1039_v63 = vld [vmem:[#allocation2 + $0xc0] sm:$0xe]  ;;  %v2334_v31 = vshll.u32 %v8533_v36, 16  ;;  %v10005_v29 = vshrl.u32 %v7709_v49, 16 }
  0xe0   : > { %v1521_v16 = vsel %vm1506_vm10, %v1519_v59, %v1520_v22  ;;  %3245 = vmatprep.mubr.bf16.mxu1 %v2664_v55  ;;  %v1522_v22 = vrot.slane %v6359_v26, 1  ;;  %v1737_v61 = vrot.slane %v1735_v28, 1  ;;  %v8556_v24 = vrot.slane %v1814_v7, 1  ;;  %v7490_v26 = vld [vmem:[#allocation2 + $0x50] ss:$0 sps:$4 sm:$0x11]  }
  0xe1   : > { %3101 = vmatmul.mubr.bf16.gmra.mxu0 %v2494_v38  ;;  %v910_v38 = vsel %vm7595_vm3, %v748_v5, %v909_v60  ;;  %v2550_v56 = vsel %vm2483_vm11, %v1521_v16, %v8381_v13  ;;  %v1733_v59 = vor.u32 %v7967_v47, %v10005_v29  ;;  %v8559_v14 = vrot.slane %v1826_v33, 1  ;;  %v7489_v5 = vld [vmem:[#allocation2 + $0x4c] sm:$0xf]  ;;  %v8568_v47 = vld [vmem:[#allocation2 + $0xd0] sm:$0xf] }
  0xe2   : > { %911 = vst [vmem:[#allocation2 + $0xc8] sm:$0x1] %v910_v38  ;;  %3108 = vmatprep.mubr.bf16.mxu0 %v2550_v56  ;;  %v6360_v60 = vcombine.low %v966_v43, %v7489_v5  ;;  %v6417_v16 = vcombine.low %v1039_v63, %v8358_v8  ;;  %v2497_v55 = vsel %vm2483_vm11, %v7784_v35, %v8410_v12  ;;  %v8571_v7 = vrot.slane %v1838_v17, 1  ;;  %v7491_v43 = vld [vmem:[#allocation2 + $0x2c] ss:$0 sps:$4 sm:$0x11]  }
  0xe3   : > { %v1524_v28 = vsel %vm1506_vm10, %v1522_v22, %v1523_v27  ;;  %v1526_v53 = vrot.slane %v7490_v26, 1  ;;  %v1747_v38 = vshll.u32 %v7491_v43, 16  ;;  %v2332_v8 = vshrl.u32 %v8533_v36, 16  ;;  %v8582_v17 = vld [vmem:[#allocation2 + $0xd4] ss:$0 sps:$4 sm:$0x11]  }
  0xe4   : > { %v8566_v49 = vpop.permute.xlu1 %1442  ;;  %v2554_v33 = vsel %vm2483_vm11, %v1524_v28, %v8402_v20  ;;  %v2336_v63 = vrot.slane %v2334_v31, 1  ;;  %v1071_v56 = vld [vmem:[#allocation2 + $0xcc] sm:$0xf]  ;;  %v1738_v35 = vsel %vm1233_vm9, %v1733_v59, %v1737_v61  ;;  %v1525_v22 = vrot.slane %v6360_v60, 1  ;;  %v967_v20 = vld [vmem:[#allocation2 + $0x54] sm:$0xe] }
  0xe5   : > { %v8580_v27 = vcombine.low %v1071_v56, %v8568_v47  ;;  %v1850_v5 = vshll.u32 %v8122_v6, 16  ;;  %v1862_v28 = vshll.u32 %v8219_v52, 16  ;;  %v2000_v31 = vrot.slane %v6417_v16, 1  ;;  %v10008_v60 = vld [vmem:[#allocation7_spill] sm:$0xff]  ;;  %v10010_v13 = vld [vmem:[#allocation28_spill] sm:$0xff]  ;;  %v10013_v36 = vld [vmem:[#allocation9_spill] sm:$0xff] }
  0xe6   : > { %v1749_v56 = vrot.slane %v1747_v38, 1  ;;  %v10009_v58 = vshrl.u32 %v10008_v60, 16  ;;  %v10011_v38 = vld [vmem:[#allocation14_spill] sm:$0xff]  ;;  %v10012_v60 = vld [vmem:[#allocation25_spill] sm:$0xff] }
  0xe7   : > { %v8577_v12 = vpop.permute.xlu0 %1653  ;;  %10006 = vst [vmem:[#allocation40_spill] sm:$0xff] %v8580_v27  ;;  %v2344_v25 = vshrl.u32 %v8580_v27, 16  ;;  %v2346_v16 = vshll.u32 %v8580_v27, 16  ;;  %v1874_v0 = vshll.u32 %v10012_v60, 16 }
  0xe8   : > { %v2006_v26 = vpop.permute.xlu1 %2005  ;;  %v8596_v29 = vor.u32 %v10010_v13, %v10009_v58  ;;  %v1527_v58 = vsel %vm1506_vm10, %v1525_v22, %v1526_v53  ;;  %v1852_v13 = vrot.slane %v1850_v5, 1 }
  0xe9   : > { %3109 = vmatmul.mubr.bf16.gmra.mxu0 %v2497_v55  ;;  %v8587_v59 = vld [vmem:[#allocation2 + $0xc8] ss:$0 sps:$4 sm:$0x11]   ;;  %v2602_v61 = vsel %vm2483_vm11, %v1738_v35, %v2006_v26  ;;  %v10007_v55 = vshrl.u32 %v7729_v15, 16  ;;  %v6361_v35 = vcombine.low %v967_v20, %v7492_v3  ;;  %v2337_v26 = vor.u32 %v2336_v63, %v2332_v8 }
  0xea   : > { %3116 = vmatprep.mubr.bf16.mxu0 %v2554_v33  ;;  %v2351_v33 = vshll.u32 %v8582_v17, 16  ;;  %3246 = vmatmul.mubr.bf16.gmra.mxu1 %v2602_v61  ;;  %v2339_v15 = vshll.u32 %v8587_v59, 16  ;;  %v2348_v27 = vrot.slane %v2346_v16, 1  ;;  %v2500_v61 = vsel %vm2483_vm11, %v10013_v36, %v8436_v23  ;;  %v7493_v20 = vld [vmem:[#allocation2 + $0x5c] ss:$0 sps:$4 sm:$0x11]  }
  0xeb   : > { %v1745_v43 = vor.u32 %v8155_v42, %v10007_v55  ;;  %v2360_v37 = vpop.permute.xlu0 %2359  ;;  %v8602_v42 = vld [vmem:[#allocation2 + $0xc8] ss:$0 sps:$4 sm:$0x11]   ;;  %v1529_v10 = vrot.slane %v7493_v20, 1  ;;  %v2558_v53 = vsel %vm2483_vm11, %v1527_v58, %v8420_v4  ;;  %v1528_v5 = vrot.slane %v6361_v35, 1 }
  0xec   : > { %v2667_v55 = vsel %vm2483_vm11, %v10011_v38, %v2360_v37  ;;  %v2341_v3 = vrot.slane %v2339_v15, 1  ;;  %v2353_v8 = vrot.slane %v2351_v33, 1  ;;  %v2001_v63 = vrot.slane %v8602_v42, 1  ;;  %v968_v16 = vld [vmem:[#allocation2 + $0x60] sm:$0xe] }
  0xed   : > { %v8611_v30 = vpop.permute.xlu1 %1444  ;;  %3253 = vmatprep.mubr.bf16.mxu1 %v2667_v55  ;;  %v2349_v37 = vor.u32 %v2348_v27, %v2344_v25  ;;  %v1750_v22 = vsel %vm1233_vm9, %v1745_v43, %v1749_v56  ;;  %v1860_v38 = vshrl.u32 %v8219_v52, 16  ;;  %v1864_v23 = vrot.slane %v1862_v28, 1  ;;  %v7494_v56 = vld [vmem:[#allocation2 + $0x64] sm:$0xf]  ;;  %v969_v20 = vld [vmem:[#allocation2 + $0x6c] sm:$0xe] }
  0xee   : > { %v2342_v36 = vsel %vm1233_vm9, %v2337_v26, %v2341_v3  ;;  %v2002_v15 = vsel %vm1506_vm10, %v2000_v31, %v2001_v63  ;;  %v1872_v33 = vshrl.u32 %v10012_v60, 16  ;;  %v1876_v55 = vrot.slane %v1874_v0, 1  ;;  %v7495_v60 = vld [vmem:[#allocation2 + $0x38] ss:$0 sps:$4 sm:$0x11]  }
  0xef   : > { %2383 = vrot.lane.b32.xlu0 %v2342_v36, %s7554_s24  ;;  %2033 = vrot.lane.b32.xlu1 %v2002_v15, %s7554_s24  ;;  %v10014_v27 = vshrl.u32 %v7951_v44, 16  ;;  %v1819_v28 = vshll.u32 %v8369_v54, 16  ;;  %v2354_v43 = vsel %vm1233_vm9, %v2349_v37, %v2353_v8  ;;  %v6362_v0 = vcombine.low %v968_v16, %v7494_v56  ;;  %v10017_v54 = vld [vmem:[#allocation27_spill] sm:$0xff]  ;;  %v10022_v56 = vld [vmem:[#allocation33_spill] sm:$0xff] }
  0xf0   : > { %v10015_v35 = vshrl.u32 %v8013_v32, 16  ;;  %v1530_v58 = vsel %vm1506_vm10, %v1528_v5, %v1529_v10  ;;  %v1759_v44 = vshll.u32 %v7495_v60, 16  ;;  %v1884_v63 = vshrl.u32 %v10017_v54, 16  ;;  %v10020_v10 = vld [vmem:[#allocation10_spill] sm:$0xff] }
  0xf1   : > { %3117 = vmatmul.mubr.bf16.gmra.mxu0 %v2500_v61  ;;  %v2008_v4 = vpop.permute.xlu1 %2007  ;;  %v1817_v52 = vor.u32 %v8556_v24, %v10014_v27  ;;  %v1821_v61 = vrot.slane %v1819_v28, 1  ;;  %v10016_v24 = vld [vmem:[#allocation34_spill] sm:$0xff]  ;;  %v1886_v8 = vshll.u32 %v10017_v54, 16  ;;  %v10018_v37 = vshrl.u32 %v8063_v19, 16 }
  0xf2   : > { %v8623_v25 = vpop.permute.xlu0 %1655  ;;  %3124 = vmatprep.mubr.bf16.mxu0 %v2558_v53  ;;  %v2606_v31 = vsel %vm2483_vm11, %v1750_v22, %v2008_v4  ;;  %v1829_v26 = vor.u32 %v8559_v14, %v10015_v35  ;;  %v1831_v3 = vshll.u32 %v10016_v24, 16  ;;  %v10019_v32 = vshrl.u32 %v8122_v6, 16  ;;  %v10021_v4 = vld [vmem:[#allocation16_spill] sm:$0xff] }
  0xf3   : > { %3254 = vmatmul.mubr.bf16.gmra.mxu1 %v2606_v31  ;;  %v1841_v53 = vor.u32 %v8571_v7, %v10018_v37  ;;  %2385 = vrot.lane.b32.xlu0 %v2354_v43, %s7554_s24  ;;  %v2503_v22 = vsel %vm2483_vm11, %v10020_v10, %v8456_v40  ;;  %v8648_v16 = vsel %vm1233_vm9, %v1817_v52, %v1821_v61  ;;  %v1843_v15 = vshll.u32 %v8399_v48, 16 }
  0xf4   : > { %v1853_v14 = vor.u32 %v1852_v13, %v10019_v32  ;;  %v1833_v36 = vrot.slane %v1831_v3, 1  ;;  %v2562_v6 = vsel %vm2483_vm11, %v1530_v58, %v8442_v62  ;;  %v1531_v7 = vrot.slane %v6362_v0, 1  ;;  %v7496_v13 = vld [vmem:[#allocation2 + $0x68] ss:$0 sps:$4 sm:$0x11]  }
  0xf5   : > { %v1532_v27 = vrot.slane %v7496_v13, 1  ;;  %v1761_v28 = vrot.slane %v1759_v44, 1  ;;  %v1845_v43 = vrot.slane %v1843_v15, 1  ;;  %v1855_v52 = vshll.u32 %v8425_v50, 16  ;;  %v7497_v58 = vld [vmem:[#allocation2 + $0x70] sm:$0xf] }
  0xf6   : > { %v2362_v5 = vpop.permute.xlu0 %2361  ;;  %v8656_v40 = vsel %vm1233_vm9, %v1829_v26, %v1833_v36  ;;  %v1888_v31 = vrot.slane %v1886_v8, 1  ;;  %v1896_v48 = vshrl.u32 %v10022_v56, 16  ;;  %v1865_v35 = vor.u32 %v1864_v23, %v1860_v38  ;;  %v970_v23 = vld [vmem:[#allocation2 + $0x78] sm:$0xe] }
  0xf7   : > { %v2670_v19 = vsel %vm2483_vm11, %v10021_v4, %v2362_v5  ;;  %v1867_v60 = vshll.u32 %v8464_v39, 16  ;;  %v1898_v62 = vshll.u32 %v10022_v56, 16  ;;  %v6363_v44 = vcombine.low %v969_v20, %v7497_v58  ;;  %v7498_v20 = vld [vmem:[#allocation2 + $0x44] ss:$0 sps:$4 sm:$0x11]  }
  0xf8   : > { %3261 = vmatprep.mubr.bf16.mxu1 %v2670_v19  ;;  %v8665_v26 = vsel %vm1233_vm9, %v1841_v53, %v1845_v43  ;;  %v1857_v61 = vrot.slane %v1855_v52, 1  ;;  %v1533_v50 = vsel %vm1506_vm10, %v1531_v7, %v1532_v27  ;;  %v1877_v54 = vor.u32 %v1876_v55, %v1872_v33  ;;  %v10023_v5 = vld [vmem:[#allocation11_spill] sm:$0xff]  ;;  %v10024_v19 = vld [vmem:[#allocation18_spill] sm:$0xff]  ;;  %v10025_v7 = vld [vmem:[#allocation8_spill] sm:$0xff] }
  0xf9   : > { %3125 = vmatmul.mubr.bf16.gmra.mxu0 %v2503_v22  ;;  %v1869_v3 = vrot.slane %v1867_v60, 1  ;;  %v1879_v38 = vshll.u32 %v8499_v45, 16  ;;  %v1762_v39 = vsel %vm1233_vm9, %v8596_v29, %v1761_v28  ;;  %v1771_v37 = vshll.u32 %v7498_v20, 16  ;;  %v7499_v28 = vld [vmem:[#allocation2 + $0x74] ss:$0 sps:$4 sm:$0x11]  }
  0xfa   : > { %v8662_v0 = vpop.permute.xlu1 %1446  ;;  %3132 = vmatprep.mubr.bf16.mxu0 %v2562_v6  ;;  %v8674_v8 = vsel %vm1233_vm9, %v1853_v14, %v1857_v61  ;;  %v1900_v10 = vrot.slane %v1898_v62, 1  ;;  %v2506_v33 = vsel %vm2483_vm11, %v10023_v5, %v8485_v57  ;;  %v2566_v45 = vsel %vm2483_vm11, %v1533_v50, %v8525_v11  ;;  %v10027_v57 = vld [vmem:[#allocation29_spill] sm:$0xff] }
  0xfb   : > { %v8677_v53 = vsel %vm1233_vm9, %v1865_v35, %v1869_v3  ;;  %v1881_v32 = vrot.slane %v1879_v38, 1  ;;  %v1534_v29 = vrot.slane %v6363_v44, 1  ;;  %v1889_v15 = vor.u32 %v1888_v31, %v1884_v63  ;;  %v7500_v43 = vld [vmem:[#allocation2 + $0x50] ss:$0 sps:$4 sm:$0x11]  }
  0xfc   : > { %v8667_v24 = vpop.permute.xlu0 %1657  ;;  %v1891_v4 = vshll.u32 %v8515_v9, 16  ;;  %v10026_v13 = vshrl.u32 %v10025_v7, 16  ;;  %v1535_v11 = vrot.slane %v7499_v28, 1  ;;  %v1783_v52 = vshll.u32 %v7500_v43, 16  ;;  %v7501_v35 = vld [vmem:[#allocation2 + $0x7c] sm:$0xf] }
  0xfd   : > { %v8686_v36 = vsel %vm1233_vm9, %v1877_v54, %v1881_v32  ;;  %v1773_v56 = vrot.slane %v1771_v37, 1  ;;  %v6364_v60 = vcombine.low %v970_v23, %v7501_v35  ;;  %v7502_v63 = vld [vmem:[#allocation2 + $0x5c] ss:$0 sps:$4 sm:$0x11]   ;;  %v971_v9 = vld [vmem:[#allocation2 + $0x84] sm:$0xe]  ;;  %v1901_v44 = vor.u32 %v1900_v10, %v1896_v48 }
  0xfe   : > { %v2010_v22 = vpop.permute.xlu1 %2009  ;;  %v1769_v27 = vor.u32 %v10027_v57, %v10026_v13  ;;  %v1795_v31 = vshll.u32 %v7502_v63, 16  ;;  %v1893_v62 = vrot.slane %v1891_v4, 1  ;;  %v1788_v58 = vshrl.u32 %v7856_v21, 16  ;;  %v7503_v38 = vld [vmem:[#allocation2 + $0x80] ss:$0 sps:$4 sm:$0x11]  }
  0xff   : > { %v2610_v55 = vsel %vm2483_vm11, %v1762_v39, %v2010_v22  ;;  %v1903_v61 = vshll.u32 %v8602_v42, 16  ;;  %v10028_v50 = vshll.u32 %v7856_v21, 16  ;;  %v1538_v39 = vrot.slane %v7503_v38, 1  ;;  %v10029_v42 = vld [vmem:[#allocation13_spill] sm:$0xff]  ;;  %v1104_v13 = vld [vmem:[#allocation2 + $0xcc] sm:$0xe] }
 0x100   : > { %v2364_v14 = vpop.permute.xlu0 %2363  ;;  %3262 = vmatmul.mubr.bf16.gmra.mxu1 %v2610_v55  ;;  %v8703_v23 = vsel %vm1233_vm9, %v1889_v15, %v1893_v62  ;;  %v1536_v20 = vsel %vm1506_vm10, %v1534_v29, %v1535_v11  ;;  %v1785_v37 = vrot.slane %v1783_v52, 1  ;;  %v1774_v22 = vsel %vm1233_vm9, %v1769_v27, %v1773_v56  ;;  %v1102_v4 = vld [vmem:[#allocation2 + $0xb4] sm:$0xe]  ;;  %v7505_v43 = vld [vmem:[#allocation2 + $0x8c] ss:$0 sps:$4 sm:$0x11]  }
 0x101   : > { %v2673_v6 = vsel %vm2483_vm11, %v10024_v19, %v2364_v14  ;;  %3133 = vmatmul.mubr.bf16.gmra.mxu0 %v2506_v33  ;;  %v8698_v3 = vrot.slane %v10028_v50, 1  ;;  %v1905_v32 = vrot.slane %v1903_v61, 1  ;;  %v1537_v48 = vrot.slane %v6364_v60, 1  ;;  %v7504_v33 = vld [vmem:[#allocation2 + $0x88] sm:$0xf] }
 0x102   : > { %3269 = vmatprep.mubr.bf16.mxu1 %v2673_v6  ;;  %3140 = vmatprep.mubr.bf16.mxu0 %v2566_v45  ;;  %v8707_v10 = vrot.slane %v1795_v31, 1  ;;  %v2509_v5 = vsel %vm2483_vm11, %v10029_v42, %v8566_v49  ;;  %v6365_v45 = vcombine.low %v971_v9, %v7504_v33  ;;  %v1101_v14 = vld [vmem:[#allocation2 + $0xa8] sm:$0xe]  ;;  %v2570_v29 = vsel %vm2483_vm11, %v1536_v20, %v8577_v12  ;;  %v1103_v6 = vld [vmem:[#allocation2 + $0xc0] sm:$0xe] }
 0x103   : > { %v8713_v55 = vsel %vm1233_vm9, %v1901_v44, %v1905_v32  ;;  %v10030_v49 = vshrl.u32 %v7835_v51, 16  ;;  %v6462_v28 = vcombine.low %v1101_v14, %v8440_v2  ;;  %v2472_v11 = vrot.slane %v8448_v46, 1  ;;  %v10031_v2 = vld [vmem:[#allocation15_spill] sm:$0xff]  ;;  %v972_v50 = vld [vmem:[#allocation2 + $0x90] sm:$0xe] }
 0x104   : > { %v8700_v54 = vpop.permute.xlu1 %1448  ;;  %v1540_v27 = vrot.slane %v6365_v45, 1  ;;  %v1539_v12 = vsel %vm1506_vm10, %v1537_v48, %v1538_v39  ;;  %v1541_v52 = vrot.slane %v7505_v43, 1  ;;  %v6463_v56 = vcombine.low %v1102_v4, %v8477_v1  ;;  %v10032_v1 = vld [vmem:[#allocation20_spill] sm:$0xff]  ;;  %v7506_v48 = vld [vmem:[#allocation2 + $0x94] sm:$0xf] }
 0x105   : > { %v1781_v57 = vor.u32 %v8519_v18, %v10030_v49  ;;  %v2475_v35 = vrot.slane %v8483_v41, 1  ;;  %v2471_v60 = vrot.slane %v6462_v28, 1  ;;  %v6464_v63 = vcombine.low %v1103_v6, %v8510_v34  ;;  %v10034_v6 = vld [vmem:[#allocation22_spill] sm:$0xff] }
 0x106   : > { %v2478_v51 = vrot.slane %v8587_v59, 1  ;;  %v6465_v18 = vcombine.low %v1104_v13, %v8568_v47  ;;  %v2512_v46 = vsel %vm2483_vm11, %v10031_v2, %v8611_v30  ;;  %v2474_v9 = vrot.slane %v6463_v56, 1  ;;  %v973_v49 = vld [vmem:[#allocation2 + $0x9c] sm:$0xe]  ;;  %v10037_v2 = vld [vmem:[#allocation24_spill] sm:$0xff] }
 0x107   : > { %v2481_v62 = vrot.slane %v8582_v17, 1  ;;  %v8740_v61 = vsel %vm1506_vm10, %v2471_v60, %v2472_v11  ;;  %v2477_v34 = vrot.slane %v6464_v63, 1  ;;  %v2574_v47 = vsel %vm2483_vm11, %v1539_v12, %v8623_v25 }
 0x108   : > { %v2012_v15 = vpop.permute.xlu1 %2011  ;;  %v2480_v59 = vrot.slane %v6465_v18, 1  ;;  %v8745_v30 = vsel %vm1506_vm10, %v2474_v9, %v2475_v35  ;;  %v1786_v17 = vsel %vm1233_vm9, %v1781_v57, %v1785_v37  ;;  %v1542_v25 = vsel %vm1506_vm10, %v1540_v27, %v1541_v52  ;;  %v10035_v57 = vld [vmem:[#allocation12_spill] sm:$0xff]  ;;  %v10036_v35 = vld [vmem:[#allocation19_spill] sm:$0xff] }
 0x109   : > { %v2614_v19 = vsel %vm2483_vm11, %v1774_v22, %v2012_v15  ;;  %3141 = vmatmul.mubr.bf16.gmra.mxu0 %v2509_v5  ;;  %v8749_v38 = vsel %vm1506_vm10, %v2477_v34, %v2478_v51  ;;  %v6366_v42 = vcombine.low %v972_v50, %v7506_v48  ;;  %v10033_v5 = vld [vmem:[#allocation17_spill] sm:$0xff]  ;;  %v1793_v33 = vor.u32 %v8698_v3, %v1788_v58  ;;  %v7508_v58 = vld [vmem:[#allocation2 + $0xa0] sm:$0xf]  ;;  %v7509_v52 = vld [vmem:[#allocation2 + $0x68] ss:$0 sps:$4 sm:$0x11]  }
 0x10a   : > { %3270 = vmatmul.mubr.bf16.gmra.mxu1 %v2614_v19  ;;  %3148 = vmatprep.mubr.bf16.mxu0 %v2570_v29  ;;  %v8752_v39 = vsel %vm1506_vm10, %v2480_v59, %v2481_v62  ;;  %v2515_v37 = vsel %vm2483_vm11, %v10033_v5, %v8662_v0  ;;  %v2578_v45 = vsel %vm2483_vm11, %v1542_v25, %v8667_v24  ;;  %v7507_v29 = vld [vmem:[#allocation2 + $0x98] ss:$0 sps:$4 sm:$0x11]   ;;  %v1802_v27 = vshll.u32 %v10035_v57, 16  ;;  %v974_v9 = vld [vmem:[#allocation2 + $0xa8] sm:$0xe] }
 0x10b   : > { %v1543_v15 = vrot.slane %v6366_v42, 1  ;;  %v1544_v4 = vrot.slane %v7507_v29, 1  ;;  %v1798_v21 = vsel %vm1233_vm9, %v1793_v33, %v8707_v10  ;;  %v6367_v3 = vcombine.low %v973_v49, %v7508_v58  ;;  %v7510_v18 = vld [vmem:[#allocation2 + $0xa4] ss:$0 sps:$4 sm:$0x11]  }
 0x10c   : > { %v8718_v7 = vpop.permute.xlu0 %1659  ;;  %v1800_v28 = vshrl.u32 %v10035_v57, 16  ;;  %v1804_v12 = vrot.slane %v1802_v27, 1  ;;  %v1807_v56 = vshll.u32 %v7509_v52, 16  ;;  %v2518_v60 = vsel %vm2483_vm11, %v10036_v35, %v8700_v54  ;;  %v7511_v34 = vld [vmem:[#allocation2 + $0xac] sm:$0xf]  ;;  %v10039_v29 = vld [vmem:[#allocation23_spill] sm:$0xff] }
 0x10d   : > { %v1545_v24 = vsel %vm1506_vm10, %v1543_v15, %v1544_v4  ;;  %v1546_v51 = vrot.slane %v6367_v3, 1  ;;  %v6368_v59 = vcombine.low %v974_v9, %v7511_v34  ;;  %v7512_v25 = vld [vmem:[#allocation2 + $0xb0] ss:$0 sps:$4 sm:$0x11]   ;;  %v975_v5 = vld [vmem:[#allocation2 + $0xb4] sm:$0xe] }
 0x10e   : > { %v2582_v10 = vsel %vm2483_vm11, %v1545_v24, %v8718_v7  ;;  %v1805_v62 = vor.u32 %v1804_v12, %v1800_v28  ;;  %v1550_v48 = vrot.slane %v7512_v25, 1  ;;  %v7514_v49 = vld [vmem:[#allocation2 + $0xbc] ss:$0 sps:$4 sm:$0x11]   ;;  %v1089_v58 = vld [vmem:[#allocation2 + $0x18] sm:$0xe] }
 0x10f   : > { %v1553_v57 = vrot.slane %v7514_v49, 1  ;;  %v10041_v28 = vld [vmem:[#allocation32_spill] sm:$0xff]  ;;  %v7515_v52 = vld [vmem:[#allocation2 + $0x1c] sm:$0xf]  ;;  %v10044_v9 = vld [vmem:[#allocation31_spill] sm:$0xff] }
 0x110   : > { %v2366_v31 = vpop.permute.xlu0 %2365  ;;  %v7518_v34 = vld [vmem:[#allocation2 + $0x34] sm:$0xf] }
 0x111   : > { %v8735_v44 = vpop.permute.xlu1 %1450  ;;  %v2676_v41 = vsel %vm2483_vm11, %v10032_v1, %v2366_v31  ;;  %3149 = vmatmul.mubr.bf16.gmra.mxu0 %v2512_v46  ;;  %v1547_v31 = vrot.slane %v7510_v18, 1  ;;  %v1809_v1 = vrot.slane %v1807_v56, 1  ;;  %v6450_v56 = vcombine.low %v1089_v58, %v7515_v52  ;;  %v1090_v18 = vld [vmem:[#allocation2 + $0x24] sm:$0xe]  ;;  %v1095_v58 = vld [vmem:[#allocation2 + $0x60] sm:$0xe] }
 0x112   : > { %3277 = vmatprep.mubr.bf16.mxu1 %v2676_v41  ;;  %3156 = vmatprep.mubr.bf16.mxu0 %v2574_v47  ;;  %v10038_v47 = vld [vmem:[#allocation21_spill] sm:$0xff]  ;;  %v7526_v52 = vld [vmem:[#allocation2 + $0x64] sm:$0xf] }
 0x113   : > { %v1548_v54 = vsel %vm1506_vm10, %v1546_v51, %v1547_v31  ;;  %v1810_v7 = vsel %vm1233_vm9, %v1805_v62, %v1809_v1  ;;  %v2521_v50 = vsel %vm2483_vm11, %v10038_v47, %v8735_v44  ;;  %v1091_v31 = vld [vmem:[#allocation2 + $0x30] sm:$0xe]  ;;  %v7517_v1 = vld [vmem:[#allocation2 + $0x28] sm:$0xf] }
 0x115   : > { %v2014_v20 = vpop.permute.xlu1 %2013 }
 0x116   : > { %v2618_v32 = vsel %vm2483_vm11, %v1786_v17, %v2014_v20 }
 0x117   : > { %3278 = vmatmul.mubr.bf16.gmra.mxu1 %v2618_v32  ;;  %v1662_v22 = vpop.permute.xlu0 %1661  ;;  %v1549_v32 = vrot.slane %v6368_v59, 1  ;;  %v6452_v59 = vcombine.low %v1091_v31, %v7518_v34 }
 0x118   : > { %v2586_v17 = vsel %vm2483_vm11, %v1548_v54, %v1662_v22  ;;  %v10040_v22 = vld [vmem:[#allocation30_spill] sm:$0xff] }
 0x119   : > { %3157 = vmatmul.mubr.bf16.gmra.mxu0 %v2515_v37  ;;  %v1551_v33 = vsel %vm1506_vm10, %v1549_v32, %v1550_v48  ;;  %v7520_v32 = vld [vmem:[#allocation2 + $0x38] ss:$0 sps:$4 sm:$0x11]   ;;  %v1092_v48 = vld [vmem:[#allocation2 + $0x3c] sm:$0xe] }
 0x11a   : > { %3164 = vmatprep.mubr.bf16.mxu0 %v2578_v45  ;;  %v7513_v45 = vld [vmem:[#allocation2 + $0xb8] sm:$0xf]  ;;  %v2442_v25 = vrot.slane %v7520_v32, 1 }
 0x11b   : > { %v2368_v14 = vpop.permute.xlu0 %2367 }
 0x11c   : > { %v1453_v19 = vpop.permute.xlu1 %1452  ;;  %v2679_v13 = vsel %vm2483_vm11, %v10034_v6, %v2368_v14  ;;  %v6369_v14 = vcombine.low %v975_v5, %v7513_v45 }
 0x11d   : > { %3285 = vmatprep.mubr.bf16.mxu1 %v2679_v13  ;;  %v2524_v44 = vsel %vm2483_vm11, %v10039_v29, %v1453_v19 }
 0x11e   : > { %v1552_v13 = vrot.slane %v6369_v14, 1  ;;  %v7521_v14 = vld [vmem:[#allocation2 + $0x40] sm:$0xf] }
 0x120   : > { %v1664_v0 = vpop.permute.xlu0 %1663  ;;  %v2016_v11 = vpop.permute.xlu1 %2015  ;;  %v1554_v24 = vsel %vm1506_vm10, %v1552_v13, %v1553_v57 }
 0x121   : > { %v2622_v43 = vsel %vm2483_vm11, %v1798_v21, %v2016_v11  ;;  %3165 = vmatmul.mubr.bf16.gmra.mxu0 %v2518_v60  ;;  %v2590_v6 = vsel %vm2483_vm11, %v1551_v33, %v1664_v0  ;;  %v10042_v11 = vld [vmem:[#allocation26_spill] sm:$0xff] }
 0x122   : > { %3286 = vmatmul.mubr.bf16.gmra.mxu1 %v2622_v43  ;;  %3172 = vmatprep.mubr.bf16.mxu0 %v2582_v10  ;;  %v2435_v10 = vrot.slane %v6450_v56, 1  ;;  %v6456_v56 = vcombine.low %v1095_v58, %v7526_v52  ;;  %v7537_v58 = vld [vmem:[#allocation2 + $0xa0] sm:$0xf] }
 0x124   : > { %v2370_v63 = vpop.permute.xlu0 %2369 }
 0x125   : > { %v2682_v46 = vsel %vm2483_vm11, %v10037_v2, %v2370_v63  ;;  %v7516_v63 = vld [vmem:[#allocation2 + $0x20] ss:$0 sps:$4 sm:$0x11]  }
 0x126   : > { %3293 = vmatprep.mubr.bf16.mxu1 %v2682_v46  ;;  %v2436_v51 = vrot.slane %v7516_v63, 1  ;;  %v10043_v46 = vld [vmem:[#allocation35_spill] sm:$0xff] }
 0x127   : > { %v1455_v41 = vpop.permute.xlu1 %1454 }
 0x128   : > { %v2527_v12 = vsel %vm2483_vm11, %v10042_v11, %v1455_v41  ;;  %v6451_v41 = vcombine.low %v1090_v18, %v7517_v1  ;;  %v2437_v54 = vsel %vm1506_vm10, %v2435_v10, %v2436_v51  ;;  %v2453_v51 = vrot.slane %v6456_v56, 1  ;;  %v7528_v18 = vld [vmem:[#allocation2 + $0x68] ss:$0 sps:$4 sm:$0x11]  }
 0x129   : > { %3173 = vmatmul.mubr.bf16.gmra.mxu0 %v2521_v50  ;;  %v2454_v31 = vrot.slane %v7528_v18, 1 }
 0x12a   : > { %3180 = vmatprep.mubr.bf16.mxu0 %v2586_v17 }
 0x12b   : > { %v2018_v20 = vpop.permute.xlu1 %2017  ;;  %v2455_v34 = vsel %vm1506_vm10, %v2453_v51, %v2454_v31 }
 0x12c   : > { %v2626_v42 = vsel %vm2483_vm11, %v1810_v7, %v2018_v20  ;;  %v7519_v7 = vld [vmem:[#allocation2 + $0x2c] ss:$0 sps:$4 sm:$0x11]   ;;  %v2441_v20 = vrot.slane %v6452_v59, 1  ;;  %v7530_v59 = vld [vmem:[#allocation2 + $0x7c] sm:$0xf] }
 0x12d   : > { %3294 = vmatmul.mubr.bf16.gmra.mxu1 %v2626_v42  ;;  %v2439_v47 = vrot.slane %v7519_v7, 1  ;;  %v1093_v42 = vld [vmem:[#allocation2 + $0x48] sm:$0xe] }
 0x12e   : > { %v1666_v37 = vpop.permute.xlu0 %1665  ;;  %v2443_v29 = vsel %vm1506_vm10, %v2441_v20, %v2442_v25  ;;  %v7532_v20 = vld [vmem:[#allocation2 + $0x80] ss:$0 sps:$4 sm:$0x11]   ;;  %v1098_v25 = vld [vmem:[#allocation2 + $0x84] sm:$0xe] }
 0x12f   : > { %v2594_v43 = vsel %vm2483_vm11, %v1554_v24, %v1666_v37  ;;  %v10045_v37 = vld [vmem:[#allocation36_spill] sm:$0xff]  ;;  %v1094_v24 = vld [vmem:[#allocation2 + $0x54] sm:$0xe]  ;;  %v2460_v32 = vrot.slane %v7532_v20, 1 }
 0x131   : > { %3181 = vmatmul.mubr.bf16.gmra.mxu0 %v2524_v44  ;;  %v7522_v44 = vld [vmem:[#allocation2 + $0x4c] sm:$0xf] }
 0x132   : > { %v2372_v15 = vpop.permute.xlu0 %2371  ;;  %3188 = vmatprep.mubr.bf16.mxu0 %v2590_v6 }
 0x133   : > { %v2685_v4 = vsel %vm2483_vm11, %v10040_v22, %v2372_v15  ;;  %v6453_v15 = vcombine.low %v1092_v48, %v7521_v14  ;;  %v6454_v22 = vcombine.low %v1093_v42, %v7522_v44  ;;  %v1099_v48 = vld [vmem:[#allocation2 + $0x90] sm:$0xe]  ;;  %v7534_v14 = vld [vmem:[#allocation2 + $0x94] sm:$0xf] }
 0x134   : > { %3301 = vmatprep.mubr.bf16.mxu1 %v2685_v4  ;;  %v1457_v27 = vpop.permute.xlu1 %1456 }
 0x135   : > { %v2530_v62 = vsel %vm2483_vm11, %v10044_v9, %v1457_v27  ;;  %v2444_v6 = vrot.slane %v6453_v15, 1  ;;  %v2447_v57 = vrot.slane %v6454_v22, 1  ;;  %v7524_v27 = vld [vmem:[#allocation2 + $0x50] ss:$0 sps:$4 sm:$0x11]   ;;  %v10047_v9 = vld [vmem:[#allocation38_spill] sm:$0xff]  ;;  %v6460_v15 = vcombine.low %v1099_v48, %v7534_v14 }
 0x136   : > { %v2374_v21 = vpop.permute.xlu0 %2373  ;;  %v7535_v22 = vld [vmem:[#allocation2 + $0x8c] ss:$0 sps:$4 sm:$0x11]  }
 0x137   : > { %v2688_v19 = vsel %vm2483_vm11, %v10041_v28, %v2374_v21  ;;  %v2448_v21 = vrot.slane %v7524_v27, 1  ;;  %v10046_v28 = vld [vmem:[#allocation37_spill] sm:$0xff] }
 0x138   : > { %v2020_v3 = vpop.permute.xlu1 %2019 }
 0x139   : > { %v2630_v0 = vsel %vm2483_vm11, %v8648_v16, %v2020_v3  ;;  %3189 = vmatmul.mubr.bf16.gmra.mxu0 %v2527_v12  ;;  %v7525_v12 = vld [vmem:[#allocation2 + $0x58] sm:$0xf] }
 0x13a   : > { %3302 = vmatmul.mubr.bf16.gmra.mxu1 %v2630_v0  ;;  %3196 = vmatprep.mubr.bf16.mxu0 %v2594_v43  ;;  %v2376_v60 = vpop.permute.xlu0 %2375  ;;  %v6455_v0 = vcombine.low %v1094_v24, %v7525_v12  ;;  %v2449_v43 = vsel %vm1506_vm10, %v2447_v57, %v2448_v21  ;;  %v10048_v57 = vld [vmem:[#allocation39_spill] sm:$0xff] }
 0x13b   : > { %3309 = vmatprep.mubr.bf16.mxu1 %v2688_v19  ;;  %v2691_v16 = vsel %vm2483_vm11, %v10043_v46, %v2376_v60  ;;  %v1097_v46 = vld [vmem:[#allocation2 + $0x78] sm:$0xe] }
 0x13c   : > { %v2022_v35 = vpop.permute.xlu1 %2021  ;;  %v2450_v60 = vrot.slane %v6455_v0, 1  ;;  %v6458_v7 = vcombine.low %v1097_v46, %v7530_v59 }
 0x13d   : > { %v2634_v2 = vsel %vm2483_vm11, %v8656_v40, %v2022_v35  ;;  %v2438_v40 = vrot.slane %v6451_v41, 1  ;;  %v7529_v41 = vld [vmem:[#allocation2 + $0x70] sm:$0xf] }
 0x13f   : > { %v2440_v45 = vsel %vm1506_vm10, %v2438_v40, %v2439_v47 }
 0x140   : > { %v2024_v50 = vpop.permute.xlu1 %2023 }
 0x141   : > { %3197 = vmatmul.mubr.bf16.gmra.mxu0 %v2530_v62  ;;  %v2378_v17 = vpop.permute.xlu0 %2377  ;;  %v2638_v5 = vsel %vm2483_vm11, %v8665_v26, %v2024_v50  ;;  %v7523_v26 = vld [vmem:[#allocation2 + $0x44] ss:$0 sps:$4 sm:$0x11]  }
 0x142   : > { %3310 = vmatmul.mubr.bf16.gmra.mxu1 %v2634_v2  ;;  %7156 = vmatprep.mubr.msk.bf16.mxu0 %vm2483_vm11, %v2437_v54  ;;  %v2694_v33 = vsel %vm2483_vm11, %v10045_v37, %v2378_v17  ;;  %v2445_v13 = vrot.slane %v7523_v26, 1  ;;  %v1096_v2 = vld [vmem:[#allocation2 + $0x6c] sm:$0xe]  ;;  %v2459_v17 = vrot.slane %v6458_v7, 1  ;;  %v7533_v37 = vld [vmem:[#allocation2 + $0x88] sm:$0xf] }
 0x143   : > { %3317 = vmatprep.mubr.bf16.mxu1 %v2691_v16  ;;  %v6457_v54 = vcombine.low %v1096_v2, %v7529_v41  ;;  %v7536_v26 = vld [vmem:[#allocation2 + $0x98] ss:$0 sps:$4 sm:$0x11]  }
 0x144   : > { %v2026_v4 = vpop.permute.xlu1 %2025  ;;  %v2446_v11 = vsel %vm1506_vm10, %v2444_v6, %v2445_v13  ;;  %v2465_v6 = vrot.slane %v6460_v15, 1  ;;  %v1100_v13 = vld [vmem:[#allocation2 + $0x9c] sm:$0xe] }
 0x145   : > { %v2380_v49 = vpop.permute.xlu0 %2379  ;;  %v2642_v3 = vsel %vm2483_vm11, %v8674_v8, %v2026_v4  ;;  %v7527_v8 = vld [vmem:[#allocation2 + $0x5c] ss:$0 sps:$4 sm:$0x11]   ;;  %v2456_v50 = vrot.slane %v6457_v54, 1  ;;  %v2463_v4 = vrot.slane %v7535_v22, 1 }
 0x146   : > { %v2697_v19 = vsel %vm2483_vm11, %v10046_v28, %v2380_v49  ;;  %v2451_v10 = vrot.slane %v7527_v8, 1 }
 0x148   : > { %v2028_v35 = vpop.permute.xlu1 %2027  ;;  %v2452_v1 = vsel %vm1506_vm10, %v2450_v60, %v2451_v10 }
 0x149   : > { %7157 = vmatmul.mubr.msk.bf16.vlgmr.msra.gmra.mxu0 %vm2483_vm11, %v2440_v45  ;;  %v2646_v16 = vsel %vm2483_vm11, %v8677_v53, %v2028_v35  ;;  %v7531_v53 = vld [vmem:[#allocation2 + $0x74] ss:$0 sps:$4 sm:$0x11]   ;;  %v2461_v45 = vsel %vm1506_vm10, %v2459_v17, %v2460_v32 }
 0x14a   : > { %3318 = vmatmul.mubr.bf16.gmra.mxu1 %v2638_v5  ;;  %7160 = vmatprep.mubr.msk.bf16.mxu0 %vm2483_vm11, %v2443_v29  ;;  %v2457_v40 = vrot.slane %v7531_v53, 1 }
 0x14b   : > { %3325 = vmatprep.mubr.bf16.mxu1 %v2694_v33  ;;  %v6459_v33 = vcombine.low %v1098_v25, %v7533_v37  ;;  %v4485_v37 = vld [vmem:[#allocation3 + $0xc] sm:$0x1] }
 0x14c   : > { %v2030_v47 = vpop.permute.xlu1 %2029  ;;  %v2458_v5 = vsel %vm1506_vm10, %v2456_v50, %v2457_v40 }
 0x14d   : > { %v2650_v42 = vsel %vm2483_vm11, %v8686_v36, %v2030_v47  ;;  %v2462_v44 = vrot.slane %v6459_v33, 1  ;;  %v2466_v36 = vrot.slane %v7536_v26, 1 }
 0x14e   : > { %v2382_v63 = vpop.permute.xlu0 %2381 }
 0x14f   : > { %v2700_v62 = vsel %vm2483_vm11, %v10047_v9, %v2382_v63  ;;  %v2464_v24 = vsel %vm1506_vm10, %v2462_v44, %v2463_v4  ;;  %v2467_v28 = vsel %vm1506_vm10, %v2465_v6, %v2466_v36 }
 0x150   : > { %v2032_v29 = vpop.permute.xlu1 %2031 }
 0x151   : > { %7161 = vmatmul.mubr.msk.bf16.gmra.mxu0 %vm2483_vm11, %v2446_v11  ;;  %v2654_v21 = vsel %vm2483_vm11, %v8703_v23, %v2032_v29  ;;  %v10049_v11 = vld [vmem:[#allocation40_spill] sm:$0xff]  ;;  %v7538_v23 = vld [vmem:[#allocation2 + $0xa4] ss:$0 sps:$4 sm:$0x11]   ;;  %v4486_v29 = vsel %vm7604_vm5, 0, %v4485_v37 }
 0x152   : > { %3326 = vmatmul.mubr.bf16.gmra.mxu1 %v2642_v3  ;;  %7164 = vmatprep.mubr.msk.bf16.mxu0 %vm2483_vm11, %v2449_v43  ;;  %v6461_v3 = vcombine.low %v1100_v13, %v7537_v58  ;;  %v2469_v52 = vrot.slane %v7538_v23, 1  ;;  %4487 = vst [vmem:[#allocation3 + $0xc] sm:$0x1] %v4486_v29 }
 0x153   : > { %3333 = vmatprep.mubr.bf16.mxu1 %v2697_v19 }
 0x154   : > { %v2468_v43 = vrot.slane %v6461_v3, 1 }
 0x156   : > { %v2470_v35 = vsel %vm1506_vm10, %v2468_v43, %v2469_v52 }
 0x159   : > { %7165 = vmatmul.mubr.msk.bf16.gmra.mxu0 %vm2483_vm11, %v2452_v1 }
 0x15a   : > { %3334 = vmatmul.mubr.bf16.gmra.mxu1 %v2646_v16  ;;  %7168 = vmatprep.mubr.msk.bf16.mxu0 %vm2483_vm11, %v2455_v34 }
 0x15b   : > { %3341 = vmatprep.mubr.bf16.mxu1 %v2700_v62 }
 0x161   : > { %7169 = vmatmul.mubr.msk.bf16.gmra.mxu0 %vm2483_vm11, %v2458_v5  ;;  %v2384_v49 = vpop.permute.xlu0 %2383  ;;  %v2034_v0 = vpop.permute.xlu1 %2033  ;;  %v4455_v5 = vld [vmem:[#allocation3 + $0x8] sm:$0x1] }
 0x162   : > { %3342 = vmatmul.mubr.bf16.gmra.mxu1 %v2650_v42  ;;  %7172 = vmatprep.mubr.msk.bf16.mxu0 %vm2483_vm11, %v2461_v45  ;;  %v2703_v27 = vsel %vm2483_vm11, %v10048_v57, %v2384_v49  ;;  %v2658_v56 = vsel %vm2483_vm11, %v8713_v55, %v2034_v0  ;;  %v4456_v14 = vsel %vm7595_vm3, 0, %v4455_v5 }
 0x163   : > { %3349 = vmatprep.mubr.bf16.mxu1 %v2703_v27  ;;  %4457 = vst [vmem:[#allocation3 + $0x8] sm:$0x1] %v4456_v14 }
 0x165   : > { %v2386_v19 = vpop.permute.xlu0 %2385 }
 0x166   : > { %v2706_v12 = vsel %vm2483_vm11, %v10049_v11, %v2386_v19 }
 0x169   : > { %7173 = vmatmul.mubr.msk.bf16.gmra.mxu0 %vm2483_vm11, %v2464_v24 }
 0x16a   : > { %3350 = vmatmul.mubr.bf16.gmra.mxu1 %v2654_v21  ;;  %7176 = vmatprep.mubr.msk.bf16.mxu0 %vm2483_vm11, %v2467_v28 }
 0x16b   : > { %3357 = vmatprep.mubr.bf16.mxu1 %v2706_v12 }
 0x171   : > { %7177 = vmatmul.mubr.msk.bf16.gmra.mxu0 %vm2483_vm11, %v2470_v35 }
 0x172   : > { %3358 = vmatmul.mubr.bf16.gmra.mxu1 %v2658_v56  ;;  %7180 = vmatprep.mubr.msk.bf16.mxu0 %vm2483_vm11, %v8740_v61 }
 0x179   : > { %7181 = vmatmul.mubr.msk.bf16.gmra.mxu0 %vm2483_vm11, %v8745_v30 }
 0x17a   : > { %7184 = vmatprep.mubr.msk.bf16.mxu0 %vm2483_vm11, %v8749_v38 }
 0x181   : > { %7185 = vmatmul.mubr.msk.bf16.gmra.mxu0 %vm2483_vm11, %v8752_v39 }
 0x189   : > { %v6832_v60 = vpop.f32.mrf.mxu0 }
 0x18b   : > { %v6833_v8 = vpop.f32.mrf.mxu0 }
 0x18c   : > { %v8860_v55 = vadd.f32 %v6833_v8, %v6832_v60 }
 0x18d   : > { %v6835_v10 = vpop.f32.mrf.mxu0 }
 0x18f   : > { %v6836_v63 = vpop.f32.mrf.mxu0 }
 0x190   : > { %v8862_v51 = vadd.f32 %v6836_v63, %v6835_v10 }
 0x191   : > { %v6838_v18 = vpop.f32.mrf.mxu0 }
 0x193   : > { %v6839_v31 = vpop.f32.mrf.mxu0 }
 0x194   : > { %v8864_v61 = vadd.f32 %v6839_v31, %v6838_v18 }
 0x195   : > { %v6841_v2 = vpop.f32.mrf.mxu0 }
 0x197   : > { %v6842_v30 = vpop.f32.mrf.mxu0  ;;  %v8870_v39 = vpop.f32.mrf.mxu1 }
 0x198   : > { %v8866_v46 = vadd.f32 %v6842_v30, %v6841_v2  ;;  %v4488_v2 = vld [vmem:[#allocation3 + $0x14] sm:$0x1] }
 0x199   : > { %v6844_v38 = vpop.f32.mrf.mxu0  ;;  %v8874_v54 = vpop.f32.mrf.mxu1 }
 0x19b   : > { %v6845_v16 = vpop.f32.mrf.mxu0  ;;  %v8878_v47 = vpop.f32.mrf.mxu1 }
 0x19c   : > { %v8868_v9 = vadd.f32 %v6845_v16, %v6844_v38  ;;  %v4489_v16 = vsel %vm7604_vm5, 0, %v4488_v2 }
 0x19d   : > { %v6847_v62 = vpop.f32.mrf.mxu0  ;;  %v8882_v17 = vpop.f32.mrf.mxu1  ;;  %4490 = vst [vmem:[#allocation3 + $0x14] sm:$0x1] %v4489_v16 }
 0x19f   : > { %v6848_v1 = vpop.f32.mrf.mxu0 }
 0x1a0   : > { %v8872_v41 = vadd.f32 %v6848_v1, %v6847_v62 }
 0x1a1   : > { %v6850_v34 = vpop.f32.mrf.mxu0 }
 0x1a3   : > { %v6851_v59 = vpop.f32.mrf.mxu0 }
 0x1a4   : > { %v8876_v7 = vadd.f32 %v6851_v59, %v6850_v34  ;;  %v4458_v59 = vld [vmem:[#allocation3 + $0x10] sm:$0x1] }
 0x1a5   : > { %v6853_v50 = vpop.f32.mrf.mxu0 }
 0x1a7   : > { %v6854_v53 = vpop.f32.mrf.mxu0 }
 0x1a8   : > { %v8880_v40 = vadd.f32 %v6854_v53, %v6853_v50 }
 0x1a9   : > { %v6856_v20 = vpop.f32.mrf.mxu0 }
 0x1aa   : > { %v8886_v48 = vpop.f32.mrf.mxu1 }
 0x1ab   : > { %v6857_v32 = vpop.f32.mrf.mxu0 }
 0x1ac   : > { %v8884_v25 = vadd.f32 %v6857_v32, %v6856_v20  ;;  %v8888_v33 = vpop.f32.mrf.mxu1  ;;  %v4459_v20 = vsel %vm7595_vm3, 0, %v4458_v59 }
 0x1ad   : > { %v6859_v42 = vpop.f32.mrf.mxu0  ;;  %4460 = vst [vmem:[#allocation3 + $0x10] sm:$0x1] %v4459_v20  ;;  %v4491_v20 = vld [vmem:[#allocation3 + $0x1c] sm:$0x1]  ;;  %v6952_v15 = vadd.f32 %v8888_v33, %v8886_v48 }
 0x1ae   : > { %v8896_v4 = vpop.f32.mrf.mxu1 }
 0x1af   : > { %v6860_v44 = vpop.f32.mrf.mxu0 }
 0x1b0   : > { %v8894_v22 = vadd.f32 %v6860_v44, %v6859_v42  ;;  %v8898_v26 = vpop.f32.mrf.mxu1 }
 0x1b1   : > { %v6862_v6 = vpop.f32.mrf.mxu0 }
 0x1b3   : > { %v6863_v36 = vpop.f32.mrf.mxu0  ;;  %v8902_v49 = vpop.f32.mrf.mxu1 }
 0x1b4   : > { %v8900_v13 = vadd.f32 %v6863_v36, %v6862_v6 }
 0x1b5   : > { %v6865_v57 = vpop.f32.mrf.mxu0  ;;  %v8904_v27 = vpop.f32.mrf.mxu1 }
 0x1b7   : > { %v6866_v21 = vpop.f32.mrf.mxu0  ;;  %v8908_v58 = vpop.f32.mrf.mxu1 }
 0x1b8   : > { %v8906_v24 = vadd.f32 %v6866_v21, %v6865_v57 }
 0x1b9   : > { %v6868_v3 = vpop.f32.mrf.mxu0  ;;  %v8912_v11 = vpop.f32.mrf.mxu1 }
 0x1bb   : > { %v6869_v28 = vpop.f32.mrf.mxu0 }
 0x1bc   : > { %v8910_v19 = vadd.f32 %v6869_v28, %v6868_v3 }
 0x1bd   : > { %v6871_v12 = vpop.f32.mrf.mxu0 }
 0x1be   : > { %10052 = vst [vmem:[#allocation7_spill] sm:$0xff] %v8910_v19 }
 0x1bf   : > { %v6872_v0 = vpop.f32.mrf.mxu0 }
 0x1c0   : > { %v8914_v43 = vadd.f32 %v6872_v0, %v6871_v12  ;;  %v8916_v23 = vpop.f32.mrf.mxu1 }
 0x1c1   : > { %v6874_v52 = vpop.f32.mrf.mxu0 }
 0x1c2   : > { %10053 = vst [vmem:[#allocation28_spill] sm:$0xff] %v8914_v43  ;;  %v8918_v56 = vpop.f32.mrf.mxu1 }
 0x1c3   : > { %v6875_v35 = vpop.f32.mrf.mxu0 }
 0x1c4   : > { %v8920_v60 = vadd.f32 %v6875_v35, %v6874_v52  ;;  %v8922_v8 = vpop.f32.mrf.mxu1 }
 0x1c5   : > { %v6877_v10 = vpop.f32.mrf.mxu0 }
 0x1c6   : > { %10054 = vst [vmem:[#allocation14_spill] sm:$0xff] %v8920_v60  ;;  %v8924_v63 = vpop.f32.mrf.mxu1 }
 0x1c7   : > { %v6878_v18 = vpop.f32.mrf.mxu0 }
 0x1c8   : > { %v8926_v31 = vadd.f32 %v6878_v18, %v6877_v10 }
 0x1c9   : > { %v6880_v38 = vpop.f32.mrf.mxu0 }
 0x1ca   : > { %10055 = vst [vmem:[#allocation25_spill] sm:$0xff] %v8926_v31  ;;  %v8928_v30 = vpop.f32.mrf.mxu1 }
 0x1cb   : > { %v6881_v1 = vpop.f32.mrf.mxu0 }
 0x1cc   : > { %v8932_v62 = vpop.f32.mrf.mxu1  ;;  %v8934_v34 = vadd.f32 %v6881_v1, %v6880_v38 }
 0x1cd   : > { %v6883_v53 = vpop.f32.mrf.mxu0 }
 0x1ce   : > { %10056 = vst [vmem:[#allocation9_spill] sm:$0xff] %v8934_v34  ;;  %v8936_v50 = vpop.f32.mrf.mxu1 }
 0x1cf   : > { %v6884_v32 = vpop.f32.mrf.mxu0 }
 0x1d0   : > { %v8940_v42 = vpop.f32.mrf.mxu1  ;;  %v8942_v5 = vadd.f32 %v6884_v32, %v6883_v53 }
 0x1d1   : > { %v6886_v37 = vpop.f32.mrf.mxu0 }
 0x1d2   : > { %10057 = vst [vmem:[#allocation34_spill] sm:$0xff] %v8942_v5 }
 0x1d3   : > { %v6887_v14 = vpop.f32.mrf.mxu0 }
 0x1d4   : > { %v8946_v44 = vadd.f32 %v6887_v14, %v6886_v37  ;;  %v4492_v37 = vsel %vm7604_vm5, 0, %v4491_v20 }
 0x1d5   : > { %v6889_v6 = vpop.f32.mrf.mxu0  ;;  %4493 = vst [vmem:[#allocation3 + $0x1c] sm:$0x1] %v4492_v37 }
 0x1d6   : > { %10058 = vst [vmem:[#allocation27_spill] sm:$0xff] %v8946_v44  ;;  %v4494_v44 = vld [vmem:[#allocation3 + $0x24] sm:$0x1] }
 0x1d7   : > { %v8944_v29 = vpop.f32.mrf.mxu1  ;;  %v6890_v57 = vpop.f32.mrf.mxu0 }
 0x1d8   : > { %v8952_v3 = vadd.f32 %v6890_v57, %v6889_v6 }
 0x1d9   : > { %v8948_v36 = vpop.f32.mrf.mxu1  ;;  %v6892_v28 = vpop.f32.mrf.mxu0 }
 0x1da   : > { %10059 = vst [vmem:[#allocation10_spill] sm:$0xff] %v8952_v3 }
 0x1db   : > { %v8950_v21 = vpop.f32.mrf.mxu1  ;;  %v6893_v0 = vpop.f32.mrf.mxu0 }
 0x1dc   : > { %v8956_v52 = vadd.f32 %v6893_v0, %v6892_v28  ;;  %v4461_v28 = vld [vmem:[#allocation3 + $0x18] sm:$0x1] }
 0x1dd   : > { %v8954_v12 = vpop.f32.mrf.mxu1  ;;  %v6895_v35 = vpop.f32.mrf.mxu0 }
 0x1de   : > { %10060 = vst [vmem:[#allocation16_spill] sm:$0xff] %v8956_v52 }
 0x1df   : > { %v6896_v18 = vpop.f32.mrf.mxu0 }
 0x1e0   : > { %v8960_v2 = vadd.f32 %v6896_v18, %v6895_v35  ;;  %v4462_v35 = vsel %vm7595_vm3, 0, %v4461_v28 }
 0x1e1   : > { %v6898_v16 = vpop.f32.mrf.mxu0  ;;  %4463 = vst [vmem:[#allocation3 + $0x18] sm:$0x1] %v4462_v35 }
 0x1e2   : > { %v8958_v10 = vpop.f32.mrf.mxu1  ;;  %10061 = vst [vmem:[#allocation33_spill] sm:$0xff] %v8960_v2 }
 0x1e3   : > { %v6899_v59 = vpop.f32.mrf.mxu0 }
 0x1e4   : > { %v8962_v38 = vpop.f32.mrf.mxu1  ;;  %v8966_v53 = vadd.f32 %v6899_v59, %v6898_v16 }
 0x1e5   : > { %v6901_v32 = vpop.f32.mrf.mxu0 }
 0x1e6   : > { %v8964_v1 = vpop.f32.mrf.mxu1  ;;  %10062 = vst [vmem:[#allocation11_spill] sm:$0xff] %v8966_v53 }
 0x1e7   : > { %v6902_v6 = vpop.f32.mrf.mxu0 }
 0x1e8   : > { %v8970_v14 = vpop.f32.mrf.mxu1  ;;  %v8972_v57 = vadd.f32 %v6902_v6, %v6901_v32 }
 0x1e9   : > { %v6904_v0 = vpop.f32.mrf.mxu0 }
 0x1ea   : > { %10063 = vst [vmem:[#allocation18_spill] sm:$0xff] %v8972_v57 }
 0x1eb   : > { %v6905_v16 = vpop.f32.mrf.mxu0 }
 0x1ec   : > { %v8980_v53 = vadd.f32 %v6905_v16, %v6904_v0 }
 0x1ed   : > { %v8976_v18 = vpop.f32.mrf.mxu1  ;;  %v6907_v20 = vpop.f32.mrf.mxu0 }
 0x1ee   : > { %10064 = vst [vmem:[#allocation8_spill] sm:$0xff] %v8980_v53 }
 0x1ef   : > { %v8978_v59 = vpop.f32.mrf.mxu1  ;;  %v6908_v2 = vpop.f32.mrf.mxu0 }
 0x1f0   : > { %v8984_v37 = vadd.f32 %v6908_v2, %v6907_v20  ;;  %v4495_v20 = vsel %vm7604_vm5, 0, %v4494_v44 }
 0x1f1   : > { %v8982_v52 = vpop.f32.mrf.mxu1  ;;  %v6910_v32 = vpop.f32.mrf.mxu0  ;;  %4496 = vst [vmem:[#allocation3 + $0x24] sm:$0x1] %v4495_v20 }
 0x1f2   : > { %10065 = vst [vmem:[#allocation29_spill] sm:$0xff] %v8984_v37 }
 0x1f3   : > { %v6911_v6 = vpop.f32.mrf.mxu0  ;;  %v8986_v57 = vpop.f32.mrf.mxu1 }
 0x1f4   : > { %v8988_v3 = vadd.f32 %v6911_v6, %v6910_v32 }
 0x1f5   : > { %v6913_v28 = vpop.f32.mrf.mxu0 }
 0x1f6   : > { %10066 = vst [vmem:[#allocation13_spill] sm:$0xff] %v8988_v3  ;;  %v7555_v3 = vmov 1983009808  }
 0x1f7   : > { %v6914_v5 = vpop.f32.mrf.mxu0  ;;  %v3664_v60 = vunpack.c.l.s4 %v7555_v3 }
 0x1f8   : > { %v8992_v34 = vadd.f32 %v6914_v5, %v6913_v28  ;;  %v3666_v5 = vlaneseq  ;;  %v4464_v28 = vld [vmem:[#allocation3 + $0x20] sm:$0x1] }
 0x1f9   : > { %v6916_v0 = vpop.f32.mrf.mxu0  ;;  %v4465_v19 = vsel %vm7595_vm3, 0, %v4464_v28  ;;  %v6955_v28 = vadd.f32 %v8898_v26, %v8896_v4  ;;  %v6973_v4 = vadd.f32 %v8940_v42, %v8936_v50  ;;  %v6985_v50 = vadd.f32 %v8970_v14, %v8964_v1 }
 0x1fa   : > { %v8990_v35 = vpop.f32.mrf.mxu1  ;;  %10067 = vst [vmem:[#allocation15_spill] sm:$0xff] %v8992_v34  ;;  %4466 = vst [vmem:[#allocation3 + $0x20] sm:$0x1] %v4465_v19  ;;  %v3667_v3 = vshrl.u32 %v3666_v5, 7  ;;  %v6958_v19 = vadd.f32 %v8904_v27, %v8902_v49 }
 0x1fb   : > { %v6917_v53 = vpop.f32.mrf.mxu0 }
 0x1fc   : > { %v8994_v16 = vpop.f32.mrf.mxu1  ;;  %v8998_v2 = vadd.f32 %v6917_v53, %v6916_v0  ;;  %v6946_v53 = vadd.f32 %v8874_v54, %v8870_v39  ;;  %v6949_v0 = vadd.f32 %v8882_v17, %v8878_v47  ;;  %v6961_v39 = vadd.f32 %v8912_v11, %v8908_v58 }
 0x1fd   : > { %v6919_v32 = vpop.f32.mrf.mxu0  ;;  %v6964_v47 = vadd.f32 %v8918_v56, %v8916_v23  ;;  %v6967_v17 = vadd.f32 %v8924_v63, %v8922_v8  ;;  %v6976_v58 = vadd.f32 %v8948_v36, %v8944_v29  ;;  %v6979_v11 = vadd.f32 %v8954_v12, %v8950_v21 }
 0x1fe   : > { %v8996_v31 = vpop.f32.mrf.mxu1  ;;  %10069 = vst [vmem:[#allocation17_spill] sm:$0xff] %v8998_v2  ;;  %v3665_v2 = vunpack.c.0.s8 %v3664_v60  ;;  %v3240_v33 = vadd.f32 %v6946_v53, %v8860_v55  ;;  %v6970_v60 = vadd.f32 %v8932_v62, %v8928_v30  ;;  %v3243_v27 = vadd.f32 %v6949_v0, %v8862_v51 }
 0x1ff   : > { %10068 = vst [vmem:[#allocation20_spill] sm:$0xff] %v8996_v31  ;;  %v6920_v37 = vpop.f32.mrf.mxu0  ;;  %v3248_v55 = vadd.f32 %v6952_v15, %v8864_v61  ;;  %v6982_v8 = vadd.f32 %v8962_v38, %v8958_v10  ;;  %v3251_v51 = vadd.f32 %v6955_v28, %v8866_v46  ;;  %v3256_v30 = vadd.f32 %v6958_v19, %v8868_v9  ;;  %v10074_v28 = vld [vmem:[#allocation14_spill] sm:$0xff] }
 0x200   : > { %v6996_v6 = vpop.f32.mrf.mxu1  ;;  %v9002_v43 = vadd.f32 %v6920_v37, %v6919_v32  ;;  %v9029_v49 = vsub.s32 %v3665_v2, %v3667_v3  ;;  %v9049_v62 = vadd.f32 %v6961_v39, %v8872_v41  ;;  %v3264_v42 = vadd.f32 %v6964_v47, %v8876_v7 }
 0x201   : > { %v6922_v31 = vpop.f32.mrf.mxu0  ;;  %v9055_v29 = vadd.f32 %v6967_v17, %v8880_v40  ;;  %v6988_v36 = vadd.f32 %v8978_v59, %v8976_v18  ;;  %v6991_v46 = vadd.f32 %v8986_v57, %v8982_v52  ;;  %v9062_v41 = vadd.f32 %v6970_v60, %v8884_v25 }
 0x202   : > { %v6998_v34 = vpop.f32.mrf.mxu1  ;;  %10070 = vst [vmem:[#allocation22_spill] sm:$0xff] %v9002_v43  ;;  %v9065_v21 = vadd.f32 %v6973_v4, %v8894_v22  ;;  %v9069_v40 = vadd.f32 %v6976_v58, %v8900_v13  ;;  %v9072_v38 = vadd.f32 %v6979_v11, %v8906_v24  ;;  %v6994_v52 = vadd.f32 %v8994_v16, %v8990_v35  ;;  %v10072_v22 = vld [vmem:[#allocation7_spill] sm:$0xff]  ;;  %v10073_v13 = vld [vmem:[#allocation28_spill] sm:$0xff]  ;;  %v10075_v16 = vld [vmem:[#allocation25_spill] sm:$0xff] }
 0x203   : > { %v6923_v20 = vpop.f32.mrf.mxu0  ;;  %v9078_v18 = vadd.f32 %v6982_v8, %v10072_v22  ;;  %v9082_v0 = vadd.f32 %v6985_v50, %v10073_v13  ;;  %v9085_v35 = vadd.f32 %v6988_v36, %v10074_v28  ;;  %v10078_v4 = vld [vmem:[#allocation34_spill] sm:$0xff] }
 0x204   : > { %v6999_v44 = vpop.f32.mrf.mxu1  ;;  %v9012_v32 = vadd.f32 %v6923_v20, %v6922_v31  ;;  %v9044_v31 = vld [vmem:[%s9911_s2] ss:$0 sm:$0xff]  ;;  %v10079_v50 = vld [vmem:[#allocation10_spill] sm:$0xff] }
 0x205   : > { %v6925_v54 = vpop.f32.mrf.mxu0  ;;  %v7000_v14 = vadd.f32 %v6999_v44, %v6998_v34  ;;  %v9088_v34 = vadd.f32 %v6991_v46, %v10075_v16 }
 0x206   : > { %v7001_v37 = vpop.f32.mrf.mxu1  ;;  %v10071_v1 = vld [vmem:[#allocation20_spill] sm:$0xff] }
 0x207   : > { %v6926_v26 = vpop.f32.mrf.mxu0  ;;  %v6997_v25 = vadd.f32 %v6996_v6, %v10071_v1 }
 0x208   : > { %v7002_v48 = vpop.f32.mrf.mxu1  ;;  %v9036_v56 = vadd.f32 %v6926_v26, %v6925_v54 }
 0x209   : > { %v7158_v63 = vpop.f32.mrf.mxu0  ;;  %v7003_v24 = vadd.f32 %v7002_v48, %v7001_v37  ;;  %v10077_v37 = vld [vmem:[#allocation9_spill] sm:$0xff]  ;;  %v9099_v26 = vadd.f32 %v6997_v25, %v10078_v4 }
 0x20a   : > { %v7004_v23 = vpop.f32.mrf.mxu1  ;;  %v3409_v15 = vadd.f32 %v7158_v63, %v3248_v55  ;;  %v9096_v48 = vadd.f32 %v6994_v52, %v10077_v37  ;;  %v10081_v52 = vld [vmem:[#allocation33_spill] sm:$0xff] }
 0x20b   : > { %v3400_v9 = vpop.f32.mrf.mxu0 }
 0x20c   : > { %v7005_v61 = vpop.f32.mrf.mxu1  ;;  %v3536_v10 = vadd.f32 %v9044_v31, %v3409_v15  ;;  %v3401_v7 = vadd.f32 %v3400_v9, %v3240_v33  ;;  %v10076_v33 = vld [vmem:[#allocation27_spill] sm:$0xff]  ;;  %v10080_v15 = vld [vmem:[#allocation16_spill] sm:$0xff] }
 0x20d   : > { %v7159_v57 = vpop.f32.mrf.mxu0  ;;  %v7006_v20 = vadd.f32 %v7005_v61, %v7004_v23  ;;  %v9093_v60 = vadd.f32 %v7000_v14, %v10076_v33  ;;  %v9104_v61 = vadd.f32 %v7003_v24, %v10079_v50 }
 0x20e   : > { %v7007_v12 = vpop.f32.mrf.mxu1  ;;  %v3568_v2 = vmax.f32 %v3536_v10, 0.0  ;;  %v3534_v5 = vadd.f32 %v9044_v31, %v3401_v7  ;;  %v3412_v53 = vadd.f32 %v7159_v57, %v3251_v51  ;;  %v4497_v7 = vld [vmem:[#allocation3 + $0x2c] sm:$0x1] }
 0x20f   : > { %v3403_v3 = vpop.f32.mrf.mxu0  ;;  %v9107_v36 = vadd.f32 %v7006_v20, %v10080_v15 }
 0x210   : > { %v7008_v59 = vpop.f32.mrf.mxu1  ;;  %v3566_v19 = vmax.f32 %v3534_v5, 0.0  ;;  %v3537_v39 = vadd.f32 %v9044_v31, %v3412_v53  ;;  %v3404_v54 = vadd.f32 %v3403_v3, %v3243_v27  ;;  %v3599_v47 = vsel %vm2483_vm11, %v3568_v2, -inf }
 0x211   : > { %v7009_v6 = vadd.f32 %v7008_v59, %v7007_v12  ;;  %v7162_v17 = vpop.f32.mrf.mxu0  ;;  %v4498_v59 = vsel %vm7604_vm5, 0, %v4497_v7 }
 0x212   : > { %v7010_v44 = vpop.f32.mrf.mxu1  ;;  %v3598_v11 = vsel %vm2483_vm11, %v3566_v19, -inf  ;;  %v3569_v23 = vmax.f32 %v3537_v39, 0.0  ;;  %v3535_v55 = vadd.f32 %v9044_v31, %v3404_v54  ;;  %v3425_v8 = vadd.f32 %v7162_v17, %v3264_v42  ;;  %4499 = vst [vmem:[#allocation3 + $0x2c] sm:$0x1] %v4498_v59 }
 0x213   : > { %v3600_v63 = vmax.f32 %v3598_v11, %v3599_v47  ;;  %v3416_v51 = vpop.f32.mrf.mxu0  ;;  %v9111_v1 = vadd.f32 %v7009_v6, %v10081_v52 }
 0x214   : > { %v7011_v58 = vpop.f32.mrf.mxu1  ;;  %v3567_v9 = vmax.f32 %v3535_v55, 0.0  ;;  %v3540_v12 = vadd.f32 %v9044_v31, %v3425_v8  ;;  %v3417_v10 = vadd.f32 %v3416_v51, %v3256_v30  ;;  %v3602_v14 = vsel %vm2483_vm11, %v3569_v23, -inf  ;;  %v10083_v30 = vld [vmem:[#allocation11_spill] sm:$0xff] }
 0x215   : > { %v7012_v27 = vadd.f32 %v7011_v58, %v7010_v44  ;;  %v3662_v25 = vcombine.high %v3600_v63, %v3600_v63  ;;  %v3669_v42 = vrot.slane %v3600_v63, %v9029_v49  ;;  %v7163_v57 = vpop.f32.mrf.mxu0 }
 0x216   : > { %v7013_v46 = vpop.f32.mrf.mxu1  ;;  %v3601_v5 = vsel %vm2483_vm11, %v3567_v9, -inf  ;;  %v3572_v53 = vmax.f32 %v3540_v12, 0.0  ;;  %v3538_v13 = vadd.f32 %v9044_v31, %v3417_v10  ;;  %v3428_v16 = vadd.f32 %v7163_v57, %v9055_v29 }
 0x217   : > { %v9120_v24 = vadd.f32 %v7012_v27, %v10083_v30  ;;  %v3676_v20 = vrot.slane %v3662_v25, %v9029_v49  ;;  %v3677_v3 = vcombine.high %v3669_v42, %v3669_v42  ;;  %v3999_v28 = vsel %vm3998_vm12, %v3669_v42, -inf }
 0x218   : > { %v7014_v2 = vpop.f32.mrf.mxu1  ;;  %v4000_v19 = vrot.slane %v3999_v28, 4  ;;  %v3603_v39 = vmax.f32 %v3601_v5, %v3602_v14  ;;  %v3570_v54 = vmax.f32 %v3538_v13, 0.0  ;;  %v3605_v37 = vsel %vm2483_vm11, %v3572_v53, -inf }
 0x219   : > { %v9125_v6 = vadd.f32 %v7014_v2, %v7013_v46  ;;  %v3678_v47 = vcombine.high %v3676_v20, %v3676_v20  ;;  %v4006_v17 = vsel %vm3998_vm12, %v3677_v3, -inf  ;;  %v4013_v33 = vsel %vm3998_vm12, %v3676_v20, -inf }
 0x21a   : > { %v7016_v44 = vpop.f32.mrf.mxu1  ;;  %v4001_v58 = vmax.f32 %v3999_v28, %v4000_v19  ;;  %v4007_v11 = vrot.slane %v4006_v17, 4  ;;  %v4014_v23 = vrot.slane %v4013_v33, 4  ;;  %v3679_v55 = vcombine.high %v3603_v39, %v3603_v39 }
 0x21b   : > { %v4020_v29 = vsel %vm3998_vm12, %v3678_v47, -inf  ;;  %v3686_v8 = vrot.slane %v3603_v39, %v9029_v49  ;;  %v3604_v27 = vsel %vm2483_vm11, %v3570_v54, -inf  ;;  %v9134_v63 = vadd.f32 %v9044_v31, %v3428_v16 }
 0x21c   : > { %v7017_v4 = vpop.f32.mrf.mxu1  ;;  %v4002_v51 = vrot.slane %v4001_v58, 2  ;;  %v4008_v50 = vmax.f32 %v4006_v17, %v4007_v11  ;;  %v4015_v15 = vmax.f32 %v4013_v33, %v4014_v23  ;;  %v4021_v46 = vrot.slane %v4020_v29, 4 }
 0x21d   : > { %v3693_v12 = vrot.slane %v3679_v55, %v9029_v49  ;;  %v3694_v10 = vcombine.high %v3686_v8, %v3686_v8  ;;  %v4027_v7 = vsel %vm3998_vm12, %v3686_v8, -inf  ;;  %v9138_v52 = vmax.f32 %v3604_v27, %v3605_v37 }
 0x21e   : > { %v7019_v9 = vpop.f32.mrf.mxu1  ;;  %v4003_v25 = vmax.f32 %v4001_v58, %v4002_v51  ;;  %v4009_v42 = vrot.slane %v4008_v50, 2  ;;  %v4016_v14 = vrot.slane %v4015_v15, 2  ;;  %v4022_v57 = vmax.f32 %v4020_v29, %v4021_v46 }
 0x21f   : > { %v9140_v59 = vadd.f32 %v7017_v4, %v7016_v44  ;;  %v3695_v2 = vcombine.high %v3693_v12, %v3693_v12  ;;  %v4028_v5 = vrot.slane %v4027_v7, 4  ;;  %v4034_v53 = vsel %vm3998_vm12, %v3694_v10, -inf }
 0x220   : > { %v4004_v13 = vrot.slane %v4003_v25, 1  ;;  %v4010_v30 = vmax.f32 %v4008_v50, %v4009_v42  ;;  %v4017_v20 = vmax.f32 %v4015_v15, %v4016_v14  ;;  %v4023_v3 = vrot.slane %v4022_v57, 2  ;;  %v7020_v28 = vpop.f32.mrf.mxu1 }
 0x221   : > { %v4029_v16 = vmax.f32 %v4027_v7, %v4028_v5  ;;  %v4035_v19 = vrot.slane %v4034_v53, 4  ;;  %v4041_v39 = vsel %vm3998_vm12, %v3693_v12, -inf  ;;  %v4048_v54 = vsel %vm3998_vm12, %v3695_v2, -inf }
 0x222   : > { %v4005_v44 = vmax.f32 %v4003_v25, %v4004_v13  ;;  %v4011_v47 = vrot.slane %v4010_v30, 1  ;;  %v4018_v17 = vrot.slane %v4017_v20, 1  ;;  %v4024_v33 = vmax.f32 %v4022_v57, %v4023_v3  ;;  %v9145_v27 = vpop.f32.mrf.mxu1 }
 0x223   : > { %v4030_v37 = vrot.slane %v4029_v16, 2  ;;  %v4036_v4 = vmax.f32 %v4034_v53, %v4035_v19  ;;  %v4042_v58 = vrot.slane %v4041_v39, 4  ;;  %v4049_v11 = vrot.slane %v4048_v54, 4 }
 0x224   : > { %v4012_v23 = vmax.f32 %v4010_v30, %v4011_v47  ;;  %v4019_v55 = vmax.f32 %v4017_v20, %v4018_v17  ;;  %v4025_v29 = vrot.slane %v4024_v33, 1  ;;  %v6744_v8 = vpack.c.bf16 %v4005_v44, %v4005_v44  ;;  %v7023_v20 = vpop.f32.mrf.mxu1  ;;  %v3419_v47 = vpop.f32.mrf.mxu0 }
 0x225   : > { %v4031_v51 = vmax.f32 %v4029_v16, %v4030_v37  ;;  %v4037_v50 = vrot.slane %v4036_v4, 2  ;;  %v4043_v15 = vmax.f32 %v4041_v39, %v4042_v58  ;;  %v4050_v46 = vmax.f32 %v4048_v54, %v4049_v11 }
 0x226   : > { %v4026_v12 = vmax.f32 %v4024_v33, %v4025_v29  ;;  %v6745_v10 = vpack.c.bf16 %v4012_v23, %v4012_v23  ;;  %v6746_v7 = vpack.c.bf16 %v4019_v55, %v4019_v55  ;;  %v9147_v25 = vadd.f32 %v7020_v28, %v7019_v9  ;;  %v7025_v29 = vpop.f32.mrf.mxu1 }
 0x227   : > { %v4032_v42 = vrot.slane %v4031_v51, 1  ;;  %v4038_v14 = vmax.f32 %v4036_v4, %v4037_v50  ;;  %v4044_v57 = vrot.slane %v4043_v15, 2  ;;  %v4051_v2 = vrot.slane %v4050_v46, 2 }
 0x228   : > { %v6747_v5 = vpack.c.bf16 %v4026_v12, %v4026_v12  ;;  %v4768_v53 = vunpack.c.l.b16 %v6744_v8  ;;  %v4769_v13 = vunpack.c.l.b16 %v6745_v10  ;;  %v4770_v30 = vunpack.c.l.b16 %v6746_v7 }
 0x229   : > { %v4033_v3 = vmax.f32 %v4031_v51, %v4032_v42  ;;  %v4039_v16 = vrot.slane %v4038_v14, 1  ;;  %v4045_v19 = vmax.f32 %v4043_v15, %v4044_v57  ;;  %v4052_v39 = vmax.f32 %v4050_v46, %v4051_v2  ;;  %v7166_v42 = vpop.f32.mrf.mxu0 }
 0x22a   : > { %v4771_v54 = vunpack.c.l.b16 %v6747_v5  ;;  %v4833_v44 = vsel %vm4832_vm13, %v4769_v13, %v4768_v53  ;;  %v3696_v9 = vcombine.high %v9138_v52, %v9138_v52  ;;  %v3703_v28 = vrot.slane %v9138_v52, %v9029_v49  ;;  %v4922_v52 = vld [vmem:[#allocation3 + $0xc] sm:$0x1] }
 0x22b   : > { %v4835_v17 = vsel %vm4834_vm14, %v4770_v30, %v4833_v44  ;;  %v4040_v33 = vmax.f32 %v4038_v14, %v4039_v16  ;;  %v4046_v37 = vrot.slane %v4045_v19, 1  ;;  %v4053_v4 = vrot.slane %v4052_v39, 1  ;;  %v7026_v16 = vpop.f32.mrf.mxu1 }
 0x22c   : > { %v6748_v58 = vpack.c.bf16 %v4033_v3, %v4033_v3  ;;  %v4837_v11 = vsel %vm4836_vm15, %v4771_v54, %v4835_v17  ;;  %v3710_v23 = vrot.slane %v3696_v9, %v9029_v49  ;;  %v3711_v55 = vcombine.high %v3703_v28, %v3703_v28 }
 0x22d   : > { %v4047_v8 = vmax.f32 %v4045_v19, %v4046_v37  ;;  %v4054_v51 = vmax.f32 %v4052_v39, %v4053_v4  ;;  %v6749_v50 = vpack.c.bf16 %v4040_v33, %v4040_v33  ;;  %v4055_v15 = vsel %vm3998_vm12, %v3703_v28, -inf  ;;  %v3432_v37 = vpop.f32.mrf.mxu0 }
 0x22e   : > { %v4772_v46 = vunpack.c.l.b16 %v6748_v58  ;;  %v3712_v12 = vcombine.high %v3710_v23, %v3710_v23  ;;  %v4056_v10 = vrot.slane %v4055_v15, 4  ;;  %v4062_v7 = vsel %vm3998_vm12, %v3711_v55, -inf  ;;  %v4919_v58 = vld [vmem:[#allocation3 + $0x8] sm:$0xf] }
 0x22f   : > { %v6750_v14 = vpack.c.bf16 %v4047_v8, %v4047_v8  ;;  %v4773_v57 = vunpack.c.l.b16 %v6749_v50  ;;  %v6808_v2 = vpack.c.bf16 %v4054_v51, %v4054_v51  ;;  %v4063_v5 = vrot.slane %v4062_v7, 4 }
 0x230   : > { %v4839_v53 = vsel %vm4838_vm0, %v4772_v46, %v4837_v11  ;;  %v4057_v13 = vmax.f32 %v4055_v15, %v4056_v10  ;;  %v4069_v30 = vsel %vm3998_vm12, %v3710_v23, -inf  ;;  %v4076_v3 = vsel %vm3998_vm12, %v3712_v12, -inf  ;;  %v7028_v46 = vpop.f32.mrf.mxu1 }
 0x231   : > { %v4774_v19 = vunpack.c.l.b16 %v6750_v14  ;;  %v4841_v39 = vsel %vm4840_vm1, %v4773_v57, %v4839_v53  ;;  %v4923_v54 = vsel %vm7595_vm3, %v6808_v2, %v4922_v52  ;;  %v4064_v44 = vmax.f32 %v4062_v7, %v4063_v5  ;;  %v7167_v2 = vpop.f32.mrf.mxu0 }
 0x232   : > { %4924 = vst [vmem:[#allocation3 + $0xc] sm:$0x1] %v4923_v54  ;;  %v9166_v9 = vadd.f32 %v7023_v20, %v9145_v27  ;;  %v4058_v28 = vrot.slane %v4057_v13, 2  ;;  %v4070_v17 = vrot.slane %v4069_v30, 4  ;;  %v4077_v33 = vrot.slane %v4076_v3, 4 }
 0x233   : > { %v4843_v4 = vsel %vm4842_vm2, %v4774_v19, %v4841_v39  ;;  %v4065_v11 = vrot.slane %v4064_v44, 2  ;;  %v3573_v23 = vmax.f32 %v9134_v63, 0.0  ;;  %v3420_v55 = vadd.f32 %v3419_v47, %v9049_v62 }
 0x234   : > { %v4886_v8 = vpack.c.b16 %v4843_v4, %v4843_v4  ;;  %v4059_v51 = vmax.f32 %v4057_v13, %v4058_v28  ;;  %v4071_v50 = vmax.f32 %v4069_v30, %v4070_v17  ;;  %v4078_v15 = vmax.f32 %v4076_v3, %v4077_v33  ;;  %v7029_v3 = vpop.f32.mrf.mxu1 }
 0x235   : > { %v4066_v52 = vmax.f32 %v4064_v44, %v4065_v11  ;;  %v9171_v27 = vadd.f32 %v7026_v16, %v7025_v29  ;;  %v3539_v20 = vadd.f32 %v9044_v31, %v3420_v55  ;;  %v3441_v12 = vadd.f32 %v7166_v42, %v9069_v40 }
 0x236   : > { %v4920_v7 = vsel %vm7655_vm8, %v4886_v8, %v4919_v58  ;;  %v4060_v14 = vrot.slane %v4059_v51, 1  ;;  %v4072_v57 = vrot.slane %v4071_v50, 2  ;;  %v4079_v63 = vrot.slane %v4078_v15, 2 }
 0x237   : > { %4921 = vst [vmem:[#allocation3 + $0x8] sm:$0xf] %v4920_v7  ;;  %v4067_v62 = vrot.slane %v4066_v52, 1  ;;  %v3608_v47 = vsel %vm2483_vm11, %v3573_v23, -inf  ;;  %v3571_v5 = vmax.f32 %v3539_v20, 0.0  ;;  %v3544_v53 = vadd.f32 %v9044_v31, %v3441_v12 }
 0x238   : > { %v4061_v29 = vmax.f32 %v4059_v51, %v4060_v14  ;;  %v4073_v13 = vmax.f32 %v4071_v50, %v4072_v57  ;;  %v4080_v30 = vmax.f32 %v4078_v15, %v4079_v63  ;;  %v3433_v40 = vadd.f32 %v3432_v37, %v9062_v41 }
 0x239   : > { %v4068_v42 = vmax.f32 %v4066_v52, %v4067_v62  ;;  %v3607_v16 = vsel %vm2483_vm11, %v3571_v5, -inf  ;;  %v3576_v19 = vmax.f32 %v3544_v53, 0.0  ;;  %v3444_v39 = vadd.f32 %v7167_v2, %v9072_v38 }
 0x23a   : > { %v4074_v54 = vrot.slane %v4073_v13, 1  ;;  %v4081_v44 = vrot.slane %v4080_v30, 1  ;;  %v6752_v28 = vpack.c.bf16 %v4061_v29, %v4061_v29  ;;  %v3609_v17 = vmax.f32 %v3607_v16, %v3608_v47 }
 0x23b   : > { %v6753_v33 = vpack.c.bf16 %v4068_v42, %v4068_v42  ;;  %v9182_v4 = vadd.f32 %v7029_v3, %v7028_v46  ;;  %v3542_v58 = vadd.f32 %v9044_v31, %v3433_v40  ;;  %v3545_v11 = vadd.f32 %v9044_v31, %v3444_v39 }
 0x23c   : > { %v4075_v23 = vmax.f32 %v4073_v13, %v4074_v54  ;;  %v4082_v55 = vmax.f32 %v4080_v30, %v4081_v44  ;;  %v4776_v41 = vunpack.c.l.b16 %v6752_v28  ;;  %v3713_v37 = vcombine.high %v3609_v17, %v3609_v17  ;;  %v9194_v13 = vpop.f32.mrf.mxu1 }
 0x23d   : > { %v4777_v8 = vunpack.c.l.b16 %v6753_v33  ;;  %v3720_v51 = vrot.slane %v3609_v17, %v9029_v49  ;;  %v3574_v50 = vmax.f32 %v3542_v58, 0.0  ;;  %v3577_v38 = vmax.f32 %v3545_v11, 0.0 }
 0x23e   : > { %v6754_v15 = vpack.c.bf16 %v4075_v23, %v4075_v23  ;;  %v6755_v52 = vpack.c.bf16 %v4082_v55, %v4082_v55  ;;  %v3727_v20 = vrot.slane %v3713_v37, %v9029_v49  ;;  %v3611_v46 = vsel %vm2483_vm11, %v3576_v19, -inf  ;;  %v3435_v19 = vpop.f32.mrf.mxu0  ;;  %v9205_v37 = vpop.f32.mrf.mxu1 }
 0x23f   : > { %v4844_v12 = vsel %vm4832_vm13, %v4777_v8, %v4776_v41  ;;  %v3728_v7 = vcombine.high %v3720_v51, %v3720_v51  ;;  %v4083_v14 = vsel %vm3998_vm12, %v3720_v51, -inf  ;;  %v3610_v57 = vsel %vm2483_vm11, %v3574_v50, -inf }
 0x240   : > { %v4778_v63 = vunpack.c.l.b16 %v6754_v15  ;;  %v4779_v2 = vunpack.c.l.b16 %v6755_v52  ;;  %v3729_v62 = vcombine.high %v3727_v20, %v3727_v20  ;;  %v4084_v47 = vrot.slane %v4083_v14, 4 }
 0x241   : > { %v4090_v5 = vsel %vm3998_vm12, %v3728_v7, -inf  ;;  %v4097_v53 = vsel %vm3998_vm12, %v3727_v20, -inf  ;;  %v3612_v29 = vmax.f32 %v3610_v57, %v3611_v46  ;;  %v9197_v30 = vsel %vm2483_vm11, %v3577_v38, -inf }
 0x242   : > { %v4845_v3 = vsel %vm4834_vm14, %v4778_v63, %v4844_v12  ;;  %v4085_v40 = vmax.f32 %v4083_v14, %v4084_v47  ;;  %v4091_v42 = vrot.slane %v4090_v5, 4  ;;  %v4098_v16 = vrot.slane %v4097_v53, 4 }
 0x243   : > { %v4104_v39 = vsel %vm3998_vm12, %v3729_v62, -inf  ;;  %v4846_v54 = vsel %vm4836_vm15, %v4779_v2, %v4845_v3  ;;  %v3730_v44 = vcombine.high %v3612_v29, %v3612_v29  ;;  %v3737_v28 = vrot.slane %v3612_v29, %v9029_v49 }
 0x244   : > { %v4086_v17 = vrot.slane %v4085_v40, 2  ;;  %v4092_v33 = vmax.f32 %v4090_v5, %v4091_v42  ;;  %v4099_v58 = vmax.f32 %v4097_v53, %v4098_v16  ;;  %v4105_v11 = vrot.slane %v4104_v39, 4  ;;  %v7170_v42 = vpop.f32.mrf.mxu0 }
 0x245   : > { %v3744_v23 = vrot.slane %v3730_v44, %v9029_v49  ;;  %v3745_v55 = vcombine.high %v3737_v28, %v3737_v28  ;;  %v4111_v41 = vsel %vm3998_vm12, %v3737_v28, -inf  ;;  %v3436_v8 = vadd.f32 %v3435_v19, %v9065_v21  ;;  %v7034_v21 = vpop.f32.mrf.mxu1 }
 0x246   : > { %v4087_v51 = vmax.f32 %v4085_v40, %v4086_v17  ;;  %v4093_v50 = vrot.slane %v4092_v33, 2  ;;  %v4100_v38 = vrot.slane %v4099_v58, 2  ;;  %v4106_v15 = vmax.f32 %v4104_v39, %v4105_v11 }
 0x247   : > { %v3746_v52 = vcombine.high %v3744_v23, %v3744_v23  ;;  %v4112_v20 = vrot.slane %v4111_v41, 4  ;;  %v4118_v46 = vsel %vm3998_vm12, %v3745_v55, -inf  ;;  %v4125_v12 = vsel %vm3998_vm12, %v3744_v23, -inf }
 0x248   : > { %v4088_v7 = vrot.slane %v4087_v51, 1  ;;  %v4094_v14 = vmax.f32 %v4092_v33, %v4093_v50  ;;  %v4101_v57 = vmax.f32 %v4099_v58, %v4100_v38  ;;  %v4107_v63 = vrot.slane %v4106_v15, 2  ;;  %v7035_v50 = vpop.f32.mrf.mxu1 }
 0x249   : > { %v4113_v2 = vmax.f32 %v4111_v41, %v4112_v20  ;;  %v4119_v62 = vrot.slane %v4118_v46, 4  ;;  %v4126_v47 = vrot.slane %v4125_v12, 4  ;;  %v4132_v5 = vsel %vm3998_vm12, %v3746_v52, -inf }
 0x24a   : > { %v4089_v53 = vmax.f32 %v4087_v51, %v4088_v7  ;;  %v4095_v29 = vrot.slane %v4094_v14, 1  ;;  %v4102_v3 = vrot.slane %v4101_v57, 1  ;;  %v4108_v40 = vmax.f32 %v4106_v15, %v4107_v63  ;;  %v3448_v7 = vpop.f32.mrf.mxu0  ;;  %v4928_v15 = vld [vmem:[#allocation3 + $0x14] sm:$0x1] }
 0x24b   : > { %v4114_v16 = vrot.slane %v4113_v2, 2  ;;  %v4120_v19 = vmax.f32 %v4118_v46, %v4119_v62  ;;  %v4127_v39 = vmax.f32 %v4125_v12, %v4126_v47  ;;  %v4133_v44 = vrot.slane %v4132_v5, 4 }
 0x24c   : > { %v4096_v28 = vmax.f32 %v4094_v14, %v4095_v29  ;;  %v4103_v17 = vmax.f32 %v4101_v57, %v4102_v3  ;;  %v4109_v33 = vrot.slane %v4108_v40, 1  ;;  %v6756_v58 = vpack.c.bf16 %v4089_v53, %v4089_v53  ;;  %v7037_v3 = vpop.f32.mrf.mxu1 }
 0x24d   : > { %v4115_v11 = vmax.f32 %v4113_v2, %v4114_v16  ;;  %v4121_v23 = vrot.slane %v4120_v19, 2  ;;  %v4128_v55 = vrot.slane %v4127_v39, 2  ;;  %v4134_v41 = vmax.f32 %v4132_v5, %v4133_v44 }
 0x24e   : > { %v4110_v38 = vmax.f32 %v4108_v40, %v4109_v33  ;;  %v6757_v52 = vpack.c.bf16 %v4096_v28, %v4096_v28  ;;  %v6758_v51 = vpack.c.bf16 %v4103_v17, %v4103_v17  ;;  %v4780_v20 = vunpack.c.l.b16 %v6756_v58  ;;  %v4925_v17 = vld [vmem:[#allocation3 + $0x10] sm:$0xf] }
 0x24f   : > { %v4116_v63 = vrot.slane %v4115_v11, 1  ;;  %v4122_v43 = vmax.f32 %v4120_v19, %v4121_v23  ;;  %v4129_v46 = vmax.f32 %v4127_v39, %v4128_v55  ;;  %v4135_v12 = vrot.slane %v4134_v41, 2  ;;  %v7171_v39 = vpop.f32.mrf.mxu0 }
 0x250   : > { %v4781_v62 = vunpack.c.l.b16 %v6757_v52  ;;  %v4782_v14 = vunpack.c.l.b16 %v6758_v51  ;;  %v4847_v57 = vsel %vm4838_vm0, %v4780_v20, %v4846_v54  ;;  %v6809_v47 = vpack.c.bf16 %v4110_v38, %v4110_v38 }
 0x251   : > { %v4117_v2 = vmax.f32 %v4115_v11, %v4116_v63  ;;  %v4123_v53 = vrot.slane %v4122_v43, 1  ;;  %v4130_v29 = vrot.slane %v4129_v46, 1  ;;  %v4136_v5 = vmax.f32 %v4134_v41, %v4135_v12  ;;  %v3451_v63 = vpop.f32.mrf.mxu0 }
 0x252   : > { %v4848_v40 = vsel %vm4840_vm1, %v4781_v62, %v4847_v57  ;;  %v4929_v16 = vsel %vm7595_vm3, %v6809_v47, %v4928_v15  ;;  %v3543_v44 = vadd.f32 %v9044_v31, %v3436_v8  ;;  %v3457_v19 = vadd.f32 %v7170_v42, %v9085_v35  ;;  %v7038_v8 = vpop.f32.mrf.mxu1 }
 0x253   : > { %v4849_v28 = vsel %vm4842_vm2, %v4782_v14, %v4848_v40  ;;  %4930 = vst [vmem:[#allocation3 + $0x14] sm:$0x1] %v4929_v16  ;;  %v4124_v54 = vmax.f32 %v4122_v43, %v4123_v53  ;;  %v4131_v33 = vmax.f32 %v4129_v46, %v4130_v29  ;;  %v4137_v58 = vrot.slane %v4136_v5, 1 }
 0x254   : > { %v4888_v11 = vpack.c.b16 %v4849_v28, %v4849_v28  ;;  %v6760_v23 = vpack.c.bf16 %v4117_v2, %v4117_v2  ;;  %v3575_v55 = vmax.f32 %v3543_v44, 0.0  ;;  %v3548_v41 = vadd.f32 %v9044_v31, %v3457_v19  ;;  %v7174_v19 = vpop.f32.mrf.mxu0 }
 0x255   : > { %v4138_v38 = vmax.f32 %v4136_v5, %v4137_v58  ;;  %v6761_v52 = vpack.c.bf16 %v4124_v54, %v4124_v54  ;;  %v6762_v51 = vpack.c.bf16 %v4131_v33, %v4131_v33  ;;  %v9219_v20 = vadd.f32 %v7035_v50, %v7034_v21 }
 0x256   : > { %v4926_v35 = vsel %vm7655_vm8, %v4888_v11, %v4925_v17  ;;  %v4784_v42 = vunpack.c.l.b16 %v6760_v23  ;;  %v3613_v15 = vsel %vm2483_vm11, %v3575_v55, -inf  ;;  %v3580_v43 = vmax.f32 %v3548_v41, 0.0 }
 0x257   : > { %4927 = vst [vmem:[#allocation3 + $0x10] sm:$0xf] %v4926_v35  ;;  %v6763_v46 = vpack.c.bf16 %v4138_v38, %v4138_v38  ;;  %v4785_v12 = vunpack.c.l.b16 %v6761_v52  ;;  %v4786_v62 = vunpack.c.l.b16 %v6762_v51  ;;  %v3615_v14 = vmax.f32 %v3613_v15, %v9197_v30 }
 0x258   : > { %v3617_v57 = vsel %vm2483_vm11, %v3580_v43, -inf  ;;  %v3449_v21 = vadd.f32 %v3448_v7, %v9078_v18  ;;  %v3460_v50 = vadd.f32 %v7171_v39, %v9088_v34  ;;  %v9228_v47 = vadd.f32 %v7038_v8, %v7037_v3 }
 0x259   : > { %v4787_v2 = vunpack.c.l.b16 %v6763_v46  ;;  %v4850_v53 = vsel %vm4832_vm13, %v4785_v12, %v4784_v42  ;;  %v3747_v29 = vcombine.high %v3615_v14, %v3615_v14  ;;  %v3754_v5 = vrot.slane %v3615_v14, %v9029_v49 }
 0x25a   : > { %v4851_v40 = vsel %vm4834_vm14, %v4786_v62, %v4850_v53  ;;  %v3546_v16 = vadd.f32 %v9044_v31, %v3449_v21  ;;  %v3549_v30 = vadd.f32 %v9044_v31, %v3460_v50  ;;  %v3452_v44 = vadd.f32 %v3451_v63, %v9082_v0 }
 0x25b   : > { %v3761_v18 = vrot.slane %v3747_v29, %v9029_v49  ;;  %v3762_v34 = vcombine.high %v3754_v5, %v3754_v5  ;;  %v4139_v7 = vsel %vm3998_vm12, %v3754_v5, -inf  ;;  %v9239_v3 = vsel %vm4836_vm15, %v4787_v2, %v4851_v40 }
 0x25c   : > { %v4140_v39 = vrot.slane %v4139_v7, 4  ;;  %v3578_v28 = vmax.f32 %v3546_v16, 0.0  ;;  %v3581_v17 = vmax.f32 %v3549_v30, 0.0  ;;  %v3547_v54 = vadd.f32 %v9044_v31, %v3452_v44 }
 0x25d   : > { %v3763_v33 = vcombine.high %v3761_v18, %v3761_v18  ;;  %v4146_v58 = vsel %vm3998_vm12, %v3762_v34, -inf  ;;  %v4153_v11 = vsel %vm3998_vm12, %v3761_v18, -inf  ;;  %v3473_v0 = vadd.f32 %v7174_v19, %v9093_v60 }
 0x25e   : > { %v4141_v23 = vmax.f32 %v4139_v7, %v4140_v39  ;;  %v4147_v55 = vrot.slane %v4146_v58, 4  ;;  %v4154_v41 = vrot.slane %v4153_v11, 4  ;;  %v3616_v38 = vsel %vm2483_vm11, %v3578_v28, -inf }
 0x25f   : > { %v4160_v52 = vsel %vm3998_vm12, %v3763_v33, -inf  ;;  %v3618_v51 = vmax.f32 %v3616_v38, %v3617_v57  ;;  %v3620_v8 = vsel %vm2483_vm11, %v3581_v17, -inf  ;;  %v3579_v35 = vmax.f32 %v3547_v54, 0.0 }
 0x260   : > { %v4142_v42 = vrot.slane %v4141_v23, 2  ;;  %v4148_v15 = vmax.f32 %v4146_v58, %v4147_v55  ;;  %v4155_v43 = vmax.f32 %v4153_v11, %v4154_v41  ;;  %v4161_v63 = vrot.slane %v4160_v52, 4 }
 0x261   : > { %v3764_v46 = vcombine.high %v3618_v51, %v3618_v51  ;;  %v3771_v12 = vrot.slane %v3618_v51, %v9029_v49  ;;  %v3619_v60 = vsel %vm2483_vm11, %v3579_v35, -inf  ;;  %v9251_v62 = vadd.f32 %v9044_v31, %v3473_v0 }
 0x262   : > { %v4143_v14 = vmax.f32 %v4141_v23, %v4142_v42  ;;  %v4149_v21 = vrot.slane %v4148_v15, 2  ;;  %v4156_v50 = vrot.slane %v4155_v43, 2  ;;  %v4162_v2 = vmax.f32 %v4160_v52, %v4161_v63  ;;  %v4934_v63 = vld [vmem:[#allocation3 + $0x1c] sm:$0x1] }
 0x263   : > { %v3778_v57 = vrot.slane %v3764_v46, %v9029_v49  ;;  %v3779_v53 = vcombine.high %v3771_v12, %v3771_v12  ;;  %v4167_v29 = vsel %vm3998_vm12, %v3771_v12, -inf  ;;  %v3621_v5 = vmax.f32 %v3619_v60, %v3620_v8 }
 0x264   : > { %v4144_v40 = vrot.slane %v4143_v14, 1  ;;  %v4150_v16 = vmax.f32 %v4148_v15, %v4149_v21  ;;  %v4157_v30 = vmax.f32 %v4155_v43, %v4156_v50  ;;  %v4163_v44 = vrot.slane %v4162_v2, 2 }
 0x265   : > { %v3780_v19 = vcombine.high %v3778_v57, %v3778_v57  ;;  %v4168_v18 = vrot.slane %v4167_v29, 4  ;;  %v4174_v34 = vsel %vm3998_vm12, %v3779_v53, -inf  ;;  %v4181_v31 = vsel %vm3998_vm12, %v3778_v57, -inf }
 0x266   : > { %v4145_v7 = vmax.f32 %v4143_v14, %v4144_v40  ;;  %v4151_v39 = vrot.slane %v4150_v16, 1  ;;  %v4158_v28 = vrot.slane %v4157_v30, 1  ;;  %v4164_v17 = vmax.f32 %v4162_v2, %v4163_v44 }
 0x267   : > { %v4169_v54 = vmax.f32 %v4167_v29, %v4168_v18  ;;  %v4175_v33 = vrot.slane %v4174_v34, 4  ;;  %v4182_v58 = vrot.slane %v4181_v31, 4  ;;  %v4188_v11 = vsel %vm3998_vm12, %v3780_v19, -inf }
 0x268   : > { %v4152_v0 = vmax.f32 %v4150_v16, %v4151_v39  ;;  %v4159_v23 = vmax.f32 %v4157_v30, %v4158_v28  ;;  %v4165_v55 = vrot.slane %v4164_v17, 1  ;;  %v6764_v41 = vpack.c.bf16 %v4145_v7, %v4145_v7 }
 0x269   : > { %v4170_v38 = vrot.slane %v4169_v54, 2  ;;  %v4176_v52 = vmax.f32 %v4174_v34, %v4175_v33  ;;  %v4183_v51 = vmax.f32 %v4181_v31, %v4182_v58  ;;  %v4189_v8 = vrot.slane %v4188_v11, 4  ;;  %v4931_v31 = vld [vmem:[#allocation3 + $0x18] sm:$0xf]  ;;  %v3464_v58 = vpop.f32.mrf.mxu0 }
 0x26a   : > { %v4166_v35 = vmax.f32 %v4164_v17, %v4165_v55  ;;  %v6765_v42 = vpack.c.bf16 %v4152_v0, %v4152_v0  ;;  %v6766_v15 = vpack.c.bf16 %v4159_v23, %v4159_v23  ;;  %v4788_v43 = vunpack.c.l.b16 %v6764_v41 }
 0x26b   : > { %v4171_v46 = vmax.f32 %v4169_v54, %v4170_v38  ;;  %v4177_v12 = vrot.slane %v4176_v52, 2  ;;  %v4184_v60 = vrot.slane %v4183_v51, 2  ;;  %v4190_v14 = vmax.f32 %v4188_v11, %v4189_v8 }
 0x26c   : > { %v4789_v21 = vunpack.c.l.b16 %v6765_v42  ;;  %v4790_v50 = vunpack.c.l.b16 %v6766_v15  ;;  %v4853_v2 = vsel %vm4838_vm0, %v4788_v43, %v9239_v3  ;;  %v6810_v57 = vpack.c.bf16 %v4166_v35, %v4166_v35 }
 0x26d   : > { %v4172_v53 = vrot.slane %v4171_v46, 1  ;;  %v4178_v29 = vmax.f32 %v4176_v52, %v4177_v12  ;;  %v4185_v40 = vmax.f32 %v4183_v51, %v4184_v60  ;;  %v4191_v16 = vrot.slane %v4190_v14, 2  ;;  %v7175_v12 = vpop.f32.mrf.mxu0 }
 0x26e   : > { %v4854_v30 = vsel %vm4840_vm1, %v4789_v21, %v4853_v2  ;;  %v4935_v44 = vsel %vm7595_vm3, %v6810_v57, %v4934_v63  ;;  %v3781_v19 = vcombine.high %v3621_v5, %v3621_v5  ;;  %v3788_v18 = vrot.slane %v3621_v5, %v9029_v49 }
 0x26f   : > { %v4855_v34 = vsel %vm4842_vm2, %v4790_v50, %v4854_v30  ;;  %4936 = vst [vmem:[#allocation3 + $0x1c] sm:$0x1] %v4935_v44  ;;  %v4173_v7 = vmax.f32 %v4171_v46, %v4172_v53  ;;  %v4179_v39 = vrot.slane %v4178_v29, 1  ;;  %v4186_v3 = vrot.slane %v4185_v40, 1 }
 0x270   : > { %v4890_v28 = vpack.c.b16 %v4855_v34, %v4855_v34  ;;  %v4192_v17 = vmax.f32 %v4190_v14, %v4191_v16  ;;  %v3795_v54 = vrot.slane %v3781_v19, %v9029_v49  ;;  %v3796_v33 = vcombine.high %v3788_v18, %v3788_v18 }
 0x271   : > { %v4180_v11 = vmax.f32 %v4178_v29, %v4179_v39  ;;  %v4187_v0 = vmax.f32 %v4185_v40, %v4186_v3  ;;  %v6768_v23 = vpack.c.bf16 %v4173_v7, %v4173_v7  ;;  %v4195_v55 = vsel %vm3998_vm12, %v3788_v18, -inf  ;;  %v3467_v7 = vpop.f32.mrf.mxu0 }
 0x272   : > { %v4932_v5 = vsel %vm7655_vm8, %v4890_v28, %v4931_v31  ;;  %v4193_v41 = vrot.slane %v4192_v17, 1  ;;  %v3797_v38 = vcombine.high %v3795_v54, %v3795_v54  ;;  %v4196_v52 = vrot.slane %v4195_v55, 4 }
 0x273   : > { %4933 = vst [vmem:[#allocation3 + $0x18] sm:$0xf] %v4932_v5  ;;  %v6769_v51 = vpack.c.bf16 %v4180_v11, %v4180_v11  ;;  %v6770_v8 = vpack.c.bf16 %v4187_v0, %v4187_v0  ;;  %v4792_v35 = vunpack.c.l.b16 %v6768_v23  ;;  %v4202_v42 = vsel %vm3998_vm12, %v3796_v33, -inf }
 0x274   : > { %v4194_v15 = vmax.f32 %v4192_v17, %v4193_v41  ;;  %v4197_v43 = vmax.f32 %v4195_v55, %v4196_v52  ;;  %v4203_v63 = vrot.slane %v4202_v42, 4  ;;  %v4209_v46 = vsel %vm3998_vm12, %v3795_v54, -inf  ;;  %v9280_v17 = vld [vmem:[%s9911_s2] ss:$0 sm:$0xff] }
 0x275   : > { %v4793_v60 = vunpack.c.l.b16 %v6769_v51  ;;  %v4794_v14 = vunpack.c.l.b16 %v6770_v8  ;;  %v4210_v21 = vrot.slane %v4209_v46, 4  ;;  %v4216_v50 = vsel %vm3998_vm12, %v3797_v38, -inf  ;;  %v7178_v8 = vpop.f32.mrf.mxu0 }
 0x276   : > { %v6771_v2 = vpack.c.bf16 %v4194_v15, %v4194_v15  ;;  %v4198_v57 = vrot.slane %v4197_v43, 2  ;;  %v4204_v53 = vmax.f32 %v4202_v42, %v4203_v63  ;;  %v4217_v29 = vrot.slane %v4216_v50, 4 }
 0x277   : > { %v4856_v40 = vsel %vm4832_vm13, %v4793_v60, %v4792_v35  ;;  %v4211_v16 = vmax.f32 %v4209_v46, %v4210_v21  ;;  %v3584_v30 = vmax.f32 %v9251_v62, 0.0  ;;  %v3465_v44 = vadd.f32 %v3464_v58, %v9096_v48  ;;  %v4467_v62 = vld [vmem:[#allocation3 + $0x28] sm:$0x1] }
 0x278   : > { %v4795_v19 = vunpack.c.l.b16 %v6771_v2  ;;  %v4857_v18 = vsel %vm4834_vm14, %v4794_v14, %v4856_v40  ;;  %v4199_v34 = vmax.f32 %v4197_v43, %v4198_v57  ;;  %v4205_v31 = vrot.slane %v4204_v53, 2 }
 0x279   : > { %v4212_v39 = vrot.slane %v4211_v16, 2  ;;  %v4218_v3 = vmax.f32 %v4216_v50, %v4217_v29  ;;  %v3623_v28 = vsel %vm2483_vm11, %v3584_v30, -inf  ;;  %v3550_v54 = vadd.f32 %v9280_v17, %v3465_v44  ;;  %v7385_v29 = vld [vmem:[%s9912_s3 + $0x118] sm:$0xff]  }
 0x27a   : > { %v4200_v33 = vrot.slane %v4199_v34, 1  ;;  %v4206_v48 = vmax.f32 %v4204_v53, %v4205_v31  ;;  %v4858_v58 = vsel %vm4836_vm15, %v4795_v19, %v4857_v18  ;;  %v3476_v11 = vadd.f32 %v7175_v12, %v9104_v61  ;;  %v7389_v19 = vld [vmem:[%s9912_s3 + $0x110] sm:$0xff]   ;;  %v4940_v31 = vld [vmem:[#allocation3 + $0x24] sm:$0x1]  ;;  %7188 = vmatprep.subr.bf16.mxu0 %v7385_v29 }
 0x27b   : > { %v4213_v0 = vmax.f32 %v4211_v16, %v4212_v39  ;;  %v4219_v23 = vrot.slane %v4218_v3, 2  ;;  %v3582_v55 = vmax.f32 %v3550_v54, 0.0  ;;  %v3468_v5 = vadd.f32 %v3467_v7, %v9099_v26  ;;  %7189 = vmatpush3.bf16.msra.mxu0 %v7385_v29 }
 0x27c   : > { %v4201_v41 = vmax.f32 %v4199_v34, %v4200_v33  ;;  %v4207_v38 = vrot.slane %v4206_v48, 1  ;;  %v3553_v52 = vadd.f32 %v9280_v17, %v3476_v11  ;;  %v4468_v51 = vsel %vm7595_vm3, 0, %v4467_v62  ;;  %7190 = vmatprep.subr.bf16.mxu0 %v7389_v19 }
 0x27d   : > { %v4214_v35 = vrot.slane %v4213_v0, 1  ;;  %v4220_v42 = vmax.f32 %v4218_v3, %v4219_v23  ;;  %v3622_v15 = vsel %vm2483_vm11, %v3582_v55, -inf  ;;  %v3551_v43 = vadd.f32 %v9280_v17, %v3468_v5  ;;  %4469 = vst [vmem:[#allocation3 + $0x28] sm:$0x1] %v4468_v51  ;;  %v7392_v3 = vld [vmem:[%s9912_s3 + $0x38] sm:$0xff]   ;;  %v7393_v55 = vld [vmem:[%s9912_s3 + $0x108] sm:$0xff]  }
 0x27e   : > { %v4208_v61 = vmax.f32 %v4206_v48, %v4207_v38  ;;  %v6772_v63 = vpack.c.bf16 %v4201_v41, %v4201_v41  ;;  %v3624_v46 = vmax.f32 %v3622_v15, %v3623_v28  ;;  %v3585_v12 = vmax.f32 %v3553_v52, 0.0  ;;  %v7401_v48 = vld [vmem:[%s9912_s3 + $0x70] sm:$0xff]   ;;  %v4937_v38 = vld [vmem:[#allocation3 + $0x20] sm:$0xf] }
 0x27f   : > { %v4215_v26 = vmax.f32 %v4213_v0, %v4214_v35  ;;  %v4221_v60 = vrot.slane %v4220_v42, 1  ;;  %v3583_v14 = vmax.f32 %v3551_v43, 0.0  ;;  %v3489_v21 = vadd.f32 %v7178_v8, %v9120_v24  ;;  %v7391_v24 = vld [vmem:[%s9912_s3 + $0x78] sm:$0xff]   ;;  %v7402_v5 = vld [vmem:[%s9912_s3 + $0x30] sm:$0xff]   ;;  %7191 = vmatpush3.bf16.msra.mxu0 %v7389_v19 }
 0x280   : > { %v6773_v50 = vpack.c.bf16 %v4208_v61, %v4208_v61  ;;  %v4796_v2 = vunpack.c.l.b16 %v6772_v63  ;;  %v3798_v57 = vcombine.high %v3624_v46, %v3624_v46  ;;  %v3805_v53 = vrot.slane %v3624_v46, %v9029_v49  ;;  %7060 = vmatprep.subr.bf16.mxu1 %v7391_v24  ;;  %7192 = vmatprep.subr.bf16.mxu0 %v7393_v55 }
 0x281   : > { %v4222_v40 = vmax.f32 %v4220_v42, %v4221_v60  ;;  %v6774_v16 = vpack.c.bf16 %v4215_v26, %v4215_v26  ;;  %v3626_v30 = vsel %vm2483_vm11, %v3585_v12, -inf  ;;  %v3625_v44 = vsel %vm2483_vm11, %v3583_v14, -inf  ;;  %7061 = vmatpush3.bf16.msra.mxu1 %v7392_v3 }
 0x282   : > { %v4797_v18 = vunpack.c.l.b16 %v6773_v50  ;;  %v4859_v34 = vsel %vm4838_vm0, %v4796_v2, %v4858_v58  ;;  %v3812_v7 = vrot.slane %v3798_v57, %v9029_v49  ;;  %v3813_v39 = vcombine.high %v3805_v53, %v3805_v53  ;;  %7062 = vmatprep.subr.bf16.mxu1 %v7401_v48  ;;  %v7395_v2 = vld [vmem:[%s9912_s3 + $0x100] sm:$0xff]   ;;  %v3480_v48 = vpop.f32.mrf.mxu0 }
 0x283   : > { %v4798_v28 = vunpack.c.l.b16 %v6774_v16  ;;  %v6811_v54 = vpack.c.bf16 %v4222_v40, %v4222_v40  ;;  %v4223_v62 = vsel %vm3998_vm12, %v3805_v53, -inf  ;;  %v3627_v33 = vmax.f32 %v3625_v44, %v3626_v30  ;;  %7193 = vmatpush3.bf16.msra.mxu0 %v7393_v55  ;;  %v7408_v55 = vld [vmem:[%s9912_s3 + $0x68] sm:$0xff]  }
 0x284   : > { %v4860_v58 = vsel %vm4840_vm1, %v4797_v18, %v4859_v34  ;;  %v3814_v11 = vcombine.high %v3812_v7, %v3812_v7  ;;  %v4224_v0 = vrot.slane %v4223_v62, 4  ;;  %v4230_v23 = vsel %vm3998_vm12, %v3813_v39, -inf  ;;  %7194 = vmatprep.subr.bf16.mxu0 %v7395_v2 }
 0x285   : > { %v4861_v41 = vsel %vm4842_vm2, %v4798_v28, %v4860_v58  ;;  %v4941_v52 = vsel %vm7595_vm3, %v6811_v54, %v4940_v31  ;;  %v4231_v51 = vrot.slane %v4230_v23, 4  ;;  %v4237_v8 = vsel %vm3998_vm12, %v3812_v7, -inf  ;;  %7063 = vmatpush3.bf16.msra.mxu1 %v7402_v5  ;;  %v7409_v5 = vld [vmem:[%s9912_s3 + $0x28] sm:$0xff]  }
 0x286   : > { %v4892_v35 = vpack.c.b16 %v4861_v41, %v4861_v41  ;;  %4942 = vst [vmem:[#allocation3 + $0x24] sm:$0x1] %v4941_v52  ;;  %v4225_v42 = vmax.f32 %v4223_v62, %v4224_v0  ;;  %v4238_v15 = vrot.slane %v4237_v8, 4  ;;  %v4244_v43 = vsel %vm3998_vm12, %v3814_v11, -inf  ;;  %7064 = vmatprep.subr.bf16.mxu1 %v7408_v55 }
 0x287   : > { %v4232_v61 = vmax.f32 %v4230_v23, %v4231_v51  ;;  %v4245_v63 = vrot.slane %v4244_v43, 4  ;;  %v3815_v46 = vcombine.high %v3627_v33, %v3627_v33  ;;  %v3822_v12 = vrot.slane %v3627_v33, %v9029_v49  ;;  %7195 = vmatpush3.bf16.msra.mxu0 %v7395_v2 }
 0x288   : > { %v4938_v26 = vsel %vm7655_vm8, %v4892_v35, %v4937_v38  ;;  %v4226_v60 = vrot.slane %v4225_v42, 2  ;;  %v4239_v14 = vmax.f32 %v4237_v8, %v4238_v15  ;;  %v3556_v50 = vadd.f32 %v9280_v17, %v3489_v21 }
 0x289   : > { %4939 = vst [vmem:[#allocation3 + $0x20] sm:$0xf] %v4938_v26  ;;  %v4233_v57 = vrot.slane %v4232_v61, 2  ;;  %v4246_v53 = vmax.f32 %v4244_v43, %v4245_v63  ;;  %v3829_v29 = vrot.slane %v3815_v46, %v9029_v49  ;;  %v3830_v40 = vcombine.high %v3822_v12, %v3822_v12  ;;  %7065 = vmatpush3.bf16.msra.mxu1 %v7409_v5 }
 0x28a   : > { %v4227_v16 = vmax.f32 %v4225_v42, %v4226_v60  ;;  %v4240_v30 = vrot.slane %v4239_v14, 2  ;;  %v4251_v44 = vsel %vm3998_vm12, %v3822_v12, -inf  ;;  %v3588_v19 = vmax.f32 %v3556_v50, 0.0  ;;  %v7179_v12 = vpop.f32.mrf.mxu0 }
 0x28b   : > { %v4234_v24 = vmax.f32 %v4232_v61, %v4233_v57  ;;  %v4247_v18 = vrot.slane %v4246_v53, 2  ;;  %v3831_v21 = vcombine.high %v3829_v29, %v3829_v29  ;;  %v4252_v34 = vrot.slane %v4251_v44, 4 }
 0x28c   : > { %v4228_v31 = vrot.slane %v4227_v16, 1  ;;  %v4241_v7 = vmax.f32 %v4239_v14, %v4240_v30  ;;  %v4258_v39 = vsel %vm3998_vm12, %v3830_v40, -inf  ;;  %v4265_v3 = vsel %vm3998_vm12, %v3829_v29, -inf }
 0x28d   : > { %v4235_v28 = vrot.slane %v4234_v24, 1  ;;  %v4248_v54 = vmax.f32 %v4246_v53, %v4247_v18  ;;  %v4253_v62 = vmax.f32 %v4251_v44, %v4252_v34  ;;  %v4259_v33 = vrot.slane %v4258_v39, 4 }
 0x28e   : > { %v4229_v58 = vmax.f32 %v4227_v16, %v4228_v31  ;;  %v4242_v11 = vrot.slane %v4241_v7, 1  ;;  %v4266_v0 = vrot.slane %v4265_v3, 4  ;;  %v4272_v23 = vsel %vm3998_vm12, %v3831_v21, -inf  ;;  %v3483_v31 = vpop.f32.mrf.mxu0 }
 0x28f   : > { %v4236_v41 = vmax.f32 %v4234_v24, %v4235_v28  ;;  %v4249_v38 = vrot.slane %v4248_v54, 1  ;;  %v4254_v52 = vrot.slane %v4253_v62, 2  ;;  %v4260_v51 = vmax.f32 %v4258_v39, %v4259_v33 }
 0x290   : > { %v4243_v8 = vmax.f32 %v4241_v7, %v4242_v11  ;;  %v6776_v35 = vpack.c.bf16 %v4229_v58, %v4229_v58  ;;  %v4267_v42 = vmax.f32 %v4265_v3, %v4266_v0  ;;  %v4273_v15 = vrot.slane %v4272_v23, 4  ;;  %v10085_v11 = vld [vmem:[#allocation18_spill] sm:$0xff] }
 0x291   : > { %v4250_v43 = vmax.f32 %v4248_v54, %v4249_v38  ;;  %v6777_v61 = vpack.c.bf16 %v4236_v41, %v4236_v41  ;;  %v4255_v63 = vmax.f32 %v4253_v62, %v4254_v52  ;;  %v4261_v46 = vrot.slane %v4260_v51, 2  ;;  %v4470_v54 = vld [vmem:[#allocation3 + $0x30] sm:$0x1]  ;;  %v4500_v41 = vld [vmem:[#allocation3 + $0x34] sm:$0x1] }
 0x292   : > { %v6778_v26 = vpack.c.bf16 %v4243_v8, %v4243_v8  ;;  %v4800_v60 = vunpack.c.l.b16 %v6776_v35  ;;  %v4268_v14 = vrot.slane %v4267_v42, 2  ;;  %v4274_v50 = vmax.f32 %v4272_v23, %v4273_v15 }
 0x293   : > { %v6779_v57 = vpack.c.bf16 %v4250_v43, %v4250_v43  ;;  %v4801_v53 = vunpack.c.l.b16 %v6777_v61  ;;  %v4256_v29 = vrot.slane %v4255_v63, 1  ;;  %v4262_v40 = vmax.f32 %v4260_v51, %v4261_v46  ;;  %v4946_v61 = vld [vmem:[#allocation3 + $0x2c] sm:$0x1] }
 0x294   : > { %v4802_v2 = vunpack.c.l.b16 %v6778_v26  ;;  %v4269_v16 = vmax.f32 %v4267_v42, %v4268_v14  ;;  %v4275_v30 = vrot.slane %v4274_v50, 2  ;;  %v3629_v44 = vsel %vm2483_vm11, %v3588_v19, -inf }
 0x295   : > { %v4803_v24 = vunpack.c.l.b16 %v6779_v57  ;;  %v4862_v18 = vsel %vm4832_vm13, %v4801_v53, %v4800_v60  ;;  %v4257_v21 = vmax.f32 %v4255_v63, %v4256_v29  ;;  %v4263_v34 = vrot.slane %v4262_v40, 1  ;;  %v10086_v53 = vld [vmem:[#allocation13_spill] sm:$0xff] }
 0x296   : > { %v4863_v7 = vsel %vm4834_vm14, %v4802_v2, %v4862_v18  ;;  %v4270_v39 = vrot.slane %v4269_v16, 1  ;;  %v4276_v3 = vmax.f32 %v4274_v50, %v4275_v30  ;;  %v3481_v28 = vadd.f32 %v3480_v48, %v9107_v36  ;;  %v7182_v48 = vpop.f32.mrf.mxu0  ;;  %v10087_v18 = vld [vmem:[#allocation8_spill] sm:$0xff] }
 0x297   : > { %v4264_v62 = vmax.f32 %v4262_v40, %v4263_v34  ;;  %v6780_v33 = vpack.c.bf16 %v4257_v21, %v4257_v21  ;;  %v4864_v58 = vsel %vm4836_vm15, %v4803_v24, %v4863_v7  ;;  %v3331_v19 = vadd.f32 %v9125_v6, %v10085_v11 }
 0x298   : > { %v4271_v0 = vmax.f32 %v4269_v16, %v4270_v39  ;;  %v4277_v23 = vrot.slane %v4276_v3, 1  ;;  %v3554_v55 = vadd.f32 %v9280_v17, %v3481_v28  ;;  %v3484_v5 = vadd.f32 %v3483_v31, %v9111_v1  ;;  %v3496_v40 = vpop.f32.mrf.mxu0  ;;  %v4943_v16 = vld [vmem:[#allocation3 + $0x28] sm:$0xf] }
 0x299   : > { %v6781_v38 = vpack.c.bf16 %v4264_v62, %v4264_v62  ;;  %v4804_v52 = vunpack.c.l.b16 %v6780_v33  ;;  %v3492_v51 = vadd.f32 %v7179_v12, %v3331_v19  ;;  %v4471_v36 = vsel %vm7595_vm3, 0, %v4470_v54  ;;  %v10088_v62 = vld [vmem:[#allocation15_spill] sm:$0xff] }
 0x29a   : > { %v4278_v8 = vmax.f32 %v4276_v3, %v4277_v23  ;;  %v6782_v35 = vpack.c.bf16 %v4271_v0, %v4271_v0  ;;  %v3586_v42 = vmax.f32 %v3554_v55, 0.0  ;;  %v3555_v15 = vadd.f32 %v9280_v17, %v3484_v5  ;;  %4472 = vst [vmem:[#allocation3 + $0x30] sm:$0x1] %v4471_v36 }
 0x29b   : > { %v4805_v6 = vunpack.c.l.b16 %v6781_v38  ;;  %v4865_v43 = vsel %vm4838_vm0, %v4804_v52, %v4864_v58  ;;  %v3557_v1 = vadd.f32 %v9280_v17, %v3492_v51  ;;  %v4501_v63 = vsel %vm7604_vm5, 0, %v4500_v41 }
 0x29c   : > { %v4806_v46 = vunpack.c.l.b16 %v6782_v35  ;;  %v6812_v12 = vpack.c.bf16 %v4278_v8, %v4278_v8  ;;  %v3628_v26 = vsel %vm2483_vm11, %v3586_v42, -inf  ;;  %v3587_v60 = vmax.f32 %v3555_v15, 0.0  ;;  %4502 = vst [vmem:[#allocation3 + $0x34] sm:$0x1] %v4501_v63 }
 0x29d   : > { %v4866_v14 = vsel %vm4840_vm1, %v4805_v6, %v4865_v43  ;;  %v3630_v50 = vmax.f32 %v3628_v26, %v3629_v44  ;;  %v3589_v57 = vmax.f32 %v3557_v1, 0.0  ;;  %v3344_v29 = vadd.f32 %v9166_v9, %v10086_v53  ;;  %v7421_v44 = vld [vmem:[%s9912_s3 + $0x60] sm:$0xff]  }
 0x29e   : > { %v4867_v2 = vsel %vm4842_vm2, %v4806_v46, %v4866_v14  ;;  %v4947_v30 = vsel %vm7595_vm3, %v6812_v12, %v4946_v61  ;;  %v3631_v24 = vsel %vm2483_vm11, %v3587_v60, -inf  ;;  %v3336_v21 = vadd.f32 %v9140_v59, %v10087_v18  ;;  %v7422_v9 = vld [vmem:[%s9912_s3 + $0x20] sm:$0xff]   ;;  %7066 = vmatprep.subr.bf16.mxu1 %v7421_v44 }
 0x29f   : > { %v4894_v34 = vpack.c.b16 %v4867_v2, %v4867_v2  ;;  %4948 = vst [vmem:[#allocation3 + $0x2c] sm:$0x1] %v4947_v30  ;;  %v3832_v31 = vcombine.high %v3630_v50, %v3630_v50  ;;  %v3839_v7 = vrot.slane %v3630_v50, %v9029_v49  ;;  %v3632_v39 = vsel %vm2483_vm11, %v3589_v57, -inf  ;;  %7067 = vmatpush3.bf16.msra.mxu1 %v7422_v9 }
 0x2a0   : > { %v3633_v3 = vmax.f32 %v3631_v24, %v3632_v39  ;;  %v3505_v28 = vadd.f32 %v7182_v48, %v3344_v29  ;;  %v3497_v54 = vadd.f32 %v3496_v40, %v3336_v21  ;;  %v9380_v59 = vadd.f32 %v9171_v27, %v10088_v62 }
 0x2a1   : > { %v4944_v33 = vsel %vm7655_vm8, %v4894_v34, %v4943_v16  ;;  %v3846_v58 = vrot.slane %v3832_v31, %v9029_v49  ;;  %v3847_v11 = vcombine.high %v3839_v7, %v3839_v7  ;;  %v4279_v19 = vsel %vm3998_vm12, %v3839_v7, -inf }
 0x2a2   : > { %4945 = vst [vmem:[#allocation3 + $0x28] sm:$0xf] %v4944_v33  ;;  %v4280_v0 = vrot.slane %v4279_v19, 4  ;;  %v3849_v23 = vcombine.high %v3633_v3, %v3633_v3  ;;  %v3856_v55 = vrot.slane %v3633_v3, %v9029_v49  ;;  %v9388_v5 = vadd.f32 %v9280_v17, %v3505_v28 }
 0x2a3   : > { %v3848_v27 = vcombine.high %v3846_v58, %v3846_v58  ;;  %v4286_v41 = vsel %vm3998_vm12, %v3847_v11, -inf  ;;  %v4293_v38 = vsel %vm3998_vm12, %v3846_v58, -inf  ;;  %v9393_v52 = vadd.f32 %v9280_v17, %v3497_v54  ;;  %v7436_v11 = vld [vmem:[%s9912_s3 + $0x58] sm:$0xff]  }
 0x2a4   : > { %v4281_v51 = vmax.f32 %v4279_v19, %v4280_v0  ;;  %v4287_v36 = vrot.slane %v4286_v41, 4  ;;  %v4294_v48 = vrot.slane %v4293_v38, 4  ;;  %v3863_v8 = vrot.slane %v3849_v23, %v9029_v49  ;;  %v7437_v19 = vld [vmem:[%s9912_s3 + $0x18] sm:$0xff]   ;;  %7068 = vmatprep.subr.bf16.mxu1 %v7436_v11  ;;  %v4473_v11 = vld [vmem:[#allocation3 + $0x38] sm:$0x1] }
 0x2a5   : > { %v4300_v35 = vsel %vm3998_vm12, %v3848_v27, -inf  ;;  %v3864_v42 = vcombine.high %v3856_v55, %v3856_v55  ;;  %v4307_v15 = vsel %vm3998_vm12, %v3856_v55, -inf  ;;  %v3592_v6 = vmax.f32 %v9388_v5, 0.0  ;;  %v7183_v27 = vpop.f32.mrf.mxu0  ;;  %7069 = vmatpush3.bf16.msra.mxu1 %v7437_v19 }
 0x2a6   : > { %v4282_v43 = vrot.slane %v4281_v51, 2  ;;  %v4288_v61 = vmax.f32 %v4286_v41, %v4287_v36  ;;  %v4295_v1 = vmax.f32 %v4293_v38, %v4294_v48  ;;  %v4301_v63 = vrot.slane %v4300_v35, 4  ;;  %v7440_v41 = vld [vmem:[%s9912_s3 + $0x50] sm:$0xff]  }
 0x2a7   : > { %v3865_v46 = vcombine.high %v3863_v8, %v3863_v8  ;;  %v4308_v12 = vrot.slane %v4307_v15, 4  ;;  %v4314_v26 = vsel %vm3998_vm12, %v3864_v42, -inf  ;;  %v4321_v60 = vsel %vm3998_vm12, %v3863_v8, -inf  ;;  %7070 = vmatprep.subr.bf16.mxu1 %v7440_v41 }
 0x2a8   : > { %v4283_v14 = vmax.f32 %v4281_v51, %v4282_v43  ;;  %v4289_v50 = vrot.slane %v4288_v61, 2  ;;  %v4296_v57 = vrot.slane %v4295_v1, 2  ;;  %v4302_v53 = vmax.f32 %v4300_v35, %v4301_v63  ;;  %v7441_v43 = vld [vmem:[%s9912_s3 + $0x10] sm:$0xff]  }
 0x2a9   : > { %v4309_v29 = vmax.f32 %v4307_v15, %v4308_v12  ;;  %v4315_v40 = vrot.slane %v4314_v26, 4  ;;  %v4322_v2 = vrot.slane %v4321_v60, 4  ;;  %v4328_v16 = vsel %vm3998_vm12, %v3865_v46, -inf  ;;  %v7443_v12 = vld [vmem:[%s9912_s3 + $0x48] sm:$0xff]   ;;  %7071 = vmatpush3.bf16.msra.mxu1 %v7441_v43 }
 0x2aa   : > { %v4284_v30 = vrot.slane %v4283_v14, 1  ;;  %v4290_v24 = vmax.f32 %v4288_v61, %v4289_v50  ;;  %v4297_v18 = vmax.f32 %v4295_v1, %v4296_v57  ;;  %v4303_v21 = vrot.slane %v4302_v53, 2  ;;  %v3499_v57 = vpop.f32.mrf.mxu0  ;;  %7072 = vmatprep.subr.bf16.mxu1 %v7443_v12 }
 0x2ab   : > { %v4310_v44 = vrot.slane %v4309_v29, 2  ;;  %v4316_v9 = vmax.f32 %v4314_v26, %v4315_v40  ;;  %v4323_v34 = vmax.f32 %v4321_v60, %v4322_v2  ;;  %v4329_v31 = vrot.slane %v4328_v16, 4 }
 0x2ac   : > { %v4285_v7 = vmax.f32 %v4283_v14, %v4284_v30  ;;  %v4291_v39 = vrot.slane %v4290_v24, 1  ;;  %v4298_v3 = vrot.slane %v4297_v18, 1  ;;  %v4304_v28 = vmax.f32 %v4302_v53, %v4303_v21  ;;  %v7444_v21 = vld [vmem:[%s9912_s3 + $0x8] sm:$0xff]  }
 0x2ad   : > { %v4311_v54 = vmax.f32 %v4309_v29, %v4310_v44  ;;  %v4317_v62 = vrot.slane %v4316_v9, 2  ;;  %v4324_v33 = vrot.slane %v4323_v34, 2  ;;  %v4330_v58 = vmax.f32 %v4328_v16, %v4329_v31  ;;  %v4991_v31 = vld [vmem:[#allocation3 + $0x8] sm:$0xf]  ;;  %7073 = vmatpush3.bf16.msra.mxu1 %v7444_v21  ;;  %v10090_v21 = vld [vmem:[#allocation17_spill] sm:$0xff] }
 0x2ae   : > { %v4292_v0 = vmax.f32 %v4290_v24, %v4291_v39  ;;  %v4299_v23 = vmax.f32 %v4297_v18, %v4298_v3  ;;  %v4305_v55 = vrot.slane %v4304_v28, 1  ;;  %v6784_v5 = vpack.c.bf16 %v4285_v7, %v4285_v7  ;;  %v4952_v3 = vld [vmem:[#allocation3 + $0x34] sm:$0x1] }
 0x2af   : > { %v4312_v38 = vrot.slane %v4311_v54, 1  ;;  %v4318_v51 = vmax.f32 %v4316_v9, %v4317_v62  ;;  %v4325_v36 = vmax.f32 %v4323_v34, %v4324_v33  ;;  %v4331_v48 = vrot.slane %v4330_v58, 2 }
 0x2b0   : > { %v4306_v8 = vmax.f32 %v4304_v28, %v4305_v55  ;;  %v6785_v35 = vpack.c.bf16 %v4292_v0, %v4292_v0  ;;  %v6786_v42 = vpack.c.bf16 %v4299_v23, %v4299_v23  ;;  %v4808_v15 = vunpack.c.l.b16 %v6784_v5  ;;  %v7186_v28 = vpop.f32.mrf.mxu0  ;;  %v10089_v55 = vld [vmem:[#allocation29_spill] sm:$0xff] }
 0x2b1   : > { %v4313_v61 = vmax.f32 %v4311_v54, %v4312_v38  ;;  %v4319_v1 = vrot.slane %v4318_v51, 1  ;;  %v4326_v63 = vrot.slane %v4325_v36, 1  ;;  %v4332_v46 = vmax.f32 %v4330_v58, %v4331_v48 }
 0x2b2   : > { %v6787_v26 = vpack.c.bf16 %v4306_v8, %v4306_v8  ;;  %v4809_v60 = vunpack.c.l.b16 %v6785_v35  ;;  %v4810_v14 = vunpack.c.l.b16 %v6786_v42  ;;  %v3635_v50 = vsel %vm2483_vm11, %v3592_v6, -inf  ;;  %v4949_v8 = vld [vmem:[#allocation3 + $0x30] sm:$0xf] }
 0x2b3   : > { %v4320_v53 = vmax.f32 %v4318_v51, %v4319_v1  ;;  %v4327_v29 = vmax.f32 %v4325_v36, %v4326_v63  ;;  %v4333_v40 = vrot.slane %v4332_v46, 1  ;;  %v6788_v2 = vpack.c.bf16 %v4313_v61, %v4313_v61  ;;  %v4503_v36 = vld [vmem:[#allocation3 + $0x3c] sm:$0x1] }
 0x2b4   : > { %v4811_v16 = vunpack.c.l.b16 %v6787_v26  ;;  %v4868_v30 = vsel %vm4832_vm13, %v4809_v60, %v4808_v15  ;;  %v3590_v24 = vmax.f32 %v9393_v52, 0.0  ;;  %v3508_v18 = vadd.f32 %v7183_v27, %v9380_v59  ;;  %v3512_v15 = vpop.f32.mrf.mxu0 }
 0x2b5   : > { %v4869_v44 = vsel %vm4834_vm14, %v4810_v14, %v4868_v30  ;;  %v4334_v6 = vmax.f32 %v4332_v46, %v4333_v40  ;;  %v6789_v9 = vpack.c.bf16 %v4320_v53, %v4320_v53  ;;  %v6790_v34 = vpack.c.bf16 %v4327_v29, %v4327_v29 }
 0x2b6   : > { %v4812_v7 = vunpack.c.l.b16 %v6788_v2  ;;  %v4870_v39 = vsel %vm4836_vm15, %v4811_v16, %v4869_v44  ;;  %v3634_v52 = vsel %vm2483_vm11, %v3590_v24, -inf  ;;  %v3561_v59 = vadd.f32 %v9280_v17, %v3508_v18  ;;  %v7187_v30 = vpop.f32.mrf.mxu0 }
 0x2b7   : > { %v4813_v54 = vunpack.c.l.b16 %v6789_v9  ;;  %v4814_v62 = vunpack.c.l.b16 %v6790_v34  ;;  %v6813_v33 = vpack.c.bf16 %v4334_v6, %v4334_v6  ;;  %v3636_v58 = vmax.f32 %v3634_v52, %v3635_v50 }
 0x2b8   : > { %v4871_v19 = vsel %vm4838_vm0, %v4812_v7, %v4870_v39  ;;  %v3593_v0 = vmax.f32 %v3561_v59, 0.0  ;;  %v6607_v23 = vcombine.low %v4991_v31, %v4991_v31  ;;  %v3339_v5 = vadd.f32 %v9147_v25, %v10089_v55 }
 0x2b9   : > { %v4872_v27 = vsel %vm4840_vm1, %v4813_v54, %v4871_v19  ;;  %v4953_v41 = vsel %vm7595_vm3, %v6813_v33, %v4952_v3  ;;  %v3866_v38 = vcombine.high %v3636_v58, %v3636_v58  ;;  %v3873_v51 = vrot.slane %v3636_v58, %v9029_v49 }
 0x2ba   : > { %v4873_v48 = vsel %vm4842_vm2, %v4814_v62, %v4872_v27  ;;  %4954 = vst [vmem:[#allocation3 + $0x34] sm:$0x1] %v4953_v41  ;;  %v3638_v35 = vsel %vm2483_vm11, %v3593_v0, -inf  ;;  %5208 = vrot.lane.b32.xlu0 %v6607_v23, %s7554_s24  ;;  %v3500_v42 = vadd.f32 %v3499_v57, %v3339_v5  ;;  %v4474_v25 = vsel %vm7595_vm3, 0, %v4473_v11 }
 0x2bb   : > { %v4896_v43 = vpack.c.b16 %v4873_v48, %v4873_v48  ;;  %v3880_v61 = vrot.slane %v3866_v38, %v9029_v49  ;;  %v3881_v1 = vcombine.high %v3873_v51, %v3873_v51  ;;  %v4335_v63 = vsel %vm3998_vm12, %v3873_v51, -inf  ;;  %4475 = vst [vmem:[#allocation3 + $0x38] sm:$0x1] %v4474_v25 }
 0x2bc   : > { %v4336_v46 = vrot.slane %v4335_v63, 4  ;;  %v3559_v12 = vadd.f32 %v9280_v17, %v3500_v42  ;;  %v4504_v26 = vsel %vm7604_vm5, 0, %v4503_v36  ;;  %v3360_v60 = vadd.f32 %v9219_v20, %v9012_v32 }
 0x2bd   : > { %v4950_v14 = vsel %vm7655_vm8, %v4896_v43, %v4949_v8  ;;  %v3882_v50 = vcombine.high %v3880_v61, %v3880_v61  ;;  %v4342_v57 = vsel %vm3998_vm12, %v3881_v1, -inf  ;;  %v4349_v53 = vsel %vm3998_vm12, %v3880_v61, -inf  ;;  %4505 = vst [vmem:[#allocation3 + $0x3c] sm:$0x1] %v4504_v26 }
 0x2be   : > { %4951 = vst [vmem:[#allocation3 + $0x30] sm:$0xf] %v4950_v14  ;;  %v4337_v29 = vmax.f32 %v4335_v63, %v4336_v46  ;;  %v4343_v40 = vrot.slane %v4342_v57, 4  ;;  %v4350_v2 = vrot.slane %v4349_v53, 4  ;;  %v3591_v16 = vmax.f32 %v3559_v12, 0.0 }
 0x2bf   : > { %v4356_v24 = vsel %vm3998_vm12, %v3882_v50, -inf  ;;  %v3521_v18 = vadd.f32 %v7186_v28, %v3360_v60  ;;  %v3352_v32 = vadd.f32 %v9182_v4, %v10090_v21  ;;  %v3363_v20 = vadd.f32 %v9228_v47, %v9036_v56 }
 0x2c0   : > { %v4338_v44 = vrot.slane %v4337_v29, 2  ;;  %v4344_v6 = vmax.f32 %v4342_v57, %v4343_v40  ;;  %v4351_v9 = vmax.f32 %v4349_v53, %v4350_v2  ;;  %v4357_v34 = vrot.slane %v4356_v24, 4 }
 0x2c1   : > { %v3637_v31 = vsel %vm2483_vm11, %v3591_v16, -inf  ;;  %v3564_v7 = vadd.f32 %v9280_v17, %v3521_v18  ;;  %v3513_v39 = vadd.f32 %v3512_v15, %v3352_v32  ;;  %v3524_v3 = vadd.f32 %v7187_v30, %v3363_v20 }
 0x2c2   : > { %v4339_v52 = vmax.f32 %v4337_v29, %v4338_v44  ;;  %v4345_v59 = vrot.slane %v4344_v6, 2  ;;  %v4352_v54 = vrot.slane %v4351_v9, 2  ;;  %v4358_v28 = vmax.f32 %v4356_v24, %v4357_v34 }
 0x2c3   : > { %v3639_v62 = vmax.f32 %v3637_v31, %v3638_v35  ;;  %v3596_v33 = vmax.f32 %v3564_v7, 0.0  ;;  %v3562_v4 = vadd.f32 %v9280_v17, %v3513_v39  ;;  %v9460_v56 = vadd.f32 %v9280_v17, %v3524_v3 }
 0x2c4   : > { %v4340_v47 = vrot.slane %v4339_v52, 1  ;;  %v4346_v58 = vmax.f32 %v4344_v6, %v4345_v59  ;;  %v4353_v11 = vmax.f32 %v4351_v9, %v4352_v54  ;;  %v4359_v19 = vrot.slane %v4358_v28, 2 }
 0x2c5   : > { %v3883_v0 = vcombine.high %v3639_v62, %v3639_v62  ;;  %v3890_v23 = vrot.slane %v3639_v62, %v9029_v49  ;;  %v3641_v55 = vsel %vm2483_vm11, %v3596_v33, -inf  ;;  %v3594_v5 = vmax.f32 %v3562_v4, 0.0 }
 0x2c6   : > { %v4341_v27 = vmax.f32 %v4339_v52, %v4340_v47  ;;  %v4347_v41 = vrot.slane %v4346_v58, 1  ;;  %v4354_v38 = vrot.slane %v4353_v11, 1  ;;  %v4360_v51 = vmax.f32 %v4358_v28, %v4359_v19 }
 0x2c7   : > { %v3897_v36 = vrot.slane %v3883_v0, %v9029_v49  ;;  %v3898_v48 = vcombine.high %v3890_v23, %v3890_v23  ;;  %v4363_v8 = vsel %vm3998_vm12, %v3890_v23, -inf  ;;  %v3640_v35 = vsel %vm2483_vm11, %v3594_v5, -inf }
 0x2c8   : > { %v4348_v42 = vmax.f32 %v4346_v58, %v4347_v41  ;;  %v4355_v25 = vmax.f32 %v4353_v11, %v4354_v38  ;;  %v4361_v15 = vrot.slane %v4360_v51, 1  ;;  %v6792_v43 = vpack.c.bf16 %v4341_v27, %v4341_v27 }
 0x2c9   : > { %v3899_v61 = vcombine.high %v3897_v36, %v3897_v36  ;;  %v4364_v1 = vrot.slane %v4363_v8, 4  ;;  %v4370_v63 = vsel %vm3998_vm12, %v3898_v48, -inf  ;;  %v4377_v46 = vsel %vm3998_vm12, %v3897_v36, -inf }
 0x2ca   : > { %v4362_v12 = vmax.f32 %v4360_v51, %v4361_v15  ;;  %v6793_v26 = vpack.c.bf16 %v4348_v42, %v4348_v42  ;;  %v6794_v60 = vpack.c.bf16 %v4355_v25, %v4355_v25  ;;  %v4816_v14 = vunpack.c.l.b16 %v6792_v43 }
 0x2cb   : > { %v4365_v50 = vmax.f32 %v4363_v8, %v4364_v1  ;;  %v4371_v57 = vrot.slane %v4370_v63, 4  ;;  %v4378_v53 = vrot.slane %v4377_v46, 4  ;;  %v4384_v29 = vsel %vm3998_vm12, %v3899_v61, -inf }
 0x2cc   : > { %v6795_v40 = vpack.c.bf16 %v4362_v12, %v4362_v12  ;;  %v4817_v2 = vunpack.c.l.b16 %v6793_v26  ;;  %v4818_v16 = vunpack.c.l.b16 %v6794_v60  ;;  %v4385_v30 = vrot.slane %v4384_v29, 4 }
 0x2cd   : > { %v4366_v24 = vrot.slane %v4365_v50, 2  ;;  %v4372_v18 = vmax.f32 %v4370_v63, %v4371_v57  ;;  %v4379_v21 = vmax.f32 %v4377_v46, %v4378_v53  ;;  %v3642_v32 = vmax.f32 %v3640_v35, %v3641_v55  ;;  %v4958_v63 = vld [vmem:[#allocation3 + $0x3c] sm:$0x1] }
 0x2ce   : > { %v7033_v20 = vadd.f32 %v9205_v37, %v9194_v13  ;;  %v4819_v44 = vunpack.c.l.b16 %v6795_v40  ;;  %v4874_v6 = vsel %vm4832_vm13, %v4817_v2, %v4816_v14  ;;  %v4386_v9 = vmax.f32 %v4384_v29, %v4385_v30  ;;  %v7446_v37 = vld [vmem:[%s9912_s3 + $0x40] sm:$0xff]  }
 0x2cf   : > { %v4875_v34 = vsel %vm4834_vm14, %v4818_v16, %v4874_v6  ;;  %v4367_v31 = vmax.f32 %v4365_v50, %v4366_v24  ;;  %v4373_v7 = vrot.slane %v4372_v18, 2  ;;  %v4380_v39 = vrot.slane %v4379_v21, 2  ;;  %7074 = vmatprep.subr.bf16.mxu1 %v7446_v37  ;;  %v9485_v50 = vld [vmem:[#allocation3 + $0x10] sm:$0xf] }
 0x2d0   : > { %v4387_v3 = vrot.slane %v4386_v9, 2  ;;  %v3900_v52 = vcombine.high %v3642_v32, %v3642_v32  ;;  %v3907_v59 = vrot.slane %v3642_v32, %v9029_v49  ;;  %v3597_v54 = vmax.f32 %v9460_v56, 0.0 }
 0x2d1   : > { %v4368_v28 = vrot.slane %v4367_v31, 1  ;;  %v4374_v62 = vmax.f32 %v4372_v18, %v4373_v7  ;;  %v4381_v33 = vmax.f32 %v4379_v21, %v4380_v39  ;;  %v4876_v13 = vsel %vm4836_vm15, %v4819_v44, %v4875_v34  ;;  %v3515_v18 = vpop.f32.mrf.mxu0  ;;  %v4476_v21 = vld [vmem:[#allocation3 + $0x40] sm:$0x1]  ;;  %v4955_v39 = vld [vmem:[#allocation3 + $0x38] sm:$0xf] }
 0x2d2   : > { %v4388_v4 = vmax.f32 %v4386_v9, %v4387_v3  ;;  %v3914_v47 = vrot.slane %v3900_v52, %v9029_v49  ;;  %v3915_v58 = vcombine.high %v3907_v59, %v3907_v59  ;;  %v4391_v11 = vsel %vm3998_vm12, %v3907_v59, -inf  ;;  %v10091_v9 = vld [vmem:[#allocation22_spill] sm:$0xff] }
 0x2d3   : > { %v4369_v19 = vmax.f32 %v4367_v31, %v4368_v28  ;;  %v4375_v0 = vrot.slane %v4374_v62, 1  ;;  %v4382_v23 = vrot.slane %v4381_v33, 1  ;;  %v4392_v55 = vrot.slane %v4391_v11, 4  ;;  %v4506_v31 = vld [vmem:[#allocation3 + $0x44] sm:$0x1] }
 0x2d4   : > { %v4389_v5 = vrot.slane %v4388_v4, 1  ;;  %v3916_v27 = vcombine.high %v3914_v47, %v3914_v47  ;;  %v4398_v41 = vsel %vm3998_vm12, %v3915_v58, -inf  ;;  %v4405_v38 = vsel %vm3998_vm12, %v3914_v47, -inf  ;;  %v4452_v28 = vld [vmem:[#allocation3] sm:$0x1] }
 0x2d5   : > { %v4376_v51 = vmax.f32 %v4374_v62, %v4375_v0  ;;  %v4383_v36 = vmax.f32 %v4381_v33, %v4382_v23  ;;  %v6796_v48 = vpack.c.bf16 %v4369_v19, %v4369_v19  ;;  %v4393_v8 = vmax.f32 %v4391_v11, %v4392_v55  ;;  %v9500_v19 = vld [vmem:[#allocation3 + $0x8] sm:$0xf] }
 0x2d6   : > { %v4390_v35 = vmax.f32 %v4388_v4, %v4389_v5  ;;  %v4399_v42 = vrot.slane %v4398_v41, 4  ;;  %v4406_v25 = vrot.slane %v4405_v38, 4  ;;  %v4412_v15 = vsel %vm3998_vm12, %v3916_v27, -inf  ;;  %v4482_v4 = vld [vmem:[#allocation3 + $0x4] sm:$0x1] }
 0x2d7   : > { %v6797_v43 = vpack.c.bf16 %v4376_v51, %v4376_v51  ;;  %v6798_v61 = vpack.c.bf16 %v4383_v36, %v4383_v36  ;;  %v4820_v1 = vunpack.c.l.b16 %v6796_v48  ;;  %v4394_v46 = vrot.slane %v4393_v8, 2  ;;  %v5032_v5 = vld [vmem:[#allocation3 + $0x10] sm:$0xe]  ;;  %v9509_v36 = vld [vmem:[#allocation3 + $0xc] sm:$0x1] }
 0x2d8   : > { %v6814_v12 = vpack.c.bf16 %v4390_v35, %v4390_v35  ;;  %v4400_v26 = vmax.f32 %v4398_v41, %v4399_v42  ;;  %v4407_v60 = vmax.f32 %v4405_v38, %v4406_v25  ;;  %v4413_v14 = vrot.slane %v4412_v15, 4  ;;  %v5033_v48 = vld [vmem:[#allocation3 + $0x18] sm:$0xe]  ;;  %v9513_v35 = vld [vmem:[#allocation3 + $0x14] sm:$0x1] }
 0x2d9   : > { %v4821_v57 = vunpack.c.l.b16 %v6797_v43  ;;  %v4822_v53 = vunpack.c.l.b16 %v6798_v61  ;;  %v4877_v29 = vsel %vm4838_vm0, %v4820_v1, %v4876_v13  ;;  %v4395_v40 = vmax.f32 %v4393_v8, %v4394_v46  ;;  %v9518_v43 = vld [vmem:[#allocation3 + $0x1c] sm:$0x1] }
 0x2da   : > { %v4959_v2 = vsel %vm7595_vm3, %v6814_v12, %v4958_v63  ;;  %v4401_v16 = vrot.slane %v4400_v26, 2  ;;  %v4408_v30 = vrot.slane %v4407_v60, 2  ;;  %v4414_v24 = vmax.f32 %v4412_v15, %v4413_v14  ;;  %v9522_v12 = vld [vmem:[#allocation3 + $0x18] sm:$0xf] }
 0x2db   : > { %v4878_v32 = vsel %vm4840_vm1, %v4821_v57, %v4877_v29  ;;  %4960 = vst [vmem:[#allocation3 + $0x3c] sm:$0x1] %v4959_v2  ;;  %v4396_v44 = vrot.slane %v4395_v40, 1  ;;  %v6608_v6 = vcombine.low %v9485_v50, %v9485_v50  ;;  %v3355_v34 = vadd.f32 %v7033_v20, %v10091_v9 }
 0x2dc   : > { %v4879_v7 = vsel %vm4842_vm2, %v4822_v53, %v4878_v32  ;;  %v4402_v3 = vmax.f32 %v4400_v26, %v4401_v16  ;;  %v4409_v52 = vmax.f32 %v4407_v60, %v4408_v30  ;;  %v4415_v59 = vrot.slane %v4414_v24, 2  ;;  %v9528_v30 = vld [vmem:[#allocation3 + $0x10] sm:$0xf] }
 0x2dd   : > { %v4898_v62 = vpack.c.b16 %v4879_v7, %v4879_v7  ;;  %v4397_v33 = vmax.f32 %v4395_v40, %v4396_v44  ;;  %5210 = vrot.lane.b32.xlu1 %v6608_v6, %s7554_s24  ;;  %v3516_v13 = vadd.f32 %v3515_v18, %v3355_v34  ;;  %v4477_v37 = vsel %vm7595_vm3, 0, %v4476_v21  ;;  %v7447_v18 = vld [vmem:[%s9912_s3] sm:$0xff]   ;;  %v9537_v34 = vld [vmem:[#allocation3 + $0x18] sm:$0xf] }
 0x2de   : > { %v4403_v47 = vrot.slane %v4402_v3, 1  ;;  %v4410_v58 = vrot.slane %v4409_v52, 1  ;;  %v4416_v20 = vmax.f32 %v4414_v24, %v4415_v59  ;;  %4478 = vst [vmem:[#allocation3 + $0x40] sm:$0x1] %v4477_v37  ;;  %v4507_v11 = vsel %vm7604_vm5, 0, %v4506_v31  ;;  %7075 = vmatpush3.bf16.msra.mxu1 %v7447_v18 }
 0x2df   : > { %v4956_v0 = vsel %vm7655_vm8, %v4898_v62, %v4955_v39  ;;  %v3563_v23 = vadd.f32 %v9280_v17, %v3516_v13  ;;  %4508 = vst [vmem:[#allocation3 + $0x44] sm:$0x1] %v4507_v11  ;;  %v4453_v55 = vsel %vm7595_vm3, 0, %v4452_v28  ;;  %v4483_v51 = vsel %vm7604_vm5, 0, %v4482_v4  ;;  %v9530_v24 = vld [vmem:[#allocation3 + $0x20] sm:$0xf] }
 0x2e0   : > { %4957 = vst [vmem:[#allocation3 + $0x38] sm:$0xf] %v4956_v0  ;;  %v4404_v27 = vmax.f32 %v4402_v3, %v4403_v47  ;;  %v4411_v41 = vmax.f32 %v4409_v52, %v4410_v58  ;;  %v4417_v38 = vrot.slane %v4416_v20, 1  ;;  %4454 = vst [vmem:[#allocation3] sm:$0x1] %v4453_v55  ;;  %v6592_v17 = vcombine.low %v9500_v19, %v9509_v36 }
 0x2e1   : > { %v3595_v8 = vmax.f32 %v3563_v23, 0.0  ;;  %4484 = vst [vmem:[#allocation3 + $0x4] sm:$0x1] %v4483_v51  ;;  %v6800_v25 = vpack.c.bf16 %v4397_v33, %v4397_v33  ;;  %v3644_v15 = vsel %vm2483_vm11, %v3597_v54, -inf  ;;  %v6639_v61 = vcombine.low %v5032_v5, %v9513_v35  ;;  %v9543_v59 = vld [vmem:[#allocation3 + $0x14] sm:$0x1] }
 0x2e2   : > { %v4418_v42 = vmax.f32 %v4416_v20, %v4417_v38  ;;  %v6801_v1 = vpack.c.bf16 %v4404_v27, %v4404_v27  ;;  %v5090_v46 = vshll.u32 %v6592_v17, 16  ;;  %v6640_v26 = vcombine.low %v5033_v48, %v9518_v43  ;;  %v9555_v13 = vld [vmem:[#allocation3 + $0x1c] sm:$0x1] }
 0x2e3   : > { %v3643_v63 = vsel %vm2483_vm11, %v3595_v8, -inf  ;;  %v6802_v60 = vpack.c.bf16 %v4411_v41, %v4411_v41  ;;  %v5088_v57 = vshrl.u32 %v6592_v17, 16  ;;  %v5488_v29 = vrot.slane %v6639_v61, 1  ;;  %v5034_v17 = vld [vmem:[#allocation3 + $0x20] sm:$0xe] }
 0x2e4   : > { %v3645_v14 = vmax.f32 %v3643_v63, %v3644_v15  ;;  %v5092_v53 = vrot.slane %v5090_v46, 1  ;;  %v5489_v56 = vrot.slane %v6640_v26, 1  ;;  %v4824_v40 = vunpack.c.l.b16 %v6800_v25 }
 0x2e5   : > { %v6609_v16 = vcombine.low %v9522_v12, %v9522_v12  ;;  %v6803_v21 = vpack.c.bf16 %v4418_v42, %v4418_v42  ;;  %v4825_v32 = vunpack.c.l.b16 %v6801_v1  ;;  %v4826_v31 = vunpack.c.l.b16 %v6802_v60  ;;  %v5035_v42 = vld [vmem:[#allocation3 + $0x28] sm:$0xe] }
 0x2e6   : > { %v3917_v54 = vcombine.high %v3645_v14, %v3645_v14  ;;  %v3924_v2 = vrot.slane %v3645_v14, %v9029_v49  ;;  %v5093_v6 = vor.u32 %v5092_v53, %v5088_v57  ;;  %v6651_v9 = vcombine.low %v5488_v29, %v5489_v56  ;;  %v9565_v14 = vld [vmem:[#allocation3 + $0x24] sm:$0x1]  ;;  %v9567_v57 = vld [vmem:[#allocation3 + $0x2c] sm:$0x1] }
 0x2e7   : > { %v9535_v44 = vld [vmem:[#allocation3] sm:$0xf]  ;;  %v9551_v33 = vcombine.low %v9528_v30, %v9543_v59  ;;  %v6594_v58 = vcombine.low %v9537_v34, %v9555_v13  ;;  %v4827_v20 = vunpack.c.l.b16 %v6803_v21  ;;  %v4880_v55 = vsel %vm4832_vm13, %v4825_v32, %v4824_v40 }
 0x2e8   : > { %v3931_v7 = vrot.slane %v3917_v54, %v9029_v49  ;;  %v3932_v39 = vcombine.high %v3924_v2, %v3924_v2  ;;  %v4419_v3 = vsel %vm3998_vm12, %v3924_v2, -inf  ;;  %v9541_v52 = vld [vmem:[#allocation3 + $0x4] sm:$0x1]  ;;  %5138 = vrot.lane.b32.xlu1 %v5093_v6, %s7554_s24  ;;  %7196 = vmatprep.mubr.msk.bf16.mxu0 %vm2483_vm11, %v6651_v9  ;;  %v6610_v49 = vcombine.low %v9530_v24, %v9530_v24  ;;  %v9571_v32 = vld [vmem:[#allocation3 + $0x20] sm:$0xf] }
 0x2e9   : > { %v4420_v28 = vrot.slane %v4419_v3, 4  ;;  %v6591_v62 = vcombine.low %v9535_v44, %v9541_v52  ;;  %v5097_v15 = vshll.u32 %v9551_v33, 16  ;;  %v5102_v61 = vshrl.u32 %v6594_v58, 16  ;;  %v9573_v6 = vld [vmem:[#allocation3 + $0x30] sm:$0xf] }
 0x2ea   : > { %v3933_v37 = vcombine.high %v3931_v7, %v3931_v7  ;;  %v4426_v4 = vsel %vm3998_vm12, %v3932_v39, -inf  ;;  %v4433_v47 = vsel %vm3998_vm12, %v3931_v7, -inf  ;;  %v5104_v1 = vshll.u32 %v6594_v58, 16 }
 0x2eb   : > { %v4421_v11 = vmax.f32 %v4419_v3, %v4420_v28  ;;  %v4427_v0 = vrot.slane %v4426_v4, 4  ;;  %v4434_v23 = vrot.slane %v4433_v47, 4  ;;  %v5081_v27 = vshrl.u32 %v6591_v62, 16 }
 0x2ec   : > { %v4440_v5 = vsel %vm3998_vm12, %v3933_v37, -inf  ;;  %v5083_v41 = vshll.u32 %v6591_v62, 16  ;;  %5214 = vrot.lane.b32.xlu1 %v6610_v49, %s7554_s24  ;;  %v5106_v29 = vrot.slane %v5104_v1, 1  ;;  %v6641_v56 = vcombine.low %v5034_v17, %v9565_v14  ;;  %v4964_v1 = vld [vmem:[#allocation3 + $0x44] sm:$0x1] }
 0x2ed   : > { %v4422_v38 = vrot.slane %v4421_v11, 2  ;;  %v4428_v51 = vmax.f32 %v4426_v4, %v4427_v0  ;;  %v4435_v48 = vmax.f32 %v4433_v47, %v4434_v23  ;;  %v4441_v8 = vrot.slane %v4440_v5, 4  ;;  %v9577_v4 = vld [vmem:[#allocation3 + $0x24] sm:$0x1]  ;;  %v9579_v47 = vld [vmem:[#allocation3 + $0x28] sm:$0xf] }
 0x2ee   : > { %v5085_v25 = vrot.slane %v5083_v41, 1  ;;  %v6642_v40 = vcombine.low %v5035_v42, %v9567_v57  ;;  %v4881_v9 = vsel %vm4834_vm14, %v4826_v31, %v4880_v55  ;;  %v5107_v7 = vor.u32 %v5106_v29, %v5102_v61  ;;  %v9586_v41 = vld [vmem:[#allocation3 + $0x2c] sm:$0x1]  ;;  %v4995_v61 = vld [vmem:[#allocation3 + $0x28] sm:$0xf] }
 0x2ef   : > { %v4423_v63 = vmax.f32 %v4421_v11, %v4422_v38  ;;  %v4429_v46 = vrot.slane %v4428_v51, 2  ;;  %v4436_v26 = vrot.slane %v4435_v48, 2  ;;  %v4442_v60 = vmax.f32 %v4440_v5, %v4441_v8  ;;  %v7451_v38 = vld [vmem:[%s9912_s3 + $0xf8] sm:$0xff]  }
 0x2f0   : > { %v5086_v53 = vor.u32 %v5085_v25, %v5081_v27  ;;  %v5490_v39 = vrot.slane %v6641_v56, 1  ;;  %v5491_v3 = vrot.slane %v6642_v40, 1  ;;  %v5099_v58 = vrot.slane %v5097_v15, 1  ;;  %5142 = vrot.lane.b32.xlu1 %v5107_v7, %s7554_s24  ;;  %7100 = vmatprep.subr.bf16.mxu1 %v7451_v38  ;;  %v4961_v7 = vld [vmem:[#allocation3 + $0x40] sm:$0xf] }
 0x2f1   : > { %v4424_v54 = vrot.slane %v4423_v63, 1  ;;  %v4430_v2 = vmax.f32 %v4428_v51, %v4429_v46  ;;  %v4437_v18 = vmax.f32 %v4435_v48, %v4436_v26  ;;  %v4443_v21 = vrot.slane %v4442_v60, 2 }
 0x2f2   : > { %5136 = vrot.lane.b32.xlu0 %v5086_v53, %s7554_s24  ;;  %v6656_v11 = vcombine.low %v5490_v39, %v5491_v3  ;;  %v6595_v31 = vcombine.low %v9571_v32, %v9577_v4  ;;  %v6612_v0 = vcombine.low %v9573_v6, %v9573_v6  ;;  %v4882_v51 = vsel %vm4836_vm15, %v4827_v20, %v4881_v9  ;;  %v9602_v53 = vld [vmem:[#allocation3 + $0x30] sm:$0xf] }
 0x2f3   : > { %v4425_v28 = vmax.f32 %v4423_v63, %v4424_v54  ;;  %v4431_v62 = vrot.slane %v4430_v2, 1  ;;  %v4438_v49 = vrot.slane %v4437_v18, 1  ;;  %v4444_v37 = vmax.f32 %v4442_v60, %v4443_v21  ;;  %v9610_v21 = vld [vmem:[#allocation3 + $0x10] sm:$0xf] }
 0x2f4   : > { %v5095_v48 = vshrl.u32 %v9551_v33, 16  ;;  %7197 = vmatmul.mubr.msk.bf16.vlgmr.msra.gmra.mxu0 %vm2483_vm11, %v6656_v11  ;;  %v6596_v8 = vcombine.low %v9579_v47, %v9586_v41  ;;  %v5111_v63 = vshll.u32 %v6595_v31, 16  ;;  %5218 = vrot.lane.b32.xlu1 %v6612_v0, %s7554_s24  ;;  %v6611_v29 = vcombine.low %v4995_v61, %v4995_v61  ;;  %v9621_v11 = vld [vmem:[#allocation3 + $0x1c] sm:$0x1] }
 0x2f5   : > { %v4432_v23 = vmax.f32 %v4430_v2, %v4431_v62  ;;  %v4439_v55 = vmax.f32 %v4437_v18, %v4438_v49  ;;  %v4445_v5 = vrot.slane %v4444_v37, 1  ;;  %v6804_v27 = vpack.c.bf16 %v4425_v28, %v4425_v28  ;;  %v9608_v18 = vld [vmem:[#allocation3 + $0x34] sm:$0x1]  ;;  %v9615_v62 = vld [vmem:[#allocation3 + $0x38] sm:$0xf] }
 0x2f6   : > { %5212 = vrot.lane.b32.xlu0 %v6609_v16, %s7554_s24  ;;  %v5100_v20 = vor.u32 %v5099_v58, %v5095_v48  ;;  %v5118_v46 = vshll.u32 %v6596_v8, 16  ;;  %v5116_v56 = vshrl.u32 %v6596_v8, 16  ;;  %v5113_v39 = vrot.slane %v5111_v63, 1  ;;  %v9619_v58 = vld [vmem:[#allocation3 + $0x3c] sm:$0x1] }
 0x2f7   : > { %v4446_v17 = vmax.f32 %v4444_v37, %v4445_v5  ;;  %v6805_v42 = vpack.c.bf16 %v4432_v23, %v4432_v23  ;;  %v6806_v25 = vpack.c.bf16 %v4439_v55, %v4439_v55  ;;  %v4828_v15 = vunpack.c.l.b16 %v6804_v27  ;;  %v4997_v23 = vld [vmem:[#allocation3 + $0x38] sm:$0xf]  ;;  %v9635_v48 = vld [vmem:[#allocation3 + $0x14] sm:$0x1]  ;;  %v9652_v63 = vld [vmem:[#allocation3 + $0x24] sm:$0x1] }
 0x2f8   : > { %v5120_v40 = vrot.slane %v5118_v46, 1  ;;  %v6597_v28 = vcombine.low %v9602_v53, %v9608_v18  ;;  %v5109_v37 = vshrl.u32 %v6595_v31, 16  ;;  %v6631_v55 = vcombine.low %v9610_v21, %v9513_v35 }
 0x2f9   : > { %v4829_v16 = vunpack.c.l.b16 %v6805_v42  ;;  %v4830_v26 = vunpack.c.l.b16 %v6806_v25  ;;  %v4883_v33 = vsel %vm4838_vm0, %v4828_v15, %v4882_v51  ;;  %v6815_v60 = vpack.c.bf16 %v4446_v17, %v4446_v17  ;;  %v9633_v51 = vld [vmem:[#allocation3 + $0x18] sm:$0xf]  ;;  %v9642_v42 = vld [vmem:[#allocation3 + $0x2c] sm:$0x1]  ;;  %v9644_v25 = vld [vmem:[#allocation3 + $0x20] sm:$0xf] }
 0x2fa   : > { %5140 = vrot.lane.b32.xlu0 %v5100_v20, %s7554_s24  ;;  %v5121_v3 = vor.u32 %v5120_v40, %v5116_v56  ;;  %v6598_v5 = vcombine.low %v9615_v62, %v9619_v58  ;;  %v9631_v27 = vcombine.low %v9522_v12, %v9621_v11  ;;  %v5114_v31 = vor.u32 %v5113_v39, %v5109_v37  ;;  %v9672_v37 = vld [vmem:[#allocation3 + $0x34] sm:$0x1] }
 0x2fb   : > { %v4884_v54 = vsel %vm4840_vm1, %v4829_v16, %v4883_v33  ;;  %v4965_v2 = vsel %vm7595_vm3, %v6815_v60, %v4964_v1  ;;  %v5125_v38 = vshll.u32 %v6597_v28, 16  ;;  %v6613_v10 = vcombine.low %v4997_v23, %v4997_v23  ;;  %v9660_v60 = vld [vmem:[#allocation3 + $0x3c] sm:$0x1] }
 0x2fc   : > { %v4885_v9 = vsel %vm4842_vm2, %v4830_v26, %v4884_v54  ;;  %4966 = vst [vmem:[#allocation3 + $0x44] sm:$0x1] %v4965_v2  ;;  %5146 = vrot.lane.b32.xlu1 %v5121_v3, %s7554_s24  ;;  %v9640_v35 = vcombine.low %v9485_v50, %v9635_v48  ;;  %v5395_v8 = vshll.u32 %v6631_v55, 16  ;;  %v5132_v17 = vshll.u32 %v6598_v5, 16 }
 0x2fd   : > { %v4900_v49 = vpack.c.b16 %v4885_v9, %v4885_v9  ;;  %v5127_v12 = vrot.slane %v5125_v38, 1  ;;  %v6632_v15 = vcombine.low %v9633_v51, %v9518_v43  ;;  %v9649_v1 = vcombine.low %v4995_v61, %v9642_v42  ;;  %v9665_v9 = vld [vmem:[#allocation3 + $0x28] sm:$0xf] }
 0x2fe   : > { %5216 = vrot.lane.b32.xlu0 %v6611_v29, %s7554_s24  ;;  %v5123_v20 = vshrl.u32 %v6597_v28, 16  ;;  %v5397_v50 = vrot.slane %v5395_v8, 1  ;;  %v5134_v16 = vrot.slane %v5132_v17, 1  ;;  %v6633_v26 = vcombine.low %v9644_v25, %v9565_v14  ;;  %v5007_v29 = vld [vmem:[#allocation3 + $0x8] sm:$0xe] }
 0x2ff   : > { %v4962_v0 = vsel %vm7655_vm8, %v4900_v49, %v4961_v7  ;;  %v9658_v33 = vcombine.low %v9530_v24, %v9652_v63  ;;  %v5402_v56 = vshll.u32 %v6632_v15, 16  ;;  %v9663_v40 = vcombine.low %v4997_v23, %v9660_v60  ;;  %v4479_v7 = vld [vmem:[#allocation3 + $0x48] sm:$0x1]  ;;  %v9669_v24 = vld [vmem:[#allocation3 + $0xc] sm:$0x1] }
 0x300   : > { %4963 = vst [vmem:[#allocation3 + $0x40] sm:$0xf] %v4962_v0  ;;  %v5128_v43 = vor.u32 %v5127_v12, %v5123_v20  ;;  %v5393_v54 = vshrl.u32 %v6631_v55, 16  ;;  %v5130_v2 = vshrl.u32 %v6598_v5, 16  ;;  %v4509_v14 = vld [vmem:[#allocation3 + $0x4c] sm:$0x1]  ;;  %v6623_v3 = vcombine.low %v5007_v29, %v9669_v24 }
 0x301   : > { %v5409_v49 = vshll.u32 %v6633_v26, 16  ;;  %v5404_v0 = vrot.slane %v5402_v56, 1  ;;  %v9674_v23 = vld [vmem:[#allocation3 + $0x30] sm:$0xf]  ;;  %v6634_v55 = vcombine.low %v9665_v9, %v9567_v57  ;;  %v9680_v5 = vcombine.low %v9573_v6, %v9672_v37  ;;  %v5028_v6 = vld [vmem:[#allocation3 + $0x34] sm:$0x1] }
 0x302   : > { %5144 = vrot.lane.b32.xlu0 %v5114_v31, %s7554_s24  ;;  %v5398_v39 = vor.u32 %v5397_v50, %v5393_v54  ;;  %v5135_v28 = vor.u32 %v5134_v16, %v5130_v2  ;;  %v4480_v31 = vsel %vm7595_vm3, 0, %v4479_v7  ;;  %v4510_v8 = vsel %vm7604_vm5, 0, %v4509_v14  ;;  %v5029_v7 = vld [vmem:[#allocation3 + $0x3c] sm:$0x1]  ;;  %v5039_v14 = vld [vmem:[#allocation3 + $0x48] sm:$0xe] }
 0x303   : > { %v9684_v38 = vld [vmem:[#allocation3 + $0x44] sm:$0x1]  ;;  %4481 = vst [vmem:[#allocation3 + $0x48] sm:$0x1] %v4480_v31  ;;  %v5400_v57 = vshrl.u32 %v6632_v15, 16  ;;  %v5328_v12 = vrot.slane %v6623_v3, 1  ;;  %v6635_v45 = vcombine.low %v9674_v23, %v5028_v6 }
 0x304   : > { %4511 = vst [vmem:[#allocation3 + $0x4c] sm:$0x1] %v4510_v8  ;;  %v5411_v50 = vrot.slane %v5409_v49, 1  ;;  %v5030_v29 = vld [vmem:[#allocation3 + $0x44] sm:$0x1]  ;;  %v5407_v56 = vshrl.u32 %v6633_v26, 16 }
 0x305   : > { %v5405_v16 = vor.u32 %v5404_v0, %v5400_v57  ;;  %v5423_v2 = vshll.u32 %v6635_v45, 16  ;;  %v5010_v49 = vld [vmem:[#allocation3 + $0x20] sm:$0xe]  ;;  %v5414_v26 = vshrl.u32 %v6634_v55, 16 }
 0x306   : > { %5220 = vrot.lane.b32.xlu0 %v6613_v10, %s7554_s24  ;;  %v5008_v10 = vld [vmem:[#allocation3 + $0x10] sm:$0xe] }
 0x307   : > { %v4998_v46 = vld [vmem:[#allocation3 + $0x40] sm:$0xf]  ;;  %v6624_v22 = vcombine.low %v5008_v10, %v9635_v48  ;;  %v5425_v57 = vrot.slane %v5423_v2, 1 }
 0x308   : > { %v6614_v61 = vcombine.low %v4998_v46, %v4998_v46  ;;  %v9689_v17 = vcombine.low %v4998_v46, %v9684_v38  ;;  %v5038_v20 = vld [vmem:[#allocation3 + $0x40] sm:$0xe]  ;;  %v9695_v46 = vld [vmem:[#allocation3 + $0x38] sm:$0xf] }
 0x309   : > { %v6645_v15 = vcombine.low %v5038_v20, %v5030_v29  ;;  %v5329_v3 = vrot.slane %v6624_v22, 1  ;;  %v6636_v48 = vcombine.low %v9695_v46, %v5029_v7  ;;  %v9701_v0 = vld [vmem:[#allocation3 + $0x40] sm:$0xf]  ;;  %v6626_v20 = vcombine.low %v5010_v49, %v9652_v63 }
 0x30a   : > { %5148 = vrot.lane.b32.xlu0 %v5128_v43, %s7554_s24  ;;  %5222 = vrot.lane.b32.xlu1 %v6614_v61, %s7554_s24  ;;  %v5009_v43 = vld [vmem:[#allocation3 + $0x18] sm:$0xe]  ;;  %v5416_v61 = vshll.u32 %v6634_v55, 16  ;;  %v5421_v55 = vshrl.u32 %v6635_v45, 16 }
 0x30b   : > { %v6625_v54 = vcombine.low %v5009_v43, %v9621_v11  ;;  %v5031_v31 = vld [vmem:[#allocation3 + $0x4c] sm:$0x1]  ;;  %v9705_v10 = vrot.slane %v6645_v15, 1  ;;  %v6637_v43 = vcombine.low %v9701_v0, %v5030_v29  ;;  %v5430_v22 = vshll.u32 %v6636_v48, 16 }
 0x30c   : > { %v6646_v11 = vcombine.low %v5039_v14, %v5031_v31  ;;  %v5426_v29 = vor.u32 %v5425_v57, %v5421_v55  ;;  %v5428_v45 = vshrl.u32 %v6636_v48, 16 }
 0x30d   : > { %v5330_v8 = vrot.slane %v6625_v54, 1  ;;  %v5432_v49 = vrot.slane %v5430_v22, 1 }
 0x30e   : > { %5448 = vrot.lane.b32.xlu0 %v5398_v39, %s7554_s24  ;;  %5150 = vrot.lane.b32.xlu1 %v5135_v28, %s7554_s24  ;;  %v5412_v39 = vor.u32 %v5411_v50, %v5407_v56  ;;  %v5418_v28 = vrot.slane %v5416_v61, 1  ;;  %v9708_v50 = vld [vmem:[#allocation3 + $0x48] sm:$0xf]  ;;  %v9711_v61 = vrot.slane %v6646_v11, 1  ;;  %v5036_v56 = vld [vmem:[#allocation3 + $0x30] sm:$0xe] }
 0x30f   : > { %v6638_v15 = vcombine.low %v9708_v50, %v5031_v31  ;;  %v6643_v2 = vcombine.low %v5036_v56, %v5028_v6  ;;  %v5433_v57 = vor.u32 %v5432_v49, %v5428_v45 }
 0x310   : > { %v6666_v63 = vcombine.low %v9705_v10, %v9711_v61 }
 0x311   : > { %v9719_v11 = vrot.slane %v6643_v2, 1  ;;  %v5444_v31 = vshll.u32 %v6638_v15, 16  ;;  %v5442_v22 = vshrl.u32 %v6638_v15, 16  ;;  %v5014_v2 = vld [vmem:[#allocation3 + $0x40] sm:$0xe] }
 0x312   : > { %5336 = vrot.lane.b32.xlu0 %v5328_v12, %s7554_s24  ;;  %5450 = vrot.lane.b32.xlu1 %v5405_v16, %s7554_s24  ;;  %v5011_v12 = vld [vmem:[#allocation3 + $0x28] sm:$0xe]  ;;  %v5419_v16 = vor.u32 %v5418_v28, %v5414_v26  ;;  %v5437_v28 = vshll.u32 %v6637_v43, 16  ;;  %v5012_v26 = vld [vmem:[#allocation3 + $0x30] sm:$0xe] }
 0x313   : > { %v6627_v54 = vcombine.low %v5011_v12, %v9642_v42  ;;  %v6628_v12 = vcombine.low %v5012_v26, %v9672_v37  ;;  %v5446_v56 = vrot.slane %v5444_v31, 1  ;;  %v6630_v37 = vcombine.low %v5014_v2, %v9684_v38  ;;  %v4983_v15 = vld [vmem:[#allocation3] sm:$0xe] }
 0x315   : > { %v5332_v6 = vrot.slane %v6627_v54, 1  ;;  %v5333_v55 = vrot.slane %v6628_v12, 1  ;;  %v5447_v54 = vor.u32 %v5446_v56, %v5442_v22  ;;  %v4985_v12 = vld [vmem:[#allocation3 + $0x10] sm:$0xe] }
 0x316   : > { %5452 = vrot.lane.b32.xlu0 %v5412_v39, %s7554_s24  ;;  %5338 = vrot.lane.b32.xlu1 %v5329_v3, %s7554_s24  ;;  %v5037_v39 = vld [vmem:[#allocation3 + $0x38] sm:$0xe]  ;;  %v5331_v3 = vrot.slane %v6626_v20, 1 }
 0x317   : > { %v6644_v14 = vcombine.low %v5037_v39, %v5029_v7  ;;  %v5439_v7 = vrot.slane %v5437_v28, 1  ;;  %v5013_v20 = vld [vmem:[#allocation3 + $0x38] sm:$0xe] }
 0x318   : > { %v6629_v48 = vcombine.low %v5013_v20, %v9660_v60  ;;  %v6599_v60 = vcombine.low %v4983_v15, %v9541_v52  ;;  %v7455_v15 = vld [vmem:[%s9912_s3 + $0xb0] sm:$0xff]  }
 0x31a   : > { %5340 = vrot.lane.b32.xlu0 %v5330_v8, %s7554_s24  ;;  %5454 = vrot.lane.b32.xlu1 %v5419_v16, %s7554_s24  ;;  %v9721_v8 = vrot.slane %v6644_v14, 1  ;;  %v5435_v16 = vshrl.u32 %v6637_v43, 16  ;;  %v5334_v14 = vrot.slane %v6629_v48, 1  ;;  %v5335_v43 = vrot.slane %v6630_v37, 1  ;;  %v7452_v48 = vld [vmem:[%s9912_s3 + $0xb8] sm:$0xff]  }
 0x31b   : > { %v5176_v28 = vrot.slane %v6599_v60, 1  ;;  %v4987_v37 = vld [vmem:[#allocation3 + $0x20] sm:$0xe] }
 0x31c   : > { %v6661_v42 = vcombine.low %v9719_v11, %v9721_v8  ;;  %v5440_v39 = vor.u32 %v5439_v7, %v5435_v16 }
 0x31e   : > { %5456 = vrot.lane.b32.xlu0 %v5426_v29, %s7554_s24  ;;  %5342 = vrot.lane.b32.xlu1 %v5331_v3, %s7554_s24  ;;  %v4984_v29 = vld [vmem:[#allocation3 + $0x8] sm:$0xe] }
 0x31f   : > { %v6600_v3 = vcombine.low %v4984_v29, %v9509_v36  ;;  %v6601_v36 = vcombine.low %v4985_v12, %v9543_v59  ;;  %v7460_v12 = vld [vmem:[%s9912_s3 + $0xa0] sm:$0xff]  }
 0x321   : > { %v5177_v26 = vrot.slane %v6600_v3, 1  ;;  %v7456_v3 = vld [vmem:[%s9912_s3 + $0xe8] sm:$0xff]  }
 0x322   : > { %5344 = vrot.lane.b32.xlu0 %v5332_v6, %s7554_s24  ;;  %5458 = vrot.lane.b32.xlu1 %v5433_v57, %s7554_s24  ;;  %v4986_v57 = vld [vmem:[#allocation3 + $0x18] sm:$0xe] }
 0x323   : > { %v6602_v16 = vcombine.low %v4986_v57, %v9555_v13  ;;  %v7454_v13 = vld [vmem:[%s9912_s3 + $0xf0] sm:$0xff]  }
 0x326   : > { %5460 = vrot.lane.b32.xlu0 %v5440_v39, %s7554_s24  ;;  %5346 = vrot.lane.b32.xlu1 %v5333_v55, %s7554_s24  ;;  %v5179_v39 = vrot.slane %v6602_v16, 1  ;;  %v7461_v16 = vld [vmem:[%s9912_s3 + $0xd8] sm:$0xff]  }
 0x32a   : > { %5348 = vrot.lane.b32.xlu0 %v5334_v14, %s7554_s24  ;;  %5462 = vrot.lane.b32.xlu1 %v5447_v54, %s7554_s24  ;;  %v4988_v54 = vld [vmem:[#allocation3 + $0x28] sm:$0xe]  ;;  %v5178_v14 = vrot.slane %v6601_v36, 1 }
 0x32c   : > { %v5209_v49 = vpop.permute.xlu0 %5208 }
 0x32d   : > { %v5522_v31 = vsel %vm2483_vm11, %v5176_v28, %v5209_v49  ;;  %v6603_v49 = vcombine.low %v4987_v37, %v9577_v4 }
 0x32e   : > { %5350 = vrot.lane.b32.xlu1 %v5335_v43, %s7554_s24  ;;  %v6604_v43 = vcombine.low %v4988_v54, %v9586_v41 }
 0x34f   : > { %v5211_v45 = vpop.permute.xlu1 %5210 }
 0x350   : > { %v5525_v38 = vsel %vm2483_vm11, %v5177_v26, %v5211_v45  ;;  %v5181_v45 = vrot.slane %v6604_v43, 1 }
 0x351   : > { %v6648_v6 = vcombine.low %v5522_v31, %v5525_v38  ;;  %v7458_v31 = vld [vmem:[%s9912_s3 + $0xa8] sm:$0xff]  }
 0x353   : > { %6032 = vmatprep.mubr.bf16.mxu1 %v6648_v6  ;;  %v7459_v6 = vld [vmem:[%s9912_s3 + $0xe0] sm:$0xff]  }
 0x35a   : > { %v5139_v7 = vpop.permute.xlu1 %5138 }
 0x35b   : > { %v5501_v52 = vsel %vm2483_vm11, %v9500_v19, %v5139_v7 }
 0x35e   : > { %v5215_v20 = vpop.permute.xlu1 %5214 }
 0x35f   : > { %v5531_v19 = vsel %vm2483_vm11, %v5179_v39, %v5215_v20 }
 0x362   : > { %v5143_v2 = vpop.permute.xlu1 %5142 }
 0x363   : > { %v5507_v28 = vsel %vm2483_vm11, %v9537_v34, %v5143_v2  ;;  %v5180_v34 = vrot.slane %v6603_v49, 1  ;;  %v7464_v2 = vld [vmem:[%s9912_s3 + $0xd0] sm:$0xff]  }
 0x364   : > { %v5137_v22 = vpop.permute.xlu0 %5136 }
 0x365   : > { %v5498_v56 = vsel %vm2483_vm11, %v9535_v44, %v5137_v22  ;;  %v4989_v22 = vld [vmem:[#allocation3 + $0x30] sm:$0xe] }
 0x366   : > { %v6647_v55 = vcombine.low %v5498_v56, %v5501_v52  ;;  %v5219_v60 = vpop.permute.xlu1 %5218  ;;  %v4990_v56 = vld [vmem:[#allocation3 + $0x38] sm:$0xe] }
 0x367   : > { %v5537_v4 = vsel %vm2483_vm11, %v5181_v45, %v5219_v60  ;;  %v6606_v54 = vcombine.low %v4990_v56, %v9619_v58 }
 0x368   : > { %v5213_v59 = vpop.permute.xlu0 %5212  ;;  %6033 = vmatmul.mubr.bf16.vlgmr.msra.gmra.mxu1 %v6647_v55 }
 0x369   : > { %v5528_v44 = vsel %vm2483_vm11, %v5178_v14, %v5213_v59  ;;  %7101 = vmatpush3.bf16.msra.mxu1 %v7452_v48  ;;  %v7462_v48 = vld [vmem:[%s9912_s3 + $0x98] sm:$0xff]   ;;  %v7466_v14 = vld [vmem:[%s9912_s3 + $0xc8] sm:$0xff]  }
 0x36a   : > { %v6653_v29 = vcombine.low %v5528_v44, %v5531_v19  ;;  %7102 = vmatprep.subr.bf16.mxu1 %v7454_v13  ;;  %v7540_v19 = vld [vmem:[#allocation3 + $0x8] sm:$0xf]  ;;  %v5183_v44 = vrot.slane %v6606_v54, 1 }
 0x36b   : > { %v6615_v59 = vcombine.low %v7540_v19, %v9669_v24 }
 0x36c   : > { %v5141_v26 = vpop.permute.xlu0 %5140  ;;  %6040 = vmatprep.mubr.bf16.mxu1 %v6653_v29  ;;  %v7467_v29 = vld [vmem:[%s9912_s3 + $0x88] sm:$0xff]  }
 0x36d   : > { %v5504_v41 = vsel %vm2483_vm11, %v9528_v30, %v5141_v26  ;;  %7103 = vmatpush3.bf16.msra.mxu1 %v7455_v15  ;;  %v5251_v24 = vshll.u32 %v6615_v59, 16 }
 0x36e   : > { %v6652_v38 = vcombine.low %v5504_v41, %v5507_v28  ;;  %7104 = vmatprep.subr.bf16.mxu1 %v7456_v3  ;;  %v5147_v57 = vpop.permute.xlu1 %5146  ;;  %v7468_v3 = vld [vmem:[%s9912_s3 + $0xc0] sm:$0xff]   ;;  %v5258_v28 = vshll.u32 %v9640_v35, 16 }
 0x36f   : > { %v5513_v52 = vsel %vm2483_vm11, %v9579_v47, %v5147_v57  ;;  %v6605_v47 = vcombine.low %v4989_v22, %v9608_v18 }
 0x370   : > { %v5217_v7 = vpop.permute.xlu0 %5216  ;;  %6041 = vmatmul.mubr.bf16.gmra.mxu1 %v6652_v38 }
 0x371   : > { %v5534_v30 = vsel %vm2483_vm11, %v5180_v34, %v5217_v7  ;;  %7105 = vmatpush3.bf16.msra.mxu1 %v7458_v31  ;;  %v5182_v37 = vrot.slane %v6605_v47, 1  ;;  %v7469_v31 = vld [vmem:[%s9912_s3 + $0x80] sm:$0xff]   ;;  %v5260_v34 = vrot.slane %v5258_v28, 1 }
 0x372   : > { %v6658_v20 = vcombine.low %v5534_v30, %v5537_v4  ;;  %7106 = vmatprep.subr.bf16.mxu1 %v7459_v6  ;;  %v5253_v6 = vrot.slane %v5251_v24, 1  ;;  %v5249_v30 = vshrl.u32 %v6615_v59, 16  ;;  %v7542_v59 = vld [vmem:[%s9912_s3 + $0x110] sm:$0xff]  }
 0x374   : > { %v5145_v36 = vpop.permute.xlu0 %5144  ;;  %6048 = vmatprep.mubr.bf16.mxu1 %v6658_v20  ;;  %v7541_v20 = vld [vmem:[%s9912_s3 + $0x118] sm:$0xff]  }
 0x375   : > { %v5510_v39 = vsel %vm2483_vm11, %v9571_v32, %v5145_v36  ;;  %7107 = vmatpush3.bf16.msra.mxu1 %v7460_v12  ;;  %v7465_v32 = vld [vmem:[%s9912_s3 + $0x90] sm:$0xff]   ;;  %v5254_v36 = vor.u32 %v5253_v6, %v5249_v30  ;;  %v5300_v6 = vshll.u32 %v9689_v17, 16 }
 0x376   : > { %v6657_v55 = vcombine.low %v5510_v39, %v5513_v52  ;;  %7108 = vmatprep.subr.bf16.mxu1 %v7461_v16  ;;  %v5265_v16 = vshll.u32 %v9631_v27, 16  ;;  %v5272_v52 = vshll.u32 %v9658_v33, 16 }
 0x377   : > { %v5302_v30 = vrot.slane %v5300_v6, 1 }
 0x378   : > { %v5221_v13 = vpop.permute.xlu0 %5220  ;;  %6049 = vmatmul.mubr.bf16.gmra.mxu1 %v6657_v55  ;;  %v5274_v55 = vrot.slane %v5272_v52, 1 }
 0x379   : > { %7109 = vmatpush3.bf16.msra.mxu1 %v7462_v48  ;;  %v5540_v58 = vsel %vm2483_vm11, %v5182_v37, %v5221_v13  ;;  %v5267_v48 = vrot.slane %v5265_v16, 1  ;;  %v5263_v13 = vshrl.u32 %v9631_v27, 16  ;;  %v5279_v37 = vshll.u32 %v9649_v1, 16 }
 0x37a   : > { %7110 = vmatprep.subr.bf16.mxu1 %v7464_v2  ;;  %v5298_v16 = vshrl.u32 %v9689_v17, 16 }
 0x37c   : > { %v5149_v18 = vpop.permute.xlu0 %5148  ;;  %v5223_v43 = vpop.permute.xlu1 %5222 }
 0x37d   : > { %v5543_v15 = vsel %vm2483_vm11, %v5183_v44, %v5223_v43  ;;  %7111 = vmatpush3.bf16.msra.mxu1 %v7465_v32  ;;  %v5516_v41 = vsel %vm2483_vm11, %v9602_v53, %v5149_v18  ;;  %v5286_v44 = vshll.u32 %v9680_v5, 16  ;;  %v5268_v18 = vor.u32 %v5267_v48, %v5263_v13 }
 0x37e   : > { %v6663_v60 = vcombine.low %v5540_v58, %v5543_v15  ;;  %7112 = vmatprep.subr.bf16.mxu1 %v7466_v14  ;;  %v5270_v14 = vshrl.u32 %v9658_v33, 16  ;;  %v7543_v15 = vld [vmem:[%s9912_s3 + $0x108] sm:$0xff]  }
 0x380   : > { %v5449_v49 = vpop.permute.xlu0 %5448  ;;  %6056 = vmatprep.mubr.bf16.mxu1 %v6663_v60  ;;  %v5151_v26 = vpop.permute.xlu1 %5150  ;;  %v5288_v60 = vrot.slane %v5286_v44, 1 }
 0x381   : > { %v5519_v45 = vsel %vm2483_vm11, %v9615_v62, %v5151_v26  ;;  %7113 = vmatpush3.bf16.msra.mxu1 %v7467_v29  ;;  %v5570_v57 = vsel %vm2483_vm11, %v9610_v21, %v5449_v49  ;;  %v5256_v62 = vshrl.u32 %v9640_v35, 16  ;;  %v5281_v29 = vrot.slane %v5279_v37, 1 }
 0x382   : > { %v6662_v38 = vcombine.low %v5516_v41, %v5519_v45  ;;  %7114 = vmatprep.subr.bf16.mxu1 %v7468_v3  ;;  %v5277_v49 = vshrl.u32 %v9649_v1, 16  ;;  %v5284_v41 = vshrl.u32 %v9680_v5, 16 }
 0x383   : > { %v5261_v22 = vor.u32 %v5260_v34, %v5256_v62 }
 0x384   : > { %v5337_v4 = vpop.permute.xlu0 %5336  ;;  %6057 = vmatmul.mubr.bf16.gmra.mxu1 %v6662_v38  ;;  %v5451_v7 = vpop.permute.xlu1 %5450  ;;  %v5293_v38 = vshll.u32 %v9663_v40, 16  ;;  %v5282_v34 = vor.u32 %v5281_v29, %v5277_v49 }
 0x385   : > { %v5573_v53 = vsel %vm2483_vm11, %v9633_v51, %v5451_v7  ;;  %7115 = vmatpush3.bf16.msra.mxu1 %v7469_v31  ;;  %v5546_v51 = vsel %vm2483_vm11, %v5254_v36, %v5337_v4  ;;  %v7544_v31 = vld [vmem:[%s9912_s3 + $0x100] sm:$0xff]  }
 0x386   : > { %v6650_v12 = vcombine.low %v5570_v57, %v5573_v53  ;;  %7204 = vmatprep.subr.bf16.mxu1 %v7541_v20  ;;  %v5295_v57 = vrot.slane %v5293_v38, 1 }
 0x388   : > { %v5453_v21 = vpop.permute.xlu0 %5452  ;;  %6097 = vmatprep.mubr.bf16.mxu1 %v6650_v12  ;;  %v5339_v56 = vpop.permute.xlu1 %5338  ;;  %v5291_v12 = vshrl.u32 %v9663_v40, 16 }
 0x389   : > { %v5549_v39 = vsel %vm2483_vm11, %v5261_v22, %v5339_v56  ;;  %v5576_v54 = vsel %vm2483_vm11, %v9644_v25, %v5453_v21  ;;  %v5275_v25 = vor.u32 %v5274_v55, %v5270_v14  ;;  %v5303_v21 = vor.u32 %v5302_v30, %v5298_v16 }
 0x38a   : > { %v6649_v35 = vcombine.low %v5546_v51, %v5549_v39  ;;  %v5296_v22 = vor.u32 %v5295_v57, %v5291_v12 }
 0x38c   : > { %v5341_v2 = vpop.permute.xlu0 %5340  ;;  %6098 = vmatmul.mubr.bf16.vlgmr.msra.gmra.mxu1 %v6649_v35  ;;  %v5455_v47 = vpop.permute.xlu1 %5454 }
 0x38d   : > { %7208 = vmatpush3.bf16.msra.mxu1 %v7541_v20  ;;  %v5579_v32 = vsel %vm2483_vm11, %v9665_v9, %v5455_v47  ;;  %v5552_v58 = vsel %vm2483_vm11, %v5268_v18, %v5341_v2 }
 0x38e   : > { %v6655_v19 = vcombine.low %v5576_v54, %v5579_v32  ;;  %7205 = vmatprep.subr.bf16.mxu1 %v7542_v59 }
 0x390   : > { %v5457_v43 = vpop.permute.xlu0 %5456  ;;  %6105 = vmatprep.mubr.bf16.mxu1 %v6655_v19  ;;  %v5343_v27 = vpop.permute.xlu1 %5342 }
 0x391   : > { %v5555_v9 = vsel %vm2483_vm11, %v5275_v25, %v5343_v27  ;;  %7209 = vmatpush3.bf16.msra.mxu1 %v7542_v59  ;;  %v5582_v28 = vsel %vm2483_vm11, %v9674_v23, %v5457_v43  ;;  %v5289_v23 = vor.u32 %v5288_v60, %v5284_v41  ;;  %v9880_v27 = vld [vmem:[%s9913_s4] ss:$0 sm:$0xff] }
 0x392   : > { %v6654_v33 = vcombine.low %v5552_v58, %v5555_v9  ;;  %7206 = vmatprep.subr.bf16.mxu1 %v7543_v15 }
 0x394   : > { %v5345_v3 = vpop.permute.xlu0 %5344  ;;  %6106 = vmatmul.mubr.bf16.gmra.mxu1 %v6654_v33  ;;  %v5459_v24 = vpop.permute.xlu1 %5458 }
 0x395   : > { %v5585_v26 = vsel %vm2483_vm11, %v9695_v46, %v5459_v24  ;;  %7210 = vmatpush3.bf16.msra.mxu1 %v7543_v15  ;;  %v5558_v46 = vsel %vm2483_vm11, %v5282_v34, %v5345_v3 }
 0x396   : > { %v6660_v45 = vcombine.low %v5582_v28, %v5585_v26  ;;  %7207 = vmatprep.subr.bf16.mxu1 %v7544_v31 }
 0x398   : > { %v5461_v4 = vpop.permute.xlu0 %5460  ;;  %6113 = vmatprep.mubr.bf16.mxu1 %v6660_v45  ;;  %v5347_v1 = vpop.permute.xlu1 %5346 }
 0x399   : > { %v5561_v5 = vsel %vm2483_vm11, %v5289_v23, %v5347_v1  ;;  %7211 = vmatpush3.bf16.msra.mxu1 %v7544_v31  ;;  %v5588_v62 = vsel %vm2483_vm11, %v9701_v0, %v5461_v4 }
 0x39a   : > { %v6659_v7 = vcombine.low %v5558_v46, %v5561_v5 }
 0x39c   : > { %6114 = vmatmul.mubr.bf16.gmra.mxu1 %v6659_v7  ;;  %v5463_v53 = vpop.permute.xlu1 %5462  ;;  %v5349_v52 = vpop.permute.xlu0 %5348 }
 0x39d   : > { %v5591_v20 = vsel %vm2483_vm11, %v9708_v50, %v5463_v53  ;;  %v5564_v51 = vsel %vm2483_vm11, %v5296_v22, %v5349_v52 }
 0x39e   : > { %v6665_v36 = vcombine.low %v5588_v62, %v5591_v20 }
 0x3a0   : > { %6121 = vmatprep.mubr.bf16.mxu1 %v6665_v36  ;;  %v5351_v56 = vpop.permute.xlu1 %5350 }
 0x3a1   : > { %v5567_v39 = vsel %vm2483_vm11, %v5303_v21, %v5351_v56 }
 0x3a2   : > { %v6664_v35 = vcombine.low %v5564_v51, %v5567_v39 }
 0x3a4   : > { %6122 = vmatmul.mubr.bf16.gmra.mxu1 %v6664_v35 }
 0x3a5   : > { %7200 = vmatprep.mubr.msk.bf16.mxu1 %vm2483_vm11, %v6661_v42 }
 0x3ac   : > { %7201 = vmatmul.mubr.msk.bf16.vlgmr.msra.gmra.mxu1 %vm2483_vm11, %v6666_v63 }
 0x3b4   : > { %v7198_v61 = vpop.f32.mrf.mxu0 }
 0x3b6   : > { %v6164_v19 = vpop.f32.mrf.mxu0 }
 0x3b8   : > { %v7199_v43 = vpop.f32.mrf.mxu0 }
 0x3ba   : > { %v6167_v24 = vpop.f32.mrf.mxu0 }
 0x428   : > { %v7076_v40 = vpop.f32.mrf.mxu1 }
 0x42a   : > { %v7077_v17 = vpop.f32.mrf.mxu1 }
 0x42b   : > { %v7078_v37 = vadd.f32 %v7077_v17, %v7076_v40 }
 0x42c   : > { %v7079_v0 = vpop.f32.mrf.mxu1 }
 0x42e   : > { %v7080_v50 = vpop.f32.mrf.mxu1 }
 0x42f   : > { %v7081_v9 = vadd.f32 %v7080_v50, %v7079_v0 }
 0x430   : > { %v7082_v48 = vpop.f32.mrf.mxu1 }
 0x432   : > { %v7083_v55 = vpop.f32.mrf.mxu1 }
 0x433   : > { %v7084_v49 = vadd.f32 %v7083_v55, %v7082_v48 }
 0x434   : > { %v7085_v2 = vpop.f32.mrf.mxu1 }
 0x436   : > { %v7086_v47 = vpop.f32.mrf.mxu1 }
 0x437   : > { %v7087_v23 = vadd.f32 %v7086_v47, %v7085_v2 }
 0x438   : > { %v7088_v54 = vpop.f32.mrf.mxu1 }
 0x43a   : > { %v7089_v13 = vpop.f32.mrf.mxu1 }
 0x43b   : > { %v7090_v40 = vadd.f32 %v7089_v13, %v7088_v54 }
 0x43c   : > { %v9873_v32 = vpop.f32.mrf.mxu1 }
 0x43e   : > { %v9875_v11 = vpop.f32.mrf.mxu1 }
 0x444   : > { %v7094_v8 = vpop.f32.mrf.mxu1 }
 0x446   : > { %v7095_v42 = vpop.f32.mrf.mxu1 }
 0x447   : > { %v7096_v51 = vadd.f32 %v7095_v42, %v7094_v8 }
 0x448   : > { %v7097_v10 = vpop.f32.mrf.mxu1 }
 0x44a   : > { %v7098_v63 = vpop.f32.mrf.mxu1 }
 0x44b   : > { %v7099_v48 = vadd.f32 %v7098_v63, %v7097_v10 }
 0x44c   : > { %v7116_v14 = vpop.f32.mrf.mxu1 }
 0x44e   : > { %v7117_v59 = vpop.f32.mrf.mxu1 }
 0x44f   : > { %v7118_v44 = vadd.f32 %v7117_v59, %v7116_v14  ;;  %v7093_v14 = vadd.f32 %v9875_v11, %v9873_v32 }
 0x450   : > { %v7119_v18 = vpop.f32.mrf.mxu1 }
 0x451   : > { %v6100_v25 = vadd.f32 %v7118_v44, %v7078_v37 }
 0x452   : > { %v7120_v58 = vpop.f32.mrf.mxu1 }
 0x453   : > { %v6165_v33 = vadd.f32 %v6164_v19, %v6100_v25  ;;  %v7121_v15 = vadd.f32 %v7120_v58, %v7119_v18 }
 0x454   : > { %v7122_v29 = vpop.f32.mrf.mxu1 }
 0x455   : > { %v6202_v60 = vadd.f32 %v9880_v27, %v6165_v33  ;;  %v6103_v3 = vadd.f32 %v7121_v15, %v7081_v9 }
 0x456   : > { %v7123_v28 = vpop.f32.mrf.mxu1 }
 0x457   : > { %v6210_v26 = vmax.f32 %v6202_v60, 0.0  ;;  %v6168_v41 = vadd.f32 %v6167_v24, %v6103_v3  ;;  %v7124_v45 = vadd.f32 %v7123_v28, %v7122_v29 }
 0x458   : > { %v7125_v31 = vpop.f32.mrf.mxu1 }
 0x459   : > { %6218 = vst [vmem:[%s9887_s7] sm:$0xff] %v6210_v26  ;;  %v6203_v38 = vadd.f32 %v9880_v27, %v6168_v41  ;;  %v6108_v6 = vadd.f32 %v7124_v45, %v7084_v49 }
 0x45a   : > { %v7126_v34 = vpop.f32.mrf.mxu1 }
 0x45b   : > { %v6211_v4 = vmax.f32 %v6203_v38, 0.0  ;;  %v6173_v1 = vadd.f32 %v7198_v61, %v6108_v6  ;;  %v7127_v46 = vadd.f32 %v7126_v34, %v7125_v31 }
 0x45c   : > { %v7128_v5 = vpop.f32.mrf.mxu1 }
 0x45d   : > { %6219 = vst [vmem:[%s9887_s7 + $0x8] sm:$0xff] %v6211_v4  ;;  %v6204_v7 = vadd.f32 %v9880_v27, %v6173_v1  ;;  %v6111_v57 = vadd.f32 %v7127_v46, %v7087_v23 }
 0x45e   : > { %v7129_v30 = vpop.f32.mrf.mxu1 }
 0x45f   : > { %v6212_v53 = vmax.f32 %v6204_v7, 0.0  ;;  %v6176_v62 = vadd.f32 %v7199_v43, %v6111_v57  ;;  %v7130_v39 = vadd.f32 %v7129_v30, %v7128_v5 }
 0x460   : > { %v7131_v12 = vpop.f32.mrf.mxu1 }
 0x461   : > { %6220 = vst [vmem:[%s9887_s7 + $0x10] sm:$0xff] %v6212_v53  ;;  %v6205_v20 = vadd.f32 %v9880_v27, %v6176_v62  ;;  %v6116_v47 = vadd.f32 %v7130_v39, %v7090_v40 }
 0x462   : > { %v7132_v16 = vpop.f32.mrf.mxu1 }
 0x463   : > { %v6213_v52 = vmax.f32 %v6205_v20, 0.0  ;;  %v7133_v55 = vadd.f32 %v7132_v16, %v7131_v12 }
 0x464   : > { %v7134_v36 = vpop.f32.mrf.mxu1 }
 0x465   : > { %6221 = vst [vmem:[%s9887_s7 + $0x18] sm:$0xff] %v6213_v52  ;;  %v6119_v10 = vadd.f32 %v7133_v55, %v7093_v14 }
 0x466   : > { %v7135_v22 = vpop.f32.mrf.mxu1 }
 0x467   : > { %v7136_v21 = vadd.f32 %v7135_v22, %v7134_v36 }
 0x468   : > { %v7137_v56 = vpop.f32.mrf.mxu1 }
 0x469   : > { %v6124_v0 = vadd.f32 %v7136_v21, %v7096_v51 }
 0x46a   : > { %v7138_v35 = vpop.f32.mrf.mxu1 }
 0x46b   : > { %v7139_v17 = vadd.f32 %v7138_v35, %v7137_v56 }
 0x46c   : > { %v7202_v50 = vpop.f32.mrf.mxu1 }
 0x46d   : > { %v6189_v2 = vadd.f32 %v7202_v50, %v6124_v0  ;;  %v6127_v42 = vadd.f32 %v7139_v17, %v7099_v48 }
 0x46e   : > { %v6180_v61 = vpop.f32.mrf.mxu1 }
 0x46f   : > { %v6208_v19 = vadd.f32 %v9880_v27, %v6189_v2  ;;  %v6181_v8 = vadd.f32 %v6180_v61, %v6116_v47 }
 0x470   : > { %v7203_v54 = vpop.f32.mrf.mxu1 }
 0x471   : > { %v6216_v13 = vmax.f32 %v6208_v19, 0.0  ;;  %v6206_v59 = vadd.f32 %v9880_v27, %v6181_v8  ;;  %v6192_v37 = vadd.f32 %v7203_v54, %v6127_v42 }
 0x472   : > { %v6183_v63 = vpop.f32.mrf.mxu1 }
 0x473   : > { %6224 = vst [vmem:[%s9887_s7 + $0x30] sm:$0xff] %v6216_v13  ;;  %v6214_v44 = vmax.f32 %v6206_v59, 0.0  ;;  %v6209_v18 = vadd.f32 %v9880_v27, %v6192_v37  ;;  %v6184_v25 = vadd.f32 %v6183_v63, %v6119_v10 }
 0x475   : > { %6222 = vst [vmem:[%s9887_s7 + $0x20] sm:$0xff] %v6214_v44  ;;  %v6217_v32 = vmax.f32 %v6209_v18, 0.0  ;;  %v6207_v11 = vadd.f32 %v9880_v27, %v6184_v25 }
 0x477   : > { %6225 = vst [vmem:[%s9887_s7 + $0x38] sm:$0xff] %v6217_v32  ;;  %v6215_v43 = vmax.f32 %v6207_v11, 0.0 }
 0x479   : > { %6223 = vst [vmem:[%s9887_s7 + $0x28] sm:$0xff] %v6215_v43 }
 0x47a PF: > { %s15_s18 = sadd.s32 1, %s7551_s18  }
 0x47b   : > { %p12_p4 = scmp.ge.s32.totalorder %s15_s18, 4  }
 0x47d   :  { %14 = sbr.rel (!%p12_p4) target bundleno = 1 (0x1), region = 76 }

</bundles_post_ra>
